<compile_context>
chip_gen: v6e
topology: v6e:2x2x1
jax: 0.10.0
libtpu: 0.0.40
codegen_flags: <defaults>
</compile_context>

<pallas_src>
import jax
import jax.numpy as jnp
from jax.experimental import pallas as pl
from jax.experimental.pallas import tpu as pltpu

F32 = jnp.float32
BF16 = jnp.bfloat16

K_FC = 128 * 32 * 32          # 131072 fc1 input features
TK = 32768                    # fc1 K tile per grid step (8 MiB int8 block)
TKI = 4096                    # in-kernel dequant sub-chunk (2 MiB bf16 temp)
NJ = 2                        # fc1 output split (2 x 256 columns)


# --------------------------------------------------------------------------- #
# Stage 1 kernel: conv1 (1 -> 64, 3x3, pad 1) + ReLU + maxpool(2, 2), fused.
# Output is NHWC-pooled directly: rows = pooled pixels, lanes = c_out.
# --------------------------------------------------------------------------- #
def _conv1_pool_kernel(col_ref, w_ref, b_ref, out_ref):
    # col_ref : (4, 1024, 9) bf16   group g = 2x2 pooling position, taps last
    # w_ref   : (9, 64)      bf16   [dh*3 + dw, c_out]
    # b_ref   : (1, 64)      f32
    # out_ref : (1024, 64)   bf16   (pooled pixel, c_out)
    w = w_ref[...]
    acc = jnp.dot(col_ref[0], w, preferred_element_type=jnp.float32)
    for g in range(1, 4):                                   # max over 2x2 window
        acc = jnp.maximum(
            acc, jnp.dot(col_ref[g], w, preferred_element_type=jnp.float32))
    out_ref[...] = jnp.maximum(acc + b_ref[...], 0.0).astype(out_ref.dtype)


# --------------------------------------------------------------------------- #
# Stage 2 kernel: conv2 (64 -> 128, 3x3, pad 1) + ReLU + maxpool(2, 2), fused.
# Implicit GEMM: LHS rows = (conv row r, padded col j), lanes = dh*64 + c_in
# (K = 192), RHS columns = c_out (N = 128).  W-pool via even/odd padded-column
# parity, H-pool via row-block max.  One aligned superset load per parity per
# 8-row block; the +1 column shift is an in-register slice of that window.
# --------------------------------------------------------------------------- #
def _conv2_pool_kernel(a3e_ref, a3o_ref, w_ref, b_ref, out_ref):
    # a3e_ref / a3o_ref : (2120, 192) bf16  rows = r*33 + j (+ 8 zero pad rows)
    # w_ref   : (3, 192, 128) bf16   [dw, dh*64 + c_in, c_out]
    # b_ref   : (1, 128)      f32
    # out_ref : (16, 32, 128) bf16 = (pooled_h block, pooled_w, c_out)
    ho = pl.program_id(1)                                   # 32-conv-row block
    w0, w1, w2 = w_ref[0], w_ref[1], w_ref[2]               # hoisted weight loads
    bb = jnp.broadcast_to(b_ref[...], (32, 128))            # hoisted bias bcast

    @pl.loop(0, 4)
    def _(hbl):                                             # 8 conv rows / iter
        base = pl.multiple_of(ho * 1056 + hbl * 264, 8)     # = 264 * global hb
        win_e = a3e_ref[pl.ds(base, 272), :]                # aligned superset
        win_o = a3o_ref[pl.ds(base, 272), :]
        e0, e1 = win_e[0:264], win_e[1:265]                 # taps at j / j+1
        o0, o1 = win_o[0:264], win_o[1:265]
        # even / odd conv output columns (dw folded as three K=192 matmuls)
        acc_e = (jnp.dot(e0, w0, preferred_element_type=jnp.float32)
                 + jnp.dot(o0, w1, preferred_element_type=jnp.float32)
                 + jnp.dot(e1, w2, preferred_element_type=jnp.float32))
        acc_o = (jnp.dot(o0, w0, preferred_element_type=jnp.float32)
                 + jnp.dot(e1, w1, preferred_element_type=jnp.float32)
                 + jnp.dot(o1, w2, preferred_element_type=jnp.float32))
        m = jnp.maximum(acc_e, acc_o)                       # (264, 128) W-pool
        for hr in range(4):                                 # H-pool, 4 rows
            top = m[66 * hr: 66 * hr + 33]
            bot = m[66 * hr + 33: 66 * hr + 66]
            pooled = jnp.maximum(top, bot)[0:32]            # drop garbage col
            out_ref[4 * hbl + hr] = jnp.maximum(pooled + bb, 0.0
                                                ).astype(out_ref.dtype)


# --------------------------------------------------------------------------- #
# Stage 3 kernel: fc1 (131072 -> 512) + ReLU + fc2 (512 -> 1).
# grid = (2 output halves [parallel], 4 K tiles [arbitrary]).
# int8 weight stream, VPU dequant to bf16 in 4096-row sub-chunks, f32 accum.
# Per-column scales + bias + ReLU + fc2 in the epilogue.
# --------------------------------------------------------------------------- #
def _fc_kernel(x_ref, wq_ref, sc_ref, b1_ref, w2_ref, out_ref, acc_ref):
    k = pl.program_id(1)

    @pl.when(k == 0)
    def _():
        acc_ref[...] = jnp.zeros_like(acc_ref)

    @pl.loop(0, TK // TKI)
    def _(kk):
        off = pl.multiple_of(kk * TKI, TKI)
        xs = x_ref[:, pl.ds(off, TKI)]                       # (B, TKI) bf16
        ws = wq_ref[pl.ds(off, TKI), :].astype(jnp.bfloat16)  # int8 -> bf16
        acc_ref[...] += jnp.dot(xs, ws, preferred_element_type=jnp.float32)

    @pl.when(k == pl.num_programs(1) - 1)
    def _():
        h = jnp.maximum(acc_ref[...] * sc_ref[...] + b1_ref[...], 0.0)
        out_ref[...] = jnp.dot(h, w2_ref[...],
                               preferred_element_type=jnp.float32)


# --------------------------------------------------------------------------- #
# Parameters: raw (PyTorch-shaped) synthetic init + one-time kernel re-layout.
# --------------------------------------------------------------------------- #
def init_params(key):
    ks = jax.random.split(key, 8)
    return {
        "w_conv1": 0.20 * jax.random.normal(ks[0], (64, 1, 3, 3), F32),
        "b_conv1": 0.10 * jax.random.normal(ks[1], (64,), F32),
        "w_conv2": 0.05 * jax.random.normal(ks[2], (128, 64, 3, 3), F32),
        "b_conv2": 0.10 * jax.random.normal(ks[3], (128,), F32),
        "w_fc1":   0.003 * jax.random.normal(ks[4], (512, K_FC), F32),
        "b_fc1":   0.10 * jax.random.normal(ks[5], (512,), F32),
        "w_fc2":   0.05 * jax.random.normal(ks[6], (1, 512), F32),
        "b_fc2":   0.10 * jax.random.normal(ks[7], (1,), F32),
    }


def prepare_params(p):
    """One-time (outside jit) weight re-layouts / quantization for the kernels."""
    # conv1: (9, 64) bf16, taps ordered dh*3 + dw
    w1m = jnp.transpose(p["w_conv1"][:, 0].reshape(64, 9)).astype(BF16)
    b1m = p["b_conv1"].reshape(1, 64).astype(F32)
    # conv2: [dw, dh*64 + c_in, c_out] bf16
    w2 = p["w_conv2"]                                            # (128, 64, 3, 3)
    w2m = jnp.stack(
        [w2[:, :, :, dw].transpose(2, 1, 0).reshape(192, 128) for dw in range(3)],
        axis=0).astype(BF16)
    b2m = p["b_conv2"].reshape(1, 128).astype(F32)
    # fc1: transpose to (K, 512), permute K from PyTorch (c, h, w) order to the
    # kernel's (h, w, c) activation layout, then int8-quantize per column.
    h = jnp.arange(32)[:, None, None]
    w = jnp.arange(32)[None, :, None]
    c = jnp.arange(128)[None, None, :]
    perm = (c * 1024 + h * 32 + w).reshape(-1)                   # new-K -> old-K
    w_fc1_k = jnp.transpose(p["w_fc1"])[perm]                    # (K, 512) f32
    scale = jnp.maximum(jnp.max(jnp.abs(w_fc1_k), axis=0, keepdims=True) / 127.0,
                        1e-12)                                   # (1, 512)
    wq = jnp.clip(jnp.round(w_fc1_k / scale), -127.0, 127.0).astype(jnp.int8)
    # split the 512 outputs into 2 contiguous halves (one per grid j) so each
    # streamed weight block is a fully contiguous 8 MiB chunk in HBM.
    wq2 = jnp.stack([wq[:, :256], wq[:, 256:]], axis=0)          # (2, K, 256) i8
    sc2 = jnp.stack([scale[:, :256], scale[:, 256:]], axis=0)    # (2, 1, 256)
    b1f = p["b_fc1"].astype(F32)
    b1_2 = jnp.stack([b1f[None, :256], b1f[None, 256:]], axis=0)  # (2, 1, 256)
    w_fc2_t = jnp.transpose(p["w_fc2"]).astype(F32)              # (512, 1)
    w2_2 = jnp.stack([w_fc2_t[:256], w_fc2_t[256:]], axis=0)     # (2, 256, 1)
    return {
        "w1m": w1m, "b1m": b1m, "w2m": w2m, "b2m": b2m,
        "wq": wq2, "sc": sc2, "b1": b1_2, "w2": w2_2,
        "b_fc2": p["b_fc2"].astype(F32),
    }


# --------------------------------------------------------------------------- #
# Forward pass.
# --------------------------------------------------------------------------- #
@jax.jit
def agenet_gray_forward(x, kp):
    # x: (B, 1, 128, 128) float32 NCHW (spatial size fixed by fc1 = 128*32*32).
    B = x.shape[0]
    conv_cp = pltpu.CompilerParams(dimension_semantics=("parallel", "parallel"),
                                   vmem_limit_bytes=32 * 1024 * 1024)

    # ---- stage 1 glue: zero-pad + bf16 im2col grouped by 2x2 pool position --
    xpad = jnp.pad(x[:, 0].astype(BF16), ((0, 0), (1, 1), (1, 1)))   # (B,130,130)
    groups = []
    for a in range(2):                 # row inside the 2x2 pooling window
        for pcol in range(2):          # column inside the window
            taps = [xpad[:, a + dh: a + dh + 128: 2,
                         pcol + dw: pcol + dw + 128: 2].reshape(B, 4096)
                    for dh in range(3) for dw in range(3)]
            groups.append(jnp.stack(taps, axis=-1))                  # (B,4096,9)
    col = jnp.stack(groups, axis=1)                                  # (B,4,4096,9)

    a1 = pl.pallas_call(
        _conv1_pool_kernel,
        out_shape=jax.ShapeDtypeStruct((B, 4096, 64), BF16),
        grid=(B, 4),
        in_specs=[
            pl.BlockSpec((None, 4, 1024, 9), lambda b, t: (b, 0, t, 0)),
            pl.BlockSpec((9, 64), lambda b, t: (0, 0)),
            pl.BlockSpec((1, 64), lambda b, t: (0, 0)),
        ],
        out_specs=pl.BlockSpec((None, 1024, 64), lambda b, t: (b, t, 0)),
        compiler_params=conv_cp,
    )(col, kp["w1m"], kp["b1m"])

    # ---- stage 2 glue: pad NHWC, fold dh into lanes, split padded-W parity --
    a1 = a1.reshape(B, 64, 64, 64)                                   # (b,h,w,c)
    a1p = jnp.pad(a1, ((0, 0), (1, 1), (1, 1), (0, 0)))              # (B,66,66,64)
    a3e = jnp.concatenate([a1p[:, dh:dh + 64, 0::2, :] for dh in range(3)],
                          axis=-1).reshape(B, 64 * 33, 192)
    a3o = jnp.concatenate([a1p[:, dh:dh + 64, 1::2, :] for dh in range(3)],
                          axis=-1).reshape(B, 64 * 33, 192)
    a3e = jnp.pad(a3e, ((0, 0), (0, 8), (0, 0)))                     # (B,2120,192)
    a3o = jnp.pad(a3o, ((0, 0), (0, 8), (0, 0)))

    a2 = pl.pallas_call(
        _conv2_pool_kernel,
        out_shape=jax.ShapeDtypeStruct((B, 32, 32, 128), BF16),      # (b,h,w,c)
        grid=(B, 2),
        in_specs=[
            pl.BlockSpec((None, 2120, 192), lambda b, ho: (b, 0, 0)),
            pl.BlockSpec((None, 2120, 192), lambda b, ho: (b, 0, 0)),
            pl.BlockSpec((3, 192, 128), lambda b, ho: (0, 0, 0)),
            pl.BlockSpec((1, 128), lambda b, ho: (0, 0)),
        ],
        out_specs=pl.BlockSpec((None, 16, 32, 128), lambda b, ho: (b, ho, 0, 0)),
        compiler_params=conv_cp,
    )(a3e, a3o, kp["w2m"], kp["b2m"])

    # ---- stage 3: fc1 + ReLU + fc2 (int8 weight stream, bf16 activations) ---
    flat = a2.reshape(B, K_FC)                                       # bf16
    partial = pl.pallas_call(
        _fc_kernel,
        out_shape=jax.ShapeDtypeStruct((NJ, B, 1), F32),
        grid=(NJ, K_FC // TK),
        in_specs=[
            pl.BlockSpec((B, TK), lambda j, k: (0, k)),              # x (bf16)
            pl.BlockSpec((None, TK, 256), lambda j, k: (j, k, 0)),   # wq (int8)
            pl.BlockSpec((None, 1, 256), lambda j, k: (j, 0, 0)),    # scales
            pl.BlockSpec((None, 1, 256), lambda j, k: (j, 0, 0)),    # b_fc1
            pl.BlockSpec((None, 256, 1), lambda j, k: (j, 0, 0)),    # w_fc2
        ],
        out_specs=pl.BlockSpec((None, B, 1), lambda j, k: (j, 0, 0)),
        scratch_shapes=[pltpu.VMEM((B, 256), F32)],
        compiler_params=pltpu.CompilerParams(
            dimension_semantics=("parallel", "arbitrary"),
            vmem_limit_bytes=40 * 1024 * 1024),
    )(flat, kp["wq"], kp["sc"], kp["b1"], kp["w2"])

    return partial.sum(axis=0) + kp["b_fc2"]


if __name__ == "__main__":
    key = jax.random.PRNGKey(0)
    pkey, xkey = jax.random.split(key)
    params = init_params(pkey)
    kp = prepare_params(params)
    # Spatial size is fixed to 128x128 by fc1's 128*32*32 input dimension.
    x = jax.random.normal(xkey, (2, 1, 128, 128), jnp.float32)
    y = agenet_gray_forward(x, kp)
    y = jax.block_until_ready(y)
    assert y.shape == (2, 1)
    assert bool(jnp.all(jnp.isfinite(y)))
    print("KERNEL_OK")
</pallas_src>

<mosaic_0001>
module attributes {stable_mosaic.version = 11 : i64} {
  func.func @_conv1_pool_kernel(%arg0: i32, %arg1: i32, %arg2: memref<1x4x1024x9xbf16, #tpu.memory_space<vmem>>, %arg3: memref<9x64xbf16, #tpu.memory_space<vmem>>, %arg4: memref<1x64xf32, #tpu.memory_space<vmem>>, %arg5: memref<1x1024x64xbf16, #tpu.memory_space<vmem>>) attributes {dimension_semantics = [#tpu.dimension_semantics<parallel>, #tpu.dimension_semantics<parallel>], iteration_bounds = array<i64: 2, 4>, scalar_prefetch = 0 : i64, scratch_operands = 0 : i64, tpu.core_type = #tpu.core_type<tc>, window_params = [{transform_indices = @transform_0, window_bounds = array<i64: 1, 4, 1024, 9>}, {pipeline_mode = #tpu.pipeline_mode<synchronous>, transform_indices = @transform_1, window_bounds = array<i64: 9, 64>}, {pipeline_mode = #tpu.pipeline_mode<synchronous>, transform_indices = @transform_2, window_bounds = array<i64: 1, 64>}, {transform_indices = @transform_3, window_bounds = array<i64: 1, 1024, 64>}]} {
    %c0 = arith.constant 0 : index
    %c0_0 = arith.constant 0 : index
    %0 = vector.load %arg3[%c0, %c0_0] : memref<9x64xbf16, #tpu.memory_space<vmem>>, vector<9x64xbf16>
    %c0_1 = arith.constant 0 : index
    %c0_2 = arith.constant 0 : index
    %c0_3 = arith.constant 0 : index
    %c0_4 = arith.constant 0 : index
    %1 = vector.load %arg2[%c0_1, %c0_2, %c0_3, %c0_4] : memref<1x4x1024x9xbf16, #tpu.memory_space<vmem>>, vector<1x1x1024x9xbf16>
    %2 = vector.shape_cast %1 : vector<1x1x1024x9xbf16> to vector<1024x9xbf16>
    %cst = arith.constant dense<0.000000e+00> : vector<1024x64xf32>
    %3 = tpu.matmul %2, %0, %cst {dimension_numbers = #tpu.dot_dimension_numbers<[1], [0], [0], [1], [0, 0, 1, 1], [], []>} : vector<1024x9xbf16>, vector<9x64xbf16>, vector<1024x64xf32> -> vector<1024x64xf32>
    %c0_5 = arith.constant 0 : index
    %c1 = arith.constant 1 : index
    %c0_6 = arith.constant 0 : index
    %c0_7 = arith.constant 0 : index
    %4 = vector.load %arg2[%c0_5, %c1, %c0_6, %c0_7] : memref<1x4x1024x9xbf16, #tpu.memory_space<vmem>>, vector<1x1x1024x9xbf16>
    %5 = vector.shape_cast %4 : vector<1x1x1024x9xbf16> to vector<1024x9xbf16>
    %cst_8 = arith.constant dense<0.000000e+00> : vector<1024x64xf32>
    %6 = tpu.matmul %5, %0, %cst_8 {dimension_numbers = #tpu.dot_dimension_numbers<[1], [0], [0], [1], [0, 0, 1, 1], [], []>} : vector<1024x9xbf16>, vector<9x64xbf16>, vector<1024x64xf32> -> vector<1024x64xf32>
    %7 = arith.maximumf %3, %6 : vector<1024x64xf32>
    %c0_9 = arith.constant 0 : index
    %c2 = arith.constant 2 : index
    %c0_10 = arith.constant 0 : index
    %c0_11 = arith.constant 0 : index
    %8 = vector.load %arg2[%c0_9, %c2, %c0_10, %c0_11] : memref<1x4x1024x9xbf16, #tpu.memory_space<vmem>>, vector<1x1x1024x9xbf16>
    %9 = vector.shape_cast %8 : vector<1x1x1024x9xbf16> to vector<1024x9xbf16>
    %cst_12 = arith.constant dense<0.000000e+00> : vector<1024x64xf32>
    %10 = tpu.matmul %9, %0, %cst_12 {dimension_numbers = #tpu.dot_dimension_numbers<[1], [0], [0], [1], [0, 0, 1, 1], [], []>} : vector<1024x9xbf16>, vector<9x64xbf16>, vector<1024x64xf32> -> vector<1024x64xf32>
    %11 = arith.maximumf %7, %10 : vector<1024x64xf32>
    %c0_13 = arith.constant 0 : index
    %c3 = arith.constant 3 : index
    %c0_14 = arith.constant 0 : index
    %c0_15 = arith.constant 0 : index
    %12 = vector.load %arg2[%c0_13, %c3, %c0_14, %c0_15] : memref<1x4x1024x9xbf16, #tpu.memory_space<vmem>>, vector<1x1x1024x9xbf16>
    %13 = vector.shape_cast %12 : vector<1x1x1024x9xbf16> to vector<1024x9xbf16>
    %cst_16 = arith.constant dense<0.000000e+00> : vector<1024x64xf32>
    %14 = tpu.matmul %13, %0, %cst_16 {dimension_numbers = #tpu.dot_dimension_numbers<[1], [0], [0], [1], [0, 0, 1, 1], [], []>} : vector<1024x9xbf16>, vector<9x64xbf16>, vector<1024x64xf32> -> vector<1024x64xf32>
    %15 = arith.maximumf %11, %14 : vector<1024x64xf32>
    %c0_17 = arith.constant 0 : index
    %c0_18 = arith.constant 0 : index
    %16 = vector.load %arg4[%c0_17, %c0_18] : memref<1x64xf32, #tpu.memory_space<vmem>>, vector<1x64xf32>
    %17 = vector.broadcast %16 : vector<1x64xf32> to vector<1024x64xf32>
    %18 = arith.addf %15, %17 : vector<1024x64xf32>
    %cst_19 = arith.constant 0.000000e+00 : f32
    %19 = vector.broadcast %cst_19 : f32 to vector<1024x64xf32>
    %20 = arith.maximumf %18, %19 : vector<1024x64xf32>
    %21 = arith.truncf %20 : vector<1024x64xf32> to vector<1024x64xbf16>
    %c0_20 = arith.constant 0 : index
    %c0_21 = arith.constant 0 : index
    %c0_22 = arith.constant 0 : index
    %22 = vector.load %arg5[%c0_20, %c0_21, %c0_22] : memref<1x1024x64xbf16, #tpu.memory_space<vmem>>, vector<1x1024x64xbf16>
    %23 = vector.shape_cast %22 : vector<1x1024x64xbf16> to vector<1024x64xbf16>
    %24 = vector.shape_cast %21 : vector<1024x64xbf16> to vector<1x1024x64xbf16>
    tpu.vector_store %arg5[%c0_20, %c0_21, %c0_22], %24 {strides = array<i32>} : memref<1x1024x64xbf16, #tpu.memory_space<vmem>>, vector<1x1024x64xbf16>,
    return
  }
  func.func @transform_0(%arg0: i32, %arg1: i32) -> (i32, i32, i32, i32) {
    %c0_i32 = arith.constant 0 : i32
    %c0_i32_0 = arith.constant 0 : i32
    %c0_i32_1 = arith.constant 0 : i32
    return %arg0, %c0_i32, %arg1, %c0_i32_0 : i32, i32, i32, i32
  }
  func.func @transform_1(%arg0: i32, %arg1: i32) -> (i32, i32) {
    %c0_i32 = arith.constant 0 : i32
    %c0_i32_0 = arith.constant 0 : i32
    %c0_i32_1 = arith.constant 0 : i32
    return %c0_i32, %c0_i32_0 : i32, i32
  }
  func.func @transform_2(%arg0: i32, %arg1: i32) -> (i32, i32) {
    %c0_i32 = arith.constant 0 : i32
    %c0_i32_0 = arith.constant 0 : i32
    %c0_i32_1 = arith.constant 0 : i32
    return %c0_i32, %c0_i32_0 : i32, i32
  }
  func.func @transform_3(%arg0: i32, %arg1: i32) -> (i32, i32, i32) {
    %c0_i32 = arith.constant 0 : i32
    %c0_i32_0 = arith.constant 0 : i32
    return %arg0, %arg1, %c0_i32 : i32, i32, i32
  }
}

module attributes {stable_mosaic.version = 11 : i64} {
  func.func @_conv2_pool_kernel(%arg0: i32, %arg1: i32, %arg2: memref<1x2120x192xbf16, #tpu.memory_space<vmem>>, %arg3: memref<1x2120x192xbf16, #tpu.memory_space<vmem>>, %arg4: memref<3x192x128xbf16, #tpu.memory_space<vmem>>, %arg5: memref<1x128xf32, #tpu.memory_space<vmem>>, %arg6: memref<1x16x32x128xbf16, #tpu.memory_space<vmem>>) attributes {dimension_semantics = [#tpu.dimension_semantics<parallel>, #tpu.dimension_semantics<parallel>], iteration_bounds = array<i64: 2, 2>, scalar_prefetch = 0 : i64, scratch_operands = 0 : i64, tpu.core_type = #tpu.core_type<tc>, window_params = [{transform_indices = @transform_0, window_bounds = array<i64: 1, 2120, 192>}, {transform_indices = @transform_1, window_bounds = array<i64: 1, 2120, 192>}, {pipeline_mode = #tpu.pipeline_mode<synchronous>, transform_indices = @transform_2, window_bounds = array<i64: 3, 192, 128>}, {pipeline_mode = #tpu.pipeline_mode<synchronous>, transform_indices = @transform_3, window_bounds = array<i64: 1, 128>}, {transform_indices = @transform_4, window_bounds = array<i64: 1, 16, 32, 128>}]} {
    %c0 = arith.constant 0 : index
    %c0_0 = arith.constant 0 : index
    %c0_1 = arith.constant 0 : index
    %0 = vector.load %arg4[%c0, %c0_0, %c0_1] : memref<3x192x128xbf16, #tpu.memory_space<vmem>>, vector<1x192x128xbf16>
    %1 = vector.shape_cast %0 : vector<1x192x128xbf16> to vector<192x128xbf16>
    %c1 = arith.constant 1 : index
    %c0_2 = arith.constant 0 : index
    %c0_3 = arith.constant 0 : index
    %2 = vector.load %arg4[%c1, %c0_2, %c0_3] : memref<3x192x128xbf16, #tpu.memory_space<vmem>>, vector<1x192x128xbf16>
    %3 = vector.shape_cast %2 : vector<1x192x128xbf16> to vector<192x128xbf16>
    %c2 = arith.constant 2 : index
    %c0_4 = arith.constant 0 : index
    %c0_5 = arith.constant 0 : index
    %4 = vector.load %arg4[%c2, %c0_4, %c0_5] : memref<3x192x128xbf16, #tpu.memory_space<vmem>>, vector<1x192x128xbf16>
    %5 = vector.shape_cast %4 : vector<1x192x128xbf16> to vector<192x128xbf16>
    %c0_6 = arith.constant 0 : index
    %c0_7 = arith.constant 0 : index
    %6 = vector.load %arg5[%c0_6, %c0_7] : memref<1x128xf32, #tpu.memory_space<vmem>>, vector<1x128xf32>
    %7 = vector.shape_cast %6 : vector<1x128xf32> to vector<1x128xf32>
    %8 = vector.broadcast %7 : vector<1x128xf32> to vector<32x128xf32>
    %c0_i32 = arith.constant 0 : i32
    %c4_i32 = arith.constant 4 : i32
    %9 = arith.addi %c0_i32, %c4_i32 : i32
    %c1_i32 = arith.constant 1 : i32
    scf.for %arg7 = %c0_i32 to %9 step %c1_i32  : i32 {
      %c1_i32_9 = arith.constant 1 : i32
      %10 = arith.muli %arg7, %c1_i32_9 : i32
      %c0_i32_10 = arith.constant 0 : i32
      %11 = arith.addi %c0_i32_10, %10 : i32
      %c1056_i32 = arith.constant 1056 : i32
      %12 = arith.muli %arg1, %c1056_i32 : i32
      %c264_i32 = arith.constant 264 : i32
      %13 = arith.muli %11, %c264_i32 : i32
      %14 = arith.addi %12, %13 : i32
      %15 = tpu.assume_multiple %14, 8 : i32
      %c0_11 = arith.constant 0 : index
      %16 = arith.index_cast %15 : i32 to index
      %c0_12 = arith.constant 0 : index
      %17 = vector.load %arg2[%c0_11, %16, %c0_12] : memref<1x2120x192xbf16, #tpu.memory_space<vmem>>, vector<1x272x192xbf16>
      %18 = vector.shape_cast %17 : vector<1x272x192xbf16> to vector<272x192xbf16>
      %c0_13 = arith.constant 0 : index
      %19 = arith.index_cast %15 : i32 to index
      %c0_14 = arith.constant 0 : index
      %20 = vector.load %arg3[%c0_13, %19, %c0_14] : memref<1x2120x192xbf16, #tpu.memory_space<vmem>>, vector<1x272x192xbf16>
      %21 = vector.shape_cast %20 : vector<1x272x192xbf16> to vector<272x192xbf16>
      %22 = vector.extract_strided_slice %18 {offsets = [0, 0], sizes = [264, 192], strides = [1, 1]} : vector<272x192xbf16> to vector<264x192xbf16>
      %23 = vector.extract_strided_slice %18 {offsets = [1, 0], sizes = [264, 192], strides = [1, 1]} : vector<272x192xbf16> to vector<264x192xbf16>
      %24 = vector.extract_strided_slice %21 {offsets = [0, 0], sizes = [264, 192], strides = [1, 1]} : vector<272x192xbf16> to vector<264x192xbf16>
      %25 = vector.extract_strided_slice %21 {offsets = [1, 0], sizes = [264, 192], strides = [1, 1]} : vector<272x192xbf16> to vector<264x192xbf16>
      %cst = arith.constant dense<0.000000e+00> : vector<264x128xf32>
      %26 = tpu.matmul %22, %1, %cst {dimension_numbers = #tpu.dot_dimension_numbers<[1], [0], [0], [1], [0, 0, 1, 1], [], []>} : vector<264x192xbf16>, vector<192x128xbf16>, vector<264x128xf32> -> vector<264x128xf32>
      %cst_15 = arith.constant dense<0.000000e+00> : vector<264x128xf32>
      %27 = tpu.matmul %24, %3, %cst_15 {dimension_numbers = #tpu.dot_dimension_numbers<[1], [0], [0], [1], [0, 0, 1, 1], [], []>} : vector<264x192xbf16>, vector<192x128xbf16>, vector<264x128xf32> -> vector<264x128xf32>
      %28 = arith.addf %26, %27 : vector<264x128xf32>
      %cst_16 = arith.constant dense<0.000000e+00> : vector<264x128xf32>
      %29 = tpu.matmul %23, %5, %cst_16 {dimension_numbers = #tpu.dot_dimension_numbers<[1], [0], [0], [1], [0, 0, 1, 1], [], []>} : vector<264x192xbf16>, vector<192x128xbf16>, vector<264x128xf32> -> vector<264x128xf32>
      %30 = arith.addf %28, %29 : vector<264x128xf32>
      %cst_17 = arith.constant dense<0.000000e+00> : vector<264x128xf32>
      %31 = tpu.matmul %24, %1, %cst_17 {dimension_numbers = #tpu.dot_dimension_numbers<[1], [0], [0], [1], [0, 0, 1, 1], [], []>} : vector<264x192xbf16>, vector<192x128xbf16>, vector<264x128xf32> -> vector<264x128xf32>
      %cst_18 = arith.constant dense<0.000000e+00> : vector<264x128xf32>
      %32 = tpu.matmul %23, %3, %cst_18 {dimension_numbers = #tpu.dot_dimension_numbers<[1], [0], [0], [1], [0, 0, 1, 1], [], []>} : vector<264x192xbf16>, vector<192x128xbf16>, vector<264x128xf32> -> vector<264x128xf32>
      %33 = arith.addf %31, %32 : vector<264x128xf32>
      %cst_19 = arith.constant dense<0.000000e+00> : vector<264x128xf32>
      %34 = tpu.matmul %25, %5, %cst_19 {dimension_numbers = #tpu.dot_dimension_numbers<[1], [0], [0], [1], [0, 0, 1, 1], [], []>} : vector<264x192xbf16>, vector<192x128xbf16>, vector<264x128xf32> -> vector<264x128xf32>
      %35 = arith.addf %33, %34 : vector<264x128xf32>
      %36 = arith.maximumf %30, %35 : vector<264x128xf32>
      %37 = vector.extract_strided_slice %36 {offsets = [0, 0], sizes = [33, 128], strides = [1, 1]} : vector<264x128xf32> to vector<33x128xf32>
      %38 = vector.extract_strided_slice %36 {offsets = [33, 0], sizes = [33, 128], strides = [1, 1]} : vector<264x128xf32> to vector<33x128xf32>
      %39 = arith.maximumf %37, %38 : vector<33x128xf32>
      %40 = vector.extract_strided_slice %39 {offsets = [0, 0], sizes = [32, 128], strides = [1, 1]} : vector<33x128xf32> to vector<32x128xf32>
      %41 = arith.addf %40, %8 : vector<32x128xf32>
      %cst_20 = arith.constant 0.000000e+00 : f32
      %42 = vector.broadcast %cst_20 : f32 to vector<32x128xf32>
      %43 = arith.maximumf %41, %42 : vector<32x128xf32>
      %44 = arith.truncf %43 : vector<32x128xf32> to vector<32x128xbf16>
      %c4_i32_21 = arith.constant 4 : i32
      %45 = arith.muli %c4_i32_21, %11 : i32
      %c0_i32_22 = arith.constant 0 : i32
      %46 = arith.addi %45, %c0_i32_22 : i32
      %c0_23 = arith.constant 0 : index
      %47 = arith.index_cast %46 : i32 to index
      %c0_24 = arith.constant 0 : index
      %c0_25 = arith.constant 0 : index
      %48 = vector.load %arg6[%c0_23, %47, %c0_24, %c0_25] : memref<1x16x32x128xbf16, #tpu.memory_space<vmem>>, vector<1x1x32x128xbf16>
      %49 = vector.shape_cast %48 : vector<1x1x32x128xbf16> to vector<32x128xbf16>
      %50 = vector.shape_cast %44 : vector<32x128xbf16> to vector<1x1x32x128xbf16>
      tpu.vector_store %arg6[%c0_23, %47, %c0_24, %c0_25], %50 {strides = array<i32>} : memref<1x16x32x128xbf16, #tpu.memory_space<vmem>>, vector<1x1x32x128xbf16>,
      %51 = vector.extract_strided_slice %36 {offsets = [66, 0], sizes = [33, 128], strides = [1, 1]} : vector<264x128xf32> to vector<33x128xf32>
      %52 = vector.extract_strided_slice %36 {offsets = [99, 0], sizes = [33, 128], strides = [1, 1]} : vector<264x128xf32> to vector<33x128xf32>
      %53 = arith.maximumf %51, %52 : vector<33x128xf32>
      %54 = vector.extract_strided_slice %53 {offsets = [0, 0], sizes = [32, 128], strides = [1, 1]} : vector<33x128xf32> to vector<32x128xf32>
      %55 = arith.addf %54, %8 : vector<32x128xf32>
      %cst_26 = arith.constant 0.000000e+00 : f32
      %56 = vector.broadcast %cst_26 : f32 to vector<32x128xf32>
      %57 = arith.maximumf %55, %56 : vector<32x128xf32>
      %58 = arith.truncf %57 : vector<32x128xf32> to vector<32x128xbf16>
      %c4_i32_27 = arith.constant 4 : i32
      %59 = arith.muli %c4_i32_27, %11 : i32
      %c1_i32_28 = arith.constant 1 : i32
      %60 = arith.addi %59, %c1_i32_28 : i32
      %c0_29 = arith.constant 0 : index
      %61 = arith.index_cast %60 : i32 to index
      %c0_30 = arith.constant 0 : index
      %c0_31 = arith.constant 0 : index
      %62 = vector.load %arg6[%c0_29, %61, %c0_30, %c0_31] : memref<1x16x32x128xbf16, #tpu.memory_space<vmem>>, vector<1x1x32x128xbf16>
      %63 = vector.shape_cast %62 : vector<1x1x32x128xbf16> to vector<32x128xbf16>
      %64 = vector.shape_cast %58 : vector<32x128xbf16> to vector<1x1x32x128xbf16>
      tpu.vector_store %arg6[%c0_29, %61, %c0_30, %c0_31], %64 {strides = array<i32>} : memref<1x16x32x128xbf16, #tpu.memory_space<vmem>>, vector<1x1x32x128xbf16>,
      %65 = vector.extract_strided_slice %36 {offsets = [132, 0], sizes = [33, 128], strides = [1, 1]} : vector<264x128xf32> to vector<33x128xf32>
      %66 = vector.extract_strided_slice %36 {offsets = [165, 0], sizes = [33, 128], strides = [1, 1]} : vector<264x128xf32> to vector<33x128xf32>
      %67 = arith.maximumf %65, %66 : vector<33x128xf32>
      %68 = vector.extract_strided_slice %67 {offsets = [0, 0], sizes = [32, 128], strides = [1, 1]} : vector<33x128xf32> to vector<32x128xf32>
      %69 = arith.addf %68, %8 : vector<32x128xf32>
      %cst_32 = arith.constant 0.000000e+00 : f32
      %70 = vector.broadcast %cst_32 : f32 to vector<32x128xf32>
      %71 = arith.maximumf %69, %70 : vector<32x128xf32>
      %72 = arith.truncf %71 : vector<32x128xf32> to vector<32x128xbf16>
      %c4_i32_33 = arith.constant 4 : i32
      %73 = arith.muli %c4_i32_33, %11 : i32
      %c2_i32 = arith.constant 2 : i32
      %74 = arith.addi %73, %c2_i32 : i32
      %c0_34 = arith.constant 0 : index
      %75 = arith.index_cast %74 : i32 to index
      %c0_35 = arith.constant 0 : index
      %c0_36 = arith.constant 0 : index
      %76 = vector.load %arg6[%c0_34, %75, %c0_35, %c0_36] : memref<1x16x32x128xbf16, #tpu.memory_space<vmem>>, vector<1x1x32x128xbf16>
      %77 = vector.shape_cast %76 : vector<1x1x32x128xbf16> to vector<32x128xbf16>
      %78 = vector.shape_cast %72 : vector<32x128xbf16> to vector<1x1x32x128xbf16>
      tpu.vector_store %arg6[%c0_34, %75, %c0_35, %c0_36], %78 {strides = array<i32>} : memref<1x16x32x128xbf16, #tpu.memory_space<vmem>>, vector<1x1x32x128xbf16>,
      %79 = vector.extract_strided_slice %36 {offsets = [198, 0], sizes = [33, 128], strides = [1, 1]} : vector<264x128xf32> to vector<33x128xf32>
      %80 = vector.extract_strided_slice %36 {offsets = [231, 0], sizes = [33, 128], strides = [1, 1]} : vector<264x128xf32> to vector<33x128xf32>
      %81 = arith.maximumf %79, %80 : vector<33x128xf32>
      %82 = vector.extract_strided_slice %81 {offsets = [0, 0], sizes = [32, 128], strides = [1, 1]} : vector<33x128xf32> to vector<32x128xf32>
      %83 = arith.addf %82, %8 : vector<32x128xf32>
      %cst_37 = arith.constant 0.000000e+00 : f32
      %84 = vector.broadcast %cst_37 : f32 to vector<32x128xf32>
      %85 = arith.maximumf %83, %84 : vector<32x128xf32>
      %86 = arith.truncf %85 : vector<32x128xf32> to vector<32x128xbf16>
      %c4_i32_38 = arith.constant 4 : i32
      %87 = arith.muli %c4_i32_38, %11 : i32
      %c3_i32 = arith.constant 3 : i32
      %88 = arith.addi %87, %c3_i32 : i32
      %c0_39 = arith.constant 0 : index
      %89 = arith.index_cast %88 : i32 to index
      %c0_40 = arith.constant 0 : index
      %c0_41 = arith.constant 0 : index
      %90 = vector.load %arg6[%c0_39, %89, %c0_40, %c0_41] : memref<1x16x32x128xbf16, #tpu.memory_space<vmem>>, vector<1x1x32x128xbf16>
      %91 = vector.shape_cast %90 : vector<1x1x32x128xbf16> to vector<32x128xbf16>
      %92 = vector.shape_cast %86 : vector<32x128xbf16> to vector<1x1x32x128xbf16>
      tpu.vector_store %arg6[%c0_39, %89, %c0_40, %c0_41], %92 {strides = array<i32>} : memref<1x16x32x128xbf16, #tpu.memory_space<vmem>>, vector<1x1x32x128xbf16>,
    }
    %c4_i32_8 = arith.constant 4 : i32
    return
  }
  func.func @transform_0(%arg0: i32, %arg1: i32) -> (i32, i32, i32) {
    %c0_i32 = arith.constant 0 : i32
    %c0_i32_0 = arith.constant 0 : i32
    %c0_i32_1 = arith.constant 0 : i32
    return %arg0, %c0_i32, %c0_i32_0 : i32, i32, i32
  }
  func.func @transform_1(%arg0: i32, %arg1: i32) -> (i32, i32, i32) {
    %c0_i32 = arith.constant 0 : i32
    %c0_i32_0 = arith.constant 0 : i32
    %c0_i32_1 = arith.constant 0 : i32
    return %arg0, %c0_i32, %c0_i32_0 : i32, i32, i32
  }
  func.func @transform_2(%arg0: i32, %arg1: i32) -> (i32, i32, i32) {
    %c0_i32 = arith.constant 0 : i32
    %c0_i32_0 = arith.constant 0 : i32
    %c0_i32_1 = arith.constant 0 : i32
    %c0_i32_2 = arith.constant 0 : i32
    return %c0_i32, %c0_i32_0, %c0_i32_1 : i32, i32, i32
  }
  func.func @transform_3(%arg0: i32, %arg1: i32) -> (i32, i32) {
    %c0_i32 = arith.constant 0 : i32
    %c0_i32_0 = arith.constant 0 : i32
    %c0_i32_1 = arith.constant 0 : i32
    return %c0_i32, %c0_i32_0 : i32, i32
  }
  func.func @transform_4(%arg0: i32, %arg1: i32) -> (i32, i32, i32, i32) {
    %c0_i32 = arith.constant 0 : i32
    %c0_i32_0 = arith.constant 0 : i32
    %c0_i32_1 = arith.constant 0 : i32
    return %arg0, %arg1, %c0_i32, %c0_i32_0 : i32, i32, i32, i32
  }
}

module attributes {stable_mosaic.version = 11 : i64} {
  func.func @_fc_kernel(%arg0: i32, %arg1: i32, %arg2: memref<2x32768xbf16, #tpu.memory_space<vmem>>, %arg3: memref<1x32768x256xi8, #tpu.memory_space<vmem>>, %arg4: memref<1x1x256xf32, #tpu.memory_space<vmem>>, %arg5: memref<1x1x256xf32, #tpu.memory_space<vmem>>, %arg6: memref<1x256x1xf32, #tpu.memory_space<vmem>>, %arg7: memref<1x2x1xf32, #tpu.memory_space<vmem>>, %arg8: memref<2x256xf32, #tpu.memory_space<vmem>>) attributes {dimension_semantics = [#tpu.dimension_semantics<parallel>, #tpu.dimension_semantics<arbitrary>], iteration_bounds = array<i64: 2, 4>, scalar_prefetch = 0 : i64, scratch_operands = 1 : i64, tpu.core_type = #tpu.core_type<tc>, window_params = [{transform_indices = @transform_0, window_bounds = array<i64: 2, 32768>}, {transform_indices = @transform_1, window_bounds = array<i64: 1, 32768, 256>}, {transform_indices = @transform_2, window_bounds = array<i64: 1, 1, 256>}, {transform_indices = @transform_3, window_bounds = array<i64: 1, 1, 256>}, {transform_indices = @transform_4, window_bounds = array<i64: 1, 256, 1>}, {transform_indices = @transform_5, window_bounds = array<i64: 1, 2, 1>}]} {
    %c0_i32 = arith.constant 0 : i32
    %0 = arith.cmpi eq, %arg1, %c0_i32 : i32
    %1 = arith.extui %0 : i1 to i32
    %c0_i32_0 = arith.constant 0 : i32
    %2 = arith.cmpi ne, %1, %c0_i32_0 : i32
    scf.if %2 {
      %cst = arith.constant 0.000000e+00 : f32
      %7 = vector.broadcast %cst : f32 to vector<2x256xf32>
      %c0 = arith.constant 0 : index
      %c0_4 = arith.constant 0 : index
      %8 = vector.load %arg8[%c0, %c0_4] : memref<2x256xf32, #tpu.memory_space<vmem>>, vector<2x256xf32>
      tpu.vector_store %arg8[%c0, %c0_4], %7 {strides = array<i32>} : memref<2x256xf32, #tpu.memory_space<vmem>>, vector<2x256xf32>,
    } else {
    }
    %c0_i32_1 = arith.constant 0 : i32
    %c8_i32 = arith.constant 8 : i32
    %3 = arith.addi %c0_i32_1, %c8_i32 : i32
    %c1_i32 = arith.constant 1 : i32
    scf.for %arg9 = %c0_i32_1 to %3 step %c1_i32  : i32 {
      %c1_i32_4 = arith.constant 1 : i32
      %7 = arith.muli %arg9, %c1_i32_4 : i32
      %c0_i32_5 = arith.constant 0 : i32
      %8 = arith.addi %c0_i32_5, %7 : i32
      %c4096_i32 = arith.constant 4096 : i32
      %9 = arith.muli %8, %c4096_i32 : i32
      %10 = tpu.assume_multiple %9, 4096 : i32
      %c0 = arith.constant 0 : index
      %11 = arith.index_cast %10 : i32 to index
      %12 = vector.load %arg2[%c0, %11] : memref<2x32768xbf16, #tpu.memory_space<vmem>>, vector<2x4096xbf16>
      %c0_6 = arith.constant 0 : index
      %13 = arith.index_cast %10 : i32 to index
      %c0_7 = arith.constant 0 : index
      %14 = vector.load %arg3[%c0_6, %13, %c0_7] : memref<1x32768x256xi8, #tpu.memory_space<vmem>>, vector<1x4096x256xi8>
      %15 = vector.shape_cast %14 : vector<1x4096x256xi8> to vector<4096x256xi8>
      %16 = arith.sitofp %15 : vector<4096x256xi8> to vector<4096x256xbf16>
      %c0_8 = arith.constant 0 : index
      %c0_9 = arith.constant 0 : index
      %17 = vector.load %arg8[%c0_8, %c0_9] : memref<2x256xf32, #tpu.memory_space<vmem>>, vector<2x256xf32>
      %cst = arith.constant dense<0.000000e+00> : vector<2x256xf32>
      %18 = tpu.matmul %12, %16, %cst {dimension_numbers = #tpu.dot_dimension_numbers<[1], [0], [0], [1], [0, 0, 1, 1], [], []>} : vector<2x4096xbf16>, vector<4096x256xbf16>, vector<2x256xf32> -> vector<2x256xf32>
      %19 = arith.addf %17, %18 : vector<2x256xf32>
      %c0_10 = arith.constant 0 : index
      %c0_11 = arith.constant 0 : index
      %20 = vector.load %arg8[%c0_10, %c0_11] : memref<2x256xf32, #tpu.memory_space<vmem>>, vector<2x256xf32>
      tpu.vector_store %arg8[%c0_10, %c0_11], %19 {strides = array<i32>} : memref<2x256xf32, #tpu.memory_space<vmem>>, vector<2x256xf32>,
    }
    %c8_i32_2 = arith.constant 8 : i32
    %c3_i32 = arith.constant 3 : i32
    %4 = arith.cmpi eq, %arg1, %c3_i32 : i32
    %5 = arith.extui %4 : i1 to i32
    %c0_i32_3 = arith.constant 0 : i32
    %6 = arith.cmpi ne, %5, %c0_i32_3 : i32
    scf.if %6 {
      %c0 = arith.constant 0 : index
      %c0_4 = arith.constant 0 : index
      %7 = vector.load %arg8[%c0, %c0_4] : memref<2x256xf32, #tpu.memory_space<vmem>>, vector<2x256xf32>
      %c0_5 = arith.constant 0 : index
      %c0_6 = arith.constant 0 : index
      %c0_7 = arith.constant 0 : index
      %8 = vector.load %arg4[%c0_5, %c0_6, %c0_7] : memref<1x1x256xf32, #tpu.memory_space<vmem>>, vector<1x1x256xf32>
      %9 = vector.shape_cast %8 : vector<1x1x256xf32> to vector<1x256xf32>
      %10 = vector.broadcast %9 : vector<1x256xf32> to vector<2x256xf32>
      %11 = arith.mulf %7, %10 : vector<2x256xf32>
      %c0_8 = arith.constant 0 : index
      %c0_9 = arith.constant 0 : index
      %c0_10 = arith.constant 0 : index
      %12 = vector.load %arg5[%c0_8, %c0_9, %c0_10] : memref<1x1x256xf32, #tpu.memory_space<vmem>>, vector<1x1x256xf32>
      %13 = vector.shape_cast %12 : vector<1x1x256xf32> to vector<1x256xf32>
      %14 = vector.broadcast %13 : vector<1x256xf32> to vector<2x256xf32>
      %15 = arith.addf %11, %14 : vector<2x256xf32>
      %cst = arith.constant 0.000000e+00 : f32
      %16 = vector.broadcast %cst : f32 to vector<2x256xf32>
      %17 = arith.maximumf %15, %16 : vector<2x256xf32>
      %c0_11 = arith.constant 0 : index
      %c0_12 = arith.constant 0 : index
      %c0_13 = arith.constant 0 : index
      %18 = vector.load %arg6[%c0_11, %c0_12, %c0_13] : memref<1x256x1xf32, #tpu.memory_space<vmem>>, vector<1x256x1xf32>
      %19 = vector.shape_cast %18 : vector<1x256x1xf32> to vector<256x1xf32>
      %cst_14 = arith.constant dense<0.000000e+00> : vector<2x1xf32>
      %20 = tpu.matmul %17, %19, %cst_14 {dimension_numbers = #tpu.dot_dimension_numbers<[1], [0], [0], [1], [0, 0, 1, 1], [], []>} : vector<2x256xf32>, vector<256x1xf32>, vector<2x1xf32> -> vector<2x1xf32>
      %c0_15 = arith.constant 0 : index
      %c0_16 = arith.constant 0 : index
      %c0_17 = arith.constant 0 : index
      %21 = vector.load %arg7[%c0_15, %c0_16, %c0_17] : memref<1x2x1xf32, #tpu.memory_space<vmem>>, vector<1x2x1xf32>
      %22 = vector.shape_cast %21 : vector<1x2x1xf32> to vector<2x1xf32>
      %23 = vector.shape_cast %20 : vector<2x1xf32> to vector<1x2x1xf32>
      tpu.vector_store %arg7[%c0_15, %c0_16, %c0_17], %23 {strides = array<i32>} : memref<1x2x1xf32, #tpu.memory_space<vmem>>, vector<1x2x1xf32>,
    } else {
    }
    return
  }
  func.func @transform_0(%arg0: i32, %arg1: i32) -> (i32, i32) {
    %c0_i32 = arith.constant 0 : i32
    %c0_i32_0 = arith.constant 0 : i32
    return %c0_i32, %arg1 : i32, i32
  }
  func.func @transform_1(%arg0: i32, %arg1: i32) -> (i32, i32, i32) {
    %c0_i32 = arith.constant 0 : i32
    %c0_i32_0 = arith.constant 0 : i32
    return %arg0, %arg1, %c0_i32 : i32, i32, i32
  }
  func.func @transform_2(%arg0: i32, %arg1: i32) -> (i32, i32, i32) {
    %c0_i32 = arith.constant 0 : i32
    %c0_i32_0 = arith.constant 0 : i32
    %c0_i32_1 = arith.constant 0 : i32
    return %arg0, %c0_i32, %c0_i32_0 : i32, i32, i32
  }
  func.func @transform_3(%arg0: i32, %arg1: i32) -> (i32, i32, i32) {
    %c0_i32 = arith.constant 0 : i32
    %c0_i32_0 = arith.constant 0 : i32
    %c0_i32_1 = arith.constant 0 : i32
    return %arg0, %c0_i32, %c0_i32_0 : i32, i32, i32
  }
  func.func @transform_4(%arg0: i32, %arg1: i32) -> (i32, i32, i32) {
    %c0_i32 = arith.constant 0 : i32
    %c0_i32_0 = arith.constant 0 : i32
    %c0_i32_1 = arith.constant 0 : i32
    return %arg0, %c0_i32, %c0_i32_0 : i32, i32, i32
  }
  func.func @transform_5(%arg0: i32, %arg1: i32) -> (i32, i32, i32) {
    %c0_i32 = arith.constant 0 : i32
    %c0_i32_0 = arith.constant 0 : i32
    %c0_i32_1 = arith.constant 0 : i32
    return %arg0, %c0_i32, %c0_i32_0 : i32, i32, i32
  }
}

</mosaic_0001>

<bundles_post_ra>
// kernel: agenet_gray_forward.3
= control target key start
LH: loop header
LB: loop body
LE: loop exit
PB: predicated region body
PF: predicated region fallthrough
CT: control target
= control target key end

     0   :  { %s12855_s12 = smov 0   ;;  %s12857_s13 = smov 0   ;;  %s15522_s0 = inlined_call_operand.vmem [shape: bf16[2,4,4096,9], index: 0, kind: input, shape index: {}]   ;;  %s15523_s1 = inlined_call_operand.vmem [shape: bf16[9,64], index: 1, kind: input, shape index: {}]   ;;  %s15524_s2 = inlined_call_operand.vmem [shape: f32[1,64], index: 2, kind: input, shape index: {}]   ;;  %s15525_s3 = inlined_call_operand.vmem [shape: bf16[2,4096,64], index: 3, kind: output, shape index: {}]  }
   0x1   :  { %s12859_s14 = smov 0   ;;  %s12861_s15 = smov 0  }
   0x2   :  { %s12863_s16 = smov 0   ;;  %s12865_s17 = smov 0  }
   0x3   :  { %s12867_s18 = smov 0  }
   0x4 LB: > { %s22_s19 = sadd.s32 1, %s12824_s16  ;;  %s25_s20 = sadd.s32 1, %s12828_s17  ;;  %s12832_s18 = sphi %s12867_s18, %s13_s18   ;;  %s12828_s17 = sphi %s12865_s17, %s16286_s17   ;;  %s12824_s16 = sphi %s12863_s16, %s16285_s16   ;;  %s12820_s15 = sphi %s12861_s15, %s16284_s15   ;;  %s12816_s14 = sphi %s12859_s14, %s16283_s14   ;;  %s12812_s13 = sphi %s12857_s13, %s16282_s13   ;;  %s12808_s12 = sphi %s12855_s12, %s16281_s12  }
   0x5   : > { %p23_p0 = scmp.ge.s32.totalorder %s22_s19, 4  ;;  %p41_p1 = scmp.ne.s32.totalorder %s12812_s13, %s12808_s12 }
   0x6   : > { %p42_p2 = scmp.eq.s32.totalorder %s12832_s18, 0  ;;  %s34_s24 = sadd.s32 1, %s12812_s13 }
   0x7   : > { %s16288_s19 = smov (%p23_p0, %s22_s19), 0  ;;  %s16290_s20 = smov (!%p23_p0, %s25_s20), %s12828_s17 }
   0x8   : > { %p43_p3 = por %p42_p2, %p41_p1  ;;  %p27_p4 = scmp.ge.s32.totalorder %s16290_s20, 2 }
   0x9   : > { %s30_s21 = ssub.s32 %s12824_s16, %s16288_s19  ;;  %p10516_p6 = scmp.ge.s32.totalorder %s12832_s18, 8 }
   0xa   : > { %s16292_s20 = smov (%p27_p4, %s16290_s20), 0 }
   0xb   : > { %s29_s22 = ssub.s32 %s12828_s17, %s16292_s20  ;;  %143 = sbr.rel (%p10516_p6) target bundleno = 151 (0x97), region = 24 }
   0xc   : > { %s31_s23 = sor.u32 %s30_s21, %s29_s22 }
   0xd   : > { %p32_p5 = scmp.eq.s32.totalorder %s31_s23, 0 }
   0xf   : > { %s12906_s25 = scalar_select %p32_p5, %s12812_s13, %s34_s24  }
  0x10   : > { %146 = sbr.rel (!%p43_p3) target bundleno = 151 (0x97), region = 28  ;;  %s148_s26 = sand.u32 (%p43_p3), 1, %s12812_s13  }
  0x11   : > { %s10518_s27 = sshll.u32 (%p43_p3), %s12824_s16, 7  ;;  %s10517_s28 = sshll.u32 (%p43_p3), %s148_s26, 11 }
  0x12   : > { %s10519_s29 = sshll.u32 (%p43_p3), %s12828_s17, 11  ;;  %s12920_s8 = scalar_lea.vmem (%p43_p3), [#allocation2], %s10517_s28 }
  0x13   : > { %s153_s30 = sadd.s32 (%p43_p3), %s10519_s29, %s10518_s27 }
  0x14   : > { %s10520_s4 = sshll.u32 (%p43_p3), %s153_s30, 2 }
  0x15   : > { %s12915_s7 = scalar_lea.vmem %s15522_s0, %s10520_s4 }
  0x16   : > { %v172_v0 = vld [vmem:[%s12915_s7] sm:$0xff]   ;;  %v176_v1 = vld [vmem:[%s12915_s7 + $0x8] sm:$0xff]   ;;  %v180_v2 = vld [vmem:[%s12915_s7 + $0x10] sm:$0xff]  }
  0x17   : > { %173 = vst [vmem:[%s12920_s8] sm:$0xff] %v172_v0   ;;  %177 = vst [vmem:[%s12920_s8 + $0x8] sm:$0xff] %v176_v1   ;;  %v184_v3 = vld [vmem:[%s12915_s7 + $0x18] sm:$0xff]   ;;  %v188_v4 = vld [vmem:[%s12915_s7 + $0x20] sm:$0xff]  }
  0x18   : > { %181 = vst [vmem:[%s12920_s8 + $0x10] sm:$0xff] %v180_v2   ;;  %v192_v5 = vld [vmem:[%s12915_s7 + $0x28] sm:$0xff]   ;;  %185 = vst [vmem:[%s12920_s8 + $0x18] sm:$0xff] %v184_v3   ;;  %v196_v6 = vld [vmem:[%s12915_s7 + $0x30] sm:$0xff]  }
  0x19   : > { %189 = vst [vmem:[%s12920_s8 + $0x20] sm:$0xff] %v188_v4   ;;  %193 = vst [vmem:[%s12920_s8 + $0x28] sm:$0xff] %v192_v5   ;;  %v200_v7 = vld [vmem:[%s12915_s7 + $0x38] sm:$0xff]   ;;  %v204_v8 = vld [vmem:[%s12915_s7 + $0x40] sm:$0xff]  }
  0x1a   : > { %197 = vst [vmem:[%s12920_s8 + $0x30] sm:$0xff] %v196_v6   ;;  %201 = vst [vmem:[%s12920_s8 + $0x38] sm:$0xff] %v200_v7   ;;  %v208_v9 = vld [vmem:[%s12915_s7 + $0x48] sm:$0xff]   ;;  %v212_v10 = vld [vmem:[%s12915_s7 + $0x50] sm:$0xff]  }
  0x1b   : > { %205 = vst [vmem:[%s12920_s8 + $0x40] sm:$0xff] %v204_v8   ;;  %v216_v11 = vld [vmem:[%s12915_s7 + $0x58] sm:$0xff]   ;;  %209 = vst [vmem:[%s12920_s8 + $0x48] sm:$0xff] %v208_v9   ;;  %v220_v12 = vld [vmem:[%s12915_s7 + $0x60] sm:$0xff]  }
  0x1c   : > { %213 = vst [vmem:[%s12920_s8 + $0x50] sm:$0xff] %v212_v10   ;;  %217 = vst [vmem:[%s12920_s8 + $0x58] sm:$0xff] %v216_v11   ;;  %v224_v13 = vld [vmem:[%s12915_s7 + $0x68] sm:$0xff]   ;;  %v228_v14 = vld [vmem:[%s12915_s7 + $0x70] sm:$0xff]  }
  0x1d   : > { %221 = vst [vmem:[%s12920_s8 + $0x60] sm:$0xff] %v220_v12   ;;  %225 = vst [vmem:[%s12920_s8 + $0x68] sm:$0xff] %v224_v13   ;;  %v232_v15 = vld [vmem:[%s12915_s7 + $0x78] sm:$0xff]   ;;  %v236_v16 = vld [vmem:[%s12915_s7 + $0x80] sm:$0xff]  }
  0x1e   : > { %229 = vst [vmem:[%s12920_s8 + $0x70] sm:$0xff] %v228_v14   ;;  %v240_v17 = vld [vmem:[%s12915_s7 + $0x88] sm:$0xff]   ;;  %233 = vst [vmem:[%s12920_s8 + $0x78] sm:$0xff] %v232_v15   ;;  %v244_v18 = vld [vmem:[%s12915_s7 + $0x90] sm:$0xff]  }
  0x1f   : > { %237 = vst [vmem:[%s12920_s8 + $0x80] sm:$0xff] %v236_v16   ;;  %241 = vst [vmem:[%s12920_s8 + $0x88] sm:$0xff] %v240_v17   ;;  %v248_v19 = vld [vmem:[%s12915_s7 + $0x98] sm:$0xff]   ;;  %v252_v20 = vld [vmem:[%s12915_s7 + $0xa0] sm:$0xff]  }
  0x20   : > { %245 = vst [vmem:[%s12920_s8 + $0x90] sm:$0xff] %v244_v18   ;;  %249 = vst [vmem:[%s12920_s8 + $0x98] sm:$0xff] %v248_v19   ;;  %v256_v21 = vld [vmem:[%s12915_s7 + $0xa8] sm:$0xff]   ;;  %v260_v22 = vld [vmem:[%s12915_s7 + $0xb0] sm:$0xff]  }
  0x21   : > { %253 = vst [vmem:[%s12920_s8 + $0xa0] sm:$0xff] %v252_v20   ;;  %v264_v23 = vld [vmem:[%s12915_s7 + $0xb8] sm:$0xff]   ;;  %257 = vst [vmem:[%s12920_s8 + $0xa8] sm:$0xff] %v256_v21   ;;  %v268_v24 = vld [vmem:[%s12915_s7 + $0xc0] sm:$0xff]  }
  0x22   : > { %261 = vst [vmem:[%s12920_s8 + $0xb0] sm:$0xff] %v260_v22   ;;  %265 = vst [vmem:[%s12920_s8 + $0xb8] sm:$0xff] %v264_v23   ;;  %v272_v25 = vld [vmem:[%s12915_s7 + $0xc8] sm:$0xff]   ;;  %v276_v26 = vld [vmem:[%s12915_s7 + $0xd0] sm:$0xff]  }
  0x23   : > { %269 = vst [vmem:[%s12920_s8 + $0xc0] sm:$0xff] %v268_v24   ;;  %273 = vst [vmem:[%s12920_s8 + $0xc8] sm:$0xff] %v272_v25   ;;  %v280_v27 = vld [vmem:[%s12915_s7 + $0xd8] sm:$0xff]   ;;  %v284_v28 = vld [vmem:[%s12915_s7 + $0xe0] sm:$0xff]  }
  0x24   : > { %277 = vst [vmem:[%s12920_s8 + $0xd0] sm:$0xff] %v276_v26   ;;  %v288_v29 = vld [vmem:[%s12915_s7 + $0xe8] sm:$0xff]   ;;  %281 = vst [vmem:[%s12920_s8 + $0xd8] sm:$0xff] %v280_v27   ;;  %v292_v30 = vld [vmem:[%s12915_s7 + $0xf0] sm:$0xff]  }
  0x25   : > { %285 = vst [vmem:[%s12920_s8 + $0xe0] sm:$0xff] %v284_v28   ;;  %289 = vst [vmem:[%s12920_s8 + $0xe8] sm:$0xff] %v288_v29   ;;  %v296_v31 = vld [vmem:[%s12915_s7 + $0xf8] sm:$0xff]   ;;  %v300_v32 = vld [vmem:[%s12915_s7 + $0x100] sm:$0xff]  }
  0x26   : > { %293 = vst [vmem:[%s12920_s8 + $0xf0] sm:$0xff] %v292_v30   ;;  %297 = vst [vmem:[%s12920_s8 + $0xf8] sm:$0xff] %v296_v31   ;;  %v304_v33 = vld [vmem:[%s12915_s7 + $0x108] sm:$0xff]   ;;  %v308_v34 = vld [vmem:[%s12915_s7 + $0x110] sm:$0xff]  }
  0x27   : > { %301 = vst [vmem:[%s12920_s8 + $0x100] sm:$0xff] %v300_v32   ;;  %v312_v35 = vld [vmem:[%s12915_s7 + $0x118] sm:$0xff]   ;;  %305 = vst [vmem:[%s12920_s8 + $0x108] sm:$0xff] %v304_v33   ;;  %v316_v36 = vld [vmem:[%s12915_s7 + $0x120] sm:$0xff]  }
  0x28   : > { %309 = vst [vmem:[%s12920_s8 + $0x110] sm:$0xff] %v308_v34   ;;  %313 = vst [vmem:[%s12920_s8 + $0x118] sm:$0xff] %v312_v35   ;;  %v320_v37 = vld [vmem:[%s12915_s7 + $0x128] sm:$0xff]   ;;  %v324_v38 = vld [vmem:[%s12915_s7 + $0x130] sm:$0xff]  }
  0x29   : > { %317 = vst [vmem:[%s12920_s8 + $0x120] sm:$0xff] %v316_v36   ;;  %321 = vst [vmem:[%s12920_s8 + $0x128] sm:$0xff] %v320_v37   ;;  %v328_v39 = vld [vmem:[%s12915_s7 + $0x138] sm:$0xff]   ;;  %v332_v40 = vld [vmem:[%s12915_s7 + $0x140] sm:$0xff]  }
  0x2a   : > { %325 = vst [vmem:[%s12920_s8 + $0x130] sm:$0xff] %v324_v38   ;;  %v336_v41 = vld [vmem:[%s12915_s7 + $0x148] sm:$0xff]   ;;  %329 = vst [vmem:[%s12920_s8 + $0x138] sm:$0xff] %v328_v39   ;;  %v340_v42 = vld [vmem:[%s12915_s7 + $0x150] sm:$0xff]  }
  0x2b   : > { %333 = vst [vmem:[%s12920_s8 + $0x140] sm:$0xff] %v332_v40   ;;  %337 = vst [vmem:[%s12920_s8 + $0x148] sm:$0xff] %v336_v41   ;;  %v344_v43 = vld [vmem:[%s12915_s7 + $0x158] sm:$0xff]   ;;  %v348_v44 = vld [vmem:[%s12915_s7 + $0x160] sm:$0xff]  }
  0x2c   : > { %341 = vst [vmem:[%s12920_s8 + $0x150] sm:$0xff] %v340_v42   ;;  %345 = vst [vmem:[%s12920_s8 + $0x158] sm:$0xff] %v344_v43   ;;  %v352_v45 = vld [vmem:[%s12915_s7 + $0x168] sm:$0xff]   ;;  %v356_v46 = vld [vmem:[%s12915_s7 + $0x170] sm:$0xff]  }
  0x2d   : > { %349 = vst [vmem:[%s12920_s8 + $0x160] sm:$0xff] %v348_v44   ;;  %v360_v47 = vld [vmem:[%s12915_s7 + $0x178] sm:$0xff]   ;;  %353 = vst [vmem:[%s12920_s8 + $0x168] sm:$0xff] %v352_v45   ;;  %v364_v48 = vld [vmem:[%s12915_s7 + $0x180] sm:$0xff]  }
  0x2e   : > { %357 = vst [vmem:[%s12920_s8 + $0x170] sm:$0xff] %v356_v46   ;;  %361 = vst [vmem:[%s12920_s8 + $0x178] sm:$0xff] %v360_v47   ;;  %v368_v49 = vld [vmem:[%s12915_s7 + $0x188] sm:$0xff]   ;;  %v372_v50 = vld [vmem:[%s12915_s7 + $0x190] sm:$0xff]  }
  0x2f   : > { %365 = vst [vmem:[%s12920_s8 + $0x180] sm:$0xff] %v364_v48   ;;  %369 = vst [vmem:[%s12920_s8 + $0x188] sm:$0xff] %v368_v49   ;;  %v376_v51 = vld [vmem:[%s12915_s7 + $0x198] sm:$0xff]   ;;  %v380_v52 = vld [vmem:[%s12915_s7 + $0x1a0] sm:$0xff]  }
  0x30   : > { %373 = vst [vmem:[%s12920_s8 + $0x190] sm:$0xff] %v372_v50   ;;  %v384_v53 = vld [vmem:[%s12915_s7 + $0x1a8] sm:$0xff]   ;;  %377 = vst [vmem:[%s12920_s8 + $0x198] sm:$0xff] %v376_v51   ;;  %v388_v54 = vld [vmem:[%s12915_s7 + $0x1b0] sm:$0xff]  }
  0x31   : > { %381 = vst [vmem:[%s12920_s8 + $0x1a0] sm:$0xff] %v380_v52   ;;  %385 = vst [vmem:[%s12920_s8 + $0x1a8] sm:$0xff] %v384_v53   ;;  %v392_v55 = vld [vmem:[%s12915_s7 + $0x1b8] sm:$0xff]   ;;  %v396_v56 = vld [vmem:[%s12915_s7 + $0x1c0] sm:$0xff]  }
  0x32   : > { %389 = vst [vmem:[%s12920_s8 + $0x1b0] sm:$0xff] %v388_v54   ;;  %393 = vst [vmem:[%s12920_s8 + $0x1b8] sm:$0xff] %v392_v55   ;;  %v400_v57 = vld [vmem:[%s12915_s7 + $0x1c8] sm:$0xff]   ;;  %v404_v58 = vld [vmem:[%s12915_s7 + $0x1d0] sm:$0xff]  }
  0x33   : > { %397 = vst [vmem:[%s12920_s8 + $0x1c0] sm:$0xff] %v396_v56   ;;  %v408_v59 = vld [vmem:[%s12915_s7 + $0x1d8] sm:$0xff]   ;;  %401 = vst [vmem:[%s12920_s8 + $0x1c8] sm:$0xff] %v400_v57   ;;  %v412_v60 = vld [vmem:[%s12915_s7 + $0x1e0] sm:$0xff]  }
  0x34   : > { %405 = vst [vmem:[%s12920_s8 + $0x1d0] sm:$0xff] %v404_v58   ;;  %409 = vst [vmem:[%s12920_s8 + $0x1d8] sm:$0xff] %v408_v59   ;;  %v416_v61 = vld [vmem:[%s12915_s7 + $0x1e8] sm:$0xff]   ;;  %v420_v62 = vld [vmem:[%s12915_s7 + $0x1f0] sm:$0xff]  }
  0x35   : > { %413 = vst [vmem:[%s12920_s8 + $0x1e0] sm:$0xff] %v412_v60   ;;  %417 = vst [vmem:[%s12920_s8 + $0x1e8] sm:$0xff] %v416_v61   ;;  %v424_v63 = vld [vmem:[%s12915_s7 + $0x1f8] sm:$0xff]   ;;  %v428_v0 = vld [vmem:[%s12915_s7 + $0x800] sm:$0xff]  }
  0x36   : > { %421 = vst [vmem:[%s12920_s8 + $0x1f0] sm:$0xff] %v420_v62   ;;  %v432_v1 = vld [vmem:[%s12915_s7 + $0x808] sm:$0xff]   ;;  %425 = vst [vmem:[%s12920_s8 + $0x1f8] sm:$0xff] %v424_v63   ;;  %v436_v2 = vld [vmem:[%s12915_s7 + $0x810] sm:$0xff]  }
  0x37   : > { %429 = vst [vmem:[%s12920_s8 + $0x200] sm:$0xff] %v428_v0   ;;  %433 = vst [vmem:[%s12920_s8 + $0x208] sm:$0xff] %v432_v1   ;;  %v440_v3 = vld [vmem:[%s12915_s7 + $0x818] sm:$0xff]   ;;  %v444_v4 = vld [vmem:[%s12915_s7 + $0x820] sm:$0xff]  }
  0x38   : > { %437 = vst [vmem:[%s12920_s8 + $0x210] sm:$0xff] %v436_v2   ;;  %441 = vst [vmem:[%s12920_s8 + $0x218] sm:$0xff] %v440_v3   ;;  %v448_v5 = vld [vmem:[%s12915_s7 + $0x828] sm:$0xff]   ;;  %v452_v6 = vld [vmem:[%s12915_s7 + $0x830] sm:$0xff]  }
  0x39   : > { %445 = vst [vmem:[%s12920_s8 + $0x220] sm:$0xff] %v444_v4   ;;  %v456_v7 = vld [vmem:[%s12915_s7 + $0x838] sm:$0xff]   ;;  %449 = vst [vmem:[%s12920_s8 + $0x228] sm:$0xff] %v448_v5   ;;  %v460_v8 = vld [vmem:[%s12915_s7 + $0x840] sm:$0xff]  }
  0x3a   : > { %453 = vst [vmem:[%s12920_s8 + $0x230] sm:$0xff] %v452_v6   ;;  %457 = vst [vmem:[%s12920_s8 + $0x238] sm:$0xff] %v456_v7   ;;  %v464_v9 = vld [vmem:[%s12915_s7 + $0x848] sm:$0xff]   ;;  %v468_v10 = vld [vmem:[%s12915_s7 + $0x850] sm:$0xff]  }
  0x3b   : > { %461 = vst [vmem:[%s12920_s8 + $0x240] sm:$0xff] %v460_v8   ;;  %465 = vst [vmem:[%s12920_s8 + $0x248] sm:$0xff] %v464_v9   ;;  %v472_v11 = vld [vmem:[%s12915_s7 + $0x858] sm:$0xff]   ;;  %v476_v12 = vld [vmem:[%s12915_s7 + $0x860] sm:$0xff]  }
  0x3c   : > { %469 = vst [vmem:[%s12920_s8 + $0x250] sm:$0xff] %v468_v10   ;;  %v480_v13 = vld [vmem:[%s12915_s7 + $0x868] sm:$0xff]   ;;  %473 = vst [vmem:[%s12920_s8 + $0x258] sm:$0xff] %v472_v11   ;;  %v484_v14 = vld [vmem:[%s12915_s7 + $0x870] sm:$0xff]  }
  0x3d   : > { %477 = vst [vmem:[%s12920_s8 + $0x260] sm:$0xff] %v476_v12   ;;  %481 = vst [vmem:[%s12920_s8 + $0x268] sm:$0xff] %v480_v13   ;;  %v488_v15 = vld [vmem:[%s12915_s7 + $0x878] sm:$0xff]   ;;  %v492_v16 = vld [vmem:[%s12915_s7 + $0x880] sm:$0xff]  }
  0x3e   : > { %485 = vst [vmem:[%s12920_s8 + $0x270] sm:$0xff] %v484_v14   ;;  %489 = vst [vmem:[%s12920_s8 + $0x278] sm:$0xff] %v488_v15   ;;  %v496_v17 = vld [vmem:[%s12915_s7 + $0x888] sm:$0xff]   ;;  %v500_v18 = vld [vmem:[%s12915_s7 + $0x890] sm:$0xff]  }
  0x3f   : > { %493 = vst [vmem:[%s12920_s8 + $0x280] sm:$0xff] %v492_v16   ;;  %v504_v19 = vld [vmem:[%s12915_s7 + $0x898] sm:$0xff]   ;;  %497 = vst [vmem:[%s12920_s8 + $0x288] sm:$0xff] %v496_v17   ;;  %v508_v20 = vld [vmem:[%s12915_s7 + $0x8a0] sm:$0xff]  }
  0x40   : > { %501 = vst [vmem:[%s12920_s8 + $0x290] sm:$0xff] %v500_v18   ;;  %505 = vst [vmem:[%s12920_s8 + $0x298] sm:$0xff] %v504_v19   ;;  %v512_v21 = vld [vmem:[%s12915_s7 + $0x8a8] sm:$0xff]   ;;  %v516_v22 = vld [vmem:[%s12915_s7 + $0x8b0] sm:$0xff]  }
  0x41   : > { %509 = vst [vmem:[%s12920_s8 + $0x2a0] sm:$0xff] %v508_v20   ;;  %513 = vst [vmem:[%s12920_s8 + $0x2a8] sm:$0xff] %v512_v21   ;;  %v520_v23 = vld [vmem:[%s12915_s7 + $0x8b8] sm:$0xff]   ;;  %v524_v24 = vld [vmem:[%s12915_s7 + $0x8c0] sm:$0xff]  }
  0x42   : > { %517 = vst [vmem:[%s12920_s8 + $0x2b0] sm:$0xff] %v516_v22   ;;  %v528_v25 = vld [vmem:[%s12915_s7 + $0x8c8] sm:$0xff]   ;;  %521 = vst [vmem:[%s12920_s8 + $0x2b8] sm:$0xff] %v520_v23   ;;  %v532_v26 = vld [vmem:[%s12915_s7 + $0x8d0] sm:$0xff]  }
  0x43   : > { %525 = vst [vmem:[%s12920_s8 + $0x2c0] sm:$0xff] %v524_v24   ;;  %529 = vst [vmem:[%s12920_s8 + $0x2c8] sm:$0xff] %v528_v25   ;;  %v536_v27 = vld [vmem:[%s12915_s7 + $0x8d8] sm:$0xff]   ;;  %v540_v28 = vld [vmem:[%s12915_s7 + $0x8e0] sm:$0xff]  }
  0x44   : > { %533 = vst [vmem:[%s12920_s8 + $0x2d0] sm:$0xff] %v532_v26   ;;  %537 = vst [vmem:[%s12920_s8 + $0x2d8] sm:$0xff] %v536_v27   ;;  %v544_v29 = vld [vmem:[%s12915_s7 + $0x8e8] sm:$0xff]   ;;  %v548_v30 = vld [vmem:[%s12915_s7 + $0x8f0] sm:$0xff]  }
  0x45   : > { %541 = vst [vmem:[%s12920_s8 + $0x2e0] sm:$0xff] %v540_v28   ;;  %v552_v31 = vld [vmem:[%s12915_s7 + $0x8f8] sm:$0xff]   ;;  %545 = vst [vmem:[%s12920_s8 + $0x2e8] sm:$0xff] %v544_v29   ;;  %v556_v32 = vld [vmem:[%s12915_s7 + $0x900] sm:$0xff]  }
  0x46   : > { %549 = vst [vmem:[%s12920_s8 + $0x2f0] sm:$0xff] %v548_v30   ;;  %553 = vst [vmem:[%s12920_s8 + $0x2f8] sm:$0xff] %v552_v31   ;;  %v560_v33 = vld [vmem:[%s12915_s7 + $0x908] sm:$0xff]   ;;  %v564_v34 = vld [vmem:[%s12915_s7 + $0x910] sm:$0xff]  }
  0x47   : > { %557 = vst [vmem:[%s12920_s8 + $0x300] sm:$0xff] %v556_v32   ;;  %561 = vst [vmem:[%s12920_s8 + $0x308] sm:$0xff] %v560_v33   ;;  %v568_v35 = vld [vmem:[%s12915_s7 + $0x918] sm:$0xff]   ;;  %v572_v36 = vld [vmem:[%s12915_s7 + $0x920] sm:$0xff]  }
  0x48   : > { %565 = vst [vmem:[%s12920_s8 + $0x310] sm:$0xff] %v564_v34   ;;  %v576_v37 = vld [vmem:[%s12915_s7 + $0x928] sm:$0xff]   ;;  %569 = vst [vmem:[%s12920_s8 + $0x318] sm:$0xff] %v568_v35   ;;  %v580_v38 = vld [vmem:[%s12915_s7 + $0x930] sm:$0xff]  }
  0x49   : > { %573 = vst [vmem:[%s12920_s8 + $0x320] sm:$0xff] %v572_v36   ;;  %577 = vst [vmem:[%s12920_s8 + $0x328] sm:$0xff] %v576_v37   ;;  %v584_v39 = vld [vmem:[%s12915_s7 + $0x938] sm:$0xff]   ;;  %v588_v40 = vld [vmem:[%s12915_s7 + $0x940] sm:$0xff]  }
  0x4a   : > { %581 = vst [vmem:[%s12920_s8 + $0x330] sm:$0xff] %v580_v38   ;;  %585 = vst [vmem:[%s12920_s8 + $0x338] sm:$0xff] %v584_v39   ;;  %v592_v41 = vld [vmem:[%s12915_s7 + $0x948] sm:$0xff]   ;;  %v596_v42 = vld [vmem:[%s12915_s7 + $0x950] sm:$0xff]  }
  0x4b   : > { %589 = vst [vmem:[%s12920_s8 + $0x340] sm:$0xff] %v588_v40   ;;  %v600_v43 = vld [vmem:[%s12915_s7 + $0x958] sm:$0xff]   ;;  %593 = vst [vmem:[%s12920_s8 + $0x348] sm:$0xff] %v592_v41   ;;  %v604_v44 = vld [vmem:[%s12915_s7 + $0x960] sm:$0xff]  }
  0x4c   : > { %597 = vst [vmem:[%s12920_s8 + $0x350] sm:$0xff] %v596_v42   ;;  %601 = vst [vmem:[%s12920_s8 + $0x358] sm:$0xff] %v600_v43   ;;  %v608_v45 = vld [vmem:[%s12915_s7 + $0x968] sm:$0xff]   ;;  %v612_v46 = vld [vmem:[%s12915_s7 + $0x970] sm:$0xff]  }
  0x4d   : > { %605 = vst [vmem:[%s12920_s8 + $0x360] sm:$0xff] %v604_v44   ;;  %609 = vst [vmem:[%s12920_s8 + $0x368] sm:$0xff] %v608_v45   ;;  %v616_v47 = vld [vmem:[%s12915_s7 + $0x978] sm:$0xff]   ;;  %v620_v48 = vld [vmem:[%s12915_s7 + $0x980] sm:$0xff]  }
  0x4e   : > { %613 = vst [vmem:[%s12920_s8 + $0x370] sm:$0xff] %v612_v46   ;;  %v624_v49 = vld [vmem:[%s12915_s7 + $0x988] sm:$0xff]   ;;  %617 = vst [vmem:[%s12920_s8 + $0x378] sm:$0xff] %v616_v47   ;;  %v628_v50 = vld [vmem:[%s12915_s7 + $0x990] sm:$0xff]  }
  0x4f   : > { %621 = vst [vmem:[%s12920_s8 + $0x380] sm:$0xff] %v620_v48   ;;  %625 = vst [vmem:[%s12920_s8 + $0x388] sm:$0xff] %v624_v49   ;;  %v632_v51 = vld [vmem:[%s12915_s7 + $0x998] sm:$0xff]   ;;  %v636_v52 = vld [vmem:[%s12915_s7 + $0x9a0] sm:$0xff]  }
  0x50   : > { %629 = vst [vmem:[%s12920_s8 + $0x390] sm:$0xff] %v628_v50   ;;  %633 = vst [vmem:[%s12920_s8 + $0x398] sm:$0xff] %v632_v51   ;;  %v640_v53 = vld [vmem:[%s12915_s7 + $0x9a8] sm:$0xff]   ;;  %v644_v54 = vld [vmem:[%s12915_s7 + $0x9b0] sm:$0xff]  }
  0x51   : > { %637 = vst [vmem:[%s12920_s8 + $0x3a0] sm:$0xff] %v636_v52   ;;  %v648_v55 = vld [vmem:[%s12915_s7 + $0x9b8] sm:$0xff]   ;;  %641 = vst [vmem:[%s12920_s8 + $0x3a8] sm:$0xff] %v640_v53   ;;  %v652_v56 = vld [vmem:[%s12915_s7 + $0x9c0] sm:$0xff]  }
  0x52   : > { %645 = vst [vmem:[%s12920_s8 + $0x3b0] sm:$0xff] %v644_v54   ;;  %649 = vst [vmem:[%s12920_s8 + $0x3b8] sm:$0xff] %v648_v55   ;;  %v656_v57 = vld [vmem:[%s12915_s7 + $0x9c8] sm:$0xff]   ;;  %v660_v58 = vld [vmem:[%s12915_s7 + $0x9d0] sm:$0xff]  }
  0x53   : > { %653 = vst [vmem:[%s12920_s8 + $0x3c0] sm:$0xff] %v652_v56   ;;  %657 = vst [vmem:[%s12920_s8 + $0x3c8] sm:$0xff] %v656_v57   ;;  %v664_v59 = vld [vmem:[%s12915_s7 + $0x9d8] sm:$0xff]   ;;  %v668_v60 = vld [vmem:[%s12915_s7 + $0x9e0] sm:$0xff]  }
  0x54   : > { %661 = vst [vmem:[%s12920_s8 + $0x3d0] sm:$0xff] %v660_v58   ;;  %v672_v61 = vld [vmem:[%s12915_s7 + $0x9e8] sm:$0xff]   ;;  %665 = vst [vmem:[%s12920_s8 + $0x3d8] sm:$0xff] %v664_v59   ;;  %v676_v62 = vld [vmem:[%s12915_s7 + $0x9f0] sm:$0xff]  }
  0x55   : > { %669 = vst [vmem:[%s12920_s8 + $0x3e0] sm:$0xff] %v668_v60   ;;  %673 = vst [vmem:[%s12920_s8 + $0x3e8] sm:$0xff] %v672_v61   ;;  %v680_v63 = vld [vmem:[%s12915_s7 + $0x9f8] sm:$0xff]   ;;  %v684_v0 = vld [vmem:[%s12915_s7 + $0x1000] sm:$0xff]  }
  0x56   : > { %677 = vst [vmem:[%s12920_s8 + $0x3f0] sm:$0xff] %v676_v62   ;;  %681 = vst [vmem:[%s12920_s8 + $0x3f8] sm:$0xff] %v680_v63   ;;  %v688_v1 = vld [vmem:[%s12915_s7 + $0x1008] sm:$0xff]   ;;  %v692_v2 = vld [vmem:[%s12915_s7 + $0x1010] sm:$0xff]  }
  0x57   : > { %685 = vst [vmem:[%s12920_s8 + $0x400] sm:$0xff] %v684_v0   ;;  %v696_v3 = vld [vmem:[%s12915_s7 + $0x1018] sm:$0xff]   ;;  %689 = vst [vmem:[%s12920_s8 + $0x408] sm:$0xff] %v688_v1   ;;  %v700_v4 = vld [vmem:[%s12915_s7 + $0x1020] sm:$0xff]  }
  0x58   : > { %693 = vst [vmem:[%s12920_s8 + $0x410] sm:$0xff] %v692_v2   ;;  %697 = vst [vmem:[%s12920_s8 + $0x418] sm:$0xff] %v696_v3   ;;  %v704_v5 = vld [vmem:[%s12915_s7 + $0x1028] sm:$0xff]   ;;  %v708_v6 = vld [vmem:[%s12915_s7 + $0x1030] sm:$0xff]  }
  0x59   : > { %701 = vst [vmem:[%s12920_s8 + $0x420] sm:$0xff] %v700_v4   ;;  %705 = vst [vmem:[%s12920_s8 + $0x428] sm:$0xff] %v704_v5   ;;  %v712_v7 = vld [vmem:[%s12915_s7 + $0x1038] sm:$0xff]   ;;  %v716_v8 = vld [vmem:[%s12915_s7 + $0x1040] sm:$0xff]  }
  0x5a   : > { %709 = vst [vmem:[%s12920_s8 + $0x430] sm:$0xff] %v708_v6   ;;  %v720_v9 = vld [vmem:[%s12915_s7 + $0x1048] sm:$0xff]   ;;  %713 = vst [vmem:[%s12920_s8 + $0x438] sm:$0xff] %v712_v7   ;;  %v724_v10 = vld [vmem:[%s12915_s7 + $0x1050] sm:$0xff]  }
  0x5b   : > { %717 = vst [vmem:[%s12920_s8 + $0x440] sm:$0xff] %v716_v8   ;;  %721 = vst [vmem:[%s12920_s8 + $0x448] sm:$0xff] %v720_v9   ;;  %v728_v11 = vld [vmem:[%s12915_s7 + $0x1058] sm:$0xff]   ;;  %v732_v12 = vld [vmem:[%s12915_s7 + $0x1060] sm:$0xff]  }
  0x5c   : > { %725 = vst [vmem:[%s12920_s8 + $0x450] sm:$0xff] %v724_v10   ;;  %729 = vst [vmem:[%s12920_s8 + $0x458] sm:$0xff] %v728_v11   ;;  %v736_v13 = vld [vmem:[%s12915_s7 + $0x1068] sm:$0xff]   ;;  %v740_v14 = vld [vmem:[%s12915_s7 + $0x1070] sm:$0xff]  }
  0x5d   : > { %733 = vst [vmem:[%s12920_s8 + $0x460] sm:$0xff] %v732_v12   ;;  %v744_v15 = vld [vmem:[%s12915_s7 + $0x1078] sm:$0xff]   ;;  %737 = vst [vmem:[%s12920_s8 + $0x468] sm:$0xff] %v736_v13   ;;  %v748_v16 = vld [vmem:[%s12915_s7 + $0x1080] sm:$0xff]  }
  0x5e   : > { %741 = vst [vmem:[%s12920_s8 + $0x470] sm:$0xff] %v740_v14   ;;  %745 = vst [vmem:[%s12920_s8 + $0x478] sm:$0xff] %v744_v15   ;;  %v752_v17 = vld [vmem:[%s12915_s7 + $0x1088] sm:$0xff]   ;;  %v756_v18 = vld [vmem:[%s12915_s7 + $0x1090] sm:$0xff]  }
  0x5f   : > { %749 = vst [vmem:[%s12920_s8 + $0x480] sm:$0xff] %v748_v16   ;;  %753 = vst [vmem:[%s12920_s8 + $0x488] sm:$0xff] %v752_v17   ;;  %v760_v19 = vld [vmem:[%s12915_s7 + $0x1098] sm:$0xff]   ;;  %v764_v20 = vld [vmem:[%s12915_s7 + $0x10a0] sm:$0xff]  }
  0x60   : > { %757 = vst [vmem:[%s12920_s8 + $0x490] sm:$0xff] %v756_v18   ;;  %v768_v21 = vld [vmem:[%s12915_s7 + $0x10a8] sm:$0xff]   ;;  %761 = vst [vmem:[%s12920_s8 + $0x498] sm:$0xff] %v760_v19   ;;  %v772_v22 = vld [vmem:[%s12915_s7 + $0x10b0] sm:$0xff]  }
  0x61   : > { %765 = vst [vmem:[%s12920_s8 + $0x4a0] sm:$0xff] %v764_v20   ;;  %769 = vst [vmem:[%s12920_s8 + $0x4a8] sm:$0xff] %v768_v21   ;;  %v776_v23 = vld [vmem:[%s12915_s7 + $0x10b8] sm:$0xff]   ;;  %v780_v24 = vld [vmem:[%s12915_s7 + $0x10c0] sm:$0xff]  }
  0x62   : > { %773 = vst [vmem:[%s12920_s8 + $0x4b0] sm:$0xff] %v772_v22   ;;  %777 = vst [vmem:[%s12920_s8 + $0x4b8] sm:$0xff] %v776_v23   ;;  %v784_v25 = vld [vmem:[%s12915_s7 + $0x10c8] sm:$0xff]   ;;  %v788_v26 = vld [vmem:[%s12915_s7 + $0x10d0] sm:$0xff]  }
  0x63   : > { %781 = vst [vmem:[%s12920_s8 + $0x4c0] sm:$0xff] %v780_v24   ;;  %v792_v27 = vld [vmem:[%s12915_s7 + $0x10d8] sm:$0xff]   ;;  %785 = vst [vmem:[%s12920_s8 + $0x4c8] sm:$0xff] %v784_v25   ;;  %v796_v28 = vld [vmem:[%s12915_s7 + $0x10e0] sm:$0xff]  }
  0x64   : > { %789 = vst [vmem:[%s12920_s8 + $0x4d0] sm:$0xff] %v788_v26   ;;  %793 = vst [vmem:[%s12920_s8 + $0x4d8] sm:$0xff] %v792_v27   ;;  %v800_v29 = vld [vmem:[%s12915_s7 + $0x10e8] sm:$0xff]   ;;  %v804_v30 = vld [vmem:[%s12915_s7 + $0x10f0] sm:$0xff]  }
  0x65   : > { %797 = vst [vmem:[%s12920_s8 + $0x4e0] sm:$0xff] %v796_v28   ;;  %801 = vst [vmem:[%s12920_s8 + $0x4e8] sm:$0xff] %v800_v29   ;;  %v808_v31 = vld [vmem:[%s12915_s7 + $0x10f8] sm:$0xff]   ;;  %v812_v32 = vld [vmem:[%s12915_s7 + $0x1100] sm:$0xff]  }
  0x66   : > { %805 = vst [vmem:[%s12920_s8 + $0x4f0] sm:$0xff] %v804_v30   ;;  %v816_v33 = vld [vmem:[%s12915_s7 + $0x1108] sm:$0xff]   ;;  %809 = vst [vmem:[%s12920_s8 + $0x4f8] sm:$0xff] %v808_v31   ;;  %v820_v34 = vld [vmem:[%s12915_s7 + $0x1110] sm:$0xff]  }
  0x67   : > { %813 = vst [vmem:[%s12920_s8 + $0x500] sm:$0xff] %v812_v32   ;;  %817 = vst [vmem:[%s12920_s8 + $0x508] sm:$0xff] %v816_v33   ;;  %v824_v35 = vld [vmem:[%s12915_s7 + $0x1118] sm:$0xff]   ;;  %v828_v36 = vld [vmem:[%s12915_s7 + $0x1120] sm:$0xff]  }
  0x68   : > { %821 = vst [vmem:[%s12920_s8 + $0x510] sm:$0xff] %v820_v34   ;;  %825 = vst [vmem:[%s12920_s8 + $0x518] sm:$0xff] %v824_v35   ;;  %v832_v37 = vld [vmem:[%s12915_s7 + $0x1128] sm:$0xff]   ;;  %v836_v38 = vld [vmem:[%s12915_s7 + $0x1130] sm:$0xff]  }
  0x69   : > { %829 = vst [vmem:[%s12920_s8 + $0x520] sm:$0xff] %v828_v36   ;;  %v840_v39 = vld [vmem:[%s12915_s7 + $0x1138] sm:$0xff]   ;;  %833 = vst [vmem:[%s12920_s8 + $0x528] sm:$0xff] %v832_v37   ;;  %v844_v40 = vld [vmem:[%s12915_s7 + $0x1140] sm:$0xff]  }
  0x6a   : > { %837 = vst [vmem:[%s12920_s8 + $0x530] sm:$0xff] %v836_v38   ;;  %841 = vst [vmem:[%s12920_s8 + $0x538] sm:$0xff] %v840_v39   ;;  %v848_v41 = vld [vmem:[%s12915_s7 + $0x1148] sm:$0xff]   ;;  %v852_v42 = vld [vmem:[%s12915_s7 + $0x1150] sm:$0xff]  }
  0x6b   : > { %845 = vst [vmem:[%s12920_s8 + $0x540] sm:$0xff] %v844_v40   ;;  %849 = vst [vmem:[%s12920_s8 + $0x548] sm:$0xff] %v848_v41   ;;  %v856_v43 = vld [vmem:[%s12915_s7 + $0x1158] sm:$0xff]   ;;  %v860_v44 = vld [vmem:[%s12915_s7 + $0x1160] sm:$0xff]  }
  0x6c   : > { %853 = vst [vmem:[%s12920_s8 + $0x550] sm:$0xff] %v852_v42   ;;  %v864_v45 = vld [vmem:[%s12915_s7 + $0x1168] sm:$0xff]   ;;  %857 = vst [vmem:[%s12920_s8 + $0x558] sm:$0xff] %v856_v43   ;;  %v868_v46 = vld [vmem:[%s12915_s7 + $0x1170] sm:$0xff]  }
  0x6d   : > { %861 = vst [vmem:[%s12920_s8 + $0x560] sm:$0xff] %v860_v44   ;;  %865 = vst [vmem:[%s12920_s8 + $0x568] sm:$0xff] %v864_v45   ;;  %v872_v47 = vld [vmem:[%s12915_s7 + $0x1178] sm:$0xff]   ;;  %v876_v48 = vld [vmem:[%s12915_s7 + $0x1180] sm:$0xff]  }
  0x6e   : > { %869 = vst [vmem:[%s12920_s8 + $0x570] sm:$0xff] %v868_v46   ;;  %873 = vst [vmem:[%s12920_s8 + $0x578] sm:$0xff] %v872_v47   ;;  %v880_v49 = vld [vmem:[%s12915_s7 + $0x1188] sm:$0xff]   ;;  %v884_v50 = vld [vmem:[%s12915_s7 + $0x1190] sm:$0xff]  }
  0x6f   : > { %877 = vst [vmem:[%s12920_s8 + $0x580] sm:$0xff] %v876_v48   ;;  %v888_v51 = vld [vmem:[%s12915_s7 + $0x1198] sm:$0xff]   ;;  %881 = vst [vmem:[%s12920_s8 + $0x588] sm:$0xff] %v880_v49   ;;  %v892_v52 = vld [vmem:[%s12915_s7 + $0x11a0] sm:$0xff]  }
  0x70   : > { %885 = vst [vmem:[%s12920_s8 + $0x590] sm:$0xff] %v884_v50   ;;  %889 = vst [vmem:[%s12920_s8 + $0x598] sm:$0xff] %v888_v51   ;;  %v896_v53 = vld [vmem:[%s12915_s7 + $0x11a8] sm:$0xff]   ;;  %v900_v54 = vld [vmem:[%s12915_s7 + $0x11b0] sm:$0xff]  }
  0x71   : > { %893 = vst [vmem:[%s12920_s8 + $0x5a0] sm:$0xff] %v892_v52   ;;  %897 = vst [vmem:[%s12920_s8 + $0x5a8] sm:$0xff] %v896_v53   ;;  %v904_v55 = vld [vmem:[%s12915_s7 + $0x11b8] sm:$0xff]   ;;  %v908_v56 = vld [vmem:[%s12915_s7 + $0x11c0] sm:$0xff]  }
  0x72   : > { %901 = vst [vmem:[%s12920_s8 + $0x5b0] sm:$0xff] %v900_v54   ;;  %v912_v57 = vld [vmem:[%s12915_s7 + $0x11c8] sm:$0xff]   ;;  %905 = vst [vmem:[%s12920_s8 + $0x5b8] sm:$0xff] %v904_v55   ;;  %v916_v58 = vld [vmem:[%s12915_s7 + $0x11d0] sm:$0xff]  }
  0x73   : > { %909 = vst [vmem:[%s12920_s8 + $0x5c0] sm:$0xff] %v908_v56   ;;  %913 = vst [vmem:[%s12920_s8 + $0x5c8] sm:$0xff] %v912_v57   ;;  %v920_v59 = vld [vmem:[%s12915_s7 + $0x11d8] sm:$0xff]   ;;  %v924_v60 = vld [vmem:[%s12915_s7 + $0x11e0] sm:$0xff]  }
  0x74   : > { %917 = vst [vmem:[%s12920_s8 + $0x5d0] sm:$0xff] %v916_v58   ;;  %921 = vst [vmem:[%s12920_s8 + $0x5d8] sm:$0xff] %v920_v59   ;;  %v928_v61 = vld [vmem:[%s12915_s7 + $0x11e8] sm:$0xff]   ;;  %v932_v62 = vld [vmem:[%s12915_s7 + $0x11f0] sm:$0xff]  }
  0x75   : > { %925 = vst [vmem:[%s12920_s8 + $0x5e0] sm:$0xff] %v924_v60   ;;  %v936_v63 = vld [vmem:[%s12915_s7 + $0x11f8] sm:$0xff]   ;;  %929 = vst [vmem:[%s12920_s8 + $0x5e8] sm:$0xff] %v928_v61   ;;  %v940_v0 = vld [vmem:[%s12915_s7 + $0x1800] sm:$0xff]  }
  0x76   : > { %933 = vst [vmem:[%s12920_s8 + $0x5f0] sm:$0xff] %v932_v62   ;;  %937 = vst [vmem:[%s12920_s8 + $0x5f8] sm:$0xff] %v936_v63   ;;  %v944_v1 = vld [vmem:[%s12915_s7 + $0x1808] sm:$0xff]   ;;  %v948_v2 = vld [vmem:[%s12915_s7 + $0x1810] sm:$0xff]  }
  0x77   : > { %941 = vst [vmem:[%s12920_s8 + $0x600] sm:$0xff] %v940_v0   ;;  %945 = vst [vmem:[%s12920_s8 + $0x608] sm:$0xff] %v944_v1   ;;  %v952_v3 = vld [vmem:[%s12915_s7 + $0x1818] sm:$0xff]   ;;  %v956_v4 = vld [vmem:[%s12915_s7 + $0x1820] sm:$0xff]  }
  0x78   : > { %949 = vst [vmem:[%s12920_s8 + $0x610] sm:$0xff] %v948_v2   ;;  %v960_v5 = vld [vmem:[%s12915_s7 + $0x1828] sm:$0xff]   ;;  %953 = vst [vmem:[%s12920_s8 + $0x618] sm:$0xff] %v952_v3   ;;  %v964_v6 = vld [vmem:[%s12915_s7 + $0x1830] sm:$0xff]  }
  0x79   : > { %957 = vst [vmem:[%s12920_s8 + $0x620] sm:$0xff] %v956_v4   ;;  %961 = vst [vmem:[%s12920_s8 + $0x628] sm:$0xff] %v960_v5   ;;  %v968_v7 = vld [vmem:[%s12915_s7 + $0x1838] sm:$0xff]   ;;  %v972_v8 = vld [vmem:[%s12915_s7 + $0x1840] sm:$0xff]  }
  0x7a   : > { %965 = vst [vmem:[%s12920_s8 + $0x630] sm:$0xff] %v964_v6   ;;  %969 = vst [vmem:[%s12920_s8 + $0x638] sm:$0xff] %v968_v7   ;;  %v976_v9 = vld [vmem:[%s12915_s7 + $0x1848] sm:$0xff]   ;;  %v980_v10 = vld [vmem:[%s12915_s7 + $0x1850] sm:$0xff]  }
  0x7b   : > { %973 = vst [vmem:[%s12920_s8 + $0x640] sm:$0xff] %v972_v8   ;;  %v984_v11 = vld [vmem:[%s12915_s7 + $0x1858] sm:$0xff]   ;;  %977 = vst [vmem:[%s12920_s8 + $0x648] sm:$0xff] %v976_v9   ;;  %v988_v12 = vld [vmem:[%s12915_s7 + $0x1860] sm:$0xff]  }
  0x7c   : > { %981 = vst [vmem:[%s12920_s8 + $0x650] sm:$0xff] %v980_v10   ;;  %985 = vst [vmem:[%s12920_s8 + $0x658] sm:$0xff] %v984_v11   ;;  %v992_v13 = vld [vmem:[%s12915_s7 + $0x1868] sm:$0xff]   ;;  %v996_v14 = vld [vmem:[%s12915_s7 + $0x1870] sm:$0xff]  }
  0x7d   : > { %989 = vst [vmem:[%s12920_s8 + $0x660] sm:$0xff] %v988_v12   ;;  %993 = vst [vmem:[%s12920_s8 + $0x668] sm:$0xff] %v992_v13   ;;  %v1000_v15 = vld [vmem:[%s12915_s7 + $0x1878] sm:$0xff]   ;;  %v1004_v16 = vld [vmem:[%s12915_s7 + $0x1880] sm:$0xff]  }
  0x7e   : > { %997 = vst [vmem:[%s12920_s8 + $0x670] sm:$0xff] %v996_v14   ;;  %v1008_v17 = vld [vmem:[%s12915_s7 + $0x1888] sm:$0xff]   ;;  %1001 = vst [vmem:[%s12920_s8 + $0x678] sm:$0xff] %v1000_v15   ;;  %v1012_v18 = vld [vmem:[%s12915_s7 + $0x1890] sm:$0xff]  }
  0x7f   : > { %1005 = vst [vmem:[%s12920_s8 + $0x680] sm:$0xff] %v1004_v16   ;;  %1009 = vst [vmem:[%s12920_s8 + $0x688] sm:$0xff] %v1008_v17   ;;  %v1016_v19 = vld [vmem:[%s12915_s7 + $0x1898] sm:$0xff]   ;;  %v1020_v20 = vld [vmem:[%s12915_s7 + $0x18a0] sm:$0xff]  }
  0x80   : > { %1013 = vst [vmem:[%s12920_s8 + $0x690] sm:$0xff] %v1012_v18   ;;  %1017 = vst [vmem:[%s12920_s8 + $0x698] sm:$0xff] %v1016_v19   ;;  %v1024_v21 = vld [vmem:[%s12915_s7 + $0x18a8] sm:$0xff]   ;;  %v1028_v22 = vld [vmem:[%s12915_s7 + $0x18b0] sm:$0xff]  }
  0x81   : > { %1021 = vst [vmem:[%s12920_s8 + $0x6a0] sm:$0xff] %v1020_v20   ;;  %v1032_v23 = vld [vmem:[%s12915_s7 + $0x18b8] sm:$0xff]   ;;  %1025 = vst [vmem:[%s12920_s8 + $0x6a8] sm:$0xff] %v1024_v21   ;;  %v1036_v24 = vld [vmem:[%s12915_s7 + $0x18c0] sm:$0xff]  }
  0x82   : > { %1029 = vst [vmem:[%s12920_s8 + $0x6b0] sm:$0xff] %v1028_v22   ;;  %1033 = vst [vmem:[%s12920_s8 + $0x6b8] sm:$0xff] %v1032_v23   ;;  %v1040_v25 = vld [vmem:[%s12915_s7 + $0x18c8] sm:$0xff]   ;;  %v1044_v26 = vld [vmem:[%s12915_s7 + $0x18d0] sm:$0xff]  }
  0x83   : > { %1037 = vst [vmem:[%s12920_s8 + $0x6c0] sm:$0xff] %v1036_v24   ;;  %1041 = vst [vmem:[%s12920_s8 + $0x6c8] sm:$0xff] %v1040_v25   ;;  %v1048_v27 = vld [vmem:[%s12915_s7 + $0x18d8] sm:$0xff]   ;;  %v1052_v28 = vld [vmem:[%s12915_s7 + $0x18e0] sm:$0xff]  }
  0x84   : > { %1045 = vst [vmem:[%s12920_s8 + $0x6d0] sm:$0xff] %v1044_v26   ;;  %v1056_v29 = vld [vmem:[%s12915_s7 + $0x18e8] sm:$0xff]   ;;  %1049 = vst [vmem:[%s12920_s8 + $0x6d8] sm:$0xff] %v1048_v27   ;;  %v1060_v30 = vld [vmem:[%s12915_s7 + $0x18f0] sm:$0xff]  }
  0x85   : > { %1053 = vst [vmem:[%s12920_s8 + $0x6e0] sm:$0xff] %v1052_v28   ;;  %1057 = vst [vmem:[%s12920_s8 + $0x6e8] sm:$0xff] %v1056_v29   ;;  %v1064_v31 = vld [vmem:[%s12915_s7 + $0x18f8] sm:$0xff]   ;;  %v1068_v32 = vld [vmem:[%s12915_s7 + $0x1900] sm:$0xff]  }
  0x86   : > { %1061 = vst [vmem:[%s12920_s8 + $0x6f0] sm:$0xff] %v1060_v30   ;;  %1065 = vst [vmem:[%s12920_s8 + $0x6f8] sm:$0xff] %v1064_v31   ;;  %v1072_v33 = vld [vmem:[%s12915_s7 + $0x1908] sm:$0xff]   ;;  %v1076_v34 = vld [vmem:[%s12915_s7 + $0x1910] sm:$0xff]  }
  0x87   : > { %1069 = vst [vmem:[%s12920_s8 + $0x700] sm:$0xff] %v1068_v32   ;;  %v1080_v35 = vld [vmem:[%s12915_s7 + $0x1918] sm:$0xff]   ;;  %1073 = vst [vmem:[%s12920_s8 + $0x708] sm:$0xff] %v1072_v33   ;;  %v1084_v36 = vld [vmem:[%s12915_s7 + $0x1920] sm:$0xff]  }
  0x88   : > { %1077 = vst [vmem:[%s12920_s8 + $0x710] sm:$0xff] %v1076_v34   ;;  %1081 = vst [vmem:[%s12920_s8 + $0x718] sm:$0xff] %v1080_v35   ;;  %v1088_v37 = vld [vmem:[%s12915_s7 + $0x1928] sm:$0xff]   ;;  %v1092_v38 = vld [vmem:[%s12915_s7 + $0x1930] sm:$0xff]  }
  0x89   : > { %1085 = vst [vmem:[%s12920_s8 + $0x720] sm:$0xff] %v1084_v36   ;;  %1089 = vst [vmem:[%s12920_s8 + $0x728] sm:$0xff] %v1088_v37   ;;  %v1096_v39 = vld [vmem:[%s12915_s7 + $0x1938] sm:$0xff]   ;;  %v1100_v40 = vld [vmem:[%s12915_s7 + $0x1940] sm:$0xff]  }
  0x8a   : > { %1093 = vst [vmem:[%s12920_s8 + $0x730] sm:$0xff] %v1092_v38   ;;  %v1104_v41 = vld [vmem:[%s12915_s7 + $0x1948] sm:$0xff]   ;;  %1097 = vst [vmem:[%s12920_s8 + $0x738] sm:$0xff] %v1096_v39   ;;  %v1108_v42 = vld [vmem:[%s12915_s7 + $0x1950] sm:$0xff]  }
  0x8b   : > { %1101 = vst [vmem:[%s12920_s8 + $0x740] sm:$0xff] %v1100_v40   ;;  %1105 = vst [vmem:[%s12920_s8 + $0x748] sm:$0xff] %v1104_v41   ;;  %v1112_v43 = vld [vmem:[%s12915_s7 + $0x1958] sm:$0xff]   ;;  %v1116_v44 = vld [vmem:[%s12915_s7 + $0x1960] sm:$0xff]  }
  0x8c   : > { %1109 = vst [vmem:[%s12920_s8 + $0x750] sm:$0xff] %v1108_v42   ;;  %1113 = vst [vmem:[%s12920_s8 + $0x758] sm:$0xff] %v1112_v43   ;;  %v1120_v45 = vld [vmem:[%s12915_s7 + $0x1968] sm:$0xff]   ;;  %v1124_v46 = vld [vmem:[%s12915_s7 + $0x1970] sm:$0xff]  }
  0x8d   : > { %1117 = vst [vmem:[%s12920_s8 + $0x760] sm:$0xff] %v1116_v44   ;;  %v1128_v47 = vld [vmem:[%s12915_s7 + $0x1978] sm:$0xff]   ;;  %1121 = vst [vmem:[%s12920_s8 + $0x768] sm:$0xff] %v1120_v45   ;;  %v1132_v48 = vld [vmem:[%s12915_s7 + $0x1980] sm:$0xff]  }
  0x8e   : > { %1125 = vst [vmem:[%s12920_s8 + $0x770] sm:$0xff] %v1124_v46   ;;  %1129 = vst [vmem:[%s12920_s8 + $0x778] sm:$0xff] %v1128_v47   ;;  %v1136_v49 = vld [vmem:[%s12915_s7 + $0x1988] sm:$0xff]   ;;  %v1140_v50 = vld [vmem:[%s12915_s7 + $0x1990] sm:$0xff]  }
  0x8f   : > { %1133 = vst [vmem:[%s12920_s8 + $0x780] sm:$0xff] %v1132_v48   ;;  %1137 = vst [vmem:[%s12920_s8 + $0x788] sm:$0xff] %v1136_v49   ;;  %v1144_v51 = vld [vmem:[%s12915_s7 + $0x1998] sm:$0xff]   ;;  %v1148_v52 = vld [vmem:[%s12915_s7 + $0x19a0] sm:$0xff]  }
  0x90   : > { %1141 = vst [vmem:[%s12920_s8 + $0x790] sm:$0xff] %v1140_v50   ;;  %v1152_v53 = vld [vmem:[%s12915_s7 + $0x19a8] sm:$0xff]   ;;  %1145 = vst [vmem:[%s12920_s8 + $0x798] sm:$0xff] %v1144_v51   ;;  %v1156_v54 = vld [vmem:[%s12915_s7 + $0x19b0] sm:$0xff]  }
  0x91   : > { %1149 = vst [vmem:[%s12920_s8 + $0x7a0] sm:$0xff] %v1148_v52   ;;  %1153 = vst [vmem:[%s12920_s8 + $0x7a8] sm:$0xff] %v1152_v53   ;;  %v1160_v55 = vld [vmem:[%s12915_s7 + $0x19b8] sm:$0xff]   ;;  %v1164_v56 = vld [vmem:[%s12915_s7 + $0x19c0] sm:$0xff]  }
  0x92   : > { %1157 = vst [vmem:[%s12920_s8 + $0x7b0] sm:$0xff] %v1156_v54   ;;  %1161 = vst [vmem:[%s12920_s8 + $0x7b8] sm:$0xff] %v1160_v55   ;;  %v1168_v57 = vld [vmem:[%s12915_s7 + $0x19c8] sm:$0xff]   ;;  %v1172_v58 = vld [vmem:[%s12915_s7 + $0x19d0] sm:$0xff]  }
  0x93   : > { %1165 = vst [vmem:[%s12920_s8 + $0x7c0] sm:$0xff] %v1164_v56   ;;  %v1176_v59 = vld [vmem:[%s12915_s7 + $0x19d8] sm:$0xff]   ;;  %1169 = vst [vmem:[%s12920_s8 + $0x7c8] sm:$0xff] %v1168_v57   ;;  %v1180_v60 = vld [vmem:[%s12915_s7 + $0x19e0] sm:$0xff]  }
  0x94   : > { %1173 = vst [vmem:[%s12920_s8 + $0x7d0] sm:$0xff] %v1172_v58   ;;  %1177 = vst [vmem:[%s12920_s8 + $0x7d8] sm:$0xff] %v1176_v59   ;;  %v1184_v61 = vld [vmem:[%s12915_s7 + $0x19e8] sm:$0xff]   ;;  %v1188_v62 = vld [vmem:[%s12915_s7 + $0x19f0] sm:$0xff]  }
  0x95   : > { %1181 = vst [vmem:[%s12920_s8 + $0x7e0] sm:$0xff] %v1180_v60   ;;  %1185 = vst [vmem:[%s12920_s8 + $0x7e8] sm:$0xff] %v1184_v61   ;;  %v1192_v63 = vld [vmem:[%s12915_s7 + $0x19f8] sm:$0xff]  }
  0x96   : > { %1189 = vst [vmem:[%s12920_s8 + $0x7f0] sm:$0xff] %v1188_v62   ;;  %1193 = vst [vmem:[%s12920_s8 + $0x7f8] sm:$0xff] %v1192_v63  }
  0x97 PF: > { %p10521_p7 = scmp.ge.s32.totalorder %s12832_s18, 1  ;;  %p4320_p8 = scmp.lt.s32.totalorder %s12832_s18, 9 }
  0x99   : > { %p4321_p9 = pnand %p10521_p7, %p4320_p8 }
  0x9b   : > { %4324 = sbr.rel (%p4321_p9) target bundleno = 883 (0x373), region = 80 }
  0xa0   : > { %v12519_v0 = vld [vmem:[%s15523_s1] sm:$0x1f]   ;;  %vm5014_vm0 = vcmask 1043456   ;;  %vm5015_vm1 = vcmask 1044480   ;;  %s4327_s11 = sand.u32 1, %s12808_s12   ;;  %v12834_v1 = vmov 65535  }
  0xa1   : > { %v5016_v2 = vsel %vm5014_vm0, 4294967295, %v12834_v1  ;;  %s10522_s21 = sshll.u32 %s4327_s11, 11  ;;  %vm4821_vm2 = vcmask 72704   ;;  %s10523_s12 = sshll.u32 %s12816_s14, 7  ;;  %vm10283_vm3 = vcmask 519168  }
  0xa2   : > { %v5017_v3 = vsel %vm5015_vm1, %v5016_v2, 0  ;;  %s13437_s22 = scalar_lea.vmem [#allocation2], %s10522_s21  ;;  %p4356_p10 = scmp.lt.s32.totalorder %s12820_s15, 1 }
  0xa3   : > { %v5019_v4 = vand.u32 %v12519_v0, %v5017_v3  ;;  %v12520_v5 = vld [vmem:[%s13437_s22] sm:$0xff]   ;;  %v12522_v7 = vld [vmem:[%s13437_s22 + $0x8] sm:$0xff]   ;;  %v12524_v9 = vld [vmem:[%s13437_s22 + $0x10] sm:$0xff]   ;;  %p4358_p11 = scmp.lt.s32.totalorder %s10523_s12, 511 }
  0xa4   : > { %v12521_v6 = vld [vmem:[%s13437_s22 + $0x200] sm:$0xff]   ;;  %v12523_v8 = vld [vmem:[%s13437_s22 + $0x208] sm:$0xff]   ;;  %11944 = vmatprep.mubr.msk.bf16.mxu0 %vm4821_vm2, %v12520_v5  ;;  %v12525_v10 = vld [vmem:[%s13437_s22 + $0x210] sm:$0xff]   ;;  %s16294_s15 = smov (!%p4356_p10, %s12820_s15), 1 }
  0xa5   : > { %11942 = vmatprep.subr.bf16.mxu0 %v5019_v4  ;;  %12072 = vmatprep.subr.bf16.mxu1 %v5019_v4  ;;  %v12526_v11 = vld [vmem:[%s13437_s22 + $0x18] sm:$0xff]   ;;  %v12528_v13 = vld [vmem:[%s13437_s22 + $0x20] sm:$0xff]   ;;  %v12530_v15 = vld [vmem:[%s13437_s22 + $0x28] sm:$0xff]   ;;  %s16296_s12 = smov (!%p4358_p11, %s10523_s12), 511  ;;  %s10524_s14 = sshll.u32 %s16294_s15, 9 }
  0xa6   : > { %11943 = vmatpush3.bf16.msra.mxu0 %v5019_v4  ;;  %12073 = vmatpush3.bf16.msra.mxu1 %v5019_v4  ;;  %v12527_v12 = vld [vmem:[%s13437_s22 + $0x218] sm:$0xff]   ;;  %v12529_v14 = vld [vmem:[%s13437_s22 + $0x220] sm:$0xff]   ;;  %v12531_v16 = vld [vmem:[%s13437_s22 + $0x228] sm:$0xff]   ;;  %s4361_s23 = sadd.s32 %s10524_s14, %s16296_s12 }
  0xa7   : > { %12074 = vmatprep.mubr.msk.bf16.mxu1 %vm4821_vm2, %v12521_v6  ;;  %12202 = vmatprep.subr.bf16.mxu0 %v5019_v4  ;;  %v12532_v17 = vld [vmem:[%s13437_s22 + $0x30] sm:$0xff]   ;;  %v12534_v19 = vld [vmem:[%s13437_s22 + $0x38] sm:$0xff]   ;;  %v12536_v21 = vld [vmem:[%s13437_s22 + $0x40] sm:$0xff]   ;;  %s10525_s26 = sshll.u32 %s4361_s23, 2 }
  0xa8   : > { %12332 = vmatprep.subr.bf16.mxu1 %v5019_v4  ;;  %v12533_v18 = vld [vmem:[%s13437_s22 + $0x230] sm:$0xff]   ;;  %v12535_v20 = vld [vmem:[%s13437_s22 + $0x238] sm:$0xff]   ;;  %v12537_v22 = vld [vmem:[%s13437_s22 + $0x240] sm:$0xff]   ;;  %s14696_s29 = scalar_lea.vmem %s15525_s3, %s10525_s26 }
  0xa9   : > { %11945 = vmatmul.mubr.msk.bf16.vlgmr.msra.gmra.mxu0 %vm4821_vm2, %v12522_v7  ;;  %12075 = vmatmul.mubr.msk.bf16.vlgmr.msra.gmra.mxu1 %vm4821_vm2, %v12523_v8  ;;  %v12538_v23 = vld [vmem:[%s13437_s22 + $0x48] sm:$0xff]   ;;  %v12540_v25 = vld [vmem:[%s13437_s22 + $0x50] sm:$0xff]   ;;  %v12542_v27 = vld [vmem:[%s13437_s22 + $0x58] sm:$0xff]  }
  0xaa   : > { %12203 = vmatpush3.bf16.msra.mxu0 %v5019_v4  ;;  %12333 = vmatpush3.bf16.msra.mxu1 %v5019_v4  ;;  %v12539_v24 = vld [vmem:[%s13437_s22 + $0x248] sm:$0xff]   ;;  %v12541_v26 = vld [vmem:[%s13437_s22 + $0x250] sm:$0xff]   ;;  %v12543_v28 = vld [vmem:[%s13437_s22 + $0x258] sm:$0xff]  }
  0xab   : > { %11948 = vmatprep.mubr.msk.bf16.mxu0 %vm4821_vm2, %v12524_v9  ;;  %12078 = vmatprep.mubr.msk.bf16.mxu1 %vm4821_vm2, %v12525_v10  ;;  %v12544_v29 = vld [vmem:[%s13437_s22 + $0x60] sm:$0xff]   ;;  %v12546_v31 = vld [vmem:[%s13437_s22 + $0x68] sm:$0xff]   ;;  %v12548_v33 = vld [vmem:[%s13437_s22 + $0x70] sm:$0xff]  }
  0xac   : > { %v12545_v30 = vld [vmem:[%s13437_s22 + $0x260] sm:$0xff]   ;;  %v12547_v32 = vld [vmem:[%s13437_s22 + $0x268] sm:$0xff]   ;;  %v12549_v34 = vld [vmem:[%s13437_s22 + $0x270] sm:$0xff]  }
  0xad   : > { %v12550_v35 = vld [vmem:[%s13437_s22 + $0x78] sm:$0xff]   ;;  %v12552_v37 = vld [vmem:[%s13437_s22 + $0x80] sm:$0xff]   ;;  %v12554_v39 = vld [vmem:[%s13437_s22 + $0x88] sm:$0xff]  }
  0xae   : > { %v12551_v36 = vld [vmem:[%s13437_s22 + $0x278] sm:$0xff]   ;;  %v12553_v38 = vld [vmem:[%s13437_s22 + $0x280] sm:$0xff]   ;;  %v12555_v40 = vld [vmem:[%s13437_s22 + $0x288] sm:$0xff]  }
  0xaf   : > { %v12556_v41 = vld [vmem:[%s13437_s22 + $0x90] sm:$0xff]   ;;  %v12558_v43 = vld [vmem:[%s13437_s22 + $0x98] sm:$0xff]   ;;  %v12560_v45 = vld [vmem:[%s13437_s22 + $0xa0] sm:$0xff]  }
  0xb0   : > { %v12557_v42 = vld [vmem:[%s13437_s22 + $0x290] sm:$0xff]   ;;  %v12559_v44 = vld [vmem:[%s13437_s22 + $0x298] sm:$0xff]   ;;  %v12561_v46 = vld [vmem:[%s13437_s22 + $0x2a0] sm:$0xff]  }
  0xb1   : > { %11949 = vmatmul.mubr.msk.bf16.gmra.mxu0 %vm4821_vm2, %v12526_v11  ;;  %12079 = vmatmul.mubr.msk.bf16.gmra.mxu1 %vm4821_vm2, %v12527_v12  ;;  %v12562_v47 = vld [vmem:[%s13437_s22 + $0xa8] sm:$0xff]   ;;  %v12564_v49 = vld [vmem:[%s13437_s22 + $0xb0] sm:$0xff]   ;;  %v12566_v51 = vld [vmem:[%s13437_s22 + $0xb8] sm:$0xff]  }
  0xb2   : > { %11952 = vmatprep.mubr.msk.bf16.mxu0 %vm4821_vm2, %v12528_v13  ;;  %12082 = vmatprep.mubr.msk.bf16.mxu1 %vm4821_vm2, %v12529_v14  ;;  %v12563_v48 = vld [vmem:[%s13437_s22 + $0x2a8] sm:$0xff]   ;;  %v12565_v50 = vld [vmem:[%s13437_s22 + $0x2b0] sm:$0xff]   ;;  %v12567_v52 = vld [vmem:[%s13437_s22 + $0x2b8] sm:$0xff]  }
  0xb3   : > { %v12568_v53 = vld [vmem:[%s13437_s22 + $0xc0] sm:$0xff]   ;;  %v12570_v55 = vld [vmem:[%s13437_s22 + $0xc8] sm:$0xff]   ;;  %v12572_v57 = vld [vmem:[%s13437_s22 + $0xd0] sm:$0xff]  }
  0xb4   : > { %v12569_v54 = vld [vmem:[%s13437_s22 + $0x2c0] sm:$0xff]   ;;  %v12571_v56 = vld [vmem:[%s13437_s22 + $0x2c8] sm:$0xff]   ;;  %v12573_v58 = vld [vmem:[%s13437_s22 + $0x2d0] sm:$0xff]  }
  0xb5   : > { %v12574_v59 = vld [vmem:[%s13437_s22 + $0xd8] sm:$0xff]   ;;  %v12576_v61 = vld [vmem:[%s13437_s22 + $0xe0] sm:$0xff]   ;;  %v12578_v63 = vld [vmem:[%s13437_s22 + $0xe8] sm:$0xff]  }
  0xb6   : > { %v12575_v60 = vld [vmem:[%s13437_s22 + $0x2d8] sm:$0xff]   ;;  %v12577_v62 = vld [vmem:[%s13437_s22 + $0x2e0] sm:$0xff]   ;;  %v12579_v0 = vld [vmem:[%s13437_s22 + $0x2e8] sm:$0xff]  }
  0xb7   : > { %v12580_v1 = vld [vmem:[%s13437_s22 + $0xf0] sm:$0xff]   ;;  %v12582_v3 = vld [vmem:[%s13437_s22 + $0xf8] sm:$0xff]   ;;  %v12584_v5 = vld [vmem:[%s13437_s22 + $0x100] sm:$0xff]  }
  0xb8   : > { %v12581_v2 = vld [vmem:[%s13437_s22 + $0x2f0] sm:$0xff]   ;;  %v12583_v4 = vld [vmem:[%s13437_s22 + $0x2f8] sm:$0xff]   ;;  %v12585_v6 = vld [vmem:[%s13437_s22 + $0x300] sm:$0xff]  }
  0xb9   : > { %11953 = vmatmul.mubr.msk.bf16.gmra.mxu0 %vm4821_vm2, %v12530_v15  ;;  %12083 = vmatmul.mubr.msk.bf16.gmra.mxu1 %vm4821_vm2, %v12531_v16  ;;  %v12586_v7 = vld [vmem:[%s13437_s22 + $0x108] sm:$0xff]   ;;  %v12588_v9 = vld [vmem:[%s13437_s22 + $0x110] sm:$0xff]   ;;  %v12590_v11 = vld [vmem:[%s13437_s22 + $0x118] sm:$0xff]  }
  0xba   : > { %11956 = vmatprep.mubr.msk.bf16.mxu0 %vm4821_vm2, %v12532_v17  ;;  %12086 = vmatprep.mubr.msk.bf16.mxu1 %vm4821_vm2, %v12533_v18  ;;  %v12587_v8 = vld [vmem:[%s13437_s22 + $0x308] sm:$0xff]   ;;  %v12589_v10 = vld [vmem:[%s13437_s22 + $0x310] sm:$0xff]   ;;  %v12591_v12 = vld [vmem:[%s13437_s22 + $0x318] sm:$0xff]  }
  0xbb   : > { %v12592_v13 = vld [vmem:[%s13437_s22 + $0x120] sm:$0xff]   ;;  %v12594_v15 = vld [vmem:[%s13437_s22 + $0x128] sm:$0xff]   ;;  %v12596_v17 = vld [vmem:[%s13437_s22 + $0x130] sm:$0xff]  }
  0xbc   : > { %v12593_v14 = vld [vmem:[%s13437_s22 + $0x320] sm:$0xff]   ;;  %v12595_v16 = vld [vmem:[%s13437_s22 + $0x328] sm:$0xff]   ;;  %v12597_v18 = vld [vmem:[%s13437_s22 + $0x330] sm:$0xff]  }
  0xc1   : > { %11957 = vmatmul.mubr.msk.bf16.gmra.mxu0 %vm4821_vm2, %v12534_v19  ;;  %12087 = vmatmul.mubr.msk.bf16.gmra.mxu1 %vm4821_vm2, %v12535_v20  ;;  %v12598_v19 = vld [vmem:[%s13437_s22 + $0x138] sm:$0xff]  }
  0xc2   : > { %11960 = vmatprep.mubr.msk.bf16.mxu0 %vm4821_vm2, %v12536_v21  ;;  %12090 = vmatprep.mubr.msk.bf16.mxu1 %vm4821_vm2, %v12537_v22  ;;  %v12599_v20 = vld [vmem:[%s13437_s22 + $0x338] sm:$0xff]   ;;  %v12600_v21 = vld [vmem:[%s13437_s22 + $0x140] sm:$0xff]  }
  0xc3   : > { %v12601_v22 = vld [vmem:[%s13437_s22 + $0x340] sm:$0xff]  }
  0xc9   : > { %11961 = vmatmul.mubr.msk.bf16.gmra.mxu0 %vm4821_vm2, %v12538_v23  ;;  %12091 = vmatmul.mubr.msk.bf16.gmra.mxu1 %vm4821_vm2, %v12539_v24  ;;  %v12602_v23 = vld [vmem:[%s13437_s22 + $0x148] sm:$0xff]  }
  0xca   : > { %11964 = vmatprep.mubr.msk.bf16.mxu0 %vm4821_vm2, %v12540_v25  ;;  %12094 = vmatprep.mubr.msk.bf16.mxu1 %vm4821_vm2, %v12541_v26  ;;  %v12603_v24 = vld [vmem:[%s13437_s22 + $0x348] sm:$0xff]   ;;  %v12604_v25 = vld [vmem:[%s13437_s22 + $0x150] sm:$0xff]  }
  0xcb   : > { %v12605_v26 = vld [vmem:[%s13437_s22 + $0x350] sm:$0xff]  }
  0xd1   : > { %11965 = vmatmul.mubr.msk.bf16.gmra.mxu0 %vm4821_vm2, %v12542_v27  ;;  %12095 = vmatmul.mubr.msk.bf16.gmra.mxu1 %vm4821_vm2, %v12543_v28  ;;  %v12606_v27 = vld [vmem:[%s13437_s22 + $0x158] sm:$0xff]  }
  0xd2   : > { %11968 = vmatprep.mubr.msk.bf16.mxu0 %vm4821_vm2, %v12544_v29  ;;  %12098 = vmatprep.mubr.msk.bf16.mxu1 %vm4821_vm2, %v12545_v30  ;;  %v12607_v28 = vld [vmem:[%s13437_s22 + $0x358] sm:$0xff]   ;;  %v12608_v29 = vld [vmem:[%s13437_s22 + $0x160] sm:$0xff]  }
  0xd3   : > { %v12609_v30 = vld [vmem:[%s13437_s22 + $0x360] sm:$0xff]  }
  0xd9   : > { %11969 = vmatmul.mubr.msk.bf16.gmra.mxu0 %vm4821_vm2, %v12546_v31  ;;  %12099 = vmatmul.mubr.msk.bf16.gmra.mxu1 %vm4821_vm2, %v12547_v32  ;;  %v12610_v31 = vld [vmem:[%s13437_s22 + $0x168] sm:$0xff]  }
  0xda   : > { %11972 = vmatprep.mubr.msk.bf16.mxu0 %vm4821_vm2, %v12548_v33  ;;  %12102 = vmatprep.mubr.msk.bf16.mxu1 %vm4821_vm2, %v12549_v34  ;;  %v12611_v32 = vld [vmem:[%s13437_s22 + $0x368] sm:$0xff]   ;;  %v12612_v33 = vld [vmem:[%s13437_s22 + $0x170] sm:$0xff]  }
  0xdb   : > { %v12613_v34 = vld [vmem:[%s13437_s22 + $0x370] sm:$0xff]  }
  0xe1   : > { %11973 = vmatmul.mubr.msk.bf16.gmra.mxu0 %vm4821_vm2, %v12550_v35  ;;  %12103 = vmatmul.mubr.msk.bf16.gmra.mxu1 %vm4821_vm2, %v12551_v36  ;;  %v12614_v35 = vld [vmem:[%s13437_s22 + $0x178] sm:$0xff]  }
  0xe2   : > { %11976 = vmatprep.mubr.msk.bf16.mxu0 %vm4821_vm2, %v12552_v37  ;;  %12106 = vmatprep.mubr.msk.bf16.mxu1 %vm4821_vm2, %v12553_v38  ;;  %v12615_v36 = vld [vmem:[%s13437_s22 + $0x378] sm:$0xff]   ;;  %v12616_v37 = vld [vmem:[%s13437_s22 + $0x180] sm:$0xff]  }
  0xe3   : > { %v12617_v38 = vld [vmem:[%s13437_s22 + $0x380] sm:$0xff]  }
  0xe9   : > { %11977 = vmatmul.mubr.msk.bf16.gmra.mxu0 %vm4821_vm2, %v12554_v39  ;;  %12107 = vmatmul.mubr.msk.bf16.gmra.mxu1 %vm4821_vm2, %v12555_v40  ;;  %v12618_v39 = vld [vmem:[%s13437_s22 + $0x188] sm:$0xff]  }
  0xea   : > { %11980 = vmatprep.mubr.msk.bf16.mxu0 %vm4821_vm2, %v12556_v41  ;;  %12110 = vmatprep.mubr.msk.bf16.mxu1 %vm4821_vm2, %v12557_v42  ;;  %v12619_v40 = vld [vmem:[%s13437_s22 + $0x388] sm:$0xff]   ;;  %v12620_v41 = vld [vmem:[%s13437_s22 + $0x190] sm:$0xff]  }
  0xeb   : > { %v12621_v42 = vld [vmem:[%s13437_s22 + $0x390] sm:$0xff]  }
  0xf1   : > { %11981 = vmatmul.mubr.msk.bf16.gmra.mxu0 %vm4821_vm2, %v12558_v43  ;;  %12111 = vmatmul.mubr.msk.bf16.gmra.mxu1 %vm4821_vm2, %v12559_v44 }
  0xf2   : > { %11984 = vmatprep.mubr.msk.bf16.mxu0 %vm4821_vm2, %v12560_v45  ;;  %12114 = vmatprep.mubr.msk.bf16.mxu1 %vm4821_vm2, %v12561_v46 }
  0xf9   : > { %11985 = vmatmul.mubr.msk.bf16.gmra.mxu0 %vm4821_vm2, %v12562_v47  ;;  %12115 = vmatmul.mubr.msk.bf16.gmra.mxu1 %vm4821_vm2, %v12563_v48  ;;  %v12622_v48 = vld [vmem:[%s13437_s22 + $0x198] sm:$0xff]  }
  0xfa   : > { %11988 = vmatprep.mubr.msk.bf16.mxu0 %vm4821_vm2, %v12564_v49  ;;  %12118 = vmatprep.mubr.msk.bf16.mxu1 %vm4821_vm2, %v12565_v50  ;;  %v12623_v49 = vld [vmem:[%s13437_s22 + $0x398] sm:$0xff]  }
 0x101   : > { %11989 = vmatmul.mubr.msk.bf16.gmra.mxu0 %vm4821_vm2, %v12566_v51  ;;  %12119 = vmatmul.mubr.msk.bf16.gmra.mxu1 %vm4821_vm2, %v12567_v52 }
 0x102   : > { %11992 = vmatprep.mubr.msk.bf16.mxu0 %vm4821_vm2, %v12568_v53  ;;  %12122 = vmatprep.mubr.msk.bf16.mxu1 %vm4821_vm2, %v12569_v54  ;;  %v12624_v54 = vld [vmem:[%s13437_s22 + $0x1a0] sm:$0xff]  }
 0x109   : > { %11993 = vmatmul.mubr.msk.bf16.gmra.mxu0 %vm4821_vm2, %v12570_v55  ;;  %12123 = vmatmul.mubr.msk.bf16.gmra.mxu1 %vm4821_vm2, %v12571_v56  ;;  %v12625_v55 = vld [vmem:[%s13437_s22 + $0x3a0] sm:$0xff]  }
 0x10a   : > { %11996 = vmatprep.mubr.msk.bf16.mxu0 %vm4821_vm2, %v12572_v57  ;;  %12126 = vmatprep.mubr.msk.bf16.mxu1 %vm4821_vm2, %v12573_v58  ;;  %v12648_v58 = vld [vmem:[%s13437_s22 + $0x400] sm:$0xff]  }
 0x111   : > { %11997 = vmatmul.mubr.msk.bf16.gmra.mxu0 %vm4821_vm2, %v12574_v59  ;;  %12127 = vmatmul.mubr.msk.bf16.gmra.mxu1 %vm4821_vm2, %v12575_v60 }
 0x112   : > { %12000 = vmatprep.mubr.msk.bf16.mxu0 %vm4821_vm2, %v12576_v61  ;;  %12130 = vmatprep.mubr.msk.bf16.mxu1 %vm4821_vm2, %v12577_v62  ;;  %v12646_v61 = vld [vmem:[%s13437_s22 + $0x1f8] sm:$0xff]  }
 0x119   : > { %12001 = vmatmul.mubr.msk.bf16.gmra.mxu0 %vm4821_vm2, %v12578_v63  ;;  %12131 = vmatmul.mubr.msk.bf16.gmra.mxu1 %vm4821_vm2, %v12579_v0  ;;  %v12626_v0 = vld [vmem:[%s13437_s22 + $0x1a8] sm:$0xff]  }
 0x11a   : > { %12004 = vmatprep.mubr.msk.bf16.mxu0 %vm4821_vm2, %v12580_v1  ;;  %12134 = vmatprep.mubr.msk.bf16.mxu1 %vm4821_vm2, %v12581_v2  ;;  %v12627_v1 = vld [vmem:[%s13437_s22 + $0x3a8] sm:$0xff]  }
 0x121   : > { %12005 = vmatmul.mubr.msk.bf16.gmra.mxu0 %vm4821_vm2, %v12582_v3  ;;  %12135 = vmatmul.mubr.msk.bf16.gmra.mxu1 %vm4821_vm2, %v12583_v4 }
 0x122   : > { %12008 = vmatprep.mubr.msk.bf16.mxu0 %vm4821_vm2, %v12584_v5  ;;  %12138 = vmatprep.mubr.msk.bf16.mxu1 %vm4821_vm2, %v12585_v6  ;;  %v12628_v6 = vld [vmem:[%s13437_s22 + $0x1b0] sm:$0xff]  }
 0x129   : > { %12009 = vmatmul.mubr.msk.bf16.gmra.mxu0 %vm4821_vm2, %v12586_v7  ;;  %12139 = vmatmul.mubr.msk.bf16.gmra.mxu1 %vm4821_vm2, %v12587_v8  ;;  %v12629_v7 = vld [vmem:[%s13437_s22 + $0x3b0] sm:$0xff]  }
 0x12a   : > { %12012 = vmatprep.mubr.msk.bf16.mxu0 %vm4821_vm2, %v12588_v9  ;;  %12142 = vmatprep.mubr.msk.bf16.mxu1 %vm4821_vm2, %v12589_v10 }
 0x131   : > { %12013 = vmatmul.mubr.msk.bf16.gmra.mxu0 %vm4821_vm2, %v12590_v11  ;;  %12143 = vmatmul.mubr.msk.bf16.gmra.mxu1 %vm4821_vm2, %v12591_v12 }
 0x132   : > { %12016 = vmatprep.mubr.msk.bf16.mxu0 %vm4821_vm2, %v12592_v13  ;;  %12146 = vmatprep.mubr.msk.bf16.mxu1 %vm4821_vm2, %v12593_v14 }
 0x139   : > { %12017 = vmatmul.mubr.msk.bf16.gmra.mxu0 %vm4821_vm2, %v12594_v15  ;;  %12147 = vmatmul.mubr.msk.bf16.gmra.mxu1 %vm4821_vm2, %v12595_v16  ;;  %v12630_v16 = vld [vmem:[%s13437_s22 + $0x1b8] sm:$0xff]  }
 0x13a   : > { %12020 = vmatprep.mubr.msk.bf16.mxu0 %vm4821_vm2, %v12596_v17  ;;  %12150 = vmatprep.mubr.msk.bf16.mxu1 %vm4821_vm2, %v12597_v18  ;;  %v12631_v17 = vld [vmem:[%s13437_s22 + $0x3b8] sm:$0xff]  }
 0x141   : > { %12021 = vmatmul.mubr.msk.bf16.gmra.mxu0 %vm4821_vm2, %v12598_v19  ;;  %12151 = vmatmul.mubr.msk.bf16.gmra.mxu1 %vm4821_vm2, %v12599_v20 }
 0x142   : > { %12024 = vmatprep.mubr.msk.bf16.mxu0 %vm4821_vm2, %v12600_v21  ;;  %12154 = vmatprep.mubr.msk.bf16.mxu1 %vm4821_vm2, %v12601_v22  ;;  %v12632_v22 = vld [vmem:[%s13437_s22 + $0x1c0] sm:$0xff]  }
 0x149   : > { %12025 = vmatmul.mubr.msk.bf16.gmra.mxu0 %vm4821_vm2, %v12602_v23  ;;  %12155 = vmatmul.mubr.msk.bf16.gmra.mxu1 %vm4821_vm2, %v12603_v24  ;;  %v12633_v23 = vld [vmem:[%s13437_s22 + $0x3c0] sm:$0xff]  }
 0x14a   : > { %12028 = vmatprep.mubr.msk.bf16.mxu0 %vm4821_vm2, %v12604_v25  ;;  %12158 = vmatprep.mubr.msk.bf16.mxu1 %vm4821_vm2, %v12605_v26  ;;  %v12644_v26 = vld [vmem:[%s13437_s22 + $0x1f0] sm:$0xff]  }
 0x151   : > { %12029 = vmatmul.mubr.msk.bf16.gmra.mxu0 %vm4821_vm2, %v12606_v27  ;;  %12159 = vmatmul.mubr.msk.bf16.gmra.mxu1 %vm4821_vm2, %v12607_v28 }
 0x152   : > { %12032 = vmatprep.mubr.msk.bf16.mxu0 %vm4821_vm2, %v12608_v29  ;;  %12162 = vmatprep.mubr.msk.bf16.mxu1 %vm4821_vm2, %v12609_v30  ;;  %v12642_v29 = vld [vmem:[%s13437_s22 + $0x1e8] sm:$0xff]  }
 0x159   : > { %12033 = vmatmul.mubr.msk.bf16.gmra.mxu0 %vm4821_vm2, %v12610_v31  ;;  %12163 = vmatmul.mubr.msk.bf16.gmra.mxu1 %vm4821_vm2, %v12611_v32  ;;  %v12634_v32 = vld [vmem:[%s13437_s22 + $0x1c8] sm:$0xff]  }
 0x15a   : > { %12036 = vmatprep.mubr.msk.bf16.mxu0 %vm4821_vm2, %v12612_v33  ;;  %12166 = vmatprep.mubr.msk.bf16.mxu1 %vm4821_vm2, %v12613_v34  ;;  %v12635_v33 = vld [vmem:[%s13437_s22 + $0x3c8] sm:$0xff]  }
 0x161   : > { %12037 = vmatmul.mubr.msk.bf16.gmra.mxu0 %vm4821_vm2, %v12614_v35  ;;  %12167 = vmatmul.mubr.msk.bf16.gmra.mxu1 %vm4821_vm2, %v12615_v36 }
 0x162   : > { %12040 = vmatprep.mubr.msk.bf16.mxu0 %vm4821_vm2, %v12616_v37  ;;  %12170 = vmatprep.mubr.msk.bf16.mxu1 %vm4821_vm2, %v12617_v38  ;;  %v12636_v38 = vld [vmem:[%s13437_s22 + $0x1d0] sm:$0xff]  }
 0x169   : > { %v13639_v43 = vpop.f32.mrf.mxu0  ;;  %12041 = vmatmul.mubr.msk.bf16.gmra.mxu0 %vm4821_vm2, %v12618_v39  ;;  %v13642_v44 = vpop.f32.mrf.mxu1  ;;  %12171 = vmatmul.mubr.msk.bf16.gmra.mxu1 %vm4821_vm2, %v12619_v40  ;;  %v12637_v39 = vld [vmem:[%s13437_s22 + $0x3d0] sm:$0xff]  }
 0x16a   : > { %12044 = vmatprep.mubr.msk.bf16.mxu0 %vm4821_vm2, %v12620_v41  ;;  %12174 = vmatprep.mubr.msk.bf16.mxu1 %vm4821_vm2, %v12621_v42 }
 0x16b   : > { %v13649_v46 = vpop.f32.mrf.mxu0  ;;  %v13651_v47 = vpop.f32.mrf.mxu1 }
 0x16d   : > { %v13657_v51 = vpop.f32.mrf.mxu0  ;;  %v13659_v52 = vpop.f32.mrf.mxu1 }
 0x16f   : > { %v13665_v56 = vpop.f32.mrf.mxu0  ;;  %v13667_v57 = vpop.f32.mrf.mxu1 }
 0x171   : > { %v13671_v59 = vpop.f32.mrf.mxu0  ;;  %12045 = vmatmul.mubr.msk.bf16.gmra.mxu0 %vm4821_vm2, %v12622_v48  ;;  %v13674_v60 = vpop.f32.mrf.mxu1  ;;  %12175 = vmatmul.mubr.msk.bf16.gmra.mxu1 %vm4821_vm2, %v12623_v49 }
 0x172   : > { %12048 = vmatprep.mubr.msk.bf16.mxu0 %vm4821_vm2, %v12624_v54  ;;  %12178 = vmatprep.mubr.msk.bf16.mxu1 %vm4821_vm2, %v12625_v55 }
 0x173   : > { %v13681_v62 = vpop.f32.mrf.mxu0  ;;  %v13683_v63 = vpop.f32.mrf.mxu1 }
 0x175   : > { %v13689_v3 = vpop.f32.mrf.mxu0  ;;  %v13691_v4 = vpop.f32.mrf.mxu1 }
 0x177   : > { %v13697_v8 = vpop.f32.mrf.mxu0  ;;  %v13699_v9 = vpop.f32.mrf.mxu1 }
 0x179   : > { %v13703_v11 = vpop.f32.mrf.mxu0  ;;  %12049 = vmatmul.mubr.msk.bf16.gmra.mxu0 %vm4821_vm2, %v12626_v0  ;;  %v13706_v12 = vpop.f32.mrf.mxu1  ;;  %12179 = vmatmul.mubr.msk.bf16.gmra.mxu1 %vm4821_vm2, %v12627_v1 }
 0x17a   : > { %12052 = vmatprep.mubr.msk.bf16.mxu0 %vm4821_vm2, %v12628_v6  ;;  %12182 = vmatprep.mubr.msk.bf16.mxu1 %vm4821_vm2, %v12629_v7 }
 0x17b   : > { %v13713_v14 = vpop.f32.mrf.mxu0  ;;  %v13715_v15 = vpop.f32.mrf.mxu1 }
 0x17d   : > { %v13721_v19 = vpop.f32.mrf.mxu0  ;;  %v13723_v20 = vpop.f32.mrf.mxu1 }
 0x17f   : > { %v13729_v24 = vpop.f32.mrf.mxu0  ;;  %v13731_v25 = vpop.f32.mrf.mxu1 }
 0x181   : > { %v13735_v27 = vpop.f32.mrf.mxu0  ;;  %12053 = vmatmul.mubr.msk.bf16.gmra.mxu0 %vm4821_vm2, %v12630_v16  ;;  %v13738_v28 = vpop.f32.mrf.mxu1  ;;  %12183 = vmatmul.mubr.msk.bf16.gmra.mxu1 %vm4821_vm2, %v12631_v17  ;;  %v12638_v16 = vld [vmem:[%s13437_s22 + $0x1d8] sm:$0xff]  }
 0x182   : > { %12056 = vmatprep.mubr.msk.bf16.mxu0 %vm4821_vm2, %v12632_v22  ;;  %12186 = vmatprep.mubr.msk.bf16.mxu1 %vm4821_vm2, %v12633_v23  ;;  %v12639_v17 = vld [vmem:[%s13437_s22 + $0x3d8] sm:$0xff]   ;;  %v12640_v23 = vld [vmem:[%s13437_s22 + $0x1e0] sm:$0xff]   ;;  %v12748_v22 = vld [vmem:[%s13437_s22 + $0x590] sm:$0xff]  }
 0x183   : > { %v13745_v30 = vpop.f32.mrf.mxu0  ;;  %v13747_v31 = vpop.f32.mrf.mxu1 }
 0x185   : > { %v13753_v35 = vpop.f32.mrf.mxu0  ;;  %v13755_v36 = vpop.f32.mrf.mxu1 }
 0x187   : > { %v13761_v40 = vpop.f32.mrf.mxu0  ;;  %v13763_v41 = vpop.f32.mrf.mxu1 }
 0x189   : > { %v13767_v48 = vpop.f32.mrf.mxu0  ;;  %12057 = vmatmul.mubr.msk.bf16.gmra.mxu0 %vm4821_vm2, %v12634_v32  ;;  %v13770_v49 = vpop.f32.mrf.mxu1  ;;  %12187 = vmatmul.mubr.msk.bf16.gmra.mxu1 %vm4821_vm2, %v12635_v33  ;;  %v12641_v32 = vld [vmem:[%s13437_s22 + $0x3e0] sm:$0xff]  }
 0x18a   : > { %12060 = vmatprep.mubr.msk.bf16.mxu0 %vm4821_vm2, %v12636_v38  ;;  %12190 = vmatprep.mubr.msk.bf16.mxu1 %vm4821_vm2, %v12637_v39 }
 0x18b   : > { %v13777_v55 = vpop.f32.mrf.mxu0  ;;  %v13779_v0 = vpop.f32.mrf.mxu1 }
 0x18d   : > { %v13783_v6 = vpop.f32.mrf.mxu0  ;;  %v13785_v7 = vpop.f32.mrf.mxu1 }
 0x18f   : > { %v13793_v33 = vpop.f32.mrf.mxu0  ;;  %v13795_v38 = vpop.f32.mrf.mxu1 }
 0x191   : > { %v13799_v1 = vpop.f32.mrf.mxu0  ;;  %12061 = vmatmul.mubr.msk.bf16.gmra.mxu0 %vm4821_vm2, %v12638_v16  ;;  %v13802_v54 = vpop.f32.mrf.mxu1  ;;  %12191 = vmatmul.mubr.msk.bf16.gmra.mxu1 %vm4821_vm2, %v12639_v17  ;;  %v12643_v17 = vld [vmem:[%s13437_s22 + $0x3e8] sm:$0xff]  }
 0x192   : > { %12064 = vmatprep.mubr.msk.bf16.mxu0 %vm4821_vm2, %v12640_v23  ;;  %12194 = vmatprep.mubr.msk.bf16.mxu1 %vm4821_vm2, %v12641_v32  ;;  %v12645_v23 = vld [vmem:[%s13437_s22 + $0x3f0] sm:$0xff]  }
 0x193   : > { %v13809_v42 = vpop.f32.mrf.mxu0  ;;  %v13811_v39 = vpop.f32.mrf.mxu1 }
 0x195   : > { %v13815_v34 = vpop.f32.mrf.mxu0  ;;  %v13817_v16 = vpop.f32.mrf.mxu1 }
 0x197   : > { %v13825_v32 = vpop.f32.mrf.mxu0  ;;  %v13827_v21 = vpop.f32.mrf.mxu1 }
 0x198   : > { %15735 = vst [vmem:[#allocation3_spill] sm:$0xff] %v13827_v21 }
 0x199   : > { %v13831_v18 = vpop.f32.mrf.mxu0  ;;  %12065 = vmatmul.mubr.msk.bf16.gmra.mxu0 %vm4821_vm2, %v12642_v29  ;;  %v13834_v13 = vpop.f32.mrf.mxu1  ;;  %12195 = vmatmul.mubr.msk.bf16.gmra.mxu1 %vm4821_vm2, %v12643_v17  ;;  %v12647_v17 = vld [vmem:[%s13437_s22 + $0x3f8] sm:$0xff]  }
 0x19a   : > { %15736 = vst [vmem:[#allocation4_spill] sm:$0xff] %v13831_v18  ;;  %15737 = vst [vmem:[#allocation5_spill] sm:$0xff] %v13834_v13  ;;  %12068 = vmatprep.mubr.msk.bf16.mxu0 %vm4821_vm2, %v12644_v26  ;;  %12198 = vmatprep.mubr.msk.bf16.mxu1 %vm4821_vm2, %v12645_v23  ;;  %v12649_v26 = vld [vmem:[%s13437_s22 + $0x600] sm:$0xff]  }
 0x19b   : > { %v13841_v10 = vpop.f32.mrf.mxu0  ;;  %v13843_v37 = vpop.f32.mrf.mxu1  ;;  %v12752_v13 = vld [vmem:[%s13437_s22 + $0x5a0] sm:$0xff]  }
 0x19c   : > { %15738 = vst [vmem:[#allocation6_spill] sm:$0xff] %v13841_v10  ;;  %15739 = vst [vmem:[#allocation7_spill] sm:$0xff] %v13843_v37  ;;  %v12753_v18 = vld [vmem:[%s13437_s22 + $0x7a0] sm:$0xff]  }
 0x19d   : > { %v13847_v2 = vpop.f32.mrf.mxu0  ;;  %v13849_v29 = vpop.f32.mrf.mxu1 }
 0x19e   : > { %15740 = vst [vmem:[#allocation8_spill] sm:$0xff] %v13847_v2  ;;  %15741 = vst [vmem:[#allocation9_spill] sm:$0xff] %v13849_v29  ;;  %v12650_v2 = vld [vmem:[%s13437_s22 + $0x408] sm:$0xff]  }
 0x19f   : > { %v13857_v23 = vpop.f32.mrf.mxu0  ;;  %v13859_v53 = vpop.f32.mrf.mxu1 }
 0x1a0   : > { %15742 = vst [vmem:[#allocation10_spill] sm:$0xff] %v13857_v23  ;;  %15743 = vst [vmem:[#allocation11_spill] sm:$0xff] %v13859_v53 }
 0x1a1   : > { %v13863_v50 = vpop.f32.mrf.mxu0  ;;  %12069 = vmatmul.mubr.msk.bf16.gmra.mxu0 %vm4821_vm2, %v12646_v61  ;;  %v13866_v45 = vpop.f32.mrf.mxu1  ;;  %12199 = vmatmul.mubr.msk.bf16.gmra.mxu1 %vm4821_vm2, %v12647_v17  ;;  %v12651_v17 = vld [vmem:[%s13437_s22 + $0x608] sm:$0xff]  }
 0x1a2   : > { %15744 = vst [vmem:[#allocation12_spill] sm:$0xff] %v13863_v50  ;;  %15745 = vst [vmem:[#allocation13_spill] sm:$0xff] %v13866_v45  ;;  %12204 = vmatprep.mubr.msk.bf16.mxu0 %vm4821_vm2, %v12648_v58  ;;  %12334 = vmatprep.mubr.msk.bf16.mxu1 %vm4821_vm2, %v12649_v26  ;;  %v12652_v45 = vld [vmem:[%s13437_s22 + $0x410] sm:$0xff]  }
 0x1a3   : > { %v13873_v29 = vpop.f32.mrf.mxu0  ;;  %v13875_v5 = vpop.f32.mrf.mxu1  ;;  %v12653_v58 = vld [vmem:[%s13437_s22 + $0x610] sm:$0xff]  }
 0x1a4   : > { %15746 = vst [vmem:[#allocation14_spill] sm:$0xff] %v13873_v29  ;;  %15747 = vst [vmem:[#allocation15_spill] sm:$0xff] %v13875_v5 }
 0x1a5   : > { %v13879_v23 = vpop.f32.mrf.mxu0  ;;  %v13881_v61 = vpop.f32.mrf.mxu1 }
 0x1a6   : > { %15748 = vst [vmem:[#allocation16_spill] sm:$0xff] %v13879_v23  ;;  %15749 = vst [vmem:[#allocation17_spill] sm:$0xff] %v13881_v61 }
 0x1a7   : > { %v13889_v26 = vpop.f32.mrf.mxu0  ;;  %v13891_v50 = vpop.f32.mrf.mxu1 }
 0x1a8   : > { %15750 = vst [vmem:[#allocation18_spill] sm:$0xff] %v13889_v26  ;;  %15751 = vst [vmem:[#allocation19_spill] sm:$0xff] %v13891_v50 }
 0x1a9   : > { %v13895_v5 = vpop.f32.mrf.mxu0  ;;  %v13897_v29 = vpop.f32.mrf.mxu1  ;;  %12205 = vmatmul.mubr.msk.bf16.vlgmr.msra.gmra.mxu0 %vm4821_vm2, %v12650_v2  ;;  %12335 = vmatmul.mubr.msk.bf16.vlgmr.msra.gmra.mxu1 %vm4821_vm2, %v12651_v17  ;;  %v12654_v2 = vld [vmem:[%s13437_s22 + $0x418] sm:$0xff]  }
 0x1aa   : > { %15752 = vst [vmem:[#allocation20_spill] sm:$0xff] %v13895_v5  ;;  %15753 = vst [vmem:[#allocation21_spill] sm:$0xff] %v13897_v29  ;;  %12208 = vmatprep.mubr.msk.bf16.mxu0 %vm4821_vm2, %v12652_v45  ;;  %12338 = vmatprep.mubr.msk.bf16.mxu1 %vm4821_vm2, %v12653_v58  ;;  %v12655_v17 = vld [vmem:[%s13437_s22 + $0x618] sm:$0xff]   ;;  %v12656_v29 = vld [vmem:[%s13437_s22 + $0x420] sm:$0xff]  }
 0x1ab   : > { %v13905_v61 = vpop.f32.mrf.mxu0  ;;  %v13907_v53 = vpop.f32.mrf.mxu1  ;;  %v12657_v45 = vld [vmem:[%s13437_s22 + $0x620] sm:$0xff]  }
 0x1ac   : > { %15754 = vst [vmem:[#allocation22_spill] sm:$0xff] %v13905_v61  ;;  %15755 = vst [vmem:[#allocation23_spill] sm:$0xff] %v13907_v53 }
 0x1ad   : > { %v13911_v26 = vpop.f32.mrf.mxu0  ;;  %v13913_v23 = vpop.f32.mrf.mxu1 }
 0x1ae   : > { %15756 = vst [vmem:[#allocation24_spill] sm:$0xff] %v13911_v26  ;;  %15757 = vst [vmem:[#allocation25_spill] sm:$0xff] %v13913_v23 }
 0x1af   : > { %v13921_v58 = vpop.f32.mrf.mxu0  ;;  %v13923_v5 = vpop.f32.mrf.mxu1 }
 0x1b0   : > { %15758 = vst [vmem:[#allocation26_spill] sm:$0xff] %v13921_v58  ;;  %15759 = vst [vmem:[#allocation27_spill] sm:$0xff] %v13923_v5 }
 0x1b1   : > { %v13927_v53 = vpop.f32.mrf.mxu0  ;;  %v13929_v61 = vpop.f32.mrf.mxu1  ;;  %12209 = vmatmul.mubr.msk.bf16.gmra.mxu0 %vm4821_vm2, %v12654_v2  ;;  %12339 = vmatmul.mubr.msk.bf16.gmra.mxu1 %vm4821_vm2, %v12655_v17  ;;  %v12658_v2 = vld [vmem:[%s13437_s22 + $0x428] sm:$0xff]  }
 0x1b2   : > { %15760 = vst [vmem:[#allocation28_spill] sm:$0xff] %v13927_v53  ;;  %15761 = vst [vmem:[#allocation29_spill] sm:$0xff] %v13929_v61  ;;  %12212 = vmatprep.mubr.msk.bf16.mxu0 %vm4821_vm2, %v12656_v29  ;;  %12342 = vmatprep.mubr.msk.bf16.mxu1 %vm4821_vm2, %v12657_v45  ;;  %v12659_v17 = vld [vmem:[%s13437_s22 + $0x628] sm:$0xff]   ;;  %v12660_v61 = vld [vmem:[%s13437_s22 + $0x430] sm:$0xff]  }
 0x1b3   : > { %v13937_v23 = vpop.f32.mrf.mxu0  ;;  %v13939_v50 = vpop.f32.mrf.mxu1  ;;  %v12661_v29 = vld [vmem:[%s13437_s22 + $0x630] sm:$0xff]  }
 0x1b4   : > { %15762 = vst [vmem:[#allocation30_spill] sm:$0xff] %v13937_v23  ;;  %15763 = vst [vmem:[#allocation31_spill] sm:$0xff] %v13939_v50 }
 0x1b5   : > { %v13943_v58 = vpop.f32.mrf.mxu0  ;;  %v13945_v26 = vpop.f32.mrf.mxu1 }
 0x1b6   : > { %15764 = vst [vmem:[#allocation32_spill] sm:$0xff] %v13943_v58  ;;  %15765 = vst [vmem:[#allocation33_spill] sm:$0xff] %v13945_v26 }
 0x1b7   : > { %v13953_v45 = vpop.f32.mrf.mxu0  ;;  %v13955_v53 = vpop.f32.mrf.mxu1 }
 0x1b8   : > { %15766 = vst [vmem:[#allocation34_spill] sm:$0xff] %v13953_v45  ;;  %15767 = vst [vmem:[#allocation35_spill] sm:$0xff] %v13955_v53 }
 0x1b9   : > { %v13959_v50 = vpop.f32.mrf.mxu0  ;;  %v13961_v23 = vpop.f32.mrf.mxu1  ;;  %12213 = vmatmul.mubr.msk.bf16.gmra.mxu0 %vm4821_vm2, %v12658_v2  ;;  %12343 = vmatmul.mubr.msk.bf16.gmra.mxu1 %vm4821_vm2, %v12659_v17  ;;  %v12662_v2 = vld [vmem:[%s13437_s22 + $0x438] sm:$0xff]  }
 0x1ba   : > { %15768 = vst [vmem:[#allocation36_spill] sm:$0xff] %v13959_v50  ;;  %15769 = vst [vmem:[#allocation37_spill] sm:$0xff] %v13961_v23  ;;  %12216 = vmatprep.mubr.msk.bf16.mxu0 %vm4821_vm2, %v12660_v61  ;;  %12346 = vmatprep.mubr.msk.bf16.mxu1 %vm4821_vm2, %v12661_v29  ;;  %v12663_v17 = vld [vmem:[%s13437_s22 + $0x638] sm:$0xff]   ;;  %v12664_v23 = vld [vmem:[%s13437_s22 + $0x440] sm:$0xff]  }
 0x1bb   : > { %v13969_v26 = vpop.f32.mrf.mxu0  ;;  %v13971_v5 = vpop.f32.mrf.mxu1  ;;  %v12665_v61 = vld [vmem:[%s13437_s22 + $0x640] sm:$0xff]  }
 0x1bc   : > { %15770 = vst [vmem:[#allocation38_spill] sm:$0xff] %v13969_v26  ;;  %15771 = vst [vmem:[#allocation39_spill] sm:$0xff] %v13971_v5 }
 0x1bd   : > { %v13975_v45 = vpop.f32.mrf.mxu0  ;;  %v13977_v58 = vpop.f32.mrf.mxu1 }
 0x1be   : > { %15772 = vst [vmem:[#allocation40_spill] sm:$0xff] %v13975_v45  ;;  %15773 = vst [vmem:[#allocation41_spill] sm:$0xff] %v13977_v58 }
 0x1bf   : > { %v13985_v29 = vpop.f32.mrf.mxu0  ;;  %v13987_v50 = vpop.f32.mrf.mxu1 }
 0x1c0   : > { %15774 = vst [vmem:[#allocation42_spill] sm:$0xff] %v13985_v29  ;;  %15775 = vst [vmem:[#allocation43_spill] sm:$0xff] %v13987_v50 }
 0x1c1   : > { %v13991_v5 = vpop.f32.mrf.mxu0  ;;  %v13993_v26 = vpop.f32.mrf.mxu1  ;;  %12217 = vmatmul.mubr.msk.bf16.gmra.mxu0 %vm4821_vm2, %v12662_v2  ;;  %12347 = vmatmul.mubr.msk.bf16.gmra.mxu1 %vm4821_vm2, %v12663_v17  ;;  %v12666_v2 = vld [vmem:[%s13437_s22 + $0x448] sm:$0xff]  }
 0x1c2   : > { %15776 = vst [vmem:[#allocation44_spill] sm:$0xff] %v13991_v5  ;;  %15777 = vst [vmem:[#allocation45_spill] sm:$0xff] %v13993_v26  ;;  %12220 = vmatprep.mubr.msk.bf16.mxu0 %vm4821_vm2, %v12664_v23  ;;  %12350 = vmatprep.mubr.msk.bf16.mxu1 %vm4821_vm2, %v12665_v61  ;;  %v12667_v17 = vld [vmem:[%s13437_s22 + $0x648] sm:$0xff]   ;;  %v12668_v26 = vld [vmem:[%s13437_s22 + $0x450] sm:$0xff]  }
 0x1c3   : > { %v14001_v58 = vpop.f32.mrf.mxu0  ;;  %v14003_v53 = vpop.f32.mrf.mxu1  ;;  %v12669_v23 = vld [vmem:[%s13437_s22 + $0x650] sm:$0xff]  }
 0x1c4   : > { %15778 = vst [vmem:[#allocation46_spill] sm:$0xff] %v14001_v58  ;;  %15779 = vst [vmem:[#allocation47_spill] sm:$0xff] %v14003_v53 }
 0x1c5   : > { %v14007_v29 = vpop.f32.mrf.mxu0  ;;  %v14009_v45 = vpop.f32.mrf.mxu1 }
 0x1c6   : > { %15780 = vst [vmem:[#allocation48_spill] sm:$0xff] %v14007_v29  ;;  %15781 = vst [vmem:[#allocation49_spill] sm:$0xff] %v14009_v45 }
 0x1c7   : > { %v14017_v61 = vpop.f32.mrf.mxu0  ;;  %v14019_v5 = vpop.f32.mrf.mxu1 }
 0x1c8   : > { %15782 = vst [vmem:[#allocation50_spill] sm:$0xff] %v14017_v61  ;;  %15783 = vst [vmem:[#allocation51_spill] sm:$0xff] %v14019_v5 }
 0x1c9   : > { %v14023_v53 = vpop.f32.mrf.mxu0  ;;  %v14025_v58 = vpop.f32.mrf.mxu1  ;;  %12221 = vmatmul.mubr.msk.bf16.gmra.mxu0 %vm4821_vm2, %v12666_v2  ;;  %12351 = vmatmul.mubr.msk.bf16.gmra.mxu1 %vm4821_vm2, %v12667_v17  ;;  %v12670_v2 = vld [vmem:[%s13437_s22 + $0x458] sm:$0xff]  }
 0x1ca   : > { %15784 = vst [vmem:[#allocation52_spill] sm:$0xff] %v14023_v53  ;;  %15785 = vst [vmem:[#allocation53_spill] sm:$0xff] %v14025_v58  ;;  %12224 = vmatprep.mubr.msk.bf16.mxu0 %vm4821_vm2, %v12668_v26  ;;  %12354 = vmatprep.mubr.msk.bf16.mxu1 %vm4821_vm2, %v12669_v23  ;;  %v12671_v17 = vld [vmem:[%s13437_s22 + $0x658] sm:$0xff]   ;;  %v12672_v58 = vld [vmem:[%s13437_s22 + $0x460] sm:$0xff]  }
 0x1cb   : > { %v14033_v45 = vpop.f32.mrf.mxu0  ;;  %v14035_v50 = vpop.f32.mrf.mxu1  ;;  %v12673_v26 = vld [vmem:[%s13437_s22 + $0x660] sm:$0xff]  }
 0x1cc   : > { %15786 = vst [vmem:[#allocation54_spill] sm:$0xff] %v14033_v45  ;;  %15787 = vst [vmem:[#allocation55_spill] sm:$0xff] %v14035_v50 }
 0x1cd   : > { %v14039_v61 = vpop.f32.mrf.mxu0  ;;  %v14041_v29 = vpop.f32.mrf.mxu1 }
 0x1ce   : > { %15788 = vst [vmem:[#allocation56_spill] sm:$0xff] %v14039_v61  ;;  %15789 = vst [vmem:[#allocation57_spill] sm:$0xff] %v14041_v29 }
 0x1cf   : > { %v14049_v23 = vpop.f32.mrf.mxu0  ;;  %v14051_v53 = vpop.f32.mrf.mxu1 }
 0x1d0   : > { %15790 = vst [vmem:[#allocation58_spill] sm:$0xff] %v14049_v23  ;;  %15791 = vst [vmem:[#allocation59_spill] sm:$0xff] %v14051_v53 }
 0x1d1   : > { %v14055_v50 = vpop.f32.mrf.mxu0  ;;  %v14057_v45 = vpop.f32.mrf.mxu1  ;;  %12225 = vmatmul.mubr.msk.bf16.gmra.mxu0 %vm4821_vm2, %v12670_v2  ;;  %12355 = vmatmul.mubr.msk.bf16.gmra.mxu1 %vm4821_vm2, %v12671_v17  ;;  %v12674_v2 = vld [vmem:[%s13437_s22 + $0x468] sm:$0xff]  }
 0x1d2   : > { %15792 = vst [vmem:[#allocation60_spill] sm:$0xff] %v14055_v50  ;;  %15793 = vst [vmem:[#allocation61_spill] sm:$0xff] %v14057_v45  ;;  %12228 = vmatprep.mubr.msk.bf16.mxu0 %vm4821_vm2, %v12672_v58  ;;  %12358 = vmatprep.mubr.msk.bf16.mxu1 %vm4821_vm2, %v12673_v26  ;;  %v12675_v17 = vld [vmem:[%s13437_s22 + $0x668] sm:$0xff]   ;;  %v12676_v45 = vld [vmem:[%s13437_s22 + $0x470] sm:$0xff]  }
 0x1d3   : > { %v14065_v29 = vpop.f32.mrf.mxu0  ;;  %v14067_v5 = vpop.f32.mrf.mxu1  ;;  %v12677_v58 = vld [vmem:[%s13437_s22 + $0x670] sm:$0xff]  }
 0x1d4   : > { %15794 = vst [vmem:[#allocation62_spill] sm:$0xff] %v14065_v29  ;;  %15795 = vst [vmem:[#allocation63_spill] sm:$0xff] %v14067_v5 }
 0x1d5   : > { %v14071_v23 = vpop.f32.mrf.mxu0  ;;  %v14073_v61 = vpop.f32.mrf.mxu1 }
 0x1d6   : > { %15796 = vst [vmem:[#allocation64_spill] sm:$0xff] %v14071_v23  ;;  %15797 = vst [vmem:[#allocation65_spill] sm:$0xff] %v14073_v61 }
 0x1d7   : > { %v14081_v26 = vpop.f32.mrf.mxu0  ;;  %v14083_v50 = vpop.f32.mrf.mxu1 }
 0x1d8   : > { %15798 = vst [vmem:[#allocation66_spill] sm:$0xff] %v14081_v26  ;;  %15799 = vst [vmem:[#allocation67_spill] sm:$0xff] %v14083_v50 }
 0x1d9   : > { %v14087_v5 = vpop.f32.mrf.mxu0  ;;  %v14089_v29 = vpop.f32.mrf.mxu1  ;;  %12229 = vmatmul.mubr.msk.bf16.gmra.mxu0 %vm4821_vm2, %v12674_v2  ;;  %12359 = vmatmul.mubr.msk.bf16.gmra.mxu1 %vm4821_vm2, %v12675_v17  ;;  %v12678_v2 = vld [vmem:[%s13437_s22 + $0x478] sm:$0xff]  }
 0x1da   : > { %15800 = vst [vmem:[#allocation68_spill] sm:$0xff] %v14087_v5  ;;  %15801 = vst [vmem:[#allocation69_spill] sm:$0xff] %v14089_v29  ;;  %12232 = vmatprep.mubr.msk.bf16.mxu0 %vm4821_vm2, %v12676_v45  ;;  %12362 = vmatprep.mubr.msk.bf16.mxu1 %vm4821_vm2, %v12677_v58  ;;  %v12679_v17 = vld [vmem:[%s13437_s22 + $0x678] sm:$0xff]   ;;  %v12680_v29 = vld [vmem:[%s13437_s22 + $0x480] sm:$0xff]  }
 0x1db   : > { %v14097_v61 = vpop.f32.mrf.mxu0  ;;  %v14099_v53 = vpop.f32.mrf.mxu1  ;;  %v12681_v45 = vld [vmem:[%s13437_s22 + $0x680] sm:$0xff]  }
 0x1dc   : > { %15802 = vst [vmem:[#allocation70_spill] sm:$0xff] %v14097_v61  ;;  %15803 = vst [vmem:[#allocation71_spill] sm:$0xff] %v14099_v53 }
 0x1dd   : > { %v14103_v26 = vpop.f32.mrf.mxu0  ;;  %v14105_v23 = vpop.f32.mrf.mxu1 }
 0x1de   : > { %15804 = vst [vmem:[#allocation72_spill] sm:$0xff] %v14103_v26  ;;  %15805 = vst [vmem:[#allocation73_spill] sm:$0xff] %v14105_v23 }
 0x1df   : > { %v14113_v58 = vpop.f32.mrf.mxu0  ;;  %v14115_v5 = vpop.f32.mrf.mxu1 }
 0x1e0   : > { %15806 = vst [vmem:[#allocation74_spill] sm:$0xff] %v14113_v58  ;;  %15807 = vst [vmem:[#allocation75_spill] sm:$0xff] %v14115_v5 }
 0x1e1   : > { %v14119_v53 = vpop.f32.mrf.mxu0  ;;  %v14121_v61 = vpop.f32.mrf.mxu1  ;;  %12233 = vmatmul.mubr.msk.bf16.gmra.mxu0 %vm4821_vm2, %v12678_v2  ;;  %12363 = vmatmul.mubr.msk.bf16.gmra.mxu1 %vm4821_vm2, %v12679_v17  ;;  %v12682_v2 = vld [vmem:[%s13437_s22 + $0x488] sm:$0xff]  }
 0x1e2   : > { %15808 = vst [vmem:[#allocation76_spill] sm:$0xff] %v14119_v53  ;;  %15809 = vst [vmem:[#allocation77_spill] sm:$0xff] %v14121_v61  ;;  %12236 = vmatprep.mubr.msk.bf16.mxu0 %vm4821_vm2, %v12680_v29  ;;  %12366 = vmatprep.mubr.msk.bf16.mxu1 %vm4821_vm2, %v12681_v45  ;;  %v12683_v17 = vld [vmem:[%s13437_s22 + $0x688] sm:$0xff]   ;;  %v12684_v61 = vld [vmem:[%s13437_s22 + $0x490] sm:$0xff]  }
 0x1e3   : > { %v14129_v23 = vpop.f32.mrf.mxu0  ;;  %v14131_v50 = vpop.f32.mrf.mxu1  ;;  %v12685_v29 = vld [vmem:[%s13437_s22 + $0x690] sm:$0xff]  }
 0x1e4   : > { %15810 = vst [vmem:[#allocation78_spill] sm:$0xff] %v14129_v23  ;;  %15811 = vst [vmem:[#allocation79_spill] sm:$0xff] %v14131_v50 }
 0x1e5   : > { %v14135_v58 = vpop.f32.mrf.mxu0  ;;  %v14137_v26 = vpop.f32.mrf.mxu1 }
 0x1e6   : > { %15812 = vst [vmem:[#allocation80_spill] sm:$0xff] %v14135_v58  ;;  %15813 = vst [vmem:[#allocation81_spill] sm:$0xff] %v14137_v26 }
 0x1e7   : > { %v14145_v45 = vpop.f32.mrf.mxu0  ;;  %v14147_v53 = vpop.f32.mrf.mxu1 }
 0x1e8   : > { %15814 = vst [vmem:[#allocation82_spill] sm:$0xff] %v14145_v45  ;;  %15815 = vst [vmem:[#allocation83_spill] sm:$0xff] %v14147_v53 }
 0x1e9   : > { %v14151_v50 = vpop.f32.mrf.mxu0  ;;  %v14153_v23 = vpop.f32.mrf.mxu1  ;;  %12237 = vmatmul.mubr.msk.bf16.gmra.mxu0 %vm4821_vm2, %v12682_v2  ;;  %12367 = vmatmul.mubr.msk.bf16.gmra.mxu1 %vm4821_vm2, %v12683_v17  ;;  %v12686_v2 = vld [vmem:[%s13437_s22 + $0x498] sm:$0xff]  }
 0x1ea   : > { %15816 = vst [vmem:[#allocation84_spill] sm:$0xff] %v14151_v50  ;;  %15817 = vst [vmem:[#allocation85_spill] sm:$0xff] %v14153_v23  ;;  %12240 = vmatprep.mubr.msk.bf16.mxu0 %vm4821_vm2, %v12684_v61  ;;  %12370 = vmatprep.mubr.msk.bf16.mxu1 %vm4821_vm2, %v12685_v29  ;;  %v12687_v17 = vld [vmem:[%s13437_s22 + $0x698] sm:$0xff]   ;;  %v12688_v23 = vld [vmem:[%s13437_s22 + $0x4a0] sm:$0xff]  }
 0x1eb   : > { %v14161_v26 = vpop.f32.mrf.mxu0  ;;  %v14163_v5 = vpop.f32.mrf.mxu1  ;;  %v12689_v61 = vld [vmem:[%s13437_s22 + $0x6a0] sm:$0xff]  }
 0x1ec   : > { %15818 = vst [vmem:[#allocation86_spill] sm:$0xff] %v14161_v26  ;;  %15819 = vst [vmem:[#allocation87_spill] sm:$0xff] %v14163_v5 }
 0x1ed   : > { %v14167_v45 = vpop.f32.mrf.mxu0  ;;  %v14169_v58 = vpop.f32.mrf.mxu1 }
 0x1ee   : > { %15820 = vst [vmem:[#allocation88_spill] sm:$0xff] %v14167_v45  ;;  %15821 = vst [vmem:[#allocation89_spill] sm:$0xff] %v14169_v58 }
 0x1ef   : > { %v14177_v29 = vpop.f32.mrf.mxu0  ;;  %v14179_v50 = vpop.f32.mrf.mxu1 }
 0x1f0   : > { %15822 = vst [vmem:[#allocation90_spill] sm:$0xff] %v14177_v29  ;;  %15823 = vst [vmem:[#allocation91_spill] sm:$0xff] %v14179_v50 }
 0x1f1   : > { %v14183_v5 = vpop.f32.mrf.mxu0  ;;  %v14185_v26 = vpop.f32.mrf.mxu1  ;;  %12241 = vmatmul.mubr.msk.bf16.gmra.mxu0 %vm4821_vm2, %v12686_v2  ;;  %12371 = vmatmul.mubr.msk.bf16.gmra.mxu1 %vm4821_vm2, %v12687_v17  ;;  %v12690_v2 = vld [vmem:[%s13437_s22 + $0x4a8] sm:$0xff]  }
 0x1f2   : > { %15824 = vst [vmem:[#allocation92_spill] sm:$0xff] %v14183_v5  ;;  %15825 = vst [vmem:[#allocation93_spill] sm:$0xff] %v14185_v26  ;;  %12244 = vmatprep.mubr.msk.bf16.mxu0 %vm4821_vm2, %v12688_v23  ;;  %12374 = vmatprep.mubr.msk.bf16.mxu1 %vm4821_vm2, %v12689_v61  ;;  %v12691_v17 = vld [vmem:[%s13437_s22 + $0x6a8] sm:$0xff]   ;;  %v12692_v26 = vld [vmem:[%s13437_s22 + $0x4b0] sm:$0xff]  }
 0x1f3   : > { %v14193_v58 = vpop.f32.mrf.mxu0  ;;  %v14195_v53 = vpop.f32.mrf.mxu1  ;;  %v12693_v23 = vld [vmem:[%s13437_s22 + $0x6b0] sm:$0xff]  }
 0x1f4   : > { %15826 = vst [vmem:[#allocation94_spill] sm:$0xff] %v14193_v58  ;;  %15827 = vst [vmem:[#allocation95_spill] sm:$0xff] %v14195_v53 }
 0x1f5   : > { %v14199_v29 = vpop.f32.mrf.mxu0  ;;  %v14201_v45 = vpop.f32.mrf.mxu1 }
 0x1f6   : > { %15828 = vst [vmem:[#allocation96_spill] sm:$0xff] %v14199_v29  ;;  %15829 = vst [vmem:[#allocation97_spill] sm:$0xff] %v14201_v45 }
 0x1f7   : > { %v14209_v61 = vpop.f32.mrf.mxu0  ;;  %v14211_v5 = vpop.f32.mrf.mxu1 }
 0x1f8   : > { %15830 = vst [vmem:[#allocation98_spill] sm:$0xff] %v14209_v61  ;;  %15831 = vst [vmem:[#allocation99_spill] sm:$0xff] %v14211_v5 }
 0x1f9   : > { %v14215_v53 = vpop.f32.mrf.mxu0  ;;  %v14217_v58 = vpop.f32.mrf.mxu1  ;;  %12245 = vmatmul.mubr.msk.bf16.gmra.mxu0 %vm4821_vm2, %v12690_v2  ;;  %12375 = vmatmul.mubr.msk.bf16.gmra.mxu1 %vm4821_vm2, %v12691_v17  ;;  %v12694_v2 = vld [vmem:[%s13437_s22 + $0x4b8] sm:$0xff]  }
 0x1fa   : > { %15832 = vst [vmem:[#allocation100_spill] sm:$0xff] %v14215_v53  ;;  %15833 = vst [vmem:[#allocation101_spill] sm:$0xff] %v14217_v58  ;;  %12248 = vmatprep.mubr.msk.bf16.mxu0 %vm4821_vm2, %v12692_v26  ;;  %12378 = vmatprep.mubr.msk.bf16.mxu1 %vm4821_vm2, %v12693_v23  ;;  %v12695_v17 = vld [vmem:[%s13437_s22 + $0x6b8] sm:$0xff]   ;;  %v12696_v58 = vld [vmem:[%s13437_s22 + $0x4c0] sm:$0xff]  }
 0x1fb   : > { %v14225_v45 = vpop.f32.mrf.mxu0  ;;  %v14227_v50 = vpop.f32.mrf.mxu1  ;;  %v12697_v26 = vld [vmem:[%s13437_s22 + $0x6c0] sm:$0xff]  }
 0x1fc   : > { %15834 = vst [vmem:[#allocation102_spill] sm:$0xff] %v14225_v45  ;;  %15835 = vst [vmem:[#allocation103_spill] sm:$0xff] %v14227_v50 }
 0x1fd   : > { %v14231_v61 = vpop.f32.mrf.mxu0  ;;  %v14233_v29 = vpop.f32.mrf.mxu1 }
 0x1fe   : > { %15836 = vst [vmem:[#allocation104_spill] sm:$0xff] %v14231_v61  ;;  %15837 = vst [vmem:[#allocation105_spill] sm:$0xff] %v14233_v29 }
 0x1ff   : > { %v14241_v23 = vpop.f32.mrf.mxu0  ;;  %v14243_v53 = vpop.f32.mrf.mxu1 }
 0x200   : > { %15838 = vst [vmem:[#allocation106_spill] sm:$0xff] %v14241_v23  ;;  %15839 = vst [vmem:[#allocation107_spill] sm:$0xff] %v14243_v53 }
 0x201   : > { %v14247_v50 = vpop.f32.mrf.mxu0  ;;  %v14249_v45 = vpop.f32.mrf.mxu1  ;;  %12249 = vmatmul.mubr.msk.bf16.gmra.mxu0 %vm4821_vm2, %v12694_v2  ;;  %12379 = vmatmul.mubr.msk.bf16.gmra.mxu1 %vm4821_vm2, %v12695_v17  ;;  %v12698_v2 = vld [vmem:[%s13437_s22 + $0x4c8] sm:$0xff]  }
 0x202   : > { %15840 = vst [vmem:[#allocation108_spill] sm:$0xff] %v14247_v50  ;;  %15841 = vst [vmem:[#allocation109_spill] sm:$0xff] %v14249_v45  ;;  %12252 = vmatprep.mubr.msk.bf16.mxu0 %vm4821_vm2, %v12696_v58  ;;  %12382 = vmatprep.mubr.msk.bf16.mxu1 %vm4821_vm2, %v12697_v26  ;;  %v12699_v17 = vld [vmem:[%s13437_s22 + $0x6c8] sm:$0xff]   ;;  %v12700_v45 = vld [vmem:[%s13437_s22 + $0x4d0] sm:$0xff]  }
 0x203   : > { %v14257_v29 = vpop.f32.mrf.mxu0  ;;  %v14259_v5 = vpop.f32.mrf.mxu1  ;;  %v12701_v58 = vld [vmem:[%s13437_s22 + $0x6d0] sm:$0xff]  }
 0x204   : > { %15842 = vst [vmem:[#allocation110_spill] sm:$0xff] %v14257_v29  ;;  %15843 = vst [vmem:[#allocation111_spill] sm:$0xff] %v14259_v5 }
 0x205   : > { %v14263_v23 = vpop.f32.mrf.mxu0  ;;  %v14265_v61 = vpop.f32.mrf.mxu1 }
 0x206   : > { %15844 = vst [vmem:[#allocation112_spill] sm:$0xff] %v14263_v23  ;;  %15845 = vst [vmem:[#allocation113_spill] sm:$0xff] %v14265_v61 }
 0x207   : > { %v14273_v26 = vpop.f32.mrf.mxu0  ;;  %v14275_v50 = vpop.f32.mrf.mxu1 }
 0x208   : > { %15846 = vst [vmem:[#allocation114_spill] sm:$0xff] %v14273_v26  ;;  %15847 = vst [vmem:[#allocation115_spill] sm:$0xff] %v14275_v50 }
 0x209   : > { %v14279_v5 = vpop.f32.mrf.mxu0  ;;  %v14281_v29 = vpop.f32.mrf.mxu1  ;;  %12253 = vmatmul.mubr.msk.bf16.gmra.mxu0 %vm4821_vm2, %v12698_v2  ;;  %12383 = vmatmul.mubr.msk.bf16.gmra.mxu1 %vm4821_vm2, %v12699_v17  ;;  %v12702_v2 = vld [vmem:[%s13437_s22 + $0x4d8] sm:$0xff]  }
 0x20a   : > { %15848 = vst [vmem:[#allocation116_spill] sm:$0xff] %v14279_v5  ;;  %15849 = vst [vmem:[#allocation117_spill] sm:$0xff] %v14281_v29  ;;  %12256 = vmatprep.mubr.msk.bf16.mxu0 %vm4821_vm2, %v12700_v45  ;;  %12386 = vmatprep.mubr.msk.bf16.mxu1 %vm4821_vm2, %v12701_v58  ;;  %v12703_v17 = vld [vmem:[%s13437_s22 + $0x6d8] sm:$0xff]   ;;  %v12704_v29 = vld [vmem:[%s13437_s22 + $0x4e0] sm:$0xff]  }
 0x20b   : > { %v14289_v61 = vpop.f32.mrf.mxu0  ;;  %v14291_v53 = vpop.f32.mrf.mxu1  ;;  %v12705_v45 = vld [vmem:[%s13437_s22 + $0x6e0] sm:$0xff]  }
 0x20c   : > { %15850 = vst [vmem:[#allocation118_spill] sm:$0xff] %v14289_v61  ;;  %15851 = vst [vmem:[#allocation119_spill] sm:$0xff] %v14291_v53 }
 0x20d   : > { %v14295_v26 = vpop.f32.mrf.mxu0  ;;  %v14297_v23 = vpop.f32.mrf.mxu1 }
 0x20e   : > { %15852 = vst [vmem:[#allocation120_spill] sm:$0xff] %v14295_v26  ;;  %15853 = vst [vmem:[#allocation121_spill] sm:$0xff] %v14297_v23 }
 0x20f   : > { %v14305_v58 = vpop.f32.mrf.mxu0  ;;  %v14307_v5 = vpop.f32.mrf.mxu1 }
 0x210   : > { %15854 = vst [vmem:[#allocation122_spill] sm:$0xff] %v14305_v58  ;;  %15855 = vst [vmem:[#allocation123_spill] sm:$0xff] %v14307_v5 }
 0x211   : > { %v14311_v53 = vpop.f32.mrf.mxu0  ;;  %v14313_v61 = vpop.f32.mrf.mxu1  ;;  %12257 = vmatmul.mubr.msk.bf16.gmra.mxu0 %vm4821_vm2, %v12702_v2  ;;  %12387 = vmatmul.mubr.msk.bf16.gmra.mxu1 %vm4821_vm2, %v12703_v17  ;;  %v12706_v2 = vld [vmem:[%s13437_s22 + $0x4e8] sm:$0xff]  }
 0x212   : > { %15856 = vst [vmem:[#allocation124_spill] sm:$0xff] %v14311_v53  ;;  %15857 = vst [vmem:[#allocation125_spill] sm:$0xff] %v14313_v61  ;;  %12260 = vmatprep.mubr.msk.bf16.mxu0 %vm4821_vm2, %v12704_v29  ;;  %12390 = vmatprep.mubr.msk.bf16.mxu1 %vm4821_vm2, %v12705_v45  ;;  %v12707_v17 = vld [vmem:[%s13437_s22 + $0x6e8] sm:$0xff]   ;;  %v12708_v61 = vld [vmem:[%s13437_s22 + $0x4f0] sm:$0xff]  }
 0x213   : > { %v14321_v23 = vpop.f32.mrf.mxu0  ;;  %v14323_v50 = vpop.f32.mrf.mxu1  ;;  %v12709_v29 = vld [vmem:[%s13437_s22 + $0x6f0] sm:$0xff]  }
 0x214   : > { %15858 = vst [vmem:[#allocation126_spill] sm:$0xff] %v14321_v23  ;;  %15859 = vst [vmem:[#allocation127_spill] sm:$0xff] %v14323_v50 }
 0x215   : > { %v14327_v58 = vpop.f32.mrf.mxu0  ;;  %v14329_v26 = vpop.f32.mrf.mxu1 }
 0x216   : > { %15860 = vst [vmem:[#allocation128_spill] sm:$0xff] %v14327_v58  ;;  %15861 = vst [vmem:[#allocation129_spill] sm:$0xff] %v14329_v26 }
 0x217   : > { %v14337_v45 = vpop.f32.mrf.mxu0  ;;  %v14339_v53 = vpop.f32.mrf.mxu1 }
 0x218   : > { %15862 = vst [vmem:[#allocation130_spill] sm:$0xff] %v14337_v45  ;;  %15863 = vst [vmem:[#allocation131_spill] sm:$0xff] %v14339_v53 }
 0x219   : > { %v14343_v50 = vpop.f32.mrf.mxu0  ;;  %v14345_v23 = vpop.f32.mrf.mxu1  ;;  %12261 = vmatmul.mubr.msk.bf16.gmra.mxu0 %vm4821_vm2, %v12706_v2  ;;  %12391 = vmatmul.mubr.msk.bf16.gmra.mxu1 %vm4821_vm2, %v12707_v17  ;;  %v12710_v2 = vld [vmem:[%s13437_s22 + $0x4f8] sm:$0xff]  }
 0x21a   : > { %15864 = vst [vmem:[#allocation132_spill] sm:$0xff] %v14343_v50  ;;  %15865 = vst [vmem:[#allocation133_spill] sm:$0xff] %v14345_v23  ;;  %12264 = vmatprep.mubr.msk.bf16.mxu0 %vm4821_vm2, %v12708_v61  ;;  %12394 = vmatprep.mubr.msk.bf16.mxu1 %vm4821_vm2, %v12709_v29  ;;  %v12711_v17 = vld [vmem:[%s13437_s22 + $0x6f8] sm:$0xff]   ;;  %v12712_v23 = vld [vmem:[%s13437_s22 + $0x500] sm:$0xff]  }
 0x21b   : > { %v14353_v26 = vpop.f32.mrf.mxu0  ;;  %v14355_v5 = vpop.f32.mrf.mxu1  ;;  %v12713_v61 = vld [vmem:[%s13437_s22 + $0x700] sm:$0xff]  }
 0x21c   : > { %15866 = vst [vmem:[#allocation134_spill] sm:$0xff] %v14353_v26  ;;  %15867 = vst [vmem:[#allocation135_spill] sm:$0xff] %v14355_v5 }
 0x21d   : > { %v14359_v45 = vpop.f32.mrf.mxu0  ;;  %v14361_v58 = vpop.f32.mrf.mxu1 }
 0x21e   : > { %15868 = vst [vmem:[#allocation136_spill] sm:$0xff] %v14359_v45  ;;  %15869 = vst [vmem:[#allocation137_spill] sm:$0xff] %v14361_v58 }
 0x21f   : > { %v14369_v29 = vpop.f32.mrf.mxu0  ;;  %v14371_v50 = vpop.f32.mrf.mxu1 }
 0x220   : > { %15870 = vst [vmem:[#allocation138_spill] sm:$0xff] %v14369_v29  ;;  %15871 = vst [vmem:[#allocation139_spill] sm:$0xff] %v14371_v50 }
 0x221   : > { %v14375_v5 = vpop.f32.mrf.mxu0  ;;  %v14377_v26 = vpop.f32.mrf.mxu1  ;;  %12265 = vmatmul.mubr.msk.bf16.gmra.mxu0 %vm4821_vm2, %v12710_v2  ;;  %12395 = vmatmul.mubr.msk.bf16.gmra.mxu1 %vm4821_vm2, %v12711_v17  ;;  %v12714_v2 = vld [vmem:[%s13437_s22 + $0x508] sm:$0xff]  }
 0x222   : > { %15872 = vst [vmem:[#allocation140_spill] sm:$0xff] %v14375_v5  ;;  %15873 = vst [vmem:[#allocation141_spill] sm:$0xff] %v14377_v26  ;;  %12268 = vmatprep.mubr.msk.bf16.mxu0 %vm4821_vm2, %v12712_v23  ;;  %12398 = vmatprep.mubr.msk.bf16.mxu1 %vm4821_vm2, %v12713_v61  ;;  %v12715_v17 = vld [vmem:[%s13437_s22 + $0x708] sm:$0xff]   ;;  %v12716_v26 = vld [vmem:[%s13437_s22 + $0x510] sm:$0xff]  }
 0x223   : > { %v14385_v58 = vpop.f32.mrf.mxu0  ;;  %v14387_v53 = vpop.f32.mrf.mxu1  ;;  %v12717_v23 = vld [vmem:[%s13437_s22 + $0x710] sm:$0xff]  }
 0x224   : > { %15874 = vst [vmem:[#allocation142_spill] sm:$0xff] %v14385_v58  ;;  %15875 = vst [vmem:[#allocation143_spill] sm:$0xff] %v14387_v53 }
 0x225   : > { %v14391_v29 = vpop.f32.mrf.mxu0  ;;  %v14393_v45 = vpop.f32.mrf.mxu1 }
 0x226   : > { %15876 = vst [vmem:[#allocation144_spill] sm:$0xff] %v14391_v29  ;;  %15877 = vst [vmem:[#allocation145_spill] sm:$0xff] %v14393_v45 }
 0x227   : > { %v14401_v61 = vpop.f32.mrf.mxu0  ;;  %v14403_v5 = vpop.f32.mrf.mxu1 }
 0x228   : > { %15878 = vst [vmem:[#allocation146_spill] sm:$0xff] %v14401_v61  ;;  %15879 = vst [vmem:[#allocation147_spill] sm:$0xff] %v14403_v5 }
 0x229   : > { %v14407_v53 = vpop.f32.mrf.mxu0  ;;  %v14409_v58 = vpop.f32.mrf.mxu1  ;;  %12269 = vmatmul.mubr.msk.bf16.gmra.mxu0 %vm4821_vm2, %v12714_v2  ;;  %12399 = vmatmul.mubr.msk.bf16.gmra.mxu1 %vm4821_vm2, %v12715_v17  ;;  %v12718_v2 = vld [vmem:[%s13437_s22 + $0x518] sm:$0xff]  }
 0x22a   : > { %15880 = vst [vmem:[#allocation148_spill] sm:$0xff] %v14407_v53  ;;  %15881 = vst [vmem:[#allocation149_spill] sm:$0xff] %v14409_v58  ;;  %12272 = vmatprep.mubr.msk.bf16.mxu0 %vm4821_vm2, %v12716_v26  ;;  %12402 = vmatprep.mubr.msk.bf16.mxu1 %vm4821_vm2, %v12717_v23  ;;  %v12719_v17 = vld [vmem:[%s13437_s22 + $0x718] sm:$0xff]   ;;  %v12720_v58 = vld [vmem:[%s13437_s22 + $0x520] sm:$0xff]  }
 0x22b   : > { %v14417_v45 = vpop.f32.mrf.mxu0  ;;  %v14419_v50 = vpop.f32.mrf.mxu1  ;;  %v12721_v26 = vld [vmem:[%s13437_s22 + $0x720] sm:$0xff]  }
 0x22c   : > { %15882 = vst [vmem:[#allocation150_spill] sm:$0xff] %v14417_v45  ;;  %15883 = vst [vmem:[#allocation151_spill] sm:$0xff] %v14419_v50 }
 0x22d   : > { %v14423_v61 = vpop.f32.mrf.mxu0  ;;  %v14425_v29 = vpop.f32.mrf.mxu1 }
 0x22e   : > { %15884 = vst [vmem:[#allocation152_spill] sm:$0xff] %v14423_v61  ;;  %15885 = vst [vmem:[#allocation153_spill] sm:$0xff] %v14425_v29 }
 0x22f   : > { %v14433_v23 = vpop.f32.mrf.mxu0  ;;  %v14435_v53 = vpop.f32.mrf.mxu1 }
 0x230   : > { %15886 = vst [vmem:[#allocation154_spill] sm:$0xff] %v14433_v23  ;;  %15887 = vst [vmem:[#allocation155_spill] sm:$0xff] %v14435_v53 }
 0x231   : > { %v14439_v50 = vpop.f32.mrf.mxu0  ;;  %v14441_v45 = vpop.f32.mrf.mxu1  ;;  %12273 = vmatmul.mubr.msk.bf16.gmra.mxu0 %vm4821_vm2, %v12718_v2  ;;  %12403 = vmatmul.mubr.msk.bf16.gmra.mxu1 %vm4821_vm2, %v12719_v17  ;;  %v12722_v2 = vld [vmem:[%s13437_s22 + $0x528] sm:$0xff]  }
 0x232   : > { %15888 = vst [vmem:[#allocation156_spill] sm:$0xff] %v14439_v50  ;;  %15889 = vst [vmem:[#allocation157_spill] sm:$0xff] %v14441_v45  ;;  %12276 = vmatprep.mubr.msk.bf16.mxu0 %vm4821_vm2, %v12720_v58  ;;  %12406 = vmatprep.mubr.msk.bf16.mxu1 %vm4821_vm2, %v12721_v26  ;;  %v12723_v17 = vld [vmem:[%s13437_s22 + $0x728] sm:$0xff]   ;;  %v12724_v45 = vld [vmem:[%s13437_s22 + $0x530] sm:$0xff]  }
 0x233   : > { %v14449_v29 = vpop.f32.mrf.mxu0  ;;  %v14451_v5 = vpop.f32.mrf.mxu1  ;;  %v12725_v58 = vld [vmem:[%s13437_s22 + $0x730] sm:$0xff]  }
 0x234   : > { %15890 = vst [vmem:[#allocation158_spill] sm:$0xff] %v14449_v29  ;;  %15891 = vst [vmem:[#allocation159_spill] sm:$0xff] %v14451_v5 }
 0x235   : > { %v14455_v23 = vpop.f32.mrf.mxu0  ;;  %v14457_v61 = vpop.f32.mrf.mxu1 }
 0x236   : > { %15892 = vst [vmem:[#allocation160_spill] sm:$0xff] %v14455_v23  ;;  %15893 = vst [vmem:[#allocation161_spill] sm:$0xff] %v14457_v61 }
 0x237   : > { %v14465_v26 = vpop.f32.mrf.mxu0  ;;  %v14467_v50 = vpop.f32.mrf.mxu1 }
 0x238   : > { %15894 = vst [vmem:[#allocation162_spill] sm:$0xff] %v14465_v26  ;;  %15895 = vst [vmem:[#allocation163_spill] sm:$0xff] %v14467_v50 }
 0x239   : > { %v14471_v5 = vpop.f32.mrf.mxu0  ;;  %v14473_v29 = vpop.f32.mrf.mxu1  ;;  %12277 = vmatmul.mubr.msk.bf16.gmra.mxu0 %vm4821_vm2, %v12722_v2  ;;  %12407 = vmatmul.mubr.msk.bf16.gmra.mxu1 %vm4821_vm2, %v12723_v17  ;;  %v12726_v2 = vld [vmem:[%s13437_s22 + $0x538] sm:$0xff]  }
 0x23a   : > { %15896 = vst [vmem:[#allocation164_spill] sm:$0xff] %v14471_v5  ;;  %15897 = vst [vmem:[#allocation165_spill] sm:$0xff] %v14473_v29  ;;  %12280 = vmatprep.mubr.msk.bf16.mxu0 %vm4821_vm2, %v12724_v45  ;;  %12410 = vmatprep.mubr.msk.bf16.mxu1 %vm4821_vm2, %v12725_v58  ;;  %v12727_v17 = vld [vmem:[%s13437_s22 + $0x738] sm:$0xff]   ;;  %v12728_v29 = vld [vmem:[%s13437_s22 + $0x540] sm:$0xff]  }
 0x23b   : > { %v14481_v61 = vpop.f32.mrf.mxu0  ;;  %v14483_v53 = vpop.f32.mrf.mxu1  ;;  %v12729_v45 = vld [vmem:[%s13437_s22 + $0x740] sm:$0xff]  }
 0x23c   : > { %15898 = vst [vmem:[#allocation166_spill] sm:$0xff] %v14481_v61  ;;  %15899 = vst [vmem:[#allocation167_spill] sm:$0xff] %v14483_v53 }
 0x23d   : > { %v14487_v26 = vpop.f32.mrf.mxu0  ;;  %v14489_v23 = vpop.f32.mrf.mxu1 }
 0x23e   : > { %15900 = vst [vmem:[#allocation168_spill] sm:$0xff] %v14487_v26  ;;  %15901 = vst [vmem:[#allocation169_spill] sm:$0xff] %v14489_v23 }
 0x23f   : > { %v14497_v58 = vpop.f32.mrf.mxu0  ;;  %v14499_v5 = vpop.f32.mrf.mxu1 }
 0x240   : > { %15902 = vst [vmem:[#allocation170_spill] sm:$0xff] %v14497_v58  ;;  %15903 = vst [vmem:[#allocation171_spill] sm:$0xff] %v14499_v5 }
 0x241   : > { %v14503_v53 = vpop.f32.mrf.mxu0  ;;  %v14505_v61 = vpop.f32.mrf.mxu1  ;;  %12281 = vmatmul.mubr.msk.bf16.gmra.mxu0 %vm4821_vm2, %v12726_v2  ;;  %12411 = vmatmul.mubr.msk.bf16.gmra.mxu1 %vm4821_vm2, %v12727_v17  ;;  %v12730_v2 = vld [vmem:[%s13437_s22 + $0x548] sm:$0xff]  }
 0x242   : > { %15904 = vst [vmem:[#allocation172_spill] sm:$0xff] %v14503_v53  ;;  %15905 = vst [vmem:[#allocation173_spill] sm:$0xff] %v14505_v61  ;;  %12284 = vmatprep.mubr.msk.bf16.mxu0 %vm4821_vm2, %v12728_v29  ;;  %12414 = vmatprep.mubr.msk.bf16.mxu1 %vm4821_vm2, %v12729_v45  ;;  %v12731_v17 = vld [vmem:[%s13437_s22 + $0x748] sm:$0xff]   ;;  %v12732_v61 = vld [vmem:[%s13437_s22 + $0x550] sm:$0xff]  }
 0x243   : > { %v14513_v23 = vpop.f32.mrf.mxu0  ;;  %v14515_v50 = vpop.f32.mrf.mxu1  ;;  %v12733_v29 = vld [vmem:[%s13437_s22 + $0x750] sm:$0xff]  }
 0x244   : > { %15906 = vst [vmem:[#allocation174_spill] sm:$0xff] %v14513_v23  ;;  %15907 = vst [vmem:[#allocation175_spill] sm:$0xff] %v14515_v50 }
 0x245   : > { %v14519_v58 = vpop.f32.mrf.mxu0  ;;  %v14521_v26 = vpop.f32.mrf.mxu1 }
 0x246   : > { %15908 = vst [vmem:[#allocation176_spill] sm:$0xff] %v14519_v58  ;;  %15909 = vst [vmem:[#allocation177_spill] sm:$0xff] %v14521_v26 }
 0x247   : > { %v14529_v45 = vpop.f32.mrf.mxu0  ;;  %v14531_v53 = vpop.f32.mrf.mxu1 }
 0x248   : > { %15910 = vst [vmem:[#allocation178_spill] sm:$0xff] %v14529_v45  ;;  %15911 = vst [vmem:[#allocation179_spill] sm:$0xff] %v14531_v53 }
 0x249   : > { %v14535_v50 = vpop.f32.mrf.mxu0  ;;  %v14537_v23 = vpop.f32.mrf.mxu1  ;;  %12285 = vmatmul.mubr.msk.bf16.gmra.mxu0 %vm4821_vm2, %v12730_v2  ;;  %12415 = vmatmul.mubr.msk.bf16.gmra.mxu1 %vm4821_vm2, %v12731_v17  ;;  %v12734_v2 = vld [vmem:[%s13437_s22 + $0x558] sm:$0xff]  }
 0x24a   : > { %15912 = vst [vmem:[#allocation180_spill] sm:$0xff] %v14535_v50  ;;  %15913 = vst [vmem:[#allocation181_spill] sm:$0xff] %v14537_v23  ;;  %12288 = vmatprep.mubr.msk.bf16.mxu0 %vm4821_vm2, %v12732_v61  ;;  %12418 = vmatprep.mubr.msk.bf16.mxu1 %vm4821_vm2, %v12733_v29  ;;  %v12735_v17 = vld [vmem:[%s13437_s22 + $0x758] sm:$0xff]   ;;  %v12736_v23 = vld [vmem:[%s13437_s22 + $0x560] sm:$0xff]  }
 0x24b   : > { %v14545_v26 = vpop.f32.mrf.mxu0  ;;  %v14547_v5 = vpop.f32.mrf.mxu1  ;;  %v12737_v61 = vld [vmem:[%s13437_s22 + $0x760] sm:$0xff]  }
 0x24c   : > { %15914 = vst [vmem:[#allocation182_spill] sm:$0xff] %v14545_v26  ;;  %15915 = vst [vmem:[#allocation183_spill] sm:$0xff] %v14547_v5 }
 0x24d   : > { %v14551_v45 = vpop.f32.mrf.mxu0  ;;  %v14553_v58 = vpop.f32.mrf.mxu1 }
 0x24e   : > { %15916 = vst [vmem:[#allocation184_spill] sm:$0xff] %v14551_v45  ;;  %15917 = vst [vmem:[#allocation185_spill] sm:$0xff] %v14553_v58 }
 0x24f   : > { %v14561_v29 = vpop.f32.mrf.mxu0  ;;  %v14563_v50 = vpop.f32.mrf.mxu1 }
 0x250   : > { %15918 = vst [vmem:[#allocation186_spill] sm:$0xff] %v14561_v29  ;;  %15919 = vst [vmem:[#allocation187_spill] sm:$0xff] %v14563_v50 }
 0x251   : > { %v14567_v5 = vpop.f32.mrf.mxu0  ;;  %v14569_v26 = vpop.f32.mrf.mxu1  ;;  %12289 = vmatmul.mubr.msk.bf16.gmra.mxu0 %vm4821_vm2, %v12734_v2  ;;  %12419 = vmatmul.mubr.msk.bf16.gmra.mxu1 %vm4821_vm2, %v12735_v17  ;;  %v12738_v2 = vld [vmem:[%s13437_s22 + $0x568] sm:$0xff]  }
 0x252   : > { %15920 = vst [vmem:[#allocation188_spill] sm:$0xff] %v14567_v5  ;;  %15921 = vst [vmem:[#allocation189_spill] sm:$0xff] %v14569_v26  ;;  %12292 = vmatprep.mubr.msk.bf16.mxu0 %vm4821_vm2, %v12736_v23  ;;  %12422 = vmatprep.mubr.msk.bf16.mxu1 %vm4821_vm2, %v12737_v61  ;;  %v12739_v17 = vld [vmem:[%s13437_s22 + $0x768] sm:$0xff]   ;;  %v12740_v26 = vld [vmem:[%s13437_s22 + $0x570] sm:$0xff]  }
 0x253   : > { %v14577_v58 = vpop.f32.mrf.mxu0  ;;  %v14579_v53 = vpop.f32.mrf.mxu1  ;;  %v12741_v23 = vld [vmem:[%s13437_s22 + $0x770] sm:$0xff]  }
 0x254   : > { %15922 = vst [vmem:[#allocation190_spill] sm:$0xff] %v14577_v58  ;;  %15923 = vst [vmem:[#allocation191_spill] sm:$0xff] %v14579_v53 }
 0x255   : > { %v14583_v29 = vpop.f32.mrf.mxu0  ;;  %v14585_v45 = vpop.f32.mrf.mxu1 }
 0x256   : > { %15924 = vst [vmem:[#allocation192_spill] sm:$0xff] %v14583_v29  ;;  %15925 = vst [vmem:[#allocation193_spill] sm:$0xff] %v14585_v45  ;;  %v12743_v29 = vld [vmem:[%s13437_s22 + $0x778] sm:$0xff]  }
 0x257   : > { %v14593_v61 = vpop.f32.mrf.mxu0  ;;  %v14595_v5 = vpop.f32.mrf.mxu1 }
 0x258   : > { %15926 = vst [vmem:[#allocation194_spill] sm:$0xff] %v14593_v61  ;;  %15927 = vst [vmem:[#allocation195_spill] sm:$0xff] %v14595_v5 }
 0x259   : > { %v14599_v53 = vpop.f32.mrf.mxu0  ;;  %v14601_v58 = vpop.f32.mrf.mxu1  ;;  %12293 = vmatmul.mubr.msk.bf16.gmra.mxu0 %vm4821_vm2, %v12738_v2  ;;  %12423 = vmatmul.mubr.msk.bf16.gmra.mxu1 %vm4821_vm2, %v12739_v17  ;;  %v12742_v17 = vld [vmem:[%s13437_s22 + $0x578] sm:$0xff]  }
 0x25a   : > { %15928 = vst [vmem:[#allocation196_spill] sm:$0xff] %v14599_v53  ;;  %15929 = vst [vmem:[#allocation197_spill] sm:$0xff] %v14601_v58  ;;  %12296 = vmatprep.mubr.msk.bf16.mxu0 %vm4821_vm2, %v12740_v26  ;;  %12426 = vmatprep.mubr.msk.bf16.mxu1 %vm4821_vm2, %v12741_v23  ;;  %v12744_v26 = vld [vmem:[%s13437_s22 + $0x580] sm:$0xff]  }
 0x25b   : > { %v14609_v50 = vpop.f32.mrf.mxu0  ;;  %v14611_v5 = vpop.f32.mrf.mxu1  ;;  %v12745_v58 = vld [vmem:[%s13437_s22 + $0x780] sm:$0xff]  }
 0x25c   : > { %15930 = vst [vmem:[#allocation198_spill] sm:$0xff] %v14609_v50  ;;  %15931 = vst [vmem:[#allocation199_spill] sm:$0xff] %v14611_v5  ;;  %v15946_v50 = vmax.f32 %v13657_v51, %v13659_v52 }
 0x25d   : > { %v14615_v45 = vpop.f32.mrf.mxu0  ;;  %v14617_v2 = vpop.f32.mrf.mxu1 }
 0x25e   : > { %15932 = vst [vmem:[#allocation200_spill] sm:$0xff] %v14615_v45  ;;  %15933 = vst [vmem:[#allocation201_spill] sm:$0xff] %v14617_v2  ;;  %v12747_v45 = vld [vmem:[%s13437_s22 + $0x788] sm:$0xff]  }
 0x25f   : > { %v14625_v53 = vpop.f32.mrf.mxu0  ;;  %v14627_v23 = vpop.f32.mrf.mxu1 }
 0x260   : > { %15934 = vst [vmem:[#allocation202_spill] sm:$0xff] %v14625_v53  ;;  %15935 = vst [vmem:[#allocation203_spill] sm:$0xff] %v14627_v23  ;;  %v14676_v53 = vld [vmem:[%s15524_s2] ss:$0 sm:$0xff] }
 0x261   : > { %v14633_v61 = vpop.f32.mrf.mxu0  ;;  %v14635_v5 = vpop.f32.mrf.mxu1  ;;  %12297 = vmatmul.mubr.msk.bf16.gmra.mxu0 %vm4821_vm2, %v12742_v17  ;;  %12427 = vmatmul.mubr.msk.bf16.gmra.mxu1 %vm4821_vm2, %v12743_v29  ;;  %v12746_v29 = vld [vmem:[%s13437_s22 + $0x588] sm:$0xff]  }
 0x262   : > { %15936 = vst [vmem:[#allocation204_spill] sm:$0xff] %v14633_v61  ;;  %15937 = vst [vmem:[#allocation205_spill] sm:$0xff] %v14635_v5  ;;  %12300 = vmatprep.mubr.msk.bf16.mxu0 %vm4821_vm2, %v12744_v26  ;;  %12430 = vmatprep.mubr.msk.bf16.mxu1 %vm4821_vm2, %v12745_v58  ;;  %v12749_v58 = vld [vmem:[%s13437_s22 + $0x790] sm:$0xff]   ;;  %v15944_v26 = vmax.f32 %v13639_v43, %v13642_v44 }
 0x263   : > { %v14643_v37 = vpop.f32.mrf.mxu0  ;;  %v14645_v23 = vpop.f32.mrf.mxu1 }
 0x264   : > { %15938 = vst [vmem:[#allocation206_spill] sm:$0xff] %v14643_v37  ;;  %15939 = vst [vmem:[#allocation207_spill] sm:$0xff] %v14645_v23 }
 0x265   : > { %v14650_v17 = vpop.f32.mrf.mxu0  ;;  %v14652_v2 = vpop.f32.mrf.mxu1 }
 0x266   : > { %15940 = vst [vmem:[#allocation208_spill] sm:$0xff] %v14650_v17  ;;  %15941 = vst [vmem:[#allocation209_spill] sm:$0xff] %v14652_v2 }
 0x267   : > { %v14660_v5 = vpop.f32.mrf.mxu0  ;;  %v14662_v61 = vpop.f32.mrf.mxu1 }
 0x268   : > { %15942 = vst [vmem:[#allocation210_spill] sm:$0xff] %v14660_v5  ;;  %15943 = vst [vmem:[#allocation211_spill] sm:$0xff] %v14662_v61 }
 0x269   : > { %v12206_v23 = vpop.f32.mrf.mxu0  ;;  %12301 = vmatmul.mubr.msk.bf16.gmra.mxu0 %vm4821_vm2, %v12746_v29  ;;  %v12336_v37 = vpop.f32.mrf.mxu1  ;;  %12431 = vmatmul.mubr.msk.bf16.gmra.mxu1 %vm4821_vm2, %v12747_v45  ;;  %v15945_v45 = vmax.f32 %v13649_v46, %v13651_v47 }
 0x26a   : > { %v8068_v2 = vmax.f32 %v15944_v26, %v12206_v23  ;;  %12304 = vmatprep.mubr.msk.bf16.mxu0 %vm4821_vm2, %v12748_v22  ;;  %12434 = vmatprep.mubr.msk.bf16.mxu1 %vm4821_vm2, %v12749_v58  ;;  %v12750_v22 = vld [vmem:[%s13437_s22 + $0x598] sm:$0xff]  }
 0x26b   : > { %v7555_v29 = vpop.f32.mrf.mxu0  ;;  %v8869_v61 = vpop.f32.mrf.mxu1  ;;  %v12751_v26 = vld [vmem:[%s13437_s22 + $0x798] sm:$0xff]  }
 0x26c   : > { %v9382_v5 = vmax.f32 %v8068_v2, %v12336_v37  ;;  %v8066_v43 = vmax.f32 %v15945_v45, %v7555_v29  ;;  %v15947_v29 = vmax.f32 %v13665_v56, %v13667_v57  ;;  %v15948_v57 = vmax.f32 %v13671_v59, %v13674_v60  ;;  %v12754_v59 = vld [vmem:[%s13437_s22 + $0x5a8] sm:$0xff]  }
 0x26d   : > { %v12207_v44 = vpop.f32.mrf.mxu0  ;;  %v12337_v23 = vpop.f32.mrf.mxu1  ;;  %v12755_v60 = vld [vmem:[%s13437_s22 + $0x7a8] sm:$0xff]  }
 0x26e   : > { %v9517_v58 = vadd.f32 %v14676_v53, %v9382_v5  ;;  %v9380_v17 = vmax.f32 %v8066_v43, %v8869_v61  ;;  %v8069_v10 = vmax.f32 %v15946_v50, %v12207_v44 }
 0x26f   : > { %v7558_v21 = vpop.f32.mrf.mxu0  ;;  %v8872_v37 = vpop.f32.mrf.mxu1 }
 0x270   : > { %v9645_v2 = vmax.f32 %v9517_v58, 0.0  ;;  %v9515_v46 = vadd.f32 %v14676_v53, %v9380_v17  ;;  %v9383_v47 = vmax.f32 %v8069_v10, %v12337_v23  ;;  %v8067_v45 = vmax.f32 %v15947_v29, %v7558_v21 }
 0x271   : > { %v12210_v50 = vpop.f32.mrf.mxu0  ;;  %12305 = vmatmul.mubr.msk.bf16.gmra.mxu0 %vm4821_vm2, %v12750_v22  ;;  %v12340_v51 = vpop.f32.mrf.mxu1  ;;  %12435 = vmatmul.mubr.msk.bf16.gmra.mxu1 %vm4821_vm2, %v12751_v26  ;;  %v15949_v22 = vmax.f32 %v13681_v62, %v13683_v63 }
 0x272   : > { %v11556_v52 = vpack.c.bf16 %v9645_v2, %v9645_v2  ;;  %v9643_v5 = vmax.f32 %v9515_v46, 0.0  ;;  %v9518_v10 = vadd.f32 %v14676_v53, %v9383_v47  ;;  %v9381_v56 = vmax.f32 %v8067_v45, %v8872_v37  ;;  %12308 = vmatprep.mubr.msk.bf16.mxu0 %vm4821_vm2, %v12752_v13  ;;  %12438 = vmatprep.mubr.msk.bf16.mxu1 %vm4821_vm2, %v12753_v18  ;;  %v12756_v45 = vld [vmem:[%s13437_s22 + $0x5b0] sm:$0xff]  }
 0x273   : > { %v8072_v21 = vmax.f32 %v15948_v57, %v12210_v50  ;;  %v7571_v61 = vpop.f32.mrf.mxu0  ;;  %v8885_v17 = vpop.f32.mrf.mxu1  ;;  %v15950_v47 = vmax.f32 %v13689_v3, %v13691_v4  ;;  %v12757_v50 = vld [vmem:[%s13437_s22 + $0x7b0] sm:$0xff]  }
 0x274   : > { %10286 = vst.msk [vmem:[%s14696_s29 + $0x8] sm:$0xf] %vm10283_vm3, %v11556_v52  ;;  %v11554_v43 = vpack.c.bf16 %v9643_v5, %v9643_v5  ;;  %v9646_v44 = vmax.f32 %v9518_v10, 0.0  ;;  %v9516_v23 = vadd.f32 %v14676_v53, %v9381_v56  ;;  %v8070_v13 = vmax.f32 %v15949_v22, %v7571_v61 }
 0x275   : > { %v9386_v18 = vmax.f32 %v8072_v21, %v12340_v51  ;;  %v12211_v26 = vpop.f32.mrf.mxu0  ;;  %v12341_v58 = vpop.f32.mrf.mxu1  ;;  %v15951_v56 = vmax.f32 %v13697_v8, %v13699_v9 }
 0x276   : > { %10284 = vst.msk [vmem:[%s14696_s29] sm:$0xf] %vm10283_vm3, %v11554_v43  ;;  %v11557_v37 = vpack.c.bf16 %v9646_v44, %v9646_v44  ;;  %v9644_v2 = vmax.f32 %v9516_v23, 0.0  ;;  %v9384_v46 = vmax.f32 %v8070_v13, %v8885_v17  ;;  %v8073_v29 = vmax.f32 %v15950_v47, %v12211_v26 }
 0x277   : > { %v9521_v62 = vadd.f32 %v14676_v53, %v9386_v18  ;;  %v7574_v63 = vpop.f32.mrf.mxu0  ;;  %v8888_v51 = vpop.f32.mrf.mxu1  ;;  %v15952_v44 = vmax.f32 %v13703_v11, %v13706_v12  ;;  %v15953_v11 = vmax.f32 %v13713_v14, %v13715_v15 }
 0x278   : > { %10287 = vst.msk [vmem:[%s14696_s29 + $0xc] sm:$0xf] %vm10283_vm3, %v11557_v37  ;;  %v11555_v52 = vpack.c.bf16 %v9644_v2, %v9644_v2  ;;  %v9519_v5 = vadd.f32 %v14676_v53, %v9384_v46  ;;  %v9387_v10 = vmax.f32 %v8073_v29, %v12341_v58  ;;  %v8071_v57 = vmax.f32 %v15951_v56, %v7574_v63  ;;  %v12758_v37 = vld [vmem:[%s13437_s22 + $0x5b8] sm:$0xff]  }
 0x279   : > { %v9649_v21 = vmax.f32 %v9521_v62, 0.0  ;;  %v12214_v3 = vpop.f32.mrf.mxu0  ;;  %12309 = vmatmul.mubr.msk.bf16.gmra.mxu0 %vm4821_vm2, %v12754_v59  ;;  %v12344_v4 = vpop.f32.mrf.mxu1  ;;  %12439 = vmatmul.mubr.msk.bf16.gmra.mxu1 %vm4821_vm2, %v12755_v60  ;;  %v12759_v2 = vld [vmem:[%s13437_s22 + $0x7b8] sm:$0xff]   ;;  %v12760_v62 = vld [vmem:[%s13437_s22 + $0x5c0] sm:$0xff]   ;;  %v15955_v56 = vmax.f32 %v13729_v24, %v13731_v25  ;;  %v15956_v24 = vmax.f32 %v13735_v27, %v13738_v28  ;;  %v15957_v27 = vmax.f32 %v13745_v30, %v13747_v31 }
 0x27a   : > { %10285 = vst.msk [vmem:[%s14696_s29 + $0x4] sm:$0xf] %vm10283_vm3, %v11555_v52  ;;  %v9647_v61 = vmax.f32 %v9519_v5, 0.0  ;;  %v9522_v17 = vadd.f32 %v14676_v53, %v9387_v10  ;;  %v9385_v43 = vmax.f32 %v8071_v57, %v8888_v51  ;;  %v8076_v8 = vmax.f32 %v15952_v44, %v12214_v3  ;;  %12312 = vmatprep.mubr.msk.bf16.mxu0 %vm4821_vm2, %v12756_v45  ;;  %v12761_v51 = vld [vmem:[%s13437_s22 + $0x7c0] sm:$0xff]  }
 0x27b   : > { %12442 = vmatprep.mubr.msk.bf16.mxu1 %vm4821_vm2, %v12757_v50  ;;  %v11560_v9 = vpack.c.bf16 %v9649_v21, %v9649_v21  ;;  %v7587_v23 = vpop.f32.mrf.mxu0  ;;  %v8901_v22 = vpop.f32.mrf.mxu1  ;;  %v15954_v45 = vmax.f32 %v13721_v19, %v13723_v20  ;;  %v15958_v30 = vmax.f32 %v13753_v35, %v13755_v36 }
 0x27c   : > { %v11558_v13 = vpack.c.bf16 %v9647_v61, %v9647_v61  ;;  %v9650_v18 = vmax.f32 %v9522_v17, 0.0  ;;  %v9520_v26 = vadd.f32 %v14676_v53, %v9385_v43  ;;  %v9390_v58 = vmax.f32 %v8076_v8, %v12344_v4 }
 0x27d   : > { %10290 = vst.msk [vmem:[%s14696_s29 + $0x18] sm:$0xf] %vm10283_vm3, %v11560_v9  ;;  %v8074_v12 = vmax.f32 %v15953_v11, %v7587_v23  ;;  %v12215_v59 = vpop.f32.mrf.mxu0  ;;  %v12345_v60 = vpop.f32.mrf.mxu1 }
 0x27e   : > { %10288 = vst.msk [vmem:[%s14696_s29 + $0x10] sm:$0xf] %vm10283_vm3, %v11558_v13  ;;  %v11561_v46 = vpack.c.bf16 %v9650_v18, %v9650_v18  ;;  %v9648_v47 = vmax.f32 %v9520_v26, 0.0  ;;  %v9525_v29 = vadd.f32 %v14676_v53, %v9390_v58  ;;  %v8077_v50 = vmax.f32 %v15954_v45, %v12215_v59  ;;  %v12762_v26 = vld [vmem:[%s13437_s22 + $0x5c8] sm:$0xff]  }
 0x27f   : > { %v9388_v63 = vmax.f32 %v8074_v12, %v8901_v22  ;;  %v7590_v14 = vpop.f32.mrf.mxu0  ;;  %v8904_v15 = vpop.f32.mrf.mxu1  ;;  %v12763_v58 = vld [vmem:[%s13437_s22 + $0x7c8] sm:$0xff]  }
 0x280   : > { %10291 = vst.msk [vmem:[%s14696_s29 + $0x1c] sm:$0xf] %vm10283_vm3, %v11561_v46  ;;  %v11559_v52 = vpack.c.bf16 %v9648_v47, %v9648_v47  ;;  %v9653_v5 = vmax.f32 %v9525_v29, 0.0  ;;  %v9391_v10 = vmax.f32 %v8077_v50, %v12345_v60  ;;  %v8075_v57 = vmax.f32 %v15955_v56, %v7590_v14 }
 0x281   : > { %v9523_v21 = vadd.f32 %v14676_v53, %v9388_v63  ;;  %v12218_v19 = vpop.f32.mrf.mxu0  ;;  %12313 = vmatmul.mubr.msk.bf16.gmra.mxu0 %vm4821_vm2, %v12758_v37  ;;  %v12348_v20 = vpop.f32.mrf.mxu1  ;;  %12443 = vmatmul.mubr.msk.bf16.gmra.mxu1 %vm4821_vm2, %v12759_v2  ;;  %v12764_v37 = vld [vmem:[%s13437_s22 + $0x5d0] sm:$0xff]  }
 0x282   : > { %10289 = vst.msk [vmem:[%s14696_s29 + $0x14] sm:$0xf] %vm10283_vm3, %v11559_v52  ;;  %v11564_v3 = vpack.c.bf16 %v9653_v5, %v9653_v5  ;;  %v9526_v4 = vadd.f32 %v14676_v53, %v9391_v10  ;;  %v9389_v61 = vmax.f32 %v8075_v57, %v8904_v15  ;;  %v8080_v25 = vmax.f32 %v15956_v24, %v12218_v19  ;;  %v12765_v2 = vld [vmem:[%s13437_s22 + $0x7d0] sm:$0xff]   ;;  %v12767_v24 = vld [vmem:[%s13437_s22 + $0x7d8] sm:$0xff]  }
 0x283   : > { %12316 = vmatprep.mubr.msk.bf16.mxu0 %vm4821_vm2, %v12760_v62  ;;  %v9651_v17 = vmax.f32 %v9523_v21, 0.0  ;;  %v7603_v43 = vpop.f32.mrf.mxu0  ;;  %v8917_v44 = vpop.f32.mrf.mxu1  ;;  %12446 = vmatprep.mubr.msk.bf16.mxu1 %vm4821_vm2, %v12761_v51  ;;  %v15959_v62 = vmax.f32 %v13761_v40, %v13763_v41  ;;  %v15960_v5 = vmax.f32 %v13767_v48, %v13770_v49  ;;  %v15961_v48 = vmax.f32 %v13777_v55, %v13779_v0  ;;  %v12769_v55 = vld [vmem:[%s13437_s22 + $0x7e0] sm:$0xff]  }
 0x284   : > { %10294 = vst.msk [vmem:[%s14696_s29 + $0x28] sm:$0xf] %vm10283_vm3, %v11564_v3  ;;  %v9654_v8 = vmax.f32 %v9526_v4, 0.0  ;;  %v9524_v9 = vadd.f32 %v14676_v53, %v9389_v61  ;;  %v9394_v23 = vmax.f32 %v8080_v25, %v12348_v20  ;;  %v8078_v28 = vmax.f32 %v15957_v27, %v7603_v43  ;;  %v12766_v61 = vld [vmem:[%s13437_s22 + $0x5d8] sm:$0xff]  }
 0x285   : > { %v11562_v22 = vpack.c.bf16 %v9651_v17, %v9651_v17  ;;  %v12219_v13 = vpop.f32.mrf.mxu0  ;;  %v12349_v18 = vpop.f32.mrf.mxu1 }
 0x286   : > { %v11565_v11 = vpack.c.bf16 %v9654_v8, %v9654_v8  ;;  %v9652_v12 = vmax.f32 %v9524_v9, 0.0  ;;  %v9529_v59 = vadd.f32 %v14676_v53, %v9394_v23  ;;  %v9392_v60 = vmax.f32 %v8078_v28, %v8917_v44  ;;  %v12768_v9 = vld [vmem:[%s13437_s22 + $0x5e0] sm:$0xff]  }
 0x287   : > { %10292 = vst.msk [vmem:[%s14696_s29 + $0x20] sm:$0xf] %vm10283_vm3, %v11562_v22  ;;  %v8081_v31 = vmax.f32 %v15958_v30, %v12219_v13  ;;  %v7606_v46 = vpop.f32.mrf.mxu0  ;;  %v8920_v47 = vpop.f32.mrf.mxu1  ;;  %v15962_v44 = vmax.f32 %v13783_v6, %v13785_v7 }
 0x288   : > { %10295 = vst.msk [vmem:[%s14696_s29 + $0x2c] sm:$0xf] %vm10283_vm3, %v11565_v11  ;;  %v11563_v29 = vpack.c.bf16 %v9652_v12, %v9652_v12  ;;  %v9657_v45 = vmax.f32 %v9529_v59, 0.0  ;;  %v9527_v50 = vadd.f32 %v14676_v53, %v9392_v60  ;;  %v8079_v63 = vmax.f32 %v15959_v62, %v7606_v46  ;;  %v12771_v62 = vld [vmem:[%s13437_s22 + $0x7e8] sm:$0xff]  }
 0x289   : > { %v9395_v14 = vmax.f32 %v8081_v31, %v12349_v18  ;;  %v12222_v15 = vpop.f32.mrf.mxu0  ;;  %12317 = vmatmul.mubr.msk.bf16.gmra.mxu0 %vm4821_vm2, %v12762_v26  ;;  %v12352_v51 = vpop.f32.mrf.mxu1  ;;  %12447 = vmatmul.mubr.msk.bf16.gmra.mxu1 %vm4821_vm2, %v12763_v58  ;;  %v15963_v26 = vmax.f32 %v13793_v33, %v13795_v38  ;;  %v15964_v60 = vmax.f32 %v13799_v1, %v13802_v54 }
 0x28a   : > { %10293 = vst.msk [vmem:[%s14696_s29 + $0x24] sm:$0xf] %vm10283_vm3, %v11563_v29  ;;  %v11568_v35 = vpack.c.bf16 %v9657_v45, %v9657_v45  ;;  %v9655_v36 = vmax.f32 %v9527_v50, 0.0  ;;  %v9393_v52 = vmax.f32 %v8079_v63, %v8920_v47  ;;  %v8084_v40 = vmax.f32 %v15960_v5, %v12222_v15  ;;  %12320 = vmatprep.mubr.msk.bf16.mxu0 %vm4821_vm2, %v12764_v37  ;;  %v12770_v50 = vld [vmem:[%s13437_s22 + $0x5e8] sm:$0xff]  }
 0x28b   : > { %12450 = vmatprep.mubr.msk.bf16.mxu1 %vm4821_vm2, %v12765_v2  ;;  %v9530_v41 = vadd.f32 %v14676_v53, %v9395_v14  ;;  %v7619_v10 = vpop.f32.mrf.mxu0  ;;  %v8933_v56 = vpop.f32.mrf.mxu1  ;;  %v15965_v54 = vmax.f32 %v13809_v42, %v13811_v39  ;;  %v12773_v42 = vld [vmem:[%s13437_s22 + $0x7f0] sm:$0xff]  }
 0x28c   : > { %10298 = vst.msk [vmem:[%s14696_s29 + $0x38] sm:$0xf] %vm10283_vm3, %v11568_v35  ;;  %v11566_v57 = vpack.c.bf16 %v9655_v36, %v9655_v36  ;;  %v9528_v21 = vadd.f32 %v14676_v53, %v9393_v52  ;;  %v9398_v19 = vmax.f32 %v8084_v40, %v12352_v51  ;;  %v8082_v49 = vmax.f32 %v15961_v48, %v7619_v10  ;;  %v12772_v36 = vld [vmem:[%s13437_s22 + $0x5f0] sm:$0xff]  }
 0x28d   : > { %v9658_v20 = vmax.f32 %v9530_v41, 0.0  ;;  %v12223_v3 = vpop.f32.mrf.mxu0  ;;  %v12353_v4 = vpop.f32.mrf.mxu1  ;;  %v15966_v51 = vmax.f32 %v13815_v34, %v13817_v16 }
 0x28e   : > { %10296 = vst.msk [vmem:[%s14696_s29 + $0x30] sm:$0xf] %vm10283_vm3, %v11566_v57  ;;  %v9656_v25 = vmax.f32 %v9528_v21, 0.0  ;;  %v9533_v17 = vadd.f32 %v14676_v53, %v9398_v19  ;;  %v9396_v43 = vmax.f32 %v8082_v49, %v8933_v56  ;;  %v8085_v8 = vmax.f32 %v15962_v44, %v12223_v3  ;;  %v15967_v56 = vld [vmem:[#allocation3_spill] sm:$0xff] }
 0x28f   : > { %v11569_v0 = vpack.c.bf16 %v9658_v20, %v9658_v20  ;;  %v7622_v23 = vpop.f32.mrf.mxu0  ;;  %v8936_v27 = vpop.f32.mrf.mxu1  ;;  %v15968_v57 = vmax.f32 %v13825_v32, %v15967_v56  ;;  %v15969_v32 = vld [vmem:[#allocation4_spill] sm:$0xff]  ;;  %v15985_v56 = vld [vmem:[#allocation15_spill] sm:$0xff] }
 0x290   : > { %v11567_v28 = vpack.c.bf16 %v9656_v25, %v9656_v25  ;;  %v9661_v22 = vmax.f32 %v9533_v17, 0.0  ;;  %v9531_v13 = vadd.f32 %v14676_v53, %v9396_v43  ;;  %v9399_v18 = vmax.f32 %v8085_v8, %v12353_v4  ;;  %v15970_v4 = vld [vmem:[#allocation5_spill] sm:$0xff] }
 0x291   : > { %10299 = vst.msk [vmem:[%s14696_s29 + $0x3c] sm:$0xf] %vm10283_vm3, %v11569_v0  ;;  %v8083_v58 = vmax.f32 %v15963_v26, %v7622_v23  ;;  %v12226_v6 = vpop.f32.mrf.mxu0  ;;  %12321 = vmatmul.mubr.msk.bf16.gmra.mxu0 %vm4821_vm2, %v12766_v61  ;;  %v12356_v7 = vpop.f32.mrf.mxu1  ;;  %12451 = vmatmul.mubr.msk.bf16.gmra.mxu1 %vm4821_vm2, %v12767_v24  ;;  %v15971_v61 = vmax.f32 %v15969_v32, %v15970_v4 }
 0x292   : > { %10297 = vst.msk [vmem:[%s14696_s29 + $0x34] sm:$0xf] %vm10283_vm3, %v11567_v28  ;;  %v11572_v11 = vpack.c.bf16 %v9661_v22, %v9661_v22  ;;  %v9659_v12 = vmax.f32 %v9531_v13, 0.0  ;;  %v9534_v59 = vadd.f32 %v14676_v53, %v9399_v18  ;;  %v8088_v33 = vmax.f32 %v15964_v60, %v12226_v6  ;;  %12324 = vmatprep.mubr.msk.bf16.mxu0 %vm4821_vm2, %v12768_v9  ;;  %v15972_v9 = vld [vmem:[#allocation6_spill] sm:$0xff] }
 0x293   : > { %12454 = vmatprep.mubr.msk.bf16.mxu1 %vm4821_vm2, %v12769_v55  ;;  %v9397_v38 = vmax.f32 %v8083_v58, %v8936_v27  ;;  %v7635_v37 = vpop.f32.mrf.mxu0  ;;  %v8949_v2 = vpop.f32.mrf.mxu1  ;;  %v15973_v55 = vld [vmem:[#allocation7_spill] sm:$0xff]  ;;  %v12774_v13 = vld [vmem:[%s13437_s22 + $0x5f8] sm:$0xff]  }
 0x294   : > { %10302 = vst.msk [vmem:[%s14696_s29 + $0x48] sm:$0xf] %vm10283_vm3, %v11572_v11  ;;  %v11570_v30 = vpack.c.bf16 %v9659_v12, %v9659_v12  ;;  %v9662_v31 = vmax.f32 %v9534_v59, 0.0  ;;  %v9402_v46 = vmax.f32 %v8088_v33, %v12356_v7  ;;  %v8086_v1 = vmax.f32 %v15965_v54, %v7635_v37  ;;  %v12775_v18 = vld [vmem:[%s13437_s22 + $0x7f8] sm:$0xff]   ;;  %v15975_v7 = vld [vmem:[#allocation8_spill] sm:$0xff]  ;;  %v15976_v11 = vld [vmem:[#allocation9_spill] sm:$0xff] }
 0x295   : > { %v9532_v47 = vadd.f32 %v14676_v53, %v9397_v38  ;;  %v12227_v29 = vpop.f32.mrf.mxu0  ;;  %v12357_v45 = vpop.f32.mrf.mxu1  ;;  %v15974_v0 = vmax.f32 %v15972_v9, %v15973_v55  ;;  %v15977_v12 = vmax.f32 %v15975_v7, %v15976_v11  ;;  %v15991_v9 = vld [vmem:[#allocation19_spill] sm:$0xff] }
 0x296   : > { %10300 = vst.msk [vmem:[%s14696_s29 + $0x40] sm:$0xf] %vm10283_vm3, %v11570_v30  ;;  %v11573_v63 = vpack.c.bf16 %v9662_v31, %v9662_v31  ;;  %v9537_v14 = vadd.f32 %v14676_v53, %v9402_v46  ;;  %v9400_v15 = vmax.f32 %v8086_v1, %v8949_v2  ;;  %v8089_v35 = vmax.f32 %v15966_v51, %v12227_v29  ;;  %v15978_v31 = vld [vmem:[#allocation10_spill] sm:$0xff]  ;;  %v15979_v46 = vld [vmem:[#allocation11_spill] sm:$0xff] }
 0x297   : > { %v9660_v39 = vmax.f32 %v9532_v47, 0.0  ;;  %v7638_v52 = vpop.f32.mrf.mxu0  ;;  %v8952_v5 = vpop.f32.mrf.mxu1  ;;  %v15980_v54 = vmax.f32 %v15978_v31, %v15979_v46 }
 0x298   : > { %10303 = vst.msk [vmem:[%s14696_s29 + $0x4c] sm:$0xf] %vm10283_vm3, %v11573_v63  ;;  %v9665_v40 = vmax.f32 %v9537_v14, 0.0  ;;  %v9535_v41 = vadd.f32 %v14676_v53, %v9400_v15  ;;  %v9403_v10 = vmax.f32 %v8089_v35, %v12357_v45  ;;  %v8087_v21 = vmax.f32 %v15968_v57, %v7638_v52  ;;  %v15981_v14 = vld [vmem:[#allocation12_spill] sm:$0xff]  ;;  %v15982_v15 = vld [vmem:[#allocation13_spill] sm:$0xff] }
 0x299   : > { %v11571_v19 = vpack.c.bf16 %v9660_v39, %v9660_v39  ;;  %v12230_v34 = vpop.f32.mrf.mxu0  ;;  %12325 = vmatmul.mubr.msk.bf16.gmra.mxu0 %vm4821_vm2, %v12770_v50  ;;  %v12360_v16 = vpop.f32.mrf.mxu1  ;;  %12455 = vmatmul.mubr.msk.bf16.gmra.mxu1 %vm4821_vm2, %v12771_v62  ;;  %v15983_v51 = vmax.f32 %v15981_v14, %v15982_v15 }
 0x29a   : > { %v11576_v48 = vpack.c.bf16 %v9665_v40, %v9665_v40  ;;  %v9663_v49 = vmax.f32 %v9535_v41, 0.0  ;;  %v9538_v20 = vadd.f32 %v14676_v53, %v9403_v10  ;;  %v9401_v3 = vmax.f32 %v8087_v21, %v8952_v5  ;;  %12328 = vmatprep.mubr.msk.bf16.mxu0 %vm4821_vm2, %v12772_v36  ;;  %12458 = vmatprep.mubr.msk.bf16.mxu1 %vm4821_vm2, %v12773_v42  ;;  %v15984_v10 = vld [vmem:[#allocation14_spill] sm:$0xff] }
 0x29b   : > { %10301 = vst.msk [vmem:[%s14696_s29 + $0x44] sm:$0xf] %vm10283_vm3, %v11571_v19  ;;  %v8092_v24 = vmax.f32 %v15971_v61, %v12230_v34  ;;  %v7651_v25 = vpop.f32.mrf.mxu0  ;;  %v8965_v17 = vpop.f32.mrf.mxu1  ;;  %v15986_v57 = vmax.f32 %v15984_v10, %v15985_v56 }
 0x29c   : > { %10306 = vst.msk [vmem:[%s14696_s29 + $0x58] sm:$0xf] %vm10283_vm3, %v11576_v48  ;;  %v11574_v43 = vpack.c.bf16 %v9663_v49, %v9663_v49  ;;  %v9666_v44 = vmax.f32 %v9538_v20, 0.0  ;;  %v9536_v8 = vadd.f32 %v14676_v53, %v9401_v3  ;;  %v8090_v23 = vmax.f32 %v15974_v0, %v7651_v25  ;;  %v15987_v20 = vld [vmem:[#allocation16_spill] sm:$0xff]  ;;  %v15988_v3 = vld [vmem:[#allocation17_spill] sm:$0xff] }
 0x29d   : > { %v9406_v27 = vmax.f32 %v8092_v24, %v12360_v16  ;;  %v12231_v28 = vpop.f32.mrf.mxu0  ;;  %v12361_v22 = vpop.f32.mrf.mxu1  ;;  %v15989_v32 = vmax.f32 %v15987_v20, %v15988_v3 }
 0x29e   : > { %10304 = vst.msk [vmem:[%s14696_s29 + $0x50] sm:$0xf] %vm10283_vm3, %v11574_v43  ;;  %v11577_v26 = vpack.c.bf16 %v9666_v44, %v9666_v44  ;;  %v9664_v58 = vmax.f32 %v9536_v8, 0.0  ;;  %v9404_v6 = vmax.f32 %v8090_v23, %v8965_v17  ;;  %v8093_v59 = vmax.f32 %v15977_v12, %v12231_v28  ;;  %v15990_v8 = vld [vmem:[#allocation18_spill] sm:$0xff] }
 0x29f   : > { %v9541_v60 = vadd.f32 %v14676_v53, %v9406_v27  ;;  %v7654_v33 = vpop.f32.mrf.mxu0  ;;  %v8968_v38 = vpop.f32.mrf.mxu1  ;;  %v15992_v55 = vmax.f32 %v15990_v8, %v15991_v9 }
 0x2a0   : > { %10307 = vst.msk [vmem:[%s14696_s29 + $0x5c] sm:$0xf] %vm10283_vm3, %v11577_v26  ;;  %v11575_v37 = vpack.c.bf16 %v9664_v58, %v9664_v58  ;;  %v9539_v2 = vadd.f32 %v14676_v53, %v9404_v6  ;;  %v9407_v30 = vmax.f32 %v8093_v59, %v12361_v22  ;;  %v8091_v1 = vmax.f32 %v15980_v54, %v7654_v33  ;;  %v15993_v26 = vld [vmem:[#allocation20_spill] sm:$0xff]  ;;  %v15994_v58 = vld [vmem:[#allocation21_spill] sm:$0xff] }
 0x2a1   : > { %v9669_v47 = vmax.f32 %v9541_v60, 0.0  ;;  %v12234_v29 = vpop.f32.mrf.mxu0  ;;  %12329 = vmatmul.mubr.msk.bf16.gmra.mxu0 %vm4821_vm2, %v12774_v13  ;;  %v12364_v45 = vpop.f32.mrf.mxu1  ;;  %12459 = vmatmul.mubr.msk.bf16.gmra.mxu1 %vm4821_vm2, %v12775_v18  ;;  %v15995_v6 = vmax.f32 %v15993_v26, %v15994_v58 }
 0x2a2   : > { %10305 = vst.msk [vmem:[%s14696_s29 + $0x54] sm:$0xf] %vm10283_vm3, %v11575_v37  ;;  %v9667_v50 = vmax.f32 %v9539_v2, 0.0  ;;  %v9542_v62 = vadd.f32 %v14676_v53, %v9407_v30  ;;  %v9405_v63 = vmax.f32 %v8091_v1, %v8968_v38  ;;  %v8096_v35 = vmax.f32 %v15983_v51, %v12234_v29  ;;  %v15996_v37 = vld [vmem:[#allocation22_spill] sm:$0xff]  ;;  %v15997_v2 = vld [vmem:[#allocation23_spill] sm:$0xff] }
 0x2a3   : > { %v11580_v36 = vpack.c.bf16 %v9669_v47, %v9669_v47  ;;  %v7667_v42 = vpop.f32.mrf.mxu0  ;;  %v8981_v39 = vpop.f32.mrf.mxu1  ;;  %v15998_v30 = vmax.f32 %v15996_v37, %v15997_v2 }
 0x2a4   : > { %v11578_v52 = vpack.c.bf16 %v9667_v50, %v9667_v50  ;;  %v9670_v5 = vmax.f32 %v9542_v62, 0.0  ;;  %v9540_v40 = vadd.f32 %v14676_v53, %v9405_v63  ;;  %v9410_v41 = vmax.f32 %v8096_v35, %v12364_v45  ;;  %v15999_v62 = vld [vmem:[#allocation24_spill] sm:$0xff]  ;;  %v16000_v63 = vld [vmem:[#allocation25_spill] sm:$0xff] }
 0x2a5   : > { %10310 = vst.msk [vmem:[%s14696_s29 + $0x68] sm:$0xf] %vm10283_vm3, %v11580_v36  ;;  %v8094_v21 = vmax.f32 %v15986_v57, %v7667_v42  ;;  %v12235_v19 = vpop.f32.mrf.mxu0  ;;  %v12365_v34 = vpop.f32.mrf.mxu1  ;;  %v16001_v14 = vmax.f32 %v15999_v62, %v16000_v63 }
 0x2a6   : > { %10308 = vst.msk [vmem:[%s14696_s29 + $0x60] sm:$0xf] %vm10283_vm3, %v11578_v52  ;;  %v11581_v16 = vpack.c.bf16 %v9670_v5, %v9670_v5  ;;  %v9668_v48 = vmax.f32 %v9540_v40, 0.0  ;;  %v9545_v49 = vadd.f32 %v14676_v53, %v9410_v41  ;;  %v8097_v4 = vmax.f32 %v15989_v32, %v12235_v19  ;;  %v16002_v52 = vld [vmem:[#allocation26_spill] sm:$0xff]  ;;  %v16003_v5 = vld [vmem:[#allocation27_spill] sm:$0xff] }
 0x2a7   : > { %v9408_v61 = vmax.f32 %v8094_v21, %v8981_v39  ;;  %v7670_v24 = vpop.f32.mrf.mxu0  ;;  %v8984_v25 = vpop.f32.mrf.mxu1  ;;  %v16004_v40 = vmax.f32 %v16002_v52, %v16003_v5 }
 0x2a8   : > { %10311 = vst.msk [vmem:[%s14696_s29 + $0x6c] sm:$0xf] %vm10283_vm3, %v11581_v16  ;;  %v11579_v17 = vpack.c.bf16 %v9668_v48, %v9668_v48  ;;  %v9673_v43 = vmax.f32 %v9545_v49, 0.0  ;;  %v9411_v44 = vmax.f32 %v8097_v4, %v12365_v34  ;;  %v8095_v0 = vmax.f32 %v15992_v55, %v7670_v24  ;;  %v16005_v16 = vld [vmem:[#allocation28_spill] sm:$0xff]  ;;  %v16006_v48 = vld [vmem:[#allocation29_spill] sm:$0xff] }
 0x2a9   : > { %v9543_v23 = vadd.f32 %v14676_v53, %v9408_v61  ;;  %v12238_v27 = vpop.f32.mrf.mxu0  ;;  %v12368_v28 = vpop.f32.mrf.mxu1  ;;  %v16007_v49 = vmax.f32 %v16005_v16, %v16006_v48 }
 0x2aa   : > { %10309 = vst.msk [vmem:[%s14696_s29 + $0x64] sm:$0xf] %vm10283_vm3, %v11579_v17  ;;  %v11584_v22 = vpack.c.bf16 %v9673_v43, %v9673_v43  ;;  %v9546_v13 = vadd.f32 %v14676_v53, %v9411_v44  ;;  %v9409_v18 = vmax.f32 %v8095_v0, %v8984_v25  ;;  %v8100_v7 = vmax.f32 %v15995_v6, %v12238_v27  ;;  %v16008_v17 = vld [vmem:[#allocation30_spill] sm:$0xff]  ;;  %v16009_v43 = vld [vmem:[#allocation31_spill] sm:$0xff] }
 0x2ab   : > { %v9671_v11 = vmax.f32 %v9543_v23, 0.0  ;;  %v7683_v12 = vpop.f32.mrf.mxu0  ;;  %v8997_v59 = vpop.f32.mrf.mxu1  ;;  %v16010_v44 = vmax.f32 %v16008_v17, %v16009_v43 }
 0x2ac   : > { %10314 = vst.msk [vmem:[%s14696_s29 + $0x78] sm:$0xf] %vm10283_vm3, %v11584_v22  ;;  %v9674_v60 = vmax.f32 %v9546_v13, 0.0  ;;  %v9544_v33 = vadd.f32 %v14676_v53, %v9409_v18  ;;  %v9414_v38 = vmax.f32 %v8100_v7, %v12368_v28  ;;  %v8098_v31 = vmax.f32 %v15998_v30, %v7683_v12  ;;  %v16011_v22 = vld [vmem:[#allocation32_spill] sm:$0xff]  ;;  %v16012_v13 = vld [vmem:[#allocation33_spill] sm:$0xff] }
 0x2ad   : > { %v11582_v46 = vpack.c.bf16 %v9671_v11, %v9671_v11  ;;  %v12239_v54 = vpop.f32.mrf.mxu0  ;;  %v12369_v1 = vpop.f32.mrf.mxu1  ;;  %v16013_v18 = vmax.f32 %v16011_v22, %v16012_v13 }
 0x2ae   : > { %v11585_v47 = vpack.c.bf16 %v9674_v60, %v9674_v60  ;;  %v9672_v29 = vmax.f32 %v9544_v33, 0.0  ;;  %v9549_v45 = vadd.f32 %v14676_v53, %v9414_v38  ;;  %v9412_v50 = vmax.f32 %v8098_v31, %v8997_v59  ;;  %v16014_v33 = vld [vmem:[#allocation34_spill] sm:$0xff]  ;;  %v16015_v38 = vld [vmem:[#allocation35_spill] sm:$0xff] }
 0x2af   : > { %10312 = vst.msk [vmem:[%s14696_s29 + $0x70] sm:$0xf] %vm10283_vm3, %v11582_v46  ;;  %v8101_v15 = vmax.f32 %v16001_v14, %v12239_v54  ;;  %v7686_v51 = vpop.f32.mrf.mxu0  ;;  %v9000_v35 = vpop.f32.mrf.mxu1  ;;  %v16016_v37 = vmax.f32 %v16014_v33, %v16015_v38 }
 0x2b0   : > { %10315 = vst.msk [vmem:[%s14696_s29 + $0x7c] sm:$0xf] %vm10283_vm3, %v11585_v47  ;;  %v11583_v36 = vpack.c.bf16 %v9672_v29, %v9672_v29  ;;  %v9677_v42 = vmax.f32 %v9549_v45, 0.0  ;;  %v9547_v39 = vadd.f32 %v14676_v53, %v9412_v50  ;;  %v8099_v41 = vmax.f32 %v16004_v40, %v7686_v51  ;;  %v16017_v47 = vld [vmem:[#allocation36_spill] sm:$0xff]  ;;  %v16018_v29 = vld [vmem:[#allocation37_spill] sm:$0xff] }
 0x2b1   : > { %v9415_v10 = vmax.f32 %v8101_v15, %v12369_v1  ;;  %v12242_v56 = vpop.f32.mrf.mxu0  ;;  %v12372_v57 = vpop.f32.mrf.mxu1  ;;  %v16019_v45 = vmax.f32 %v16017_v47, %v16018_v29 }
 0x2b2   : > { %10313 = vst.msk [vmem:[%s14696_s29 + $0x74] sm:$0xf] %vm10283_vm3, %v11583_v36  ;;  %v11588_v21 = vpack.c.bf16 %v9677_v42, %v9677_v42  ;;  %v9675_v19 = vmax.f32 %v9547_v39, 0.0  ;;  %v9413_v34 = vmax.f32 %v8099_v41, %v9000_v35  ;;  %v8104_v20 = vmax.f32 %v16007_v49, %v12242_v56  ;;  %v16020_v36 = vld [vmem:[#allocation38_spill] sm:$0xff]  ;;  %v16021_v42 = vld [vmem:[#allocation39_spill] sm:$0xff] }
 0x2b3   : > { %v9550_v3 = vadd.f32 %v14676_v53, %v9415_v10  ;;  %v7699_v32 = vpop.f32.mrf.mxu0  ;;  %v9013_v4 = vpop.f32.mrf.mxu1  ;;  %v16022_v39 = vmax.f32 %v16020_v36, %v16021_v42 }
 0x2b4   : > { %10318 = vst.msk [vmem:[%s14696_s29 + $0x88] sm:$0xf] %vm10283_vm3, %v11588_v21  ;;  %v11586_v61 = vpack.c.bf16 %v9675_v19, %v9675_v19  ;;  %v9548_v24 = vadd.f32 %v14676_v53, %v9413_v34  ;;  %v9418_v25 = vmax.f32 %v8104_v20, %v12372_v57  ;;  %v8102_v8 = vmax.f32 %v16010_v44, %v7699_v32  ;;  %v16023_v21 = vld [vmem:[#allocation40_spill] sm:$0xff]  ;;  %v16024_v19 = vld [vmem:[#allocation41_spill] sm:$0xff] }
 0x2b5   : > { %v9678_v9 = vmax.f32 %v9550_v3, 0.0  ;;  %v12243_v55 = vpop.f32.mrf.mxu0  ;;  %v12373_v0 = vpop.f32.mrf.mxu1  ;;  %v16025_v34 = vmax.f32 %v16023_v21, %v16024_v19 }
 0x2b6   : > { %10316 = vst.msk [vmem:[%s14696_s29 + $0x80] sm:$0xf] %vm10283_vm3, %v11586_v61  ;;  %v9676_v23 = vmax.f32 %v9548_v24, 0.0  ;;  %v9553_v27 = vadd.f32 %v14676_v53, %v9418_v25  ;;  %v9416_v28 = vmax.f32 %v8102_v8, %v9013_v4  ;;  %v8105_v26 = vmax.f32 %v16013_v18, %v12243_v55  ;;  %v16026_v61 = vld [vmem:[#allocation42_spill] sm:$0xff]  ;;  %v16027_v24 = vld [vmem:[#allocation43_spill] sm:$0xff] }
 0x2b7   : > { %v11589_v58 = vpack.c.bf16 %v9678_v9, %v9678_v9  ;;  %v7702_v6 = vpop.f32.mrf.mxu0  ;;  %v9016_v7 = vpop.f32.mrf.mxu1  ;;  %v16028_v25 = vmax.f32 %v16026_v61, %v16027_v24 }
 0x2b8   : > { %v11587_v11 = vpack.c.bf16 %v9676_v23, %v9676_v23  ;;  %v9681_v12 = vmax.f32 %v9553_v27, 0.0  ;;  %v9551_v59 = vadd.f32 %v14676_v53, %v9416_v28  ;;  %v9419_v60 = vmax.f32 %v8105_v26, %v12373_v0  ;;  %v16029_v27 = vld [vmem:[#allocation44_spill] sm:$0xff]  ;;  %v16030_v28 = vld [vmem:[#allocation45_spill] sm:$0xff] }
 0x2b9   : > { %10319 = vst.msk [vmem:[%s14696_s29 + $0x8c] sm:$0xf] %vm10283_vm3, %v11589_v58  ;;  %v8103_v2 = vmax.f32 %v16016_v37, %v7702_v6  ;;  %v12246_v30 = vpop.f32.mrf.mxu0  ;;  %v12376_v31 = vpop.f32.mrf.mxu1  ;;  %v16031_v22 = vmax.f32 %v16029_v27, %v16030_v28 }
 0x2ba   : > { %10317 = vst.msk [vmem:[%s14696_s29 + $0x84] sm:$0xf] %vm10283_vm3, %v11587_v11  ;;  %v11592_v46 = vpack.c.bf16 %v9681_v12, %v9681_v12  ;;  %v9679_v54 = vmax.f32 %v9551_v59, 0.0  ;;  %v9554_v1 = vadd.f32 %v14676_v53, %v9419_v60  ;;  %v8108_v50 = vmax.f32 %v16019_v45, %v12246_v30  ;;  %v16032_v11 = vld [vmem:[#allocation46_spill] sm:$0xff]  ;;  %v16033_v12 = vld [vmem:[#allocation47_spill] sm:$0xff] }
 0x2bb   : > { %v9417_v62 = vmax.f32 %v8103_v2, %v9016_v7  ;;  %v7715_v63 = vpop.f32.mrf.mxu0  ;;  %v9029_v14 = vpop.f32.mrf.mxu1  ;;  %v16034_v59 = vmax.f32 %v16032_v11, %v16033_v12 }
 0x2bc   : > { %10322 = vst.msk [vmem:[%s14696_s29 + $0x98] sm:$0xf] %vm10283_vm3, %v11592_v46  ;;  %v11590_v15 = vpack.c.bf16 %v9679_v54, %v9679_v54  ;;  %v9682_v51 = vmax.f32 %v9554_v1, 0.0  ;;  %v9422_v35 = vmax.f32 %v8108_v50, %v12376_v31  ;;  %v8106_v52 = vmax.f32 %v16022_v39, %v7715_v63  ;;  %v16035_v46 = vld [vmem:[#allocation48_spill] sm:$0xff]  ;;  %v16036_v54 = vld [vmem:[#allocation49_spill] sm:$0xff] }
 0x2bd   : > { %v9552_v5 = vadd.f32 %v14676_v53, %v9417_v62  ;;  %v12247_v40 = vpop.f32.mrf.mxu0  ;;  %v12377_v41 = vpop.f32.mrf.mxu1  ;;  %v16037_v1 = vmax.f32 %v16035_v46, %v16036_v54 }
 0x2be   : > { %10320 = vst.msk [vmem:[%s14696_s29 + $0x90] sm:$0xf] %vm10283_vm3, %v11590_v15  ;;  %v11593_v10 = vpack.c.bf16 %v9682_v51, %v9682_v51  ;;  %v9557_v56 = vadd.f32 %v14676_v53, %v9422_v35  ;;  %v9420_v57 = vmax.f32 %v8106_v52, %v9029_v14  ;;  %v8109_v16 = vmax.f32 %v16025_v34, %v12247_v40  ;;  %v16038_v15 = vld [vmem:[#allocation50_spill] sm:$0xff]  ;;  %v16039_v51 = vld [vmem:[#allocation51_spill] sm:$0xff] }
 0x2bf   : > { %v9680_v48 = vmax.f32 %v9552_v5, 0.0  ;;  %v7718_v49 = vpop.f32.mrf.mxu0  ;;  %v9032_v20 = vpop.f32.mrf.mxu1  ;;  %v16040_v35 = vmax.f32 %v16038_v15, %v16039_v51 }
 0x2c0   : > { %10323 = vst.msk [vmem:[%s14696_s29 + $0x9c] sm:$0xf] %vm10283_vm3, %v11593_v10  ;;  %v9685_v3 = vmax.f32 %v9557_v56, 0.0  ;;  %v9555_v32 = vadd.f32 %v14676_v53, %v9420_v57  ;;  %v9423_v4 = vmax.f32 %v8109_v16, %v12377_v41  ;;  %v8107_v17 = vmax.f32 %v16028_v25, %v7718_v49  ;;  %v16041_v10 = vld [vmem:[#allocation52_spill] sm:$0xff]  ;;  %v16042_v56 = vld [vmem:[#allocation53_spill] sm:$0xff] }
 0x2c1   : > { %v11591_v43 = vpack.c.bf16 %v9680_v48, %v9680_v48  ;;  %v12250_v44 = vpop.f32.mrf.mxu0  ;;  %v12380_v8 = vpop.f32.mrf.mxu1  ;;  %v16043_v57 = vmax.f32 %v16041_v10, %v16042_v56 }
 0x2c2   : > { %v11596_v9 = vpack.c.bf16 %v9685_v3, %v9685_v3  ;;  %v9683_v55 = vmax.f32 %v9555_v32, 0.0  ;;  %v9558_v0 = vadd.f32 %v14676_v53, %v9423_v4  ;;  %v9421_v23 = vmax.f32 %v8107_v17, %v9032_v20  ;;  %v16044_v32 = vld [vmem:[#allocation54_spill] sm:$0xff]  ;;  %v16045_v4 = vld [vmem:[#allocation55_spill] sm:$0xff] }
 0x2c3   : > { %10321 = vst.msk [vmem:[%s14696_s29 + $0x94] sm:$0xf] %vm10283_vm3, %v11591_v43  ;;  %v8112_v13 = vmax.f32 %v16031_v22, %v12250_v44  ;;  %v7731_v18 = vpop.f32.mrf.mxu0  ;;  %v9045_v26 = vpop.f32.mrf.mxu1  ;;  %v16046_v61 = vmax.f32 %v16044_v32, %v16045_v4 }
 0x2c4   : > { %10326 = vst.msk [vmem:[%s14696_s29 + $0xa8] sm:$0xf] %vm10283_vm3, %v11596_v9  ;;  %v11594_v58 = vpack.c.bf16 %v9683_v55, %v9683_v55  ;;  %v9686_v6 = vmax.f32 %v9558_v0, 0.0  ;;  %v9556_v7 = vadd.f32 %v14676_v53, %v9421_v23  ;;  %v8110_v60 = vmax.f32 %v16034_v59, %v7731_v18  ;;  %v16047_v9 = vld [vmem:[#allocation56_spill] sm:$0xff]  ;;  %v16048_v55 = vld [vmem:[#allocation57_spill] sm:$0xff] }
 0x2c5   : > { %v9426_v33 = vmax.f32 %v8112_v13, %v12380_v8  ;;  %v12251_v38 = vpop.f32.mrf.mxu0  ;;  %v12381_v37 = vpop.f32.mrf.mxu1  ;;  %v16049_v0 = vmax.f32 %v16047_v9, %v16048_v55 }
 0x2c6   : > { %10324 = vst.msk [vmem:[%s14696_s29 + $0xa0] sm:$0xf] %vm10283_vm3, %v11594_v58  ;;  %v11597_v2 = vpack.c.bf16 %v9686_v6, %v9686_v6  ;;  %v9684_v30 = vmax.f32 %v9556_v7, 0.0  ;;  %v9424_v31 = vmax.f32 %v8110_v60, %v9045_v26  ;;  %v8113_v47 = vmax.f32 %v16037_v1, %v12251_v38  ;;  %v16050_v58 = vld [vmem:[#allocation58_spill] sm:$0xff]  ;;  %v16051_v6 = vld [vmem:[#allocation59_spill] sm:$0xff] }
 0x2c7   : > { %v9561_v29 = vadd.f32 %v14676_v53, %v9426_v33  ;;  %v7734_v45 = vpop.f32.mrf.mxu0  ;;  %v9048_v50 = vpop.f32.mrf.mxu1  ;;  %v16052_v7 = vmax.f32 %v16050_v58, %v16051_v6 }
 0x2c8   : > { %10327 = vst.msk [vmem:[%s14696_s29 + $0xac] sm:$0xf] %vm10283_vm3, %v11597_v2  ;;  %v11595_v62 = vpack.c.bf16 %v9684_v30, %v9684_v30  ;;  %v9559_v63 = vadd.f32 %v14676_v53, %v9424_v31  ;;  %v9427_v14 = vmax.f32 %v8113_v47, %v12381_v37  ;;  %v8111_v36 = vmax.f32 %v16040_v35, %v7734_v45  ;;  %v16053_v2 = vld [vmem:[#allocation60_spill] sm:$0xff]  ;;  %v16054_v30 = vld [vmem:[#allocation61_spill] sm:$0xff] }
 0x2c9   : > { %v9689_v42 = vmax.f32 %v9561_v29, 0.0  ;;  %v12254_v39 = vpop.f32.mrf.mxu0  ;;  %v12384_v52 = vpop.f32.mrf.mxu1  ;;  %v16055_v31 = vmax.f32 %v16053_v2, %v16054_v30 }
 0x2ca   : > { %10325 = vst.msk [vmem:[%s14696_s29 + $0xa4] sm:$0xf] %vm10283_vm3, %v11595_v62  ;;  %v9687_v5 = vmax.f32 %v9559_v63, 0.0  ;;  %v9562_v40 = vadd.f32 %v14676_v53, %v9427_v14  ;;  %v9425_v41 = vmax.f32 %v8111_v36, %v9048_v50  ;;  %v8116_v21 = vmax.f32 %v16043_v57, %v12254_v39  ;;  %v16056_v62 = vld [vmem:[#allocation62_spill] sm:$0xff]  ;;  %v16057_v63 = vld [vmem:[#allocation63_spill] sm:$0xff] }
 0x2cb   : > { %v11600_v19 = vpack.c.bf16 %v9689_v42, %v9689_v42  ;;  %v7747_v34 = vpop.f32.mrf.mxu0  ;;  %v9061_v16 = vpop.f32.mrf.mxu1  ;;  %v16058_v14 = vmax.f32 %v16056_v62, %v16057_v63 }
 0x2cc   : > { %v11598_v48 = vpack.c.bf16 %v9687_v5, %v9687_v5  ;;  %v9690_v49 = vmax.f32 %v9562_v40, 0.0  ;;  %v9560_v20 = vadd.f32 %v14676_v53, %v9425_v41  ;;  %v9430_v3 = vmax.f32 %v8116_v21, %v12384_v52  ;;  %v16059_v40 = vld [vmem:[#allocation64_spill] sm:$0xff]  ;;  %v16060_v41 = vld [vmem:[#allocation65_spill] sm:$0xff] }
 0x2cd   : > { %10330 = vst.msk [vmem:[%s14696_s29 + $0xb8] sm:$0xf] %vm10283_vm3, %v11600_v19  ;;  %v8114_v24 = vmax.f32 %v16046_v61, %v7747_v34  ;;  %v12255_v25 = vpop.f32.mrf.mxu0  ;;  %v12385_v17 = vpop.f32.mrf.mxu1  ;;  %v16061_v10 = vmax.f32 %v16059_v40, %v16060_v41 }
 0x2ce   : > { %10328 = vst.msk [vmem:[%s14696_s29 + $0xb0] sm:$0xf] %vm10283_vm3, %v11598_v48  ;;  %v11601_v43 = vpack.c.bf16 %v9690_v49, %v9690_v49  ;;  %v9688_v44 = vmax.f32 %v9560_v20, 0.0  ;;  %v9565_v8 = vadd.f32 %v14676_v53, %v9430_v3  ;;  %v8117_v23 = vmax.f32 %v16049_v0, %v12255_v25  ;;  %v16062_v48 = vld [vmem:[#allocation66_spill] sm:$0xff]  ;;  %v16063_v49 = vld [vmem:[#allocation67_spill] sm:$0xff] }
 0x2cf   : > { %v9428_v27 = vmax.f32 %v8114_v24, %v9061_v16  ;;  %v7750_v28 = vpop.f32.mrf.mxu0  ;;  %v9064_v22 = vpop.f32.mrf.mxu1  ;;  %v16064_v20 = vmax.f32 %v16062_v48, %v16063_v49 }
 0x2d0   : > { %10331 = vst.msk [vmem:[%s14696_s29 + $0xbc] sm:$0xf] %vm10283_vm3, %v11601_v43  ;;  %v11599_v13 = vpack.c.bf16 %v9688_v44, %v9688_v44  ;;  %v9693_v18 = vmax.f32 %v9565_v8, 0.0  ;;  %v9431_v26 = vmax.f32 %v8117_v23, %v12385_v17  ;;  %v8115_v11 = vmax.f32 %v16052_v7, %v7750_v28  ;;  %v16065_v43 = vld [vmem:[#allocation68_spill] sm:$0xff]  ;;  %v16066_v44 = vld [vmem:[#allocation69_spill] sm:$0xff] }
 0x2d1   : > { %v9563_v12 = vadd.f32 %v14676_v53, %v9428_v27  ;;  %v12258_v59 = vpop.f32.mrf.mxu0  ;;  %v12388_v60 = vpop.f32.mrf.mxu1  ;;  %v16067_v8 = vmax.f32 %v16065_v43, %v16066_v44 }
 0x2d2   : > { %10329 = vst.msk [vmem:[%s14696_s29 + $0xb4] sm:$0xf] %vm10283_vm3, %v11599_v13  ;;  %v11604_v33 = vpack.c.bf16 %v9693_v18, %v9693_v18  ;;  %v9566_v38 = vadd.f32 %v14676_v53, %v9431_v26  ;;  %v9429_v37 = vmax.f32 %v8115_v11, %v9064_v22  ;;  %v8120_v46 = vmax.f32 %v16055_v31, %v12258_v59  ;;  %v16068_v13 = vld [vmem:[#allocation70_spill] sm:$0xff]  ;;  %v16069_v18 = vld [vmem:[#allocation71_spill] sm:$0xff] }
 0x2d3   : > { %v9691_v54 = vmax.f32 %v9563_v12, 0.0  ;;  %v7763_v1 = vpop.f32.mrf.mxu0  ;;  %v9077_v47 = vpop.f32.mrf.mxu1  ;;  %v16070_v26 = vmax.f32 %v16068_v13, %v16069_v18 }
 0x2d4   : > { %10334 = vst.msk [vmem:[%s14696_s29 + $0xc8] sm:$0xf] %vm10283_vm3, %v11604_v33  ;;  %v9694_v29 = vmax.f32 %v9566_v38, 0.0  ;;  %v9564_v45 = vadd.f32 %v14676_v53, %v9429_v37  ;;  %v9434_v50 = vmax.f32 %v8120_v46, %v12388_v60  ;;  %v8118_v15 = vmax.f32 %v16058_v14, %v7763_v1  ;;  %v16071_v33 = vld [vmem:[#allocation72_spill] sm:$0xff]  ;;  %v16072_v38 = vld [vmem:[#allocation73_spill] sm:$0xff] }
 0x2d5   : > { %v11602_v51 = vpack.c.bf16 %v9691_v54, %v9691_v54  ;;  %v12259_v35 = vpop.f32.mrf.mxu0  ;;  %v12389_v36 = vpop.f32.mrf.mxu1  ;;  %v16073_v37 = vmax.f32 %v16071_v33, %v16072_v38 }
 0x2d6   : > { %v11605_v42 = vpack.c.bf16 %v9694_v29, %v9694_v29  ;;  %v9692_v39 = vmax.f32 %v9564_v45, 0.0  ;;  %v9569_v52 = vadd.f32 %v14676_v53, %v9434_v50  ;;  %v9432_v5 = vmax.f32 %v8118_v15, %v9077_v47  ;;  %v15077_v47 = vld [vmem:[%s15524_s2] ss:$0 sm:$0xff] }
 0x2d7   : > { %10332 = vst.msk [vmem:[%s14696_s29 + $0xc0] sm:$0xf] %vm10283_vm3, %v11602_v51  ;;  %v8121_v56 = vmax.f32 %v16061_v10, %v12259_v35  ;;  %v7766_v57 = vpop.f32.mrf.mxu0  ;;  %v9080_v21 = vpop.f32.mrf.mxu1  ;;  %v16075_v50 = vld [vmem:[#allocation75_spill] sm:$0xff] }
 0x2d8   : > { %10335 = vst.msk [vmem:[%s14696_s29 + $0xcc] sm:$0xf] %vm10283_vm3, %v11605_v42  ;;  %v11603_v19 = vpack.c.bf16 %v9692_v39, %v9692_v39  ;;  %v9697_v34 = vmax.f32 %v9569_v52, 0.0  ;;  %v9567_v16 = vadd.f32 %v14676_v53, %v9432_v5  ;;  %v8119_v3 = vmax.f32 %v16064_v20, %v7766_v57  ;;  %v16077_v42 = vld [vmem:[#allocation76_spill] sm:$0xff]  ;;  %v16078_v39 = vld [vmem:[#allocation77_spill] sm:$0xff] }
 0x2d9   : > { %v9435_v32 = vmax.f32 %v8121_v56, %v12389_v36  ;;  %v12262_v4 = vpop.f32.mrf.mxu0  ;;  %v12392_v61 = vpop.f32.mrf.mxu1  ;;  %v16079_v52 = vmax.f32 %v16077_v42, %v16078_v39 }
 0x2da   : > { %10333 = vst.msk [vmem:[%s14696_s29 + $0xc4] sm:$0xf] %vm10283_vm3, %v11603_v19  ;;  %v11608_v24 = vpack.c.bf16 %v9697_v34, %v9697_v34  ;;  %v9695_v25 = vmax.f32 %v9567_v16, 0.0  ;;  %v9433_v17 = vmax.f32 %v8119_v3, %v9080_v21  ;;  %v8124_v9 = vmax.f32 %v16067_v8, %v12262_v4  ;;  %v16080_v19 = vld [vmem:[#allocation78_spill] sm:$0xff]  ;;  %v16081_v34 = vld [vmem:[#allocation79_spill] sm:$0xff] }
 0x2db   : > { %v9570_v55 = vadd.f32 %v14676_v53, %v9435_v32  ;;  %v7779_v0 = vpop.f32.mrf.mxu0  ;;  %v9093_v23 = vpop.f32.mrf.mxu1  ;;  %v16082_v16 = vmax.f32 %v16080_v19, %v16081_v34 }
 0x2dc   : > { %10338 = vst.msk [vmem:[%s14696_s29 + $0xd8] sm:$0xf] %vm10283_vm3, %v11608_v24  ;;  %v11606_v27 = vpack.c.bf16 %v9695_v25, %v9695_v25  ;;  %v9568_v28 = vadd.f32 %v14676_v53, %v9433_v17  ;;  %v9438_v22 = vmax.f32 %v8124_v9, %v12392_v61  ;;  %v8122_v58 = vmax.f32 %v16070_v26, %v7779_v0  ;;  %v16083_v24 = vld [vmem:[#allocation80_spill] sm:$0xff]  ;;  %v16084_v25 = vld [vmem:[#allocation81_spill] sm:$0xff] }
 0x2dd   : > { %v9698_v6 = vmax.f32 %v9570_v55, 0.0  ;;  %v12263_v7 = vpop.f32.mrf.mxu0  ;;  %v12393_v11 = vpop.f32.mrf.mxu1  ;;  %v16085_v17 = vmax.f32 %v16083_v24, %v16084_v25 }
 0x2de   : > { %10336 = vst.msk [vmem:[%s14696_s29 + $0xd0] sm:$0xf] %vm10283_vm3, %v11606_v27  ;;  %v9696_v12 = vmax.f32 %v9568_v28, 0.0  ;;  %v9573_v59 = vadd.f32 %v14676_v53, %v9438_v22  ;;  %v9436_v60 = vmax.f32 %v8122_v58, %v9093_v23  ;;  %v8125_v2 = vmax.f32 %v16073_v37, %v12263_v7  ;;  %v16074_v53 = vld [vmem:[#allocation74_spill] sm:$0xff]  ;;  %v16087_v28 = vld [vmem:[#allocation83_spill] sm:$0xff] }
 0x2df   : > { %v11609_v30 = vpack.c.bf16 %v9698_v6, %v9698_v6  ;;  %v7782_v31 = vpop.f32.mrf.mxu0  ;;  %v9096_v46 = vpop.f32.mrf.mxu1  ;;  %v16076_v62 = vmax.f32 %v16074_v53, %v16075_v50  ;;  %v16086_v27 = vld [vmem:[#allocation82_spill] sm:$0xff] }
 0x2e0   : > { %v11607_v54 = vpack.c.bf16 %v9696_v12, %v9696_v12  ;;  %v9701_v1 = vmax.f32 %v9573_v59, 0.0  ;;  %v9571_v29 = vadd.f32 %v15077_v47, %v9436_v60  ;;  %v9439_v45 = vmax.f32 %v8125_v2, %v12393_v11  ;;  %v16089_v59 = vld [vmem:[#allocation84_spill] sm:$0xff]  ;;  %v16090_v60 = vld [vmem:[#allocation85_spill] sm:$0xff] }
 0x2e1   : > { %10339 = vst.msk [vmem:[%s14696_s29 + $0xdc] sm:$0xf] %vm10283_vm3, %v11609_v30  ;;  %v8123_v63 = vmax.f32 %v16076_v62, %v7782_v31  ;;  %v12266_v14 = vpop.f32.mrf.mxu0  ;;  %v12396_v15 = vpop.f32.mrf.mxu1  ;;  %v16088_v22 = vmax.f32 %v16086_v27, %v16087_v28  ;;  %v16091_v33 = vmax.f32 %v16089_v59, %v16090_v60 }
 0x2e2   : > { %10337 = vst.msk [vmem:[%s14696_s29 + $0xd4] sm:$0xf] %vm10283_vm3, %v11607_v54  ;;  %v11612_v51 = vpack.c.bf16 %v9701_v1, %v9701_v1  ;;  %v9699_v35 = vmax.f32 %v9571_v29, 0.0  ;;  %v9574_v36 = vadd.f32 %v15077_v47, %v9439_v45  ;;  %v8128_v5 = vmax.f32 %v16079_v52, %v12266_v14  ;;  %v16092_v54 = vld [vmem:[#allocation86_spill] sm:$0xff]  ;;  %v16093_v1 = vld [vmem:[#allocation87_spill] sm:$0xff] }
 0x2e3   : > { %v9437_v40 = vmax.f32 %v8123_v63, %v9096_v46  ;;  %v7795_v41 = vpop.f32.mrf.mxu0  ;;  %v9109_v10 = vpop.f32.mrf.mxu1  ;;  %v16094_v29 = vmax.f32 %v16092_v54, %v16093_v1 }
 0x2e4   : > { %10342 = vst.msk [vmem:[%s14696_s29 + $0xe8] sm:$0xf] %vm10283_vm3, %v11612_v51  ;;  %v11610_v56 = vpack.c.bf16 %v9699_v35, %v9699_v35  ;;  %v9702_v57 = vmax.f32 %v9574_v36, 0.0  ;;  %v9442_v21 = vmax.f32 %v8128_v5, %v12396_v15  ;;  %v8126_v48 = vmax.f32 %v16082_v16, %v7795_v41  ;;  %v16095_v51 = vld [vmem:[#allocation88_spill] sm:$0xff]  ;;  %v16096_v35 = vld [vmem:[#allocation89_spill] sm:$0xff] }
 0x2e5   : > { %v9572_v49 = vadd.f32 %v15077_v47, %v9437_v40  ;;  %v12267_v20 = vpop.f32.mrf.mxu0  ;;  %v12397_v3 = vpop.f32.mrf.mxu1  ;;  %v16097_v36 = vmax.f32 %v16095_v51, %v16096_v35 }
 0x2e6   : > { %10340 = vst.msk [vmem:[%s14696_s29 + $0xe0] sm:$0xf] %vm10283_vm3, %v11610_v56  ;;  %v11613_v32 = vpack.c.bf16 %v9702_v57, %v9702_v57  ;;  %v9577_v4 = vadd.f32 %v15077_v47, %v9442_v21  ;;  %v9440_v61 = vmax.f32 %v8126_v48, %v9109_v10  ;;  %v8129_v43 = vmax.f32 %v16085_v17, %v12267_v20  ;;  %v16098_v56 = vld [vmem:[#allocation90_spill] sm:$0xff]  ;;  %v16099_v57 = vld [vmem:[#allocation91_spill] sm:$0xff] }
 0x2e7   : > { %v9700_v44 = vmax.f32 %v9572_v49, 0.0  ;;  %v7798_v8 = vpop.f32.mrf.mxu0  ;;  %v9112_v9 = vpop.f32.mrf.mxu1  ;;  %v16100_v21 = vmax.f32 %v16098_v56, %v16099_v57 }
 0x2e8   : > { %10343 = vst.msk [vmem:[%s14696_s29 + $0xec] sm:$0xf] %vm10283_vm3, %v11613_v32  ;;  %v9705_v55 = vmax.f32 %v9577_v4, 0.0  ;;  %v9575_v0 = vadd.f32 %v15077_v47, %v9440_v61  ;;  %v9443_v23 = vmax.f32 %v8129_v43, %v12397_v3  ;;  %v8127_v13 = vmax.f32 %v16088_v22, %v7798_v8  ;;  %v16101_v32 = vld [vmem:[#allocation92_spill] sm:$0xff]  ;;  %v16102_v4 = vld [vmem:[#allocation93_spill] sm:$0xff] }
 0x2e9   : > { %v11611_v18 = vpack.c.bf16 %v9700_v44, %v9700_v44  ;;  %v12270_v26 = vpop.f32.mrf.mxu0  ;;  %v12400_v58 = vpop.f32.mrf.mxu1  ;;  %v16103_v61 = vmax.f32 %v16101_v32, %v16102_v4 }
 0x2ea   : > { %v11616_v6 = vpack.c.bf16 %v9705_v55, %v9705_v55  ;;  %v9703_v7 = vmax.f32 %v9575_v0, 0.0  ;;  %v9578_v11 = vadd.f32 %v15077_v47, %v9443_v23  ;;  %v9441_v12 = vmax.f32 %v8127_v13, %v9112_v9  ;;  %v16104_v0 = vld [vmem:[#allocation94_spill] sm:$0xff]  ;;  %v16105_v23 = vld [vmem:[#allocation95_spill] sm:$0xff] }
 0x2eb   : > { %10341 = vst.msk [vmem:[%s14696_s29 + $0xe4] sm:$0xf] %vm10283_vm3, %v11611_v18  ;;  %v8132_v38 = vmax.f32 %v16091_v33, %v12270_v26  ;;  %v7811_v37 = vpop.f32.mrf.mxu0  ;;  %v9125_v2 = vpop.f32.mrf.mxu1  ;;  %v16106_v27 = vmax.f32 %v16104_v0, %v16105_v23 }
 0x2ec   : > { %10346 = vst.msk [vmem:[%s14696_s29 + $0xf8] sm:$0xf] %vm10283_vm3, %v11616_v6  ;;  %v11614_v30 = vpack.c.bf16 %v9703_v7, %v9703_v7  ;;  %v9706_v31 = vmax.f32 %v9578_v11, 0.0  ;;  %v9576_v46 = vadd.f32 %v15077_v47, %v9441_v12  ;;  %v8130_v45 = vmax.f32 %v16094_v29, %v7811_v37  ;;  %v16107_v6 = vld [vmem:[#allocation96_spill] sm:$0xff]  ;;  %v16108_v7 = vld [vmem:[#allocation97_spill] sm:$0xff] }
 0x2ed   : > { %v9446_v53 = vmax.f32 %v8132_v38, %v12400_v58  ;;  %v12271_v50 = vpop.f32.mrf.mxu0  ;;  %v12401_v62 = vpop.f32.mrf.mxu1  ;;  %v16109_v11 = vmax.f32 %v16107_v6, %v16108_v7 }
 0x2ee   : > { %10344 = vst.msk [vmem:[%s14696_s29 + $0xf0] sm:$0xf] %vm10283_vm3, %v11614_v30  ;;  %v11617_v63 = vpack.c.bf16 %v9706_v31, %v9706_v31  ;;  %v9704_v14 = vmax.f32 %v9576_v46, 0.0  ;;  %v9444_v15 = vmax.f32 %v8130_v45, %v9125_v2  ;;  %v8133_v42 = vmax.f32 %v16097_v36, %v12271_v50  ;;  %v16110_v30 = vld [vmem:[#allocation98_spill] sm:$0xff]  ;;  %v16111_v31 = vld [vmem:[#allocation99_spill] sm:$0xff] }
 0x2ef   : > { %v9581_v39 = vadd.f32 %v15077_v47, %v9446_v53  ;;  %v7814_v52 = vpop.f32.mrf.mxu0  ;;  %v9128_v5 = vpop.f32.mrf.mxu1  ;;  %v16112_v46 = vmax.f32 %v16110_v30, %v16111_v31 }
 0x2f0   : > { %10347 = vst.msk [vmem:[%s14696_s29 + $0xfc] sm:$0xf] %vm10283_vm3, %v11617_v63  ;;  %v11615_v40 = vpack.c.bf16 %v9704_v14, %v9704_v14  ;;  %v9579_v41 = vadd.f32 %v15077_v47, %v9444_v15  ;;  %v9447_v10 = vmax.f32 %v8133_v42, %v12401_v62  ;;  %v8131_v19 = vmax.f32 %v16100_v21, %v7814_v52  ;;  %v16113_v63 = vld [vmem:[#allocation100_spill] sm:$0xff]  ;;  %v16114_v14 = vld [vmem:[#allocation101_spill] sm:$0xff] }
 0x2f1   : > { %v9709_v34 = vmax.f32 %v9581_v39, 0.0  ;;  %v12274_v16 = vpop.f32.mrf.mxu0  ;;  %v12404_v48 = vpop.f32.mrf.mxu1  ;;  %v16115_v15 = vmax.f32 %v16113_v63, %v16114_v14 }
 0x2f2   : > { %10345 = vst.msk [vmem:[%s14696_s29 + $0xf4] sm:$0xf] %vm10283_vm3, %v11615_v40  ;;  %v9707_v49 = vmax.f32 %v9579_v41, 0.0  ;;  %v9582_v20 = vadd.f32 %v15077_v47, %v9447_v10  ;;  %v9445_v3 = vmax.f32 %v8131_v19, %v9128_v5  ;;  %v8136_v24 = vmax.f32 %v16103_v61, %v12274_v16  ;;  %v16116_v40 = vld [vmem:[#allocation102_spill] sm:$0xff]  ;;  %v16117_v41 = vld [vmem:[#allocation103_spill] sm:$0xff] }
 0x2f3   : > { %v11620_v25 = vpack.c.bf16 %v9709_v34, %v9709_v34  ;;  %v7827_v17 = vpop.f32.mrf.mxu0  ;;  %v9141_v43 = vpop.f32.mrf.mxu1  ;;  %v16118_v10 = vmax.f32 %v16116_v40, %v16117_v41 }
 0x2f4   : > { %v11618_v44 = vpack.c.bf16 %v9707_v49, %v9707_v49  ;;  %v9710_v8 = vmax.f32 %v9582_v20, 0.0  ;;  %v9580_v9 = vadd.f32 %v15077_v47, %v9445_v3  ;;  %v9450_v55 = vmax.f32 %v8136_v24, %v12404_v48  ;;  %v16119_v20 = vld [vmem:[#allocation104_spill] sm:$0xff]  ;;  %v16120_v3 = vld [vmem:[#allocation105_spill] sm:$0xff] }
 0x2f5   : > { %10350 = vst.msk [vmem:[%s14696_s29 + $0x108] sm:$0xf] %vm10283_vm3, %v11620_v25  ;;  %v8134_v28 = vmax.f32 %v16106_v27, %v7827_v17  ;;  %v12275_v22 = vpop.f32.mrf.mxu0  ;;  %v12405_v13 = vpop.f32.mrf.mxu1  ;;  %v16121_v32 = vmax.f32 %v16119_v20, %v16120_v3 }
 0x2f6   : > { %10348 = vst.msk [vmem:[%s14696_s29 + $0x100] sm:$0xf] %vm10283_vm3, %v11618_v44  ;;  %v11621_v18 = vpack.c.bf16 %v9710_v8, %v9710_v8  ;;  %v9708_v26 = vmax.f32 %v9580_v9, 0.0  ;;  %v9585_v58 = vadd.f32 %v15077_v47, %v9450_v55  ;;  %v8137_v12 = vmax.f32 %v16109_v11, %v12275_v22  ;;  %v16122_v44 = vld [vmem:[#allocation106_spill] sm:$0xff]  ;;  %v16123_v8 = vld [vmem:[#allocation107_spill] sm:$0xff] }
 0x2f7   : > { %v9448_v59 = vmax.f32 %v8134_v28, %v9141_v43  ;;  %v7830_v60 = vpop.f32.mrf.mxu0  ;;  %v9144_v33 = vpop.f32.mrf.mxu1  ;;  %v16124_v9 = vmax.f32 %v16122_v44, %v16123_v8 }
 0x2f8   : > { %10351 = vst.msk [vmem:[%s14696_s29 + $0x10c] sm:$0xf] %vm10283_vm3, %v11621_v18  ;;  %v11619_v38 = vpack.c.bf16 %v9708_v26, %v9708_v26  ;;  %v9713_v37 = vmax.f32 %v9585_v58, 0.0  ;;  %v9451_v2 = vmax.f32 %v8137_v12, %v12405_v13  ;;  %v8135_v54 = vmax.f32 %v16112_v46, %v7830_v60  ;;  %v16125_v18 = vld [vmem:[#allocation108_spill] sm:$0xff]  ;;  %v16126_v26 = vld [vmem:[#allocation109_spill] sm:$0xff] }
 0x2f9   : > { %v9583_v1 = vadd.f32 %v15077_v47, %v9448_v59  ;;  %v12278_v29 = vpop.f32.mrf.mxu0  ;;  %v12408_v45 = vpop.f32.mrf.mxu1  ;;  %v16127_v58 = vmax.f32 %v16125_v18, %v16126_v26 }
 0x2fa   : > { %10349 = vst.msk [vmem:[%s14696_s29 + $0x104] sm:$0xf] %vm10283_vm3, %v11619_v38  ;;  %v11624_v53 = vpack.c.bf16 %v9713_v37, %v9713_v37  ;;  %v9586_v50 = vadd.f32 %v15077_v47, %v9451_v2  ;;  %v9449_v62 = vmax.f32 %v8135_v54, %v9144_v33  ;;  %v8140_v51 = vmax.f32 %v16115_v15, %v12278_v29  ;;  %v16128_v38 = vld [vmem:[#allocation110_spill] sm:$0xff]  ;;  %v16129_v37 = vld [vmem:[#allocation111_spill] sm:$0xff] }
 0x2fb   : > { %v9711_v35 = vmax.f32 %v9583_v1, 0.0  ;;  %v7843_v36 = vpop.f32.mrf.mxu0  ;;  %v9157_v42 = vpop.f32.mrf.mxu1  ;;  %v16130_v2 = vmax.f32 %v16128_v38, %v16129_v37 }
 0x2fc   : > { %10354 = vst.msk [vmem:[%s14696_s29 + $0x118] sm:$0xf] %vm10283_vm3, %v11624_v53  ;;  %v9714_v39 = vmax.f32 %v9586_v50, 0.0  ;;  %v9584_v52 = vadd.f32 %v15077_v47, %v9449_v62  ;;  %v9454_v5 = vmax.f32 %v8140_v51, %v12408_v45  ;;  %v8138_v56 = vmax.f32 %v16118_v10, %v7843_v36  ;;  %v16131_v53 = vld [vmem:[#allocation112_spill] sm:$0xff]  ;;  %v16132_v50 = vld [vmem:[#allocation113_spill] sm:$0xff] }
 0x2fd   : > { %v11622_v57 = vpack.c.bf16 %v9711_v35, %v9711_v35  ;;  %v12279_v21 = vpop.f32.mrf.mxu0  ;;  %v12409_v19 = vpop.f32.mrf.mxu1  ;;  %v16133_v62 = vmax.f32 %v16131_v53, %v16132_v50 }
 0x2fe   : > { %v11625_v34 = vpack.c.bf16 %v9714_v39, %v9714_v39  ;;  %v9712_v16 = vmax.f32 %v9584_v52, 0.0  ;;  %v9589_v48 = vadd.f32 %v15077_v47, %v9454_v5  ;;  %v9452_v49 = vmax.f32 %v8138_v56, %v9157_v42  ;;  %v16134_v52 = vld [vmem:[#allocation114_spill] sm:$0xff]  ;;  %v16135_v5 = vld [vmem:[#allocation115_spill] sm:$0xff] }
 0x2ff   : > { %10352 = vst.msk [vmem:[%s14696_s29 + $0x110] sm:$0xf] %vm10283_vm3, %v11622_v57  ;;  %v8141_v4 = vmax.f32 %v16121_v32, %v12279_v21  ;;  %v7846_v61 = vpop.f32.mrf.mxu0  ;;  %v9160_v24 = vpop.f32.mrf.mxu1  ;;  %v16136_v40 = vmax.f32 %v16134_v52, %v16135_v5 }
 0x300   : > { %10355 = vst.msk [vmem:[%s14696_s29 + $0x11c] sm:$0xf] %vm10283_vm3, %v11625_v34  ;;  %v11623_v25 = vpack.c.bf16 %v9712_v16, %v9712_v16  ;;  %v9717_v17 = vmax.f32 %v9589_v48, 0.0  ;;  %v9587_v43 = vadd.f32 %v15077_v47, %v9452_v49  ;;  %v8139_v55 = vmax.f32 %v16124_v9, %v7846_v61  ;;  %v16137_v34 = vld [vmem:[#allocation116_spill] sm:$0xff]  ;;  %v16138_v16 = vld [vmem:[#allocation117_spill] sm:$0xff] }
 0x301   : > { %v9455_v0 = vmax.f32 %v8141_v4, %v12409_v19  ;;  %v12282_v23 = vpop.f32.mrf.mxu0  ;;  %v12412_v27 = vpop.f32.mrf.mxu1  ;;  %v16139_v48 = vmax.f32 %v16137_v34, %v16138_v16 }
 0x302   : > { %10353 = vst.msk [vmem:[%s14696_s29 + $0x114] sm:$0xf] %vm10283_vm3, %v11623_v25  ;;  %v11628_v28 = vpack.c.bf16 %v9717_v17, %v9717_v17  ;;  %v9715_v22 = vmax.f32 %v9587_v43, 0.0  ;;  %v9453_v13 = vmax.f32 %v8139_v55, %v9160_v24  ;;  %v8144_v6 = vmax.f32 %v16127_v58, %v12282_v23  ;;  %v16140_v25 = vld [vmem:[#allocation118_spill] sm:$0xff]  ;;  %v16141_v17 = vld [vmem:[#allocation119_spill] sm:$0xff] }
 0x303   : > { %v9590_v7 = vadd.f32 %v15077_v47, %v9455_v0  ;;  %v7859_v11 = vpop.f32.mrf.mxu0  ;;  %v9173_v12 = vpop.f32.mrf.mxu1  ;;  %v16142_v43 = vmax.f32 %v16140_v25, %v16141_v17 }
 0x304   : > { %10358 = vst.msk [vmem:[%s14696_s29 + $0x128] sm:$0xf] %vm10283_vm3, %v11628_v28  ;;  %v11626_v59 = vpack.c.bf16 %v9715_v22, %v9715_v22  ;;  %v9588_v60 = vadd.f32 %v15077_v47, %v9453_v13  ;;  %v9458_v33 = vmax.f32 %v8144_v6, %v12412_v27  ;;  %v8142_v30 = vmax.f32 %v16130_v2, %v7859_v11  ;;  %v16143_v28 = vld [vmem:[#allocation120_spill] sm:$0xff]  ;;  %v16144_v22 = vld [vmem:[#allocation121_spill] sm:$0xff] }
 0x305   : > { %v9718_v31 = vmax.f32 %v9590_v7, 0.0  ;;  %v12283_v46 = vpop.f32.mrf.mxu0  ;;  %v12413_v54 = vpop.f32.mrf.mxu1  ;;  %v16145_v13 = vmax.f32 %v16143_v28, %v16144_v22 }
 0x306   : > { %10356 = vst.msk [vmem:[%s14696_s29 + $0x120] sm:$0xf] %vm10283_vm3, %v11626_v59  ;;  %v9716_v1 = vmax.f32 %v9588_v60, 0.0  ;;  %v9593_v29 = vadd.f32 %v15077_v47, %v9458_v33  ;;  %v9456_v45 = vmax.f32 %v8142_v30, %v9173_v12  ;;  %v8145_v63 = vmax.f32 %v16133_v62, %v12283_v46  ;;  %v16146_v59 = vld [vmem:[#allocation122_spill] sm:$0xff]  ;;  %v16147_v60 = vld [vmem:[#allocation123_spill] sm:$0xff] }
 0x307   : > { %v11629_v14 = vpack.c.bf16 %v9718_v31, %v9718_v31  ;;  %v7862_v15 = vpop.f32.mrf.mxu0  ;;  %v9176_v51 = vpop.f32.mrf.mxu1  ;;  %v16148_v33 = vmax.f32 %v16146_v59, %v16147_v60 }
 0x308   : > { %v11627_v35 = vpack.c.bf16 %v9716_v1, %v9716_v1  ;;  %v9721_v36 = vmax.f32 %v9593_v29, 0.0  ;;  %v9591_v42 = vadd.f32 %v15077_v47, %v9456_v45  ;;  %v9459_v39 = vmax.f32 %v8145_v63, %v12413_v54  ;;  %v16149_v29 = vld [vmem:[#allocation124_spill] sm:$0xff]  ;;  %v16150_v45 = vld [vmem:[#allocation125_spill] sm:$0xff] }
 0x309   : > { %10359 = vst.msk [vmem:[%s14696_s29 + $0x12c] sm:$0xf] %vm10283_vm3, %v11629_v14  ;;  %v8143_v41 = vmax.f32 %v16136_v40, %v7862_v15  ;;  %v12286_v10 = vpop.f32.mrf.mxu0  ;;  %v12416_v56 = vpop.f32.mrf.mxu1  ;;  %v16151_v53 = vmax.f32 %v16149_v29, %v16150_v45 }
 0x30a   : > { %10357 = vst.msk [vmem:[%s14696_s29 + $0x124] sm:$0xf] %vm10283_vm3, %v11627_v35  ;;  %v11632_v57 = vpack.c.bf16 %v9721_v36, %v9721_v36  ;;  %v9719_v21 = vmax.f32 %v9591_v42, 0.0  ;;  %v9594_v19 = vadd.f32 %v15077_v47, %v9459_v39  ;;  %v8148_v49 = vmax.f32 %v16139_v48, %v12286_v10  ;;  %v16152_v35 = vld [vmem:[#allocation126_spill] sm:$0xff]  ;;  %v16153_v36 = vld [vmem:[#allocation127_spill] sm:$0xff] }
 0x30b   : > { %v9457_v20 = vmax.f32 %v8143_v41, %v9176_v51  ;;  %v7875_v3 = vpop.f32.mrf.mxu0  ;;  %v9189_v32 = vpop.f32.mrf.mxu1  ;;  %v16154_v42 = vmax.f32 %v16152_v35, %v16153_v36 }
 0x30c   : > { %10362 = vst.msk [vmem:[%s14696_s29 + $0x138] sm:$0xf] %vm10283_vm3, %v11632_v57  ;;  %v11630_v4 = vpack.c.bf16 %v9719_v21, %v9719_v21  ;;  %v9722_v61 = vmax.f32 %v9594_v19, 0.0  ;;  %v9462_v24 = vmax.f32 %v8148_v49, %v12416_v56  ;;  %v8146_v44 = vmax.f32 %v16142_v43, %v7875_v3  ;;  %v16155_v57 = vld [vmem:[#allocation128_spill] sm:$0xff]  ;;  %v16156_v21 = vld [vmem:[#allocation129_spill] sm:$0xff] }
 0x30d   : > { %v9592_v8 = vadd.f32 %v15077_v47, %v9457_v20  ;;  %v12287_v9 = vpop.f32.mrf.mxu0  ;;  %v12417_v55 = vpop.f32.mrf.mxu1  ;;  %v16157_v19 = vmax.f32 %v16155_v57, %v16156_v21 }
 0x30e   : > { %10360 = vst.msk [vmem:[%s14696_s29 + $0x130] sm:$0xf] %vm10283_vm3, %v11630_v4  ;;  %v11633_v0 = vpack.c.bf16 %v9722_v61, %v9722_v61  ;;  %v9597_v23 = vadd.f32 %v15077_v47, %v9462_v24  ;;  %v9460_v27 = vmax.f32 %v8146_v44, %v9189_v32  ;;  %v8149_v18 = vmax.f32 %v16145_v13, %v12287_v9  ;;  %v16158_v4 = vld [vmem:[#allocation130_spill] sm:$0xff]  ;;  %v16159_v61 = vld [vmem:[#allocation131_spill] sm:$0xff] }
 0x30f   : > { %v9720_v26 = vmax.f32 %v9592_v8, 0.0  ;;  %v7878_v58 = vpop.f32.mrf.mxu0  ;;  %v9192_v6 = vpop.f32.mrf.mxu1  ;;  %v16160_v24 = vmax.f32 %v16158_v4, %v16159_v61 }
 0x310   : > { %10363 = vst.msk [vmem:[%s14696_s29 + $0x13c] sm:$0xf] %vm10283_vm3, %v11633_v0  ;;  %v9725_v7 = vmax.f32 %v9597_v23, 0.0  ;;  %v9595_v11 = vadd.f32 %v15077_v47, %v9460_v27  ;;  %v9463_v12 = vmax.f32 %v8149_v18, %v12417_v55  ;;  %v8147_v38 = vmax.f32 %v16148_v33, %v7878_v58  ;;  %v16161_v0 = vld [vmem:[#allocation132_spill] sm:$0xff]  ;;  %v16162_v23 = vld [vmem:[#allocation133_spill] sm:$0xff] }
 0x311   : > { %v11631_v37 = vpack.c.bf16 %v9720_v26, %v9720_v26  ;;  %v12290_v2 = vpop.f32.mrf.mxu0  ;;  %v12420_v30 = vpop.f32.mrf.mxu1  ;;  %v16163_v27 = vmax.f32 %v16161_v0, %v16162_v23 }
 0x312   : > { %v11636_v31 = vpack.c.bf16 %v9725_v7, %v9725_v7  ;;  %v9723_v46 = vmax.f32 %v9595_v11, 0.0  ;;  %v9598_v54 = vadd.f32 %v15077_v47, %v9463_v12  ;;  %v9461_v1 = vmax.f32 %v8147_v38, %v9192_v6  ;;  %v16164_v11 = vld [vmem:[#allocation134_spill] sm:$0xff]  ;;  %v16165_v12 = vld [vmem:[#allocation135_spill] sm:$0xff] }
 0x313   : > { %10361 = vst.msk [vmem:[%s14696_s29 + $0x134] sm:$0xf] %vm10283_vm3, %v11631_v37  ;;  %v8152_v50 = vmax.f32 %v16151_v53, %v12290_v2  ;;  %v7891_v62 = vpop.f32.mrf.mxu0  ;;  %v9205_v63 = vpop.f32.mrf.mxu1  ;;  %v16166_v59 = vmax.f32 %v16164_v11, %v16165_v12 }
 0x314   : > { %10366 = vst.msk [vmem:[%s14696_s29 + $0x148] sm:$0xf] %vm10283_vm3, %v11636_v31  ;;  %v11634_v14 = vpack.c.bf16 %v9723_v46, %v9723_v46  ;;  %v9726_v15 = vmax.f32 %v9598_v54, 0.0  ;;  %v9596_v51 = vadd.f32 %v15077_v47, %v9461_v1  ;;  %v8150_v39 = vmax.f32 %v16154_v42, %v7891_v62  ;;  %v16167_v31 = vld [vmem:[#allocation136_spill] sm:$0xff]  ;;  %v16168_v46 = vld [vmem:[#allocation137_spill] sm:$0xff] }
 0x315   : > { %v9466_v52 = vmax.f32 %v8152_v50, %v12420_v30  ;;  %v12291_v5 = vpop.f32.mrf.mxu0  ;;  %v12421_v40 = vpop.f32.mrf.mxu1  ;;  %v16169_v54 = vmax.f32 %v16167_v31, %v16168_v46 }
 0x316   : > { %10364 = vst.msk [vmem:[%s14696_s29 + $0x140] sm:$0xf] %vm10283_vm3, %v11634_v14  ;;  %v11637_v41 = vpack.c.bf16 %v9726_v15, %v9726_v15  ;;  %v9724_v10 = vmax.f32 %v9596_v51, 0.0  ;;  %v9464_v56 = vmax.f32 %v8150_v39, %v9205_v63  ;;  %v8153_v34 = vmax.f32 %v16157_v19, %v12291_v5  ;;  %v16170_v14 = vld [vmem:[#allocation138_spill] sm:$0xff]  ;;  %v16171_v15 = vld [vmem:[#allocation139_spill] sm:$0xff] }
 0x317   : > { %v9601_v16 = vadd.f32 %v15077_v47, %v9466_v52  ;;  %v7894_v48 = vpop.f32.mrf.mxu0  ;;  %v9208_v49 = vpop.f32.mrf.mxu1  ;;  %v16172_v51 = vmax.f32 %v16170_v14, %v16171_v15 }
 0x318   : > { %10367 = vst.msk [vmem:[%s14696_s29 + $0x14c] sm:$0xf] %vm10283_vm3, %v11637_v41  ;;  %v11635_v20 = vpack.c.bf16 %v9724_v10, %v9724_v10  ;;  %v9599_v3 = vadd.f32 %v15077_v47, %v9464_v56  ;;  %v9467_v32 = vmax.f32 %v8153_v34, %v12421_v40  ;;  %v8151_v25 = vmax.f32 %v16160_v24, %v7894_v48  ;;  %v16173_v41 = vld [vmem:[#allocation140_spill] sm:$0xff]  ;;  %v16174_v10 = vld [vmem:[#allocation141_spill] sm:$0xff] }
 0x319   : > { %v9729_v17 = vmax.f32 %v9601_v16, 0.0  ;;  %v12294_v43 = vpop.f32.mrf.mxu0  ;;  %v12424_v44 = vpop.f32.mrf.mxu1  ;;  %v16175_v56 = vmax.f32 %v16173_v41, %v16174_v10 }
 0x31a   : > { %10365 = vst.msk [vmem:[%s14696_s29 + $0x144] sm:$0xf] %vm10283_vm3, %v11635_v20  ;;  %v9727_v8 = vmax.f32 %v9599_v3, 0.0  ;;  %v9602_v9 = vadd.f32 %v15077_v47, %v9467_v32  ;;  %v9465_v55 = vmax.f32 %v8151_v25, %v9208_v49  ;;  %v8156_v28 = vmax.f32 %v16163_v27, %v12294_v43  ;;  %v16176_v20 = vld [vmem:[#allocation142_spill] sm:$0xff]  ;;  %v16177_v3 = vld [vmem:[#allocation143_spill] sm:$0xff] }
 0x31b   : > { %v11640_v22 = vpack.c.bf16 %v9729_v17, %v9729_v17  ;;  %v7907_v13 = vpop.f32.mrf.mxu0  ;;  %v9221_v18 = vpop.f32.mrf.mxu1  ;;  %v16178_v32 = vmax.f32 %v16176_v20, %v16177_v3 }
 0x31c   : > { %v11638_v26 = vpack.c.bf16 %v9727_v8, %v9727_v8  ;;  %v9730_v58 = vmax.f32 %v9602_v9, 0.0  ;;  %v9600_v6 = vadd.f32 %v15077_v47, %v9465_v55  ;;  %v9470_v7 = vmax.f32 %v8156_v28, %v12424_v44  ;;  %v16179_v9 = vld [vmem:[#allocation144_spill] sm:$0xff]  ;;  %v16180_v55 = vld [vmem:[#allocation145_spill] sm:$0xff] }
 0x31d   : > { %10370 = vst.msk [vmem:[%s14696_s29 + $0x158] sm:$0xf] %vm10283_vm3, %v11640_v22  ;;  %v8154_v60 = vmax.f32 %v16166_v59, %v7907_v13  ;;  %v12295_v33 = vpop.f32.mrf.mxu0  ;;  %v12425_v38 = vpop.f32.mrf.mxu1  ;;  %v16181_v0 = vmax.f32 %v16179_v9, %v16180_v55 }
 0x31e   : > { %10368 = vst.msk [vmem:[%s14696_s29 + $0x150] sm:$0xf] %vm10283_vm3, %v11638_v26  ;;  %v11641_v37 = vpack.c.bf16 %v9730_v58, %v9730_v58  ;;  %v9728_v2 = vmax.f32 %v9600_v6, 0.0  ;;  %v9605_v30 = vadd.f32 %v15077_v47, %v9470_v7  ;;  %v8157_v1 = vmax.f32 %v16169_v54, %v12295_v33  ;;  %v16182_v26 = vld [vmem:[#allocation146_spill] sm:$0xff]  ;;  %v16183_v58 = vld [vmem:[#allocation147_spill] sm:$0xff] }
 0x31f   : > { %v9468_v29 = vmax.f32 %v8154_v60, %v9221_v18  ;;  %v7910_v45 = vpop.f32.mrf.mxu0  ;;  %v9224_v53 = vpop.f32.mrf.mxu1  ;;  %v16184_v6 = vmax.f32 %v16182_v26, %v16183_v58 }
 0x320   : > { %10371 = vst.msk [vmem:[%s14696_s29 + $0x15c] sm:$0xf] %vm10283_vm3, %v11641_v37  ;;  %v11639_v50 = vpack.c.bf16 %v9728_v2, %v9728_v2  ;;  %v9733_v62 = vmax.f32 %v9605_v30, 0.0  ;;  %v9471_v63 = vmax.f32 %v8157_v1, %v12425_v38  ;;  %v8155_v35 = vmax.f32 %v16172_v51, %v7910_v45  ;;  %v16185_v37 = vld [vmem:[#allocation148_spill] sm:$0xff]  ;;  %v16186_v2 = vld [vmem:[#allocation149_spill] sm:$0xff] }
 0x321   : > { %v9603_v36 = vadd.f32 %v15077_v47, %v9468_v29  ;;  %v12298_v42 = vpop.f32.mrf.mxu0  ;;  %v12428_v39 = vpop.f32.mrf.mxu1  ;;  %v16187_v30 = vmax.f32 %v16185_v37, %v16186_v2 }
 0x322   : > { %10369 = vst.msk [vmem:[%s14696_s29 + $0x154] sm:$0xf] %vm10283_vm3, %v11639_v50  ;;  %v11644_v52 = vpack.c.bf16 %v9733_v62, %v9733_v62  ;;  %v9606_v5 = vadd.f32 %v15077_v47, %v9471_v63  ;;  %v9469_v40 = vmax.f32 %v8155_v35, %v9224_v53  ;;  %v8160_v57 = vmax.f32 %v16175_v56, %v12298_v42  ;;  %v16188_v50 = vld [vmem:[#allocation150_spill] sm:$0xff]  ;;  %v16189_v62 = vld [vmem:[#allocation151_spill] sm:$0xff] }
 0x323   : > { %v9731_v21 = vmax.f32 %v9603_v36, 0.0  ;;  %v7923_v19 = vpop.f32.mrf.mxu0  ;;  %v9237_v34 = vpop.f32.mrf.mxu1  ;;  %v16190_v63 = vmax.f32 %v16188_v50, %v16189_v62 }
 0x324   : > { %10374 = vst.msk [vmem:[%s14696_s29 + $0x168] sm:$0xf] %vm10283_vm3, %v11644_v52  ;;  %v9734_v16 = vmax.f32 %v9606_v5, 0.0  ;;  %v9604_v48 = vadd.f32 %v15077_v47, %v9469_v40  ;;  %v9474_v49 = vmax.f32 %v8160_v57, %v12428_v39  ;;  %v8158_v4 = vmax.f32 %v16178_v32, %v7923_v19  ;;  %v16191_v52 = vld [vmem:[#allocation152_spill] sm:$0xff]  ;;  %v16192_v5 = vld [vmem:[#allocation153_spill] sm:$0xff] }
 0x325   : > { %v11642_v61 = vpack.c.bf16 %v9731_v21, %v9731_v21  ;;  %v12299_v24 = vpop.f32.mrf.mxu0  ;;  %v12429_v25 = vpop.f32.mrf.mxu1  ;;  %v16193_v40 = vmax.f32 %v16191_v52, %v16192_v5 }
 0x326   : > { %v11645_v17 = vpack.c.bf16 %v9734_v16, %v9734_v16  ;;  %v9732_v43 = vmax.f32 %v9604_v48, 0.0  ;;  %v9609_v44 = vadd.f32 %v15077_v47, %v9474_v49  ;;  %v9472_v8 = vmax.f32 %v8158_v4, %v9237_v34  ;;  %v16194_v48 = vld [vmem:[#allocation154_spill] sm:$0xff]  ;;  %v16195_v49 = vld [vmem:[#allocation155_spill] sm:$0xff] }
 0x327   : > { %10372 = vst.msk [vmem:[%s14696_s29 + $0x160] sm:$0xf] %vm10283_vm3, %v11642_v61  ;;  %v8161_v23 = vmax.f32 %v16181_v0, %v12299_v24  ;;  %v7926_v27 = vpop.f32.mrf.mxu0  ;;  %v9240_v28 = vpop.f32.mrf.mxu1  ;;  %v16196_v20 = vmax.f32 %v16194_v48, %v16195_v49 }
 0x328   : > { %10375 = vst.msk [vmem:[%s14696_s29 + $0x16c] sm:$0xf] %vm10283_vm3, %v11645_v17  ;;  %v11643_v22 = vpack.c.bf16 %v9732_v43, %v9732_v43  ;;  %v9737_v13 = vmax.f32 %v9609_v44, 0.0  ;;  %v9607_v18 = vadd.f32 %v15077_v47, %v9472_v8  ;;  %v8159_v7 = vmax.f32 %v16184_v6, %v7926_v27  ;;  %v16197_v17 = vld [vmem:[#allocation156_spill] sm:$0xff]  ;;  %v16198_v43 = vld [vmem:[#allocation157_spill] sm:$0xff] }
 0x329   : > { %v9475_v11 = vmax.f32 %v8161_v23, %v12429_v25  ;;  %v12302_v12 = vpop.f32.mrf.mxu0  ;;  %v12432_v59 = vpop.f32.mrf.mxu1  ;;  %v16199_v44 = vmax.f32 %v16197_v17, %v16198_v43 }
 0x32a   : > { %10373 = vst.msk [vmem:[%s14696_s29 + $0x164] sm:$0xf] %vm10283_vm3, %v11643_v22  ;;  %v11648_v60 = vpack.c.bf16 %v9737_v13, %v9737_v13  ;;  %v9735_v33 = vmax.f32 %v9607_v18, 0.0  ;;  %v9473_v38 = vmax.f32 %v8159_v7, %v9240_v28  ;;  %v8164_v31 = vmax.f32 %v16187_v30, %v12302_v12  ;;  %v16200_v22 = vld [vmem:[#allocation158_spill] sm:$0xff]  ;;  %v16201_v13 = vld [vmem:[#allocation159_spill] sm:$0xff] }
 0x32b   : > { %v9610_v46 = vadd.f32 %v15077_v47, %v9475_v11  ;;  %v7939_v54 = vpop.f32.mrf.mxu0  ;;  %v9253_v1 = vpop.f32.mrf.mxu1  ;;  %v16202_v18 = vmax.f32 %v16200_v22, %v16201_v13 }
 0x32c   : > { %10378 = vst.msk [vmem:[%s14696_s29 + $0x178] sm:$0xf] %vm10283_vm3, %v11648_v60  ;;  %v11646_v29 = vpack.c.bf16 %v9735_v33, %v9735_v33  ;;  %v9608_v45 = vadd.f32 %v15077_v47, %v9473_v38  ;;  %v9478_v53 = vmax.f32 %v8164_v31, %v12432_v59  ;;  %v8162_v14 = vmax.f32 %v16190_v63, %v7939_v54  ;;  %v16203_v60 = vld [vmem:[#allocation160_spill] sm:$0xff]  ;;  %v16204_v33 = vld [vmem:[#allocation161_spill] sm:$0xff] }
 0x32d   : > { %v9738_v15 = vmax.f32 %v9610_v46, 0.0  ;;  %v12303_v51 = vpop.f32.mrf.mxu0  ;;  %v12433_v35 = vpop.f32.mrf.mxu1  ;;  %v16205_v38 = vmax.f32 %v16203_v60, %v16204_v33 }
 0x32e   : > { %10376 = vst.msk [vmem:[%s14696_s29 + $0x170] sm:$0xf] %vm10283_vm3, %v11646_v29  ;;  %v9736_v36 = vmax.f32 %v9608_v45, 0.0  ;;  %v9613_v42 = vadd.f32 %v15077_v47, %v9478_v53  ;;  %v9476_v39 = vmax.f32 %v8162_v14, %v9253_v1  ;;  %v8165_v41 = vmax.f32 %v16193_v40, %v12303_v51  ;;  %v16206_v29 = vld [vmem:[#allocation162_spill] sm:$0xff]  ;;  %v16207_v45 = vld [vmem:[#allocation163_spill] sm:$0xff] }
 0x32f   : > { %v11649_v10 = vpack.c.bf16 %v9738_v15, %v9738_v15  ;;  %v7942_v56 = vpop.f32.mrf.mxu0  ;;  %v9256_v57 = vpop.f32.mrf.mxu1  ;;  %v16208_v53 = vmax.f32 %v16206_v29, %v16207_v45 }
 0x330   : > { %v11647_v21 = vpack.c.bf16 %v9736_v36, %v9736_v36  ;;  %v9741_v19 = vmax.f32 %v9613_v42, 0.0  ;;  %v9611_v34 = vadd.f32 %v15077_v47, %v9476_v39  ;;  %v9479_v16 = vmax.f32 %v8165_v41, %v12433_v35  ;;  %v16209_v42 = vld [vmem:[#allocation164_spill] sm:$0xff]  ;;  %v16210_v39 = vld [vmem:[#allocation165_spill] sm:$0xff] }
 0x331   : > { %10379 = vst.msk [vmem:[%s14696_s29 + $0x17c] sm:$0xf] %vm10283_vm3, %v11649_v10  ;;  %v8163_v3 = vmax.f32 %v16196_v20, %v7942_v56  ;;  %v12306_v32 = vpop.f32.mrf.mxu0  ;;  %v12436_v4 = vpop.f32.mrf.mxu1  ;;  %v16211_v52 = vmax.f32 %v16209_v42, %v16210_v39 }
 0x332   : > { %10377 = vst.msk [vmem:[%s14696_s29 + $0x174] sm:$0xf] %vm10283_vm3, %v11647_v21  ;;  %v11652_v61 = vpack.c.bf16 %v9741_v19, %v9741_v19  ;;  %v9739_v24 = vmax.f32 %v9611_v34, 0.0  ;;  %v9614_v25 = vadd.f32 %v15077_v47, %v9479_v16  ;;  %v8168_v8 = vmax.f32 %v16199_v44, %v12306_v32  ;;  %v16212_v21 = vld [vmem:[#allocation166_spill] sm:$0xff]  ;;  %v16213_v19 = vld [vmem:[#allocation167_spill] sm:$0xff] }
 0x333   : > { %v9477_v9 = vmax.f32 %v8163_v3, %v9256_v57  ;;  %v7955_v55 = vpop.f32.mrf.mxu0  ;;  %v9269_v0 = vpop.f32.mrf.mxu1  ;;  %v16214_v34 = vmax.f32 %v16212_v21, %v16213_v19 }
 0x334   : > { %10382 = vst.msk [vmem:[%s14696_s29 + $0x188] sm:$0xf] %vm10283_vm3, %v11652_v61  ;;  %v11650_v23 = vpack.c.bf16 %v9739_v24, %v9739_v24  ;;  %v9742_v27 = vmax.f32 %v9614_v25, 0.0  ;;  %v9482_v28 = vmax.f32 %v8168_v8, %v12436_v4  ;;  %v8166_v26 = vmax.f32 %v16202_v18, %v7955_v55  ;;  %v16215_v61 = vld [vmem:[#allocation168_spill] sm:$0xff]  ;;  %v16216_v24 = vld [vmem:[#allocation169_spill] sm:$0xff] }
 0x335   : > { %v9612_v58 = vadd.f32 %v15077_v47, %v9477_v9  ;;  %v12307_v6 = vpop.f32.mrf.mxu0  ;;  %v12437_v7 = vpop.f32.mrf.mxu1  ;;  %v16217_v25 = vmax.f32 %v16215_v61, %v16216_v24 }
 0x336   : > { %10380 = vst.msk [vmem:[%s14696_s29 + $0x180] sm:$0xf] %vm10283_vm3, %v11650_v23  ;;  %v11653_v11 = vpack.c.bf16 %v9742_v27, %v9742_v27  ;;  %v9617_v12 = vadd.f32 %v15077_v47, %v9482_v28  ;;  %v9480_v59 = vmax.f32 %v8166_v26, %v9269_v0  ;;  %v8169_v37 = vmax.f32 %v16205_v38, %v12307_v6  ;;  %v16218_v23 = vld [vmem:[#allocation170_spill] sm:$0xff]  ;;  %v16219_v27 = vld [vmem:[#allocation171_spill] sm:$0xff] }
 0x337   : > { %v9740_v2 = vmax.f32 %v9612_v58, 0.0  ;;  %v7958_v30 = vpop.f32.mrf.mxu0  ;;  %v9272_v31 = vpop.f32.mrf.mxu1  ;;  %v16220_v28 = vmax.f32 %v16218_v23, %v16219_v27 }
 0x338   : > { %10383 = vst.msk [vmem:[%s14696_s29 + $0x18c] sm:$0xf] %vm10283_vm3, %v11653_v11  ;;  %v9745_v46 = vmax.f32 %v9617_v12, 0.0  ;;  %v9615_v54 = vadd.f32 %v15077_v47, %v9480_v59  ;;  %v9483_v1 = vmax.f32 %v8169_v37, %v12437_v7  ;;  %v8167_v50 = vmax.f32 %v16208_v53, %v7958_v30  ;;  %v16221_v11 = vld [vmem:[#allocation172_spill] sm:$0xff]  ;;  %v16222_v12 = vld [vmem:[#allocation173_spill] sm:$0xff] }
 0x339   : > { %v11651_v62 = vpack.c.bf16 %v9740_v2, %v9740_v2  ;;  %v12310_v63 = vpop.f32.mrf.mxu0  ;;  %v12440_v14 = vpop.f32.mrf.mxu1  ;;  %v16223_v59 = vmax.f32 %v16221_v11, %v16222_v12 }
 0x33a   : > { %v11656_v15 = vpack.c.bf16 %v9745_v46, %v9745_v46  ;;  %v9743_v51 = vmax.f32 %v9615_v54, 0.0  ;;  %v9618_v35 = vadd.f32 %v15077_v47, %v9483_v1  ;;  %v9481_v36 = vmax.f32 %v8167_v50, %v9272_v31  ;;  %v16224_v54 = vld [vmem:[#allocation174_spill] sm:$0xff]  ;;  %v16225_v1 = vld [vmem:[#allocation175_spill] sm:$0xff] }
 0x33b   : > { %10381 = vst.msk [vmem:[%s14696_s29 + $0x184] sm:$0xf] %vm10283_vm3, %v11651_v62  ;;  %v8172_v5 = vmax.f32 %v16211_v52, %v12310_v63  ;;  %v7971_v40 = vpop.f32.mrf.mxu0  ;;  %v9285_v41 = vpop.f32.mrf.mxu1  ;;  %v16226_v29 = vmax.f32 %v16224_v54, %v16225_v1 }
 0x33c   : > { %10386 = vst.msk [vmem:[%s14696_s29 + $0x198] sm:$0xf] %vm10283_vm3, %v11656_v15  ;;  %v11654_v10 = vpack.c.bf16 %v9743_v51, %v9743_v51  ;;  %v9746_v56 = vmax.f32 %v9618_v35, 0.0  ;;  %v9616_v57 = vadd.f32 %v15077_v47, %v9481_v36  ;;  %v8170_v16 = vmax.f32 %v16214_v34, %v7971_v40  ;;  %v16227_v15 = vld [vmem:[#allocation176_spill] sm:$0xff]  ;;  %v16228_v51 = vld [vmem:[#allocation177_spill] sm:$0xff] }
 0x33d   : > { %v9486_v48 = vmax.f32 %v8172_v5, %v12440_v14  ;;  %v12311_v49 = vpop.f32.mrf.mxu0  ;;  %v12441_v20 = vpop.f32.mrf.mxu1  ;;  %v16229_v35 = vmax.f32 %v16227_v15, %v16228_v51 }
 0x33e   : > { %10384 = vst.msk [vmem:[%s14696_s29 + $0x190] sm:$0xf] %vm10283_vm3, %v11654_v10  ;;  %v11657_v3 = vpack.c.bf16 %v9746_v56, %v9746_v56  ;;  %v9744_v32 = vmax.f32 %v9616_v57, 0.0  ;;  %v9484_v4 = vmax.f32 %v8170_v16, %v9285_v41  ;;  %v8173_v17 = vmax.f32 %v16217_v25, %v12311_v49  ;;  %v16230_v10 = vld [vmem:[#allocation178_spill] sm:$0xff]  ;;  %v16231_v56 = vld [vmem:[#allocation179_spill] sm:$0xff] }
 0x33f   : > { %v9621_v43 = vadd.f32 %v15077_v47, %v9486_v48  ;;  %v7974_v44 = vpop.f32.mrf.mxu0  ;;  %v9288_v8 = vpop.f32.mrf.mxu1  ;;  %v16232_v57 = vmax.f32 %v16230_v10, %v16231_v56 }
 0x340   : > { %10387 = vst.msk [vmem:[%s14696_s29 + $0x19c] sm:$0xf] %vm10283_vm3, %v11657_v3  ;;  %v11655_v9 = vpack.c.bf16 %v9744_v32, %v9744_v32  ;;  %v9619_v55 = vadd.f32 %v15077_v47, %v9484_v4  ;;  %v9487_v0 = vmax.f32 %v8173_v17, %v12441_v20  ;;  %v8171_v22 = vmax.f32 %v16220_v28, %v7974_v44  ;;  %v16233_v3 = vld [vmem:[#allocation180_spill] sm:$0xff]  ;;  %v16234_v32 = vld [vmem:[#allocation181_spill] sm:$0xff] }
 0x341   : > { %v9749_v13 = vmax.f32 %v9621_v43, 0.0  ;;  %v12314_v18 = vpop.f32.mrf.mxu0  ;;  %v12444_v26 = vpop.f32.mrf.mxu1  ;;  %v16235_v4 = vmax.f32 %v16233_v3, %v16234_v32 }
 0x342   : > { %10385 = vst.msk [vmem:[%s14696_s29 + $0x194] sm:$0xf] %vm10283_vm3, %v11655_v9  ;;  %v9747_v58 = vmax.f32 %v9619_v55, 0.0  ;;  %v9622_v6 = vadd.f32 %v15077_v47, %v9487_v0  ;;  %v9485_v7 = vmax.f32 %v8171_v22, %v9288_v8  ;;  %v8176_v60 = vmax.f32 %v16223_v59, %v12314_v18  ;;  %v16236_v9 = vld [vmem:[#allocation182_spill] sm:$0xff]  ;;  %v16237_v55 = vld [vmem:[#allocation183_spill] sm:$0xff] }
 0x343   : > { %v11660_v33 = vpack.c.bf16 %v9749_v13, %v9749_v13  ;;  %v7987_v38 = vpop.f32.mrf.mxu0  ;;  %v9301_v37 = vpop.f32.mrf.mxu1  ;;  %v16238_v0 = vmax.f32 %v16236_v9, %v16237_v55 }
 0x344   : > { %v11658_v2 = vpack.c.bf16 %v9747_v58, %v9747_v58  ;;  %v9750_v30 = vmax.f32 %v9622_v6, 0.0  ;;  %v9620_v31 = vadd.f32 %v15077_v47, %v9485_v7  ;;  %v9490_v46 = vmax.f32 %v8176_v60, %v12444_v26  ;;  %v16239_v6 = vld [vmem:[#allocation184_spill] sm:$0xff]  ;;  %v16240_v7 = vld [vmem:[#allocation185_spill] sm:$0xff] }
 0x345   : > { %10390 = vst.msk [vmem:[%s14696_s29 + $0x1a8] sm:$0xf] %vm10283_vm3, %v11660_v33  ;;  %v8174_v45 = vmax.f32 %v16226_v29, %v7987_v38  ;;  %v12315_v53 = vpop.f32.mrf.mxu0  ;;  %v12445_v50 = vpop.f32.mrf.mxu1  ;;  %v16241_v11 = vmax.f32 %v16239_v6, %v16240_v7 }
 0x346   : > { %10388 = vst.msk [vmem:[%s14696_s29 + $0x1a0] sm:$0xf] %vm10283_vm3, %v11658_v2  ;;  %v11661_v62 = vpack.c.bf16 %v9750_v30, %v9750_v30  ;;  %v9748_v63 = vmax.f32 %v9620_v31, 0.0  ;;  %v9625_v14 = vadd.f32 %v15077_v47, %v9490_v46  ;;  %v8177_v36 = vmax.f32 %v16229_v35, %v12315_v53  ;;  %v16242_v2 = vld [vmem:[#allocation186_spill] sm:$0xff]  ;;  %v16243_v30 = vld [vmem:[#allocation187_spill] sm:$0xff] }
 0x347   : > { %v9488_v42 = vmax.f32 %v8174_v45, %v9301_v37  ;;  %v7990_v39 = vpop.f32.mrf.mxu0  ;;  %v9304_v52 = vpop.f32.mrf.mxu1  ;;  %v16244_v31 = vmax.f32 %v16242_v2, %v16243_v30 }
 0x348   : > { %10391 = vst.msk [vmem:[%s14696_s29 + $0x1ac] sm:$0xf] %vm10283_vm3, %v11661_v62  ;;  %v11659_v5 = vpack.c.bf16 %v9748_v63, %v9748_v63  ;;  %v9753_v40 = vmax.f32 %v9625_v14, 0.0  ;;  %v9491_v41 = vmax.f32 %v8177_v36, %v12445_v50  ;;  %v8175_v21 = vmax.f32 %v16232_v57, %v7990_v39  ;;  %v16245_v62 = vld [vmem:[#allocation188_spill] sm:$0xff]  ;;  %v16246_v63 = vld [vmem:[#allocation189_spill] sm:$0xff] }
 0x349   : > { %v9623_v19 = vadd.f32 %v15077_v47, %v9488_v42  ;;  %v12318_v34 = vpop.f32.mrf.mxu0  ;;  %v12448_v16 = vpop.f32.mrf.mxu1  ;;  %v16247_v14 = vmax.f32 %v16245_v62, %v16246_v63 }
 0x34a   : > { %10389 = vst.msk [vmem:[%s14696_s29 + $0x1a4] sm:$0xf] %vm10283_vm3, %v11659_v5  ;;  %v11664_v48 = vpack.c.bf16 %v9753_v40, %v9753_v40  ;;  %v9626_v49 = vadd.f32 %v15077_v47, %v9491_v41  ;;  %v9489_v20 = vmax.f32 %v8175_v21, %v9304_v52  ;;  %v8180_v61 = vmax.f32 %v16235_v4, %v12318_v34  ;;  %v16248_v5 = vld [vmem:[#allocation190_spill] sm:$0xff]  ;;  %v16249_v40 = vld [vmem:[#allocation191_spill] sm:$0xff] }
 0x34b   : > { %v9751_v24 = vmax.f32 %v9623_v19, 0.0  ;;  %v8003_v25 = vpop.f32.mrf.mxu0  ;;  %v9317_v17 = vpop.f32.mrf.mxu1  ;;  %v16250_v41 = vmax.f32 %v16248_v5, %v16249_v40 }
 0x34c   : > { %10394 = vst.msk [vmem:[%s14696_s29 + $0x1b8] sm:$0xf] %vm10283_vm3, %v11664_v48  ;;  %v9754_v43 = vmax.f32 %v9626_v49, 0.0  ;;  %v9624_v44 = vadd.f32 %v15077_v47, %v9489_v20  ;;  %v9494_v8 = vmax.f32 %v8180_v61, %v12448_v16  ;;  %v8178_v23 = vmax.f32 %v16238_v0, %v8003_v25  ;;  %v16251_v48 = vld [vmem:[#allocation192_spill] sm:$0xff]  ;;  %v16252_v49 = vld [vmem:[#allocation193_spill] sm:$0xff] }
 0x34d   : > { %v11662_v27 = vpack.c.bf16 %v9751_v24, %v9751_v24  ;;  %v12319_v28 = vpop.f32.mrf.mxu0  ;;  %v12449_v22 = vpop.f32.mrf.mxu1  ;;  %v16253_v20 = vmax.f32 %v16251_v48, %v16252_v49 }
 0x34e   : > { %v11665_v13 = vpack.c.bf16 %v9754_v43, %v9754_v43  ;;  %v9752_v18 = vmax.f32 %v9624_v44, 0.0  ;;  %v9629_v26 = vadd.f32 %v15077_v47, %v9494_v8  ;;  %v9492_v58 = vmax.f32 %v8178_v23, %v9317_v17  ;;  %v16254_v44 = vld [vmem:[#allocation194_spill] sm:$0xff]  ;;  %v16255_v8 = vld [vmem:[#allocation195_spill] sm:$0xff] }
 0x34f   : > { %10392 = vst.msk [vmem:[%s14696_s29 + $0x1b0] sm:$0xf] %vm10283_vm3, %v11662_v27  ;;  %v8181_v12 = vmax.f32 %v16241_v11, %v12319_v28  ;;  %v8006_v59 = vpop.f32.mrf.mxu0  ;;  %v9320_v60 = vpop.f32.mrf.mxu1  ;;  %v16256_v9 = vmax.f32 %v16254_v44, %v16255_v8 }
 0x350   : > { %10395 = vst.msk [vmem:[%s14696_s29 + $0x1bc] sm:$0xf] %vm10283_vm3, %v11665_v13  ;;  %v11663_v33 = vpack.c.bf16 %v9752_v18, %v9752_v18  ;;  %v9757_v38 = vmax.f32 %v9629_v26, 0.0  ;;  %v9627_v37 = vadd.f32 %v15077_v47, %v9492_v58  ;;  %v8179_v46 = vmax.f32 %v16244_v31, %v8006_v59  ;;  %v16257_v13 = vld [vmem:[#allocation196_spill] sm:$0xff]  ;;  %v16258_v18 = vld [vmem:[#allocation197_spill] sm:$0xff] }
 0x351   : > { %v9495_v54 = vmax.f32 %v8181_v12, %v12449_v22  ;;  %v12322_v1 = vpop.f32.mrf.mxu0  ;;  %v12452_v29 = vpop.f32.mrf.mxu1  ;;  %v16259_v26 = vmax.f32 %v16257_v13, %v16258_v18 }
 0x352   : > { %10393 = vst.msk [vmem:[%s14696_s29 + $0x1b4] sm:$0xf] %vm10283_vm3, %v11663_v33  ;;  %v11668_v45 = vpack.c.bf16 %v9757_v38, %v9757_v38  ;;  %v9755_v53 = vmax.f32 %v9627_v37, 0.0  ;;  %v9493_v50 = vmax.f32 %v8179_v46, %v9320_v60  ;;  %v8184_v15 = vmax.f32 %v16247_v14, %v12322_v1  ;;  %v16260_v33 = vld [vmem:[#allocation198_spill] sm:$0xff]  ;;  %v16261_v38 = vld [vmem:[#allocation199_spill] sm:$0xff] }
 0x353   : > { %v9630_v51 = vadd.f32 %v15077_v47, %v9495_v54  ;;  %v8019_v35 = vpop.f32.mrf.mxu0  ;;  %v9333_v36 = vpop.f32.mrf.mxu1  ;;  %v16262_v37 = vmax.f32 %v16260_v33, %v16261_v38 }
 0x354   : > { %10398 = vst.msk [vmem:[%s14696_s29 + $0x1c8] sm:$0xf] %vm10283_vm3, %v11668_v45  ;;  %v11666_v42 = vpack.c.bf16 %v9755_v53, %v9755_v53  ;;  %v9628_v39 = vadd.f32 %v15077_v47, %v9493_v50  ;;  %v9498_v52 = vmax.f32 %v8184_v15, %v12452_v29  ;;  %v8182_v10 = vmax.f32 %v16250_v41, %v8019_v35  ;;  %v16263_v45 = vld [vmem:[#allocation200_spill] sm:$0xff]  ;;  %v16264_v53 = vld [vmem:[#allocation201_spill] sm:$0xff]  ;;  %v12777_v35 = vld [vmem:[%s15524_s2] ss:$0 sm:$0xff] }
 0x355   : > { %v9758_v56 = vmax.f32 %v9630_v51, 0.0  ;;  %v12323_v57 = vpop.f32.mrf.mxu0  ;;  %v12453_v21 = vpop.f32.mrf.mxu1  ;;  %v16265_v50 = vmax.f32 %v16263_v45, %v16264_v53 }
 0x356   : > { %10396 = vst.msk [vmem:[%s14696_s29 + $0x1c0] sm:$0xf] %vm10283_vm3, %v11666_v42  ;;  %v9756_v19 = vmax.f32 %v9628_v39, 0.0  ;;  %v9633_v34 = vadd.f32 %v15077_v47, %v9498_v52  ;;  %v9496_v16 = vmax.f32 %v8182_v10, %v9333_v36  ;;  %v8185_v3 = vmax.f32 %v16253_v20, %v12323_v57  ;;  %v16267_v39 = vld [vmem:[#allocation203_spill] sm:$0xff] }
 0x357   : > { %v11669_v32 = vpack.c.bf16 %v9758_v56, %v9758_v56  ;;  %v8022_v4 = vpop.f32.mrf.mxu0  ;;  %v9336_v61 = vpop.f32.mrf.mxu1 }
 0x358   : > { %v11667_v24 = vpack.c.bf16 %v9756_v19, %v9756_v19  ;;  %v9761_v25 = vmax.f32 %v9633_v34, 0.0  ;;  %v9631_v17 = vadd.f32 %v15077_v47, %v9496_v16  ;;  %v9499_v43 = vmax.f32 %v8185_v3, %v12453_v21  ;;  %v16269_v34 = vld [vmem:[#allocation204_spill] sm:$0xff]  ;;  %v16270_v16 = vld [vmem:[#allocation205_spill] sm:$0xff] }
 0x359   : > { %10399 = vst.msk [vmem:[%s14696_s29 + $0x1cc] sm:$0xf] %vm10283_vm3, %v11669_v32  ;;  %v8183_v55 = vmax.f32 %v16256_v9, %v8022_v4  ;;  %v12326_v0 = vpop.f32.mrf.mxu0  ;;  %v12456_v23 = vpop.f32.mrf.mxu1  ;;  %v16271_v48 = vmax.f32 %v16269_v34, %v16270_v16 }
 0x35a   : > { %10397 = vst.msk [vmem:[%s14696_s29 + $0x1c4] sm:$0xf] %vm10283_vm3, %v11667_v24  ;;  %v11672_v27 = vpack.c.bf16 %v9761_v25, %v9761_v25  ;;  %v9759_v28 = vmax.f32 %v9631_v17, 0.0  ;;  %v9634_v22 = vadd.f32 %v15077_v47, %v9499_v43  ;;  %v8188_v58 = vmax.f32 %v16259_v26, %v12326_v0  ;;  %v16272_v24 = vld [vmem:[#allocation206_spill] sm:$0xff]  ;;  %v16273_v25 = vld [vmem:[#allocation207_spill] sm:$0xff] }
 0x35b   : > { %v9497_v6 = vmax.f32 %v8183_v55, %v9336_v61  ;;  %v8035_v7 = vpop.f32.mrf.mxu0  ;;  %v9349_v11 = vpop.f32.mrf.mxu1  ;;  %v16274_v17 = vmax.f32 %v16272_v24, %v16273_v25 }
 0x35c   : > { %10402 = vst.msk [vmem:[%s14696_s29 + $0x1d8] sm:$0xf] %vm10283_vm3, %v11672_v27  ;;  %v11670_v12 = vpack.c.bf16 %v9759_v28, %v9759_v28  ;;  %v9762_v59 = vmax.f32 %v9634_v22, 0.0  ;;  %v9502_v60 = vmax.f32 %v8188_v58, %v12456_v23  ;;  %v8186_v2 = vmax.f32 %v16262_v37, %v8035_v7  ;;  %v16275_v27 = vld [vmem:[#allocation208_spill] sm:$0xff]  ;;  %v16276_v28 = vld [vmem:[#allocation209_spill] sm:$0xff] }
 0x35d   : > { %v9632_v30 = vadd.f32 %v15077_v47, %v9497_v6  ;;  %v12327_v31 = vpop.f32.mrf.mxu0  ;;  %v12457_v46 = vpop.f32.mrf.mxu1  ;;  %v16277_v22 = vmax.f32 %v16275_v27, %v16276_v28 }
 0x35e   : > { %10400 = vst.msk [vmem:[%s14696_s29 + $0x1d0] sm:$0xf] %vm10283_vm3, %v11670_v12  ;;  %v11673_v54 = vpack.c.bf16 %v9762_v59, %v9762_v59  ;;  %v9637_v1 = vadd.f32 %v15077_v47, %v9502_v60  ;;  %v9500_v29 = vmax.f32 %v8186_v2, %v9349_v11  ;;  %v8189_v62 = vmax.f32 %v16265_v50, %v12327_v31  ;;  %v16266_v47 = vld [vmem:[#allocation202_spill] sm:$0xff]  ;;  %v16279_v12 = vld [vmem:[#allocation211_spill] sm:$0xff] }
 0x35f   : > { %v9760_v63 = vmax.f32 %v9632_v30, 0.0  ;;  %v8038_v14 = vpop.f32.mrf.mxu0  ;;  %v9352_v15 = vpop.f32.mrf.mxu1  ;;  %v16268_v52 = vmax.f32 %v16266_v47, %v16267_v39  ;;  %v16278_v11 = vld [vmem:[#allocation210_spill] sm:$0xff] }
 0x360   : > { %10403 = vst.msk [vmem:[%s14696_s29 + $0x1dc] sm:$0xf] %vm10283_vm3, %v11673_v54  ;;  %v9765_v51 = vmax.f32 %v9637_v1, 0.0  ;;  %v9635_v36 = vadd.f32 %v12777_v35, %v9500_v29  ;;  %v9503_v42 = vmax.f32 %v8189_v62, %v12457_v46  ;;  %v16280_v59 = vmax.f32 %v16278_v11, %v16279_v12 }
 0x361   : > { %v8187_v5 = vmax.f32 %v16268_v52, %v8038_v14  ;;  %v11671_v40 = vpack.c.bf16 %v9760_v63, %v9760_v63  ;;  %v12330_v41 = vpop.f32.mrf.mxu0  ;;  %v12460_v10 = vpop.f32.mrf.mxu1 }
 0x362   : > { %v11676_v56 = vpack.c.bf16 %v9765_v51, %v9765_v51  ;;  %v9763_v57 = vmax.f32 %v9635_v36, 0.0  ;;  %v9638_v21 = vadd.f32 %v12777_v35, %v9503_v42  ;;  %v8192_v49 = vmax.f32 %v16271_v48, %v12330_v41 }
 0x363   : > { %v9501_v19 = vmax.f32 %v8187_v5, %v9352_v15  ;;  %10401 = vst.msk [vmem:[%s14696_s29 + $0x1d4] sm:$0xf] %vm10283_vm3, %v11671_v40  ;;  %v8051_v20 = vpop.f32.mrf.mxu0  ;;  %v9365_v3 = vpop.f32.mrf.mxu1 }
 0x364   : > { %10406 = vst.msk [vmem:[%s14696_s29 + $0x1e8] sm:$0xf] %vm10283_vm3, %v11676_v56  ;;  %v11674_v32 = vpack.c.bf16 %v9763_v57, %v9763_v57  ;;  %v9766_v4 = vmax.f32 %v9638_v21, 0.0  ;;  %v8190_v43 = vmax.f32 %v16274_v17, %v8051_v20  ;;  %v9506_v44 = vmax.f32 %v8192_v49, %v12460_v10 }
 0x365   : > { %v9636_v61 = vadd.f32 %v12777_v35, %v9501_v19  ;;  %v12331_v8 = vpop.f32.mrf.mxu0  ;;  %v12461_v9 = vpop.f32.mrf.mxu1 }
 0x366   : > { %10404 = vst.msk [vmem:[%s14696_s29 + $0x1e0] sm:$0xf] %vm10283_vm3, %v11674_v32  ;;  %v11677_v55 = vpack.c.bf16 %v9766_v4, %v9766_v4  ;;  %v9504_v23 = vmax.f32 %v8190_v43, %v9365_v3  ;;  %v8193_v13 = vmax.f32 %v16277_v22, %v12331_v8  ;;  %v9641_v18 = vadd.f32 %v12777_v35, %v9506_v44 }
 0x367   : > { %v9764_v0 = vmax.f32 %v9636_v61, 0.0  ;;  %v8054_v26 = vpop.f32.mrf.mxu0  ;;  %v9368_v38 = vpop.f32.mrf.mxu1 }
 0x368   : > { %10407 = vst.msk [vmem:[%s14696_s29 + $0x1ec] sm:$0xf] %vm10283_vm3, %v11677_v55  ;;  %v9639_v6 = vadd.f32 %v12777_v35, %v9504_v23  ;;  %v9507_v7 = vmax.f32 %v8193_v13, %v12461_v9  ;;  %v8191_v60 = vmax.f32 %v16280_v59, %v8054_v26  ;;  %v9769_v33 = vmax.f32 %v9641_v18, 0.0 }
 0x369   : > { %v11675_v58 = vpack.c.bf16 %v9764_v0, %v9764_v0 }
 0x36a   : > { %v9767_v37 = vmax.f32 %v9639_v6, 0.0  ;;  %v9642_v2 = vadd.f32 %v12777_v35, %v9507_v7  ;;  %v9505_v30 = vmax.f32 %v8191_v60, %v9368_v38  ;;  %v11680_v31 = vpack.c.bf16 %v9769_v33, %v9769_v33 }
 0x36b   : > { %10405 = vst.msk [vmem:[%s14696_s29 + $0x1e4] sm:$0xf] %vm10283_vm3, %v11675_v58 }
 0x36c   : > { %v11678_v46 = vpack.c.bf16 %v9767_v37, %v9767_v37  ;;  %v9770_v54 = vmax.f32 %v9642_v2, 0.0  ;;  %v9640_v1 = vadd.f32 %v12777_v35, %v9505_v30  ;;  %10410 = vst.msk [vmem:[%s14696_s29 + $0x1f8] sm:$0xf] %vm10283_vm3, %v11680_v31 }
 0x36e   : > { %10408 = vst.msk [vmem:[%s14696_s29 + $0x1f0] sm:$0xf] %vm10283_vm3, %v11678_v46  ;;  %v11681_v29 = vpack.c.bf16 %v9770_v54, %v9770_v54  ;;  %v9768_v45 = vmax.f32 %v9640_v1, 0.0 }
 0x370   : > { %10411 = vst.msk [vmem:[%s14696_s29 + $0x1fc] sm:$0xf] %vm10283_vm3, %v11681_v29  ;;  %v11679_v53 = vpack.c.bf16 %v9768_v45, %v9768_v45 }
 0x372   : > { %10409 = vst.msk [vmem:[%s14696_s29 + $0x1f4] sm:$0xf] %vm10283_vm3, %v11679_v53 }
 0x373 PF: > { %s13_s18 = sadd.s32 1, %s12832_s18   ;;  %s16281_s12 = smov %s12812_s13 }
 0x374   : > { %p10_p12 = scmp.ge.s32.totalorder %s13_s18, 10   ;;  %s16282_s13 = smov %s12906_s25 }
 0x375   : > { %s16283_s14 = smov %s12824_s16  ;;  %s16284_s15 = smov %s12828_s17 }
 0x376   : > { %s16285_s16 = smov %s16288_s19  ;;  %s16286_s17 = smov %s16292_s20 }
 0x377   :  { %12 = sbr.rel (!%p10_p12) target bundleno = 4 (0x4), region = 126 }

// kernel: agenet_gray_forward.4
= control target key start
LH: loop header
LB: loop body
LE: loop exit
PB: predicated region body
PF: predicated region fallthrough
CT: control target
= control target key end

     0   :  { %s3820_s15 = smov 0   ;;  %s3822_s16 = smov 0   ;;  %s5416_s0 = inlined_call_operand.vmem [shape: bf16[2,2120,192], index: 0, kind: input, shape index: {}]   ;;  %s5417_s1 = inlined_call_operand.vmem [shape: bf16[2,2120,192], index: 1, kind: input, shape index: {}]   ;;  %s5418_s2 = inlined_call_operand.vmem [shape: bf16[3,192,128], index: 2, kind: input, shape index: {}]   ;;  %s5419_s3 = inlined_call_operand.vmem [shape: f32[1,128], index: 3, kind: input, shape index: {}]   ;;  %s5420_s4 = inlined_call_operand.vmem [shape: bf16[2,32,32,128], index: 4, kind: output, shape index: {}]  }
   0x1   :  { %s3824_s17 = smov 0   ;;  %s3826_s18 = smov 0  }
   0x2   :  { %s3828_s19 = smov 0  }
   0x3 LB: > { %s23_s20 = sadd.s32 1, %s3780_s17  ;;  %s26_s21 = sadd.s32 1, %s3784_s18  ;;  %s3788_s19 = sphi %s3828_s19, %s14_s19   ;;  %s3784_s18 = sphi %s3826_s18, %s5653_s18   ;;  %s3780_s17 = sphi %s3824_s17, %s5652_s17   ;;  %s3776_s16 = sphi %s3822_s16, %s5651_s16   ;;  %s3772_s15 = sphi %s3820_s15, %s5650_s15  }
   0x4   : > { %p24_p0 = scmp.ge.s32.totalorder %s23_s20, 2  ;;  %p3208_p1 = scmp.ge.s32.totalorder %s3788_s19, 1 }
   0x5   : > { %p186_p2 = scmp.lt.s32.totalorder %s3788_s19, 5 }
   0x6   : > { %s5655_s20 = smov (%p24_p0, %s23_s20), 0  ;;  %s5657_s21 = smov (!%p24_p0, %s26_s21), %s3784_s18 }
   0x7   : > { %p187_p3 = pnand %p3208_p1, %p186_p2  ;;  %p28_p4 = scmp.ge.s32.totalorder %s5657_s21, 2 }
   0x8   : > { %p222_p5 = scmp.lt.s32.totalorder (!%p187_p3), %s3776_s16, 1  ;;  %s3211_s22 = sshll.u32 (!%p187_p3), %s3772_s15, 4 }
   0x9   : > { %s5659_s21 = smov (%p28_p4, %s5657_s21), 0  ;;  %190 = sbr.rel (%p187_p3) target bundleno = 719 (0x2cf), region = 36 }
   0xa   : > { %p235_p6 = scmp.lt.s32.totalorder (!%p187_p3), %s3211_s22, 31  ;;  %s4233_s28 = smov (!%p187_p3), 0  }
   0xe   : > { %v3856_v0 = vld [vmem:[%s5418_s2] sm:$0xf]  ;;  %v3861_v1 = vld [vmem:[%s5418_s2 + $0x4] sm:$0xf]  ;;  %v3866_v2 = vld [vmem:[%s5418_s2 + $0x8] sm:$0xf] }
   0xf   : > { %5431 = vst [vmem:[#allocation2_spill] sm:$0xff] %v3856_v0  ;;  %5432 = vst [vmem:[#allocation3_spill] sm:$0xff] %v3861_v1  ;;  %v3871_v3 = vld [vmem:[%s5418_s2 + $0xc] sm:$0xf]  ;;  %s5661_s16 = smov (!%p222_p5, %s3776_s16), 1  ;;  %s5663_s22 = smov (!%p235_p6, %s3211_s22), 31 }
  0x10   : > { %5433 = vst [vmem:[#allocation4_spill] sm:$0xff] %v3866_v2  ;;  %5434 = vst [vmem:[#allocation5_spill] sm:$0xff] %v3871_v3  ;;  %v3876_v4 = vld [vmem:[%s5418_s2 + $0x10] sm:$0xf]  ;;  %v3881_v5 = vld [vmem:[%s5418_s2 + $0x14] sm:$0xf] }
  0x11   : > { %5435 = vst [vmem:[#allocation6_spill] sm:$0xff] %v3876_v4  ;;  %5436 = vst [vmem:[#allocation7_spill] sm:$0xff] %v3881_v5  ;;  %v3886_v6 = vld [vmem:[%s5418_s2 + $0x18] sm:$0xf]  ;;  %v3891_v7 = vld [vmem:[%s5418_s2 + $0x1c] sm:$0xf] }
  0x12   : > { %5437 = vst [vmem:[#allocation8_spill] sm:$0xff] %v3886_v6  ;;  %5438 = vst [vmem:[#allocation9_spill] sm:$0xff] %v3891_v7  ;;  %s3559_s13 = smul.u32 2120, %s5661_s16  ;;  %s3213_s14 = sshll.u32 %s5661_s16, 7  ;;  %v3896_v8 = vld [vmem:[%s5418_s2 + $0x20] sm:$0xf] }
  0x13   : > { %5439 = vst [vmem:[#allocation10_spill] sm:$0xff] %v3896_v8  ;;  %v3901_v9 = vld [vmem:[%s5418_s2 + $0x24] sm:$0xf]  ;;  %s3212_s27 = sshll.u32 %s5663_s22, 2  ;;  %v3906_v10 = vld [vmem:[%s5418_s2 + $0x28] sm:$0xf] }
  0x14   : > { %5440 = vst [vmem:[#allocation11_spill] sm:$0xff] %v3901_v9  ;;  %5441 = vst [vmem:[#allocation12_spill] sm:$0xff] %v3906_v10  ;;  %v3911_v11 = vld [vmem:[%s5418_s2 + $0x2c] sm:$0xf]  ;;  %s3916_s7 = scalar_lea.vmem %s5416_s0, %s3559_s13  ;;  %s3921_s10 = scalar_lea.vmem %s5417_s1, %s3559_s13  ;;  %v3926_v12 = vld [vmem:[%s5418_s2 + $0x30] sm:$0xf] }
  0x15   : > { %5442 = vst [vmem:[#allocation13_spill] sm:$0xff] %v3911_v11  ;;  %5443 = vst [vmem:[#allocation14_spill] sm:$0xff] %v3926_v12  ;;  %v3931_v13 = vld [vmem:[%s5418_s2 + $0x34] sm:$0xf]  ;;  %v3936_v14 = vld [vmem:[%s5418_s2 + $0x38] sm:$0xf]  ;;  %s239_s26 = sadd.s32 %s3213_s14, %s3212_s27 }
  0x16   : > { %5444 = vst [vmem:[#allocation15_spill] sm:$0xff] %v3931_v13  ;;  %5445 = vst [vmem:[#allocation16_spill] sm:$0xff] %v3936_v14  ;;  %v3941_v15 = vld [vmem:[%s5418_s2 + $0x3c] sm:$0xf]  ;;  %v3946_v16 = vld [vmem:[%s5418_s2 + $0x40] sm:$0xf] }
  0x17   : > { %5446 = vst [vmem:[#allocation17_spill] sm:$0xff] %v3941_v15  ;;  %5447 = vst [vmem:[#allocation18_spill] sm:$0xff] %v3946_v16  ;;  %v3951_v17 = vld [vmem:[%s5418_s2 + $0x44] sm:$0xf]  ;;  %s3214_s6 = sshll.u32 %s239_s26, 2 }
  0x18   : > { %5448 = vst [vmem:[#allocation19_spill] sm:$0xff] %v3951_v17  ;;  %v3956_v18 = vld [vmem:[%s5418_s2 + $0x48] sm:$0xf]  ;;  %v3961_v19 = vld [vmem:[%s5418_s2 + $0x4c] sm:$0xf]  ;;  %s3966_s12 = scalar_lea.vmem %s5420_s4, %s3214_s6 }
  0x19   : > { %5449 = vst [vmem:[#allocation20_spill] sm:$0xff] %v3956_v18  ;;  %5450 = vst [vmem:[#allocation21_spill] sm:$0xff] %v3961_v19  ;;  %v3971_v20 = vld [vmem:[%s5418_s2 + $0x50] sm:$0xf]  ;;  %v3976_v21 = vld [vmem:[%s5418_s2 + $0x54] sm:$0xf] }
  0x1a   : > { %5451 = vst [vmem:[#allocation22_spill] sm:$0xff] %v3971_v20  ;;  %5452 = vst [vmem:[#allocation23_spill] sm:$0xff] %v3976_v21  ;;  %v3981_v22 = vld [vmem:[%s5418_s2 + $0x58] sm:$0xf]  ;;  %v3986_v23 = vld [vmem:[%s5418_s2 + $0x5c] sm:$0xf] }
  0x1b   : > { %5453 = vst [vmem:[#allocation24_spill] sm:$0xff] %v3981_v22  ;;  %5454 = vst [vmem:[#allocation25_spill] sm:$0xff] %v3986_v23  ;;  %v3991_v24 = vld [vmem:[%s5418_s2 + $0x60] sm:$0xf]  ;;  %v3996_v25 = vld [vmem:[%s5418_s2 + $0x64] sm:$0xf] }
  0x1c   : > { %5455 = vst [vmem:[#allocation26_spill] sm:$0xff] %v3991_v24  ;;  %5456 = vst [vmem:[#allocation27_spill] sm:$0xff] %v3996_v25  ;;  %v4001_v26 = vld [vmem:[%s5418_s2 + $0x68] sm:$0xf]  ;;  %v4006_v27 = vld [vmem:[%s5418_s2 + $0x6c] sm:$0xf] }
  0x1d   : > { %5457 = vst [vmem:[#allocation28_spill] sm:$0xff] %v4001_v26  ;;  %5458 = vst [vmem:[#allocation29_spill] sm:$0xff] %v4006_v27  ;;  %v4011_v28 = vld [vmem:[%s5418_s2 + $0x70] sm:$0xf]  ;;  %v4016_v29 = vld [vmem:[%s5418_s2 + $0x74] sm:$0xf] }
  0x1e   : > { %5459 = vst [vmem:[#allocation30_spill] sm:$0xff] %v4011_v28  ;;  %5460 = vst [vmem:[#allocation31_spill] sm:$0xff] %v4016_v29  ;;  %v4021_v30 = vld [vmem:[%s5418_s2 + $0x78] sm:$0xf]  ;;  %v4026_v31 = vld [vmem:[%s5418_s2 + $0x7c] sm:$0xf] }
  0x1f   : > { %5461 = vst [vmem:[#allocation32_spill] sm:$0xff] %v4021_v30  ;;  %5462 = vst [vmem:[#allocation33_spill] sm:$0xff] %v4026_v31  ;;  %v4031_v32 = vld [vmem:[%s5418_s2 + $0x80] sm:$0xf]  ;;  %v4036_v33 = vld [vmem:[%s5418_s2 + $0x84] sm:$0xf] }
  0x20   : > { %5463 = vst [vmem:[#allocation34_spill] sm:$0xff] %v4031_v32  ;;  %5464 = vst [vmem:[#allocation35_spill] sm:$0xff] %v4036_v33  ;;  %v4041_v34 = vld [vmem:[%s5418_s2 + $0x88] sm:$0xf]  ;;  %v4046_v35 = vld [vmem:[%s5418_s2 + $0x8c] sm:$0xf] }
  0x21   : > { %5465 = vst [vmem:[#allocation36_spill] sm:$0xff] %v4041_v34  ;;  %5466 = vst [vmem:[#allocation37_spill] sm:$0xff] %v4046_v35  ;;  %v4051_v36 = vld [vmem:[%s5418_s2 + $0x90] sm:$0xf]  ;;  %v4056_v37 = vld [vmem:[%s5418_s2 + $0x94] sm:$0xf] }
  0x22   : > { %5467 = vst [vmem:[#allocation38_spill] sm:$0xff] %v4051_v36  ;;  %5468 = vst [vmem:[#allocation39_spill] sm:$0xff] %v4056_v37  ;;  %v4061_v38 = vld [vmem:[%s5418_s2 + $0x98] sm:$0xf]  ;;  %v4066_v39 = vld [vmem:[%s5418_s2 + $0x9c] sm:$0xf] }
  0x23   : > { %5469 = vst [vmem:[#allocation40_spill] sm:$0xff] %v4061_v38  ;;  %5470 = vst [vmem:[#allocation41_spill] sm:$0xff] %v4066_v39  ;;  %v4071_v40 = vld [vmem:[%s5418_s2 + $0xa0] sm:$0xf]  ;;  %v4076_v41 = vld [vmem:[%s5418_s2 + $0xa4] sm:$0xf] }
  0x24   : > { %5471 = vst [vmem:[#allocation42_spill] sm:$0xff] %v4071_v40  ;;  %5472 = vst [vmem:[#allocation43_spill] sm:$0xff] %v4076_v41  ;;  %v4081_v42 = vld [vmem:[%s5418_s2 + $0xa8] sm:$0xf]  ;;  %v4086_v43 = vld [vmem:[%s5418_s2 + $0xac] sm:$0xf] }
  0x25   : > { %5473 = vst [vmem:[#allocation44_spill] sm:$0xff] %v4081_v42  ;;  %5474 = vst [vmem:[#allocation45_spill] sm:$0xff] %v4086_v43  ;;  %v4091_v44 = vld [vmem:[%s5418_s2 + $0xb0] sm:$0xf]  ;;  %v4096_v45 = vld [vmem:[%s5418_s2 + $0xb4] sm:$0xf] }
  0x26   : > { %5475 = vst [vmem:[#allocation46_spill] sm:$0xff] %v4091_v44  ;;  %5476 = vst [vmem:[#allocation47_spill] sm:$0xff] %v4096_v45  ;;  %v4101_v46 = vld [vmem:[%s5418_s2 + $0xb8] sm:$0xf]  ;;  %v4106_v47 = vld [vmem:[%s5418_s2 + $0xbc] sm:$0xf] }
  0x27   : > { %5477 = vst [vmem:[#allocation48_spill] sm:$0xff] %v4101_v46  ;;  %5478 = vst [vmem:[#allocation49_spill] sm:$0xff] %v4106_v47  ;;  %v4111_v48 = vld [vmem:[%s5418_s2 + $0xc0] sm:$0xf]  ;;  %v4116_v49 = vld [vmem:[%s5418_s2 + $0xc4] sm:$0xf] }
  0x28   : > { %5479 = vst [vmem:[#allocation50_spill] sm:$0xff] %v4111_v48  ;;  %5480 = vst [vmem:[#allocation51_spill] sm:$0xff] %v4116_v49  ;;  %v4121_v50 = vld [vmem:[%s5418_s2 + $0xc8] sm:$0xf]  ;;  %v4126_v51 = vld [vmem:[%s5418_s2 + $0xcc] sm:$0xf] }
  0x29   : > { %5481 = vst [vmem:[#allocation52_spill] sm:$0xff] %v4121_v50  ;;  %5482 = vst [vmem:[#allocation53_spill] sm:$0xff] %v4126_v51  ;;  %v4131_v52 = vld [vmem:[%s5418_s2 + $0xd0] sm:$0xf]  ;;  %v4136_v53 = vld [vmem:[%s5418_s2 + $0xd4] sm:$0xf] }
  0x2a   : > { %5483 = vst [vmem:[#allocation54_spill] sm:$0xff] %v4131_v52  ;;  %5484 = vst [vmem:[#allocation55_spill] sm:$0xff] %v4136_v53  ;;  %v4141_v54 = vld [vmem:[%s5418_s2 + $0xd8] sm:$0xf]  ;;  %v4146_v55 = vld [vmem:[%s5418_s2 + $0xdc] sm:$0xf] }
  0x2b   : > { %5485 = vst [vmem:[#allocation56_spill] sm:$0xff] %v4141_v54  ;;  %5486 = vst [vmem:[#allocation57_spill] sm:$0xff] %v4146_v55  ;;  %v4151_v56 = vld [vmem:[%s5418_s2 + $0xe0] sm:$0xf]  ;;  %v4156_v57 = vld [vmem:[%s5418_s2 + $0xe4] sm:$0xf] }
  0x2c   : > { %5487 = vst [vmem:[#allocation58_spill] sm:$0xff] %v4151_v56  ;;  %5488 = vst [vmem:[#allocation59_spill] sm:$0xff] %v4156_v57  ;;  %v4161_v58 = vld [vmem:[%s5418_s2 + $0xe8] sm:$0xf]  ;;  %v4166_v59 = vld [vmem:[%s5418_s2 + $0xec] sm:$0xf] }
  0x2d   : > { %5489 = vst [vmem:[#allocation60_spill] sm:$0xff] %v4161_v58  ;;  %5490 = vst [vmem:[#allocation61_spill] sm:$0xff] %v4166_v59  ;;  %v4171_v60 = vld [vmem:[%s5418_s2 + $0xf0] sm:$0xf]  ;;  %v4176_v61 = vld [vmem:[%s5418_s2 + $0xf4] sm:$0xf] }
  0x2e   : > { %5491 = vst [vmem:[#allocation62_spill] sm:$0xff] %v4171_v60  ;;  %5492 = vst [vmem:[#allocation63_spill] sm:$0xff] %v4176_v61  ;;  %v4181_v62 = vld [vmem:[%s5418_s2 + $0xf8] sm:$0xf]  ;;  %v4186_v63 = vld [vmem:[%s5418_s2 + $0xfc] sm:$0xf] }
  0x2f   : > { %5493 = vst [vmem:[#allocation64_spill] sm:$0xff] %v4181_v62  ;;  %5494 = vst [vmem:[#allocation65_spill] sm:$0xff] %v4186_v63  ;;  %v4191_v48 = vld [vmem:[%s5418_s2 + $0x100] sm:$0xf]  ;;  %v4196_v49 = vld [vmem:[%s5418_s2 + $0x104] sm:$0xf] }
  0x30   : > { %5495 = vst [vmem:[#allocation66_spill] sm:$0xff] %v4191_v48  ;;  %5496 = vst [vmem:[#allocation67_spill] sm:$0xff] %v4196_v49  ;;  %v4201_v50 = vld [vmem:[%s5418_s2 + $0x108] sm:$0xf]  ;;  %v4206_v51 = vld [vmem:[%s5418_s2 + $0x10c] sm:$0xf] }
  0x31   : > { %5497 = vst [vmem:[#allocation68_spill] sm:$0xff] %v4201_v50  ;;  %5498 = vst [vmem:[#allocation69_spill] sm:$0xff] %v4206_v51  ;;  %v4211_v52 = vld [vmem:[%s5418_s2 + $0x110] sm:$0xf]  ;;  %v4216_v48 = vld [vmem:[%s5418_s2 + $0x114] sm:$0xf] }
  0x32   : > { %5499 = vst [vmem:[#allocation70_spill] sm:$0xff] %v4211_v52  ;;  %5500 = vst [vmem:[#allocation71_spill] sm:$0xff] %v4216_v48  ;;  %v4221_v49 = vld [vmem:[%s5418_s2 + $0x118] sm:$0xf]  ;;  %v4226_v50 = vld [vmem:[%s5418_s2 + $0x11c] sm:$0xf] }
  0x33   : > { %5501 = vst [vmem:[#allocation72_spill] sm:$0xff] %v4221_v49  ;;  %5502 = vst [vmem:[#allocation73_spill] sm:$0xff] %v4226_v50  ;;  %v4231_v51 = vld [vmem:[%s5419_s3] ss:$0 sm:$0xff] }
  0x34   : > { %5503 = vst [vmem:[#allocation74_spill] sm:$0xff] %v4231_v51 }
  0x35 LB: >> { %v5504_v39 = vld [vmem:[#allocation41_spill] sm:$0xff]  ;;  %v5505_v38 = vld [vmem:[#allocation40_spill] sm:$0xff]  ;;  %s331_s29 = smul.u32 1056, %s3772_s15  ;;  %v5421_v49 = vmov 0   ;;  %v5508_v37 = vld [vmem:[#allocation39_spill] sm:$0xff]  ;;  %vm631_vm0 = vcmask 523264   ;;  %s3792_s28 = sphi %s4233_s28, %s330_s28  }
  0x36   : >> { %v4240_v52 = vcombine.low %v5505_v38, %v5504_v39  ;;  %v5506_v15 = vld [vmem:[#allocation17_spill] sm:$0xff]  ;;  %v5507_v14 = vld [vmem:[#allocation16_spill] sm:$0xff]  ;;  %683 = vmatprep.subr.bf16.mxu0 %v5421_v49  ;;  %1124 = vmatprep.subr.bf16.mxu1 %v5421_v49  ;;  %v5509_v36 = vld [vmem:[#allocation38_spill] sm:$0xff]  ;;  %s332_s13 = smul.u32 264, %s3792_s28  ;;  %vm1297_vm1 = vsmask.f32 7424 }
  0x37   : >> { %v4244_v48 = vcombine.low %v5507_v14, %v5506_v15  ;;  %v4253_v38 = vcombine.low %v5509_v36, %v5508_v37  ;;  %v5510_v13 = vld [vmem:[#allocation15_spill] sm:$0xff]  ;;  %v5511_v12 = vld [vmem:[#allocation14_spill] sm:$0xff]  ;;  %v5512_v35 = vld [vmem:[#allocation37_spill] sm:$0xff]  ;;  %vm2795_vm2 = vcmask 1046528   ;;  %s3529_s9 = sshll.u32 %s3792_s28, 6  ;;  %vm2896_vm3 = vcmask 1042432  }
  0x38   : >> { %684 = vmatpush1.bf16.msra.mxu0 %v4240_v52  ;;  %v4257_v14 = vcombine.low %v5511_v12, %v5510_v13  ;;  %s333_s30 = sadd.s32 %s332_s13, %s331_s29  ;;  %v5513_v34 = vld [vmem:[#allocation36_spill] sm:$0xff]  ;;  %v5514_v11 = vld [vmem:[#allocation13_spill] sm:$0xff]  ;;  %v5516_v33 = vld [vmem:[#allocation35_spill] sm:$0xff]  ;;  %s5227_s14 = scalar_lea.vmem %s3966_s12, %s3529_s9  ;;  %vm2897_vm4 = vcmask 1046532   ;;  %vm2974_vm6 = vcmask 1041408   ;;  %vm2975_vm7 = vcmask 1045508  }
  0x39   : >> { %1125 = vmatpush1.bf16.msra.mxu1 %v4244_v48  ;;  %685 = vmatprep.subr.bf16.mxu0 %v5421_v49  ;;  %s334_s5 = sshra.s32 %s333_s30, 3  ;;  %v4266_v15 = vcombine.low %v5513_v34, %v5512_v35  ;;  %v5515_v10 = vld [vmem:[#allocation12_spill] sm:$0xff]  ;;  %v5517_v32 = vld [vmem:[#allocation34_spill] sm:$0xff]  ;;  %v5518_v9 = vld [vmem:[#allocation11_spill] sm:$0xff]  ;;  %vm3052_vm9 = vcmask 1040384   ;;  %vm3053_vm10 = vcmask 1044484  }
  0x3a   : >> { %1126 = vmatprep.subr.bf16.mxu1 %v5421_v49  ;;  %v4270_v36 = vcombine.low %v5515_v10, %v5514_v11  ;;  %s3522_s16 = sshll.u32 %s334_s5, 3  ;;  %v4288_v10 = vcombine.low %v5517_v32, %v5516_v33  ;;  %v5519_v8 = vld [vmem:[#allocation10_spill] sm:$0xff]  ;;  %v5520_v11 = vmov 0   ;;  %v5521_v31 = vld [vmem:[#allocation33_spill] sm:$0xff]  ;;  %v5522_v30 = vld [vmem:[#allocation32_spill] sm:$0xff]  ;;  %s330_s28 = sadd.s32 1, %s3792_s28  }
  0x3b   : >> { %s4275_s6 = scalar_lea.vmem %s3921_s10, %s3522_s16  ;;  %s4278_s8 = scalar_lea.vmem %s3916_s7, %s3522_s16  ;;  %v4303_v32 = vcombine.low %v5522_v30, %v5521_v31  ;;  %v5523_v7 = vld [vmem:[#allocation9_spill] sm:$0xff]  ;;  %v5524_v6 = vld [vmem:[#allocation8_spill] sm:$0xff]  ;;  %v5525_v29 = vld [vmem:[#allocation31_spill] sm:$0xff] }
  0x3c   : >> { %686 = vmatpush1.bf16.msra.mxu0 %v4253_v38  ;;  %v3609_v12 = vld [vmem:[%s4275_s6 + $0x4] ss:$8 sps:$4 sm:$0xff]   ;;  %v5529_v27 = vld [vmem:[#allocation29_spill] sm:$0xff]  ;;  %v5530_v26 = vld [vmem:[#allocation28_spill] sm:$0xff]  ;;  %p327_p7 = scmp.ge.s32.totalorder %s330_s28, 4  }
  0x3d   : >> { %1127 = vmatpush1.bf16.msra.mxu1 %v4257_v14  ;;  %687 = vmatprep.subr.bf16.mxu0 %v5421_v49  ;;  %v4282_v13 = vld [vmem:[%s4278_s8 + $0x4] ss:$8 sps:$4 sm:$0xff]   ;;  %v5531_v3 = vld [vmem:[#allocation5_spill] sm:$0xff]  ;;  %v5532_v2 = vld [vmem:[#allocation4_spill] sm:$0xff] }
  0x3e   : >> { %1128 = vmatprep.subr.bf16.mxu1 %v5421_v49  ;;  %v4292_v49 = vcombine.low %v5519_v8, %v5518_v9  ;;  %3313 = vmatprep.mubr.msk.bf16.mxu0 %vm631_vm0, %v3609_v12  ;;  %v4307_v8 = vcombine.low %v5524_v6, %v5523_v7  ;;  %v5526_v28 = vld [vmem:[#allocation30_spill] sm:$0xff]  ;;  %v5527_v5 = vld [vmem:[#allocation7_spill] sm:$0xff]  ;;  %v4327_v6 = vcombine.low %v5530_v26, %v5529_v27  ;;  %v5537_v47 = vld [vmem:[#allocation49_spill] sm:$0xff] }
  0x3f   : >> { %3376 = vmatprep.mubr.msk.bf16.mxu1 %vm631_vm0, %v4282_v13  ;;  %v4315_v12 = vcombine.low %v5526_v28, %v5525_v29  ;;  %v5528_v4 = vld [vmem:[#allocation6_spill] sm:$0xff]  ;;  %v4331_v7 = vcombine.low %v5532_v2, %v5531_v3  ;;  %v5533_v25 = vld [vmem:[#allocation27_spill] sm:$0xff]  ;;  %v5538_v46 = vld [vmem:[#allocation48_spill] sm:$0xff]  ;;  %v1310_v28 = vshrl.u32 %v4282_v13, 16 }
  0x40   : >> { %688 = vmatpush1.bf16.msra.mxu0 %v4266_v15  ;;  %v4319_v9 = vcombine.low %v5528_v4, %v5527_v5  ;;  %v5534_v24 = vld [vmem:[#allocation26_spill] sm:$0xff]  ;;  %v5535_v1 = vld [vmem:[#allocation3_spill] sm:$0xff]  ;;  %v4351_v2 = vcombine.low %v5538_v46, %v5537_v47  ;;  %v5539_v23 = vld [vmem:[#allocation25_spill] sm:$0xff] }
  0x41   : >> { %1129 = vmatpush1.bf16.msra.mxu1 %v4270_v36  ;;  %689 = vmatprep.subr.bf16.mxu0 %v5520_v11  ;;  %v4339_v4 = vcombine.low %v5534_v24, %v5533_v25  ;;  %v5536_v0 = vld [vmem:[#allocation2_spill] sm:$0xff]  ;;  %v5540_v22 = vld [vmem:[#allocation24_spill] sm:$0xff]  ;;  %v5541_v45 = vld [vmem:[#allocation47_spill] sm:$0xff] }
  0x42   : >> { %1130 = vmatprep.subr.bf16.mxu1 %v5520_v11  ;;  %v4343_v5 = vcombine.low %v5536_v0, %v5535_v1  ;;  %v4355_v3 = vcombine.low %v5540_v22, %v5539_v23  ;;  %v5542_v44 = vld [vmem:[#allocation46_spill] sm:$0xff]  ;;  %v5543_v21 = vld [vmem:[#allocation23_spill] sm:$0xff]  ;;  %v5545_v43 = vld [vmem:[#allocation45_spill] sm:$0xff] }
  0x43   : >> { %v4363_v0 = vcombine.low %v5542_v44, %v5541_v45  ;;  %v5544_v20 = vld [vmem:[#allocation22_spill] sm:$0xff]  ;;  %v5546_v42 = vld [vmem:[#allocation44_spill] sm:$0xff]  ;;  %v5547_v19 = vld [vmem:[#allocation21_spill] sm:$0xff] }
  0x44   : >> { %690 = vmatpush1.bf16.msra.mxu0 %v4288_v10  ;;  %v4367_v1 = vcombine.low %v5544_v20, %v5543_v21  ;;  %v4375_v22 = vcombine.low %v5546_v42, %v5545_v43  ;;  %v5548_v18 = vld [vmem:[#allocation20_spill] sm:$0xff]  ;;  %v3614_v20 = vld [vmem:[%s4278_s8] ss:$8 sps:$4 sm:$0xff]   ;;  %v5553_v63 = vld [vmem:[#allocation65_spill] sm:$0xff] }
  0x45   : >> { %1131 = vmatpush1.bf16.msra.mxu1 %v4292_v49  ;;  %691 = vmatprep.subr.bf16.mxu0 %v5520_v11  ;;  %v4379_v23 = vcombine.low %v5548_v18, %v5547_v19  ;;  %v5549_v41 = vld [vmem:[#allocation43_spill] sm:$0xff]  ;;  %v5550_v40 = vld [vmem:[#allocation42_spill] sm:$0xff]  ;;  %v1301_v25 = vshll.u32 %v3614_v20, 16  ;;  %v3620_v18 = vld [vmem:[%s4278_s8 + $0x10] ss:$8 sps:$4 sm:$0xff]   ;;  %v1312_v19 = vshll.u32 %v4282_v13, 16 }
  0x46   : >> { %1132 = vmatprep.subr.bf16.mxu1 %v5520_v11  ;;  %v4388_v21 = vcombine.low %v5550_v40, %v5549_v41  ;;  %v5551_v17 = vld [vmem:[#allocation19_spill] sm:$0xff]  ;;  %v5552_v16 = vld [vmem:[#allocation18_spill] sm:$0xff]  ;;  %v1306_v26 = vshll.u32 %v3620_v18, 16  ;;  %v5554_v62 = vld [vmem:[#allocation64_spill] sm:$0xff] }
  0x47   : >> { %v4392_v24 = vcombine.low %v5552_v16, %v5551_v17  ;;  %v3613_v27 = vld [vmem:[%s4275_s6] ss:$8 sps:$4 sm:$0xff]   ;;  %v1299_v16 = vshrl.u32 %v3614_v20, 16  ;;  %v1303_v17 = vrot.slane %v1301_v25, 1  ;;  %v4404_v29 = vcombine.low %v5554_v62, %v5553_v63  ;;  %v3615_v31 = vld [vmem:[%s4275_s6 + $0x14] ss:$8 sps:$4 sm:$0xff]   ;;  %vm5269_vm5 = vmor %vm2896_vm3, %vm2897_vm4 }
  0x48   : >> { %692 = vmatpush1.bf16.msra.mxu0 %v4303_v32  ;;  %v1314_v30 = vrot.slane %v1312_v19, 1  ;;  %v3617_v33 = vld [vmem:[%s4278_s8 + $0x14] ss:$8 sps:$4 sm:$0xff]   ;;  %v1308_v34 = vrot.slane %v1306_v26, 1  ;;  %v5555_v61 = vld [vmem:[#allocation63_spill] sm:$0xff]  ;;  %v5556_v60 = vld [vmem:[#allocation62_spill] sm:$0xff] }
  0x49   : >> { %1133 = vmatpush1.bf16.msra.mxu1 %v4307_v8  ;;  %693 = vmatprep.subr.bf16.mxu0 %v5520_v11  ;;  %v4414_v13 = vcombine.low %v5556_v60, %v5555_v61  ;;  %v1304_v19 = vor.u32 %v1303_v17, %v1299_v16  ;;  %v1316_v26 = vshll.u32 %v3617_v33, 16  ;;  %v3621_v35 = vld [vmem:[%s4275_s6 + $0x24] ss:$8 sps:$4 sm:$0xff]   ;;  %v5557_v59 = vld [vmem:[#allocation61_spill] sm:$0xff]  ;;  %v5558_v58 = vld [vmem:[#allocation60_spill] sm:$0xff] }
  0x4a   : >> { %1134 = vmatprep.subr.bf16.mxu1 %v5520_v11  ;;  %v1315_v25 = vor.u32 %v1314_v30, %v1310_v28  ;;  %v3623_v16 = vld [vmem:[%s4278_s8 + $0x24] ss:$8 sps:$4 sm:$0xff]   ;;  %v4431_v17 = vcombine.low %v5558_v58, %v5557_v59  ;;  %v3626_v30 = vld [vmem:[%s4278_s8 + $0x20] ss:$8 sps:$4 sm:$0xff]   ;;  %v3627_v40 = vld [vmem:[%s4275_s6 + $0x34] ss:$8 sps:$4 sm:$0xff]  }
  0x4b   : >> { %v5559_v57 = vld [vmem:[#allocation59_spill] sm:$0xff]  ;;  %v5560_v56 = vld [vmem:[#allocation58_spill] sm:$0xff]  ;;  %v3629_v41 = vld [vmem:[%s4278_s8 + $0x34] ss:$8 sps:$4 sm:$0xff]  }
  0x4c   : >> { %694 = vmatpush1.bf16.msra.mxu0 %v4315_v12  ;;  %v3625_v37 = vld [vmem:[%s4275_s6 + $0x20] ss:$8 sps:$4 sm:$0xff]   ;;  %v5561_v55 = vld [vmem:[#allocation57_spill] sm:$0xff]  ;;  %v5562_v54 = vld [vmem:[#allocation56_spill] sm:$0xff] }
  0x4d   : >> { %1135 = vmatpush1.bf16.msra.mxu1 %v4319_v9  ;;  %695 = vmatprep.subr.bf16.mxu0 %v5520_v11  ;;  %v5563_v53 = vld [vmem:[#allocation55_spill] sm:$0xff]  ;;  %v3639_v46 = vld [vmem:[%s4275_s6 + $0x54] ss:$8 sps:$4 sm:$0xff]   ;;  %v3667_v58 = vld [vmem:[%s4275_s6 + $0x90] ss:$8 sps:$4 sm:$0xff]  }
  0x4e   : >> { %1136 = vmatprep.subr.bf16.mxu1 %v5520_v11  ;;  %v3633_v43 = vld [vmem:[%s4275_s6 + $0x44] ss:$8 sps:$4 sm:$0xff]   ;;  %v3637_v45 = vld [vmem:[%s4275_s6 + $0x40] ss:$8 sps:$4 sm:$0xff]   ;;  %v3641_v47 = vld [vmem:[%s4278_s8 + $0x54] ss:$8 sps:$4 sm:$0xff]  }
  0x4f   : >> { %v3635_v44 = vld [vmem:[%s4278_s8 + $0x44] ss:$8 sps:$4 sm:$0xff]   ;;  %v5569_v50 = vld [vmem:[#allocation73_spill] sm:$0xff]  ;;  %vm5327_vm8 = vmor %vm2974_vm6, %vm2975_vm7 }
  0x50   : >> { %696 = vmatpush1.bf16.msra.mxu0 %v4327_v6  ;;  %v3689_v62 = vld [vmem:[%s4278_s8 + $0xd4] ss:$8 sps:$4 sm:$0xff]   ;;  %v3691_v63 = vld [vmem:[%s4275_s6 + $0xd0] ss:$8 sps:$4 sm:$0xff]   ;;  %v3695_v51 = vld [vmem:[%s4278_s8 + $0xe4] ss:$8 sps:$4 sm:$0xff]  }
  0x51   : >> { %1137 = vmatpush1.bf16.msra.mxu1 %v4331_v7  ;;  %697 = vmatprep.subr.bf16.mxu0 %v5520_v11  ;;  %vm5378_vm11 = vmor %vm3052_vm9, %vm3053_vm10 }
  0x52   : >> { %1138 = vmatprep.subr.bf16.mxu1 %v5520_v11 }
  0x54   : >> { %698 = vmatpush1.bf16.msra.mxu0 %v4339_v4 }
  0x55   : >> { %1139 = vmatpush1.bf16.msra.mxu1 %v4343_v5  ;;  %707 = vmatprep.subr.bf16.mxu0 %v5520_v11 }
  0x56   : >> { %1148 = vmatprep.subr.bf16.mxu1 %v5520_v11 }
  0x58   : >> { %708 = vmatpush2.bf16.msra.mxu0 %v4351_v2 }
  0x59   : >> { %1149 = vmatpush2.bf16.msra.mxu1 %v4355_v3  ;;  %709 = vmatprep.subr.bf16.mxu0 %v5520_v11 }
  0x5a   : >> { %1150 = vmatprep.subr.bf16.mxu1 %v5520_v11 }
  0x5c   : >> { %710 = vmatpush2.bf16.msra.mxu0 %v4363_v0 }
  0x5d   : >> { %1151 = vmatpush2.bf16.msra.mxu1 %v4367_v1  ;;  %711 = vmatprep.subr.bf16.mxu0 %v5520_v11 }
  0x5e   : >> { %1152 = vmatprep.subr.bf16.mxu1 %v5520_v11 }
  0x60   : >> { %712 = vmatpush2.bf16.msra.mxu0 %v4375_v22 }
  0x61   : >> { %1153 = vmatpush2.bf16.msra.mxu1 %v4379_v23  ;;  %713 = vmatprep.subr.bf16.mxu0 %v5520_v11 }
  0x62   : >> { %1154 = vmatprep.subr.bf16.mxu1 %v5520_v11 }
  0x64   : >> { %714 = vmatpush2.bf16.msra.mxu0 %v4388_v21 }
  0x65   : >> { %1155 = vmatpush2.bf16.msra.mxu1 %v4392_v24  ;;  %1692 = vmatprep.subr.bf16.mxu0 %v5520_v11 }
  0x66   : >> { %1893 = vmatprep.subr.bf16.mxu1 %v5520_v11 }
  0x67   : >> { %716 = vmatmul.mubr.bf16.vlgmr.msra.gmra.mxu0 %v3613_v27  ;;  %v3619_v27 = vld [vmem:[%s4275_s6 + $0x10] ss:$8 sps:$4 sm:$0xff]  }
  0x68   : >> { %1157 = vmatmul.mubr.bf16.vlgmr.msra.gmra.mxu1 %v3614_v20  ;;  %1693 = vmatpush1.bf16.msra.mxu0 %v4404_v29  ;;  %v4421_v20 = vsel %vm1297_vm1, %v1304_v19, %v1308_v34  ;;  %v4444_v19 = vcombine.low %v5560_v56, %v5559_v57 }
  0x69   : >> { %1894 = vmatpush1.bf16.msra.mxu1 %v4240_v52  ;;  %3314 = vmatprep.mubr.msk.bf16.mxu0 %vm631_vm0, %v3615_v31  ;;  %v1318_v52 = vrot.slane %v1316_v26, 1  ;;  %v1328_v31 = vshrl.u32 %v3617_v33, 16  ;;  %v1324_v26 = vshll.u32 %v3626_v30, 16 }
  0x6a   : >> { %3377 = vmatprep.mubr.msk.bf16.mxu1 %vm631_vm0, %v3617_v33  ;;  %1694 = vmatprep.subr.bf16.mxu0 %v5520_v11 }
  0x6b   : >> { %1895 = vmatprep.subr.bf16.mxu1 %v5520_v11  ;;  %v4435_v28 = vsel %vm1297_vm1, %v1315_v25, %v1318_v52  ;;  %v1320_v25 = vshrl.u32 %v3620_v18, 16  ;;  %v1326_v39 = vrot.slane %v1324_v26, 1 }
  0x6c   : >> { %1695 = vmatpush1.bf16.msra.mxu0 %v4414_v13 }
  0x6d   : >> { %1896 = vmatpush1.bf16.msra.mxu1 %v4253_v38  ;;  %1696 = vmatprep.subr.bf16.mxu0 %v5520_v11  ;;  %v1331_v38 = vshll.u32 %v3623_v16, 16  ;;  %v1322_v33 = vor.u32 %v1320_v25, %v1308_v34  ;;  %v1343_v34 = vshrl.u32 %v3623_v16, 16  ;;  %v5564_v25 = vld [vmem:[#allocation54_spill] sm:$0xff] }
  0x6e   : >> { %1897 = vmatprep.subr.bf16.mxu1 %v5520_v11 }
  0x6f   : >> { %724 = vmatmul.mubr.bf16.gmra.mxu0 %v3619_v27  ;;  %v1333_v27 = vrot.slane %v1331_v38, 1  ;;  %v4461_v42 = vsel %vm1297_vm1, %v1322_v33, %v1326_v39  ;;  %v3631_v33 = vld [vmem:[%s4275_s6 + $0x30] ss:$8 sps:$4 sm:$0xff]  }
  0x70   : >> { %1165 = vmatmul.mubr.bf16.gmra.mxu1 %v3620_v18  ;;  %3315 = vmatprep.mubr.msk.bf16.mxu0 %vm631_vm0, %v3621_v35  ;;  %v1330_v35 = vor.u32 %v1328_v31, %v1318_v52  ;;  %v4458_v18 = vcombine.low %v5562_v54, %v5561_v55  ;;  %v3632_v52 = vld [vmem:[%s4278_s8 + $0x30] ss:$8 sps:$4 sm:$0xff]   ;;  %v1346_v31 = vshll.u32 %v3629_v41, 16  ;;  %v3651_v54 = vld [vmem:[%s4275_s6 + $0x74] ss:$8 sps:$4 sm:$0xff]  }
  0x71   : >> { %3378 = vmatprep.mubr.msk.bf16.mxu1 %vm631_vm0, %v3623_v16  ;;  %1697 = vmatpush1.bf16.msra.mxu0 %v4431_v17  ;;  %v1339_v38 = vshll.u32 %v3632_v52, 16  ;;  %v1345_v26 = vor.u32 %v1343_v34, %v1333_v27  ;;  %v5566_v34 = vld [vmem:[#allocation52_spill] sm:$0xff] }
  0x72   : >> { %1898 = vmatpush1.bf16.msra.mxu1 %v4266_v15  ;;  %1698 = vmatprep.subr.bf16.mxu0 %v5520_v11  ;;  %v4452_v15 = vsel %vm1297_vm1, %v1330_v35, %v1333_v27  ;;  %v1348_v16 = vrot.slane %v1346_v31, 1  ;;  %v5565_v27 = vld [vmem:[#allocation53_spill] sm:$0xff] }
  0x73   : >> { %1899 = vmatprep.subr.bf16.mxu1 %v5520_v11  ;;  %v1341_v35 = vrot.slane %v1339_v38, 1  ;;  %v4489_v31 = vcombine.low %v5566_v34, %v5565_v27  ;;  %v3653_v55 = vld [vmem:[%s4278_s8 + $0x74] ss:$8 sps:$4 sm:$0xff]  }
  0x75   : >> { %1699 = vmatpush1.bf16.msra.mxu0 %v4444_v19 }
  0x76   : >> { %1900 = vmatpush1.bf16.msra.mxu1 %v4288_v10  ;;  %1700 = vmatprep.subr.bf16.mxu0 %v5520_v11  ;;  %v1335_v10 = vshrl.u32 %v3626_v30, 16 }
  0x77   : >> { %1901 = vmatprep.subr.bf16.mxu1 %v5520_v11  ;;  %732 = vmatmul.mubr.bf16.gmra.mxu0 %v3625_v37  ;;  %v4472_v37 = vcombine.low %v5564_v25, %v5563_v53  ;;  %v3638_v25 = vld [vmem:[%s4278_s8 + $0x40] ss:$8 sps:$4 sm:$0xff]   ;;  %v3647_v53 = vld [vmem:[%s4278_s8 + $0x64] ss:$8 sps:$4 sm:$0xff]  }
  0x78   : >> { %1173 = vmatmul.mubr.bf16.gmra.mxu1 %v3626_v30  ;;  %3316 = vmatprep.mubr.msk.bf16.mxu0 %vm631_vm0, %v3627_v40  ;;  %v1337_v40 = vor.u32 %v1335_v10, %v1326_v39  ;;  %v4478_v30 = vsel %vm1297_vm1, %v1345_v26, %v1348_v16  ;;  %v1358_v39 = vshrl.u32 %v3629_v41, 16  ;;  %v1361_v10 = vshll.u32 %v3635_v44, 16  ;;  %v5567_v26 = vld [vmem:[#allocation51_spill] sm:$0xff] }
  0x79   : >> { %3379 = vmatprep.mubr.msk.bf16.mxu1 %vm631_vm0, %v3629_v41  ;;  %1701 = vmatpush1.bf16.msra.mxu0 %v4458_v18  ;;  %v1354_v38 = vshll.u32 %v3638_v25, 16 }
  0x7a   : >> { %1902 = vmatpush1.bf16.msra.mxu1 %v4303_v32  ;;  %1702 = vmatprep.subr.bf16.mxu0 %v5520_v11  ;;  %v4483_v32 = vsel %vm1297_vm1, %v1337_v40, %v1341_v35  ;;  %v5568_v40 = vld [vmem:[#allocation50_spill] sm:$0xff]  ;;  %v1360_v27 = vor.u32 %v1358_v39, %v1348_v16  ;;  %v1363_v41 = vrot.slane %v1361_v10, 1  ;;  %v5570_v16 = vld [vmem:[#allocation72_spill] sm:$0xff] }
  0x7b   : >> { %1903 = vmatprep.subr.bf16.mxu1 %v5520_v11  ;;  %v1356_v34 = vrot.slane %v1354_v38, 1  ;;  %v4517_v39 = vcombine.low %v5570_v16, %v5569_v50  ;;  %v3644_v10 = vld [vmem:[%s4278_s8 + $0x50] ss:$8 sps:$4 sm:$0xff]   ;;  %v3645_v50 = vld [vmem:[%s4275_s6 + $0x64] ss:$8 sps:$4 sm:$0xff]  }
  0x7c   : >> { %v1369_v38 = vshll.u32 %v3644_v10, 16  ;;  %v3643_v16 = vld [vmem:[%s4275_s6 + $0x50] ss:$8 sps:$4 sm:$0xff]  }
  0x7d   : >> { %1703 = vmatpush1.bf16.msra.mxu0 %v4472_v37 }
  0x7e   : >> { %1904 = vmatpush1.bf16.msra.mxu1 %v4315_v12  ;;  %1704 = vmatprep.subr.bf16.mxu0 %v5520_v11  ;;  %v1350_v12 = vshrl.u32 %v3632_v52, 16 }
  0x7f   : >> { %1905 = vmatprep.subr.bf16.mxu1 %v5520_v11  ;;  %740 = vmatmul.mubr.bf16.gmra.mxu0 %v3631_v33  ;;  %v4500_v33 = vcombine.low %v5568_v40, %v5567_v26  ;;  %v5571_v26 = vld [vmem:[#allocation71_spill] sm:$0xff]  ;;  %v5572_v40 = vld [vmem:[#allocation70_spill] sm:$0xff] }
  0x80   : >> { %1181 = vmatmul.mubr.bf16.gmra.mxu1 %v3632_v52  ;;  %3317 = vmatprep.mubr.msk.bf16.mxu0 %vm631_vm0, %v3633_v43  ;;  %v1352_v43 = vor.u32 %v1350_v12, %v1341_v35  ;;  %v4506_v52 = vsel %vm1297_vm1, %v1360_v27, %v1363_v41  ;;  %v1373_v35 = vshrl.u32 %v3635_v44, 16  ;;  %v1376_v12 = vshll.u32 %v3641_v47, 16 }
  0x81   : >> { %3380 = vmatprep.mubr.msk.bf16.mxu1 %vm631_vm0, %v3635_v44  ;;  %1705 = vmatpush1.bf16.msra.mxu0 %v4489_v31 }
  0x82   : >> { %1906 = vmatpush1.bf16.msra.mxu1 %v4327_v6  ;;  %1706 = vmatprep.subr.bf16.mxu0 %v5520_v11  ;;  %v4511_v6 = vsel %vm1297_vm1, %v1352_v43, %v1356_v34  ;;  %v1375_v27 = vor.u32 %v1373_v35, %v1363_v41  ;;  %v1378_v44 = vrot.slane %v1376_v12, 1  ;;  %v1371_v43 = vrot.slane %v1369_v38, 1  ;;  %v5573_v41 = vld [vmem:[#allocation69_spill] sm:$0xff]  ;;  %v5574_v35 = vld [vmem:[#allocation68_spill] sm:$0xff] }
  0x83   : >> { %1907 = vmatprep.subr.bf16.mxu1 %v5520_v11  ;;  %v4545_v12 = vcombine.low %v5574_v35, %v5573_v41  ;;  %v3649_v35 = vld [vmem:[%s4275_s6 + $0x60] ss:$8 sps:$4 sm:$0xff]  }
  0x85   : >> { %1707 = vmatpush1.bf16.msra.mxu0 %v4500_v33 }
  0x86   : >> { %1908 = vmatpush1.bf16.msra.mxu1 %v4339_v4  ;;  %1716 = vmatprep.subr.bf16.mxu0 %v5520_v11  ;;  %v1365_v4 = vshrl.u32 %v3638_v25, 16 }
  0x87   : >> { %1917 = vmatprep.subr.bf16.mxu1 %v5520_v11  ;;  %748 = vmatmul.mubr.bf16.gmra.mxu0 %v3637_v45  ;;  %v4528_v45 = vcombine.low %v5572_v40, %v5571_v26  ;;  %v3650_v26 = vld [vmem:[%s4278_s8 + $0x60] ss:$8 sps:$4 sm:$0xff]  }
  0x88   : >> { %1189 = vmatmul.mubr.bf16.gmra.mxu1 %v3638_v25  ;;  %3318 = vmatprep.mubr.msk.bf16.mxu0 %vm631_vm0, %v3639_v46  ;;  %v1367_v46 = vor.u32 %v1365_v4, %v1356_v34  ;;  %v4534_v25 = vsel %vm1297_vm1, %v1375_v27, %v1378_v44  ;;  %v1388_v34 = vshrl.u32 %v3641_v47, 16  ;;  %v1391_v4 = vshll.u32 %v3647_v53, 16  ;;  %v5575_v40 = vld [vmem:[#allocation67_spill] sm:$0xff]  ;;  %v5576_v27 = vld [vmem:[#allocation66_spill] sm:$0xff] }
  0x89   : >> { %3381 = vmatprep.mubr.msk.bf16.mxu1 %vm631_vm0, %v3641_v47  ;;  %1717 = vmatpush2.bf16.msra.mxu0 %v4517_v39  ;;  %v1384_v38 = vshll.u32 %v3650_v26, 16 }
  0x8a   : >> { %1918 = vmatpush2.bf16.msra.mxu1 %v4351_v2  ;;  %1718 = vmatprep.subr.bf16.mxu0 %v5520_v11  ;;  %v4539_v2 = vsel %vm1297_vm1, %v1367_v46, %v1371_v43  ;;  %v4556_v46 = vcombine.low %v5576_v27, %v5575_v40  ;;  %v1393_v47 = vrot.slane %v1391_v4, 1  ;;  %v1395_v4 = vshrl.u32 %v3650_v26, 16 }
  0x8b   : >> { %1919 = vmatprep.subr.bf16.mxu1 %v5520_v11  ;;  %v1386_v41 = vrot.slane %v1384_v38, 1 }
  0x8d   : >> { %1719 = vmatpush2.bf16.msra.mxu0 %v4528_v45  ;;  %v1397_v40 = vor.u32 %v1395_v4, %v1386_v41 }
  0x8e   : >> { %1920 = vmatpush2.bf16.msra.mxu1 %v4363_v0  ;;  %1720 = vmatprep.subr.bf16.mxu0 %v5520_v11  ;;  %v1380_v0 = vshrl.u32 %v3644_v10, 16 }
  0x8f   : >> { %1921 = vmatprep.subr.bf16.mxu1 %v5520_v11  ;;  %756 = vmatmul.mubr.bf16.gmra.mxu0 %v3643_v16  ;;  %v1390_v16 = vor.u32 %v1388_v34, %v1378_v44  ;;  %v3656_v44 = vld [vmem:[%s4278_s8 + $0x70] ss:$8 sps:$4 sm:$0xff]   ;;  %v1406_v34 = vshll.u32 %v3653_v55, 16 }
  0x90   : >> { %1197 = vmatmul.mubr.bf16.gmra.mxu1 %v3644_v10  ;;  %3319 = vmatprep.mubr.msk.bf16.mxu0 %vm631_vm0, %v3645_v50  ;;  %v1382_v50 = vor.u32 %v1380_v0, %v1371_v43  ;;  %v1403_v43 = vshrl.u32 %v3647_v53, 16  ;;  %v1399_v0 = vshll.u32 %v3656_v44, 16 }
  0x91   : >> { %3382 = vmatprep.mubr.msk.bf16.mxu1 %vm631_vm0, %v3647_v53  ;;  %1721 = vmatpush2.bf16.msra.mxu0 %v4545_v12  ;;  %v4562_v10 = vsel %vm1297_vm1, %v1390_v16, %v1393_v47  ;;  %v1408_v38 = vrot.slane %v1406_v34, 1  ;;  %v3655_v16 = vld [vmem:[%s4275_s6 + $0x70] ss:$8 sps:$4 sm:$0xff]   ;;  %v3659_v53 = vld [vmem:[%s4278_s8 + $0x84] ss:$8 sps:$4 sm:$0xff]   ;;  %v1410_v34 = vshrl.u32 %v3656_v44, 16 }
  0x92   : >> { %1922 = vmatpush2.bf16.msra.mxu1 %v4375_v22  ;;  %1722 = vmatprep.subr.bf16.mxu0 %v5520_v11  ;;  %v4567_v22 = vsel %vm1297_vm1, %v1382_v50, %v1386_v41  ;;  %v1401_v27 = vrot.slane %v1399_v0, 1  ;;  %v1421_v56 = vshll.u32 %v3659_v53, 16  ;;  %v3661_v0 = vld [vmem:[%s4275_s6 + $0x80] ss:$8 sps:$4 sm:$0xff]  }
  0x93   : >> { %1923 = vmatprep.subr.bf16.mxu1 %v5520_v11 }
  0x95   : >> { %1723 = vmatpush2.bf16.msra.mxu0 %v4556_v46 }
  0x96   : >> { %1924 = vmatpush2.bf16.msra.mxu1 %v4388_v21  ;;  %2061 = vmatprep.subr.bf16.mxu0 %v5520_v11  ;;  %v1405_v21 = vor.u32 %v1403_v43, %v1393_v47  ;;  %v3662_v47 = vld [vmem:[%s4278_s8 + $0x80] ss:$8 sps:$4 sm:$0xff]   ;;  %v1423_v43 = vrot.slane %v1421_v56, 1  ;;  %v3668_v56 = vld [vmem:[%s4278_s8 + $0x90] ss:$8 sps:$4 sm:$0xff]  }
  0x97   : >> { %2556 = vmatprep.subr.bf16.mxu1 %v5520_v11  ;;  %764 = vmatmul.mubr.bf16.gmra.mxu0 %v3649_v35  ;;  %v3657_v35 = vld [vmem:[%s4275_s6 + $0x84] ss:$8 sps:$4 sm:$0xff]   ;;  %v1414_v4 = vshll.u32 %v3662_v47, 16 }
  0x98   : >> { %1205 = vmatmul.mubr.bf16.gmra.mxu1 %v3650_v26  ;;  %3320 = vmatprep.mubr.msk.bf16.mxu0 %vm631_vm0, %v3651_v54  ;;  %v4578_v50 = vsel %vm1297_vm1, %v1405_v21, %v1408_v38  ;;  %v4583_v54 = vsel %vm1297_vm1, %v1397_v40, %v1401_v27  ;;  %v1418_v26 = vshrl.u32 %v3653_v55, 16  ;;  %v3663_v40 = vld [vmem:[%s4275_s6 + $0x94] ss:$8 sps:$4 sm:$0xff]  }
  0x99   : >> { %3383 = vmatprep.mubr.msk.bf16.mxu1 %vm631_vm0, %v3653_v55  ;;  %v1412_v55 = vor.u32 %v1410_v34, %v1401_v27  ;;  %v1416_v57 = vrot.slane %v1414_v4, 1  ;;  %v3669_v34 = vld [vmem:[%s4275_s6 + $0xa4] ss:$8 sps:$4 sm:$0xff]  }
  0x9a   : >> { %v1420_v41 = vor.u32 %v1418_v26, %v1408_v38  ;;  %v1425_v26 = vshrl.u32 %v3662_v47, 16  ;;  %v3671_v4 = vld [vmem:[%s4278_s8 + $0xa4] ss:$8 sps:$4 sm:$0xff]  }
  0x9c   : >> { %v4590_v21 = vsel %vm1297_vm1, %v1420_v41, %v1423_v43  ;;  %v1429_v41 = vshll.u32 %v3668_v56, 16 }
  0x9f   : >> { %772 = vmatmul.mubr.bf16.gmra.mxu0 %v3655_v16  ;;  %v3665_v16 = vld [vmem:[%s4278_s8 + $0x94] ss:$8 sps:$4 sm:$0xff]  }
  0xa0   : >> { %1213 = vmatmul.mubr.bf16.gmra.mxu1 %v3656_v44  ;;  %3321 = vmatprep.mubr.msk.bf16.mxu0 %vm631_vm0, %v3657_v35  ;;  %v4595_v35 = vsel %vm1297_vm1, %v1412_v55, %v1416_v57  ;;  %v1433_v44 = vshrl.u32 %v3659_v53, 16  ;;  %v1436_v38 = vshll.u32 %v3665_v16, 16  ;;  %v1427_v55 = vor.u32 %v1425_v26, %v1416_v57 }
  0xa1   : >> { %3384 = vmatprep.mubr.msk.bf16.mxu1 %vm631_vm0, %v3659_v53  ;;  %v4612_v53 = vld [vmem:[%s4278_s8 + $0xa0] ss:$8 sps:$4 sm:$0xff]   ;;  %v1440_v57 = vshrl.u32 %v3668_v56, 16 }
  0xa2   : >> { %v1435_v59 = vor.u32 %v1433_v44, %v1423_v43  ;;  %v1438_v27 = vrot.slane %v1436_v38, 1  ;;  %v1451_v43 = vshll.u32 %v3671_v4, 16  ;;  %v1444_v44 = vshll.u32 %v4612_v53, 16  ;;  %v3673_v38 = vld [vmem:[%s4275_s6 + $0xa0] ss:$8 sps:$4 sm:$0xff]  }
  0xa4   : >> { %v1453_v26 = vrot.slane %v1451_v43, 1 }
  0xa7   : >> { %780 = vmatmul.mubr.bf16.gmra.mxu0 %v3661_v0  ;;  %v1431_v0 = vrot.slane %v1429_v41, 1  ;;  %v3675_v41 = vld [vmem:[%s4275_s6 + $0xb4] ss:$8 sps:$4 sm:$0xff]  }
  0xa8   : >> { %1221 = vmatmul.mubr.bf16.gmra.mxu1 %v3662_v47  ;;  %3322 = vmatprep.mubr.msk.bf16.mxu0 %vm631_vm0, %v3663_v40  ;;  %v4604_v40 = vsel %vm1297_vm1, %v1435_v59, %v1438_v27  ;;  %v1448_v47 = vshrl.u32 %v3665_v16, 16 }
  0xa9   : >> { %3385 = vmatprep.mubr.msk.bf16.mxu1 %vm631_vm0, %v3665_v16  ;;  %v4607_v60 = vsel %vm1297_vm1, %v1427_v55, %v1431_v0  ;;  %v1442_v55 = vor.u32 %v1440_v57, %v1431_v0  ;;  %v3679_v0 = vld [vmem:[%s4275_s6 + $0xb0] ss:$8 sps:$4 sm:$0xff]  }
  0xaa   : >> { %v1450_v59 = vor.u32 %v1448_v47, %v1438_v27  ;;  %v4632_v47 = vld [vmem:[%s4278_s8 + $0xb0] ss:$8 sps:$4 sm:$0xff]  }
  0xac   : >> { %v4621_v61 = vsel %vm1297_vm1, %v1450_v59, %v1453_v26  ;;  %v3683_v59 = vld [vmem:[%s4278_s8 + $0xc4] ss:$8 sps:$4 sm:$0xff]  }
  0xaf   : >> { %788 = vmatmul.mubr.bf16.gmra.mxu0 %v3667_v58  ;;  %v3677_v58 = vld [vmem:[%s4278_s8 + $0xb4] ss:$8 sps:$4 sm:$0xff]  }
  0xb0   : >> { %1229 = vmatmul.mubr.bf16.gmra.mxu1 %v3668_v56  ;;  %3323 = vmatprep.mubr.msk.bf16.mxu0 %vm631_vm0, %v3669_v34  ;;  %v4618_v34 = vrot.slane %v1444_v44, 1  ;;  %v1463_v56 = vshrl.u32 %v3671_v4, 16  ;;  %v1466_v27 = vshll.u32 %v3677_v58, 16  ;;  %v3681_v44 = vld [vmem:[%s4275_s6 + $0xc4] ss:$8 sps:$4 sm:$0xff]  }
  0xb1   : >> { %3386 = vmatprep.mubr.msk.bf16.mxu1 %vm631_vm0, %v3671_v4  ;;  %v1478_v4 = vshrl.u32 %v3677_v58, 16 }
  0xb2   : >> { %v4625_v16 = vsel %vm1297_vm1, %v1442_v55, %v4618_v34  ;;  %v1465_v43 = vor.u32 %v1463_v56, %v1453_v26  ;;  %v1468_v57 = vrot.slane %v1466_v27, 1  ;;  %v3685_v55 = vld [vmem:[%s4275_s6 + $0xc0] ss:$8 sps:$4 sm:$0xff]  }
  0xb3   : >> { %v4644_v26 = vld [vmem:[%s4278_s8 + $0xc0] ss:$8 sps:$4 sm:$0xff]  }
  0xb4   : >> { %5577 = vst [vmem:[#allocation75_spill] sm:$0xff] %v4644_v26  ;;  %v1480_v56 = vor.u32 %v1478_v4, %v1468_v57 }
  0xb7   : >> { %796 = vmatmul.mubr.bf16.gmra.mxu0 %v3673_v38  ;;  %v4637_v38 = vsel %vm1297_vm1, %v1465_v43, %v1468_v57  ;;  %v3687_v43 = vld [vmem:[%s4275_s6 + $0xd4] ss:$8 sps:$4 sm:$0xff]   ;;  %v4656_v57 = vld [vmem:[%s4278_s8 + $0xd0] ss:$8 sps:$4 sm:$0xff]  }
  0xb8   : >> { %1237 = vmatmul.mubr.bf16.gmra.mxu1 %v4612_v53  ;;  %3324 = vmatprep.mubr.msk.bf16.mxu0 %vm631_vm0, %v3675_v41  ;;  %v1481_v41 = vshll.u32 %v3683_v59, 16  ;;  %5579 = vst [vmem:[#allocation77_spill] sm:$0xff] %v4656_v57 }
  0xb9   : >> { %3387 = vmatprep.mubr.msk.bf16.mxu1 %vm631_vm0, %v3677_v58  ;;  %v1493_v58 = vshrl.u32 %v3683_v59, 16 }
  0xba   : >> { %v1483_v27 = vrot.slane %v1481_v41, 1 }
  0xbc   : >> { %v1495_v4 = vor.u32 %v1493_v58, %v1483_v27  ;;  %v4668_v58 = vld [vmem:[%s4278_s8 + $0xe0] ss:$8 sps:$4 sm:$0xff]  }
  0xbf   : >> { %804 = vmatmul.mubr.bf16.gmra.mxu0 %v3679_v0  ;;  %v4649_v0 = vsel %vm1297_vm1, %v1480_v56, %v1483_v27  ;;  %v3693_v56 = vld [vmem:[%s4275_s6 + $0xe4] ss:$8 sps:$4 sm:$0xff]   ;;  %v3697_v27 = vld [vmem:[%s4275_s6 + $0xe0] ss:$8 sps:$4 sm:$0xff]  }
  0xc0   : >> { %1245 = vmatmul.mubr.bf16.gmra.mxu1 %v4632_v47  ;;  %3325 = vmatprep.mubr.msk.bf16.mxu0 %vm631_vm0, %v3681_v44  ;;  %5578 = vst [vmem:[#allocation76_spill] sm:$0xff] %v4649_v0  ;;  %v1496_v44 = vshll.u32 %v3689_v62, 16 }
  0xc1   : >> { %3388 = vmatprep.mubr.msk.bf16.mxu1 %vm631_vm0, %v3683_v59  ;;  %v1508_v59 = vshrl.u32 %v3689_v62, 16 }
  0xc2   : >> { %v1498_v41 = vrot.slane %v1496_v44, 1 }
  0xc4   : >> { %v1510_v44 = vor.u32 %v1508_v59, %v1498_v41  ;;  %v3703_v59 = vld [vmem:[%s4275_s6 + $0xf0] ss:$8 sps:$4 sm:$0xff]  }
  0xc7   : >> { %812 = vmatmul.mubr.bf16.gmra.mxu0 %v3685_v55  ;;  %v4661_v55 = vsel %vm1297_vm1, %v1495_v4, %v1498_v41  ;;  %v3699_v4 = vld [vmem:[%s4275_s6 + $0xf4] ss:$8 sps:$4 sm:$0xff]  }
  0xc8   : >> { %1253 = vmatmul.mubr.bf16.gmra.mxu1 %v4644_v26  ;;  %3326 = vmatprep.mubr.msk.bf16.mxu0 %vm631_vm0, %v3687_v43  ;;  %5580 = vst [vmem:[#allocation78_spill] sm:$0xff] %v4661_v55  ;;  %v1511_v43 = vshll.u32 %v3695_v51, 16  ;;  %v4672_v55 = vld [vmem:[%s4278_s8 + $0xf4] ss:$8 sps:$4 sm:$0xff]  }
  0xc9   : >> { %3389 = vmatprep.mubr.msk.bf16.mxu1 %vm631_vm0, %v3689_v62  ;;  %v407_v62 = vld [vmem:[%s4275_s6 + $0x100] sm:$0xff]  ;;  %v1526_v41 = vshll.u32 %v4672_v55, 16 }
  0xca   : >> { %v1513_v0 = vrot.slane %v1511_v43, 1  ;;  %v4688_v43 = vld [vmem:[%s4278_s8 + $0xf0] ss:$8 sps:$4 sm:$0xff]  }
  0xcf   : >> { %820 = vmatmul.mubr.bf16.gmra.mxu0 %v3691_v63  ;;  %v4675_v63 = vsel %vm1297_vm1, %v1510_v44, %v1513_v0  ;;  %v4690_v44 = vrot.slane %v1526_v41, 1 }
  0xd0   : >> { %1261 = vmatmul.mubr.bf16.gmra.mxu1 %v4656_v57  ;;  %3327 = vmatprep.mubr.msk.bf16.mxu0 %vm631_vm0, %v3693_v56  ;;  %5581 = vst [vmem:[#allocation79_spill] sm:$0xff] %v4675_v63  ;;  %v4683_v56 = vld [vmem:[%s4278_s8 + $0x100] sm:$0xff]  ;;  %v1523_v57 = vshrl.u32 %v3695_v51, 16 }
  0xd1   : >> { %3390 = vmatprep.mubr.msk.bf16.mxu1 %vm631_vm0, %v3695_v51  ;;  %v4704_v51 = vcombine.low %v407_v62, %v407_v62 }
  0xd2   : >> { %v1525_v26 = vor.u32 %v1523_v57, %v1513_v0  ;;  %v3362_v0 = vcombine.low %v4683_v56, %v4683_v56 }
  0xd4   : >> { %v4698_v63 = vsel %vm1297_vm1, %v1525_v26, %v4690_v44 }
  0xd7   : >> { %828 = vmatmul.mubr.bf16.gmra.mxu0 %v3697_v27  ;;  %v4692_v27 = vcombine.high %v407_v62, %v407_v62  ;;  %v5584_v62 = vld [vmem:[#allocation77_spill] sm:$0xff] }
  0xd8   : >> { %1269 = vmatmul.mubr.bf16.gmra.mxu1 %v4668_v58  ;;  %3328 = vmatprep.mubr.msk.bf16.mxu0 %vm631_vm0, %v3699_v4  ;;  %v3363_v4 = vcombine.high %v4683_v56, %v4683_v56  ;;  %v1489_v41 = vshll.u32 %v5584_v62, 16 }
  0xd9   : >> { %3391 = vmatprep.mubr.msk.bf16.mxu1 %vm631_vm0, %v4672_v55 }
  0xdf   : >> { %836 = vmatmul.mubr.bf16.gmra.mxu0 %v3703_v59 }
  0xe0   : >> { %1277 = vmatmul.mubr.bf16.gmra.mxu1 %v4688_v43  ;;  %3329 = vmatprep.mubr.msk.bf16.mxu0 %vm631_vm0, %v4692_v27 }
  0xe1   : >> { %3392 = vmatprep.mubr.msk.bf16.mxu1 %vm631_vm0, %v3363_v4 }
  0xe7   : >> { %844 = vmatmul.mubr.bf16.gmra.mxu0 %v4704_v51 }
  0xe8   : >> { %1285 = vmatmul.mubr.bf16.gmra.mxu1 %v3362_v0  ;;  %3407 = vmatprep.mubr.msk.bf16.mxu0 %vm631_vm0, %v4435_v28 }
  0xe9   : >> { %3424 = vmatprep.mubr.msk.bf16.mxu1 %vm631_vm0, %v4435_v28  ;;  %v1455_v28 = vshrl.u32 %v4612_v53, 16 }
  0xef   : >> { %1725 = vmatmul.mubr.bf16.vlgmr.msra.gmra.mxu0 %v4421_v20 }
  0xf0   : >> { %1926 = vmatmul.mubr.bf16.vlgmr.msra.gmra.mxu1 %v4421_v20  ;;  %2062 = vmatpush1.bf16.msra.mxu0 %v4244_v48 }
  0xf1   : >> { %2557 = vmatpush1.bf16.msra.mxu1 %v4404_v29  ;;  %3408 = vmatprep.mubr.msk.bf16.mxu0 %vm631_vm0, %v4452_v15 }
  0xf2   : >> { %3425 = vmatprep.mubr.msk.bf16.mxu1 %vm631_vm0, %v4452_v15  ;;  %2063 = vmatprep.subr.bf16.mxu0 %v5520_v11 }
  0xf3   : >> { %2558 = vmatprep.subr.bf16.mxu1 %v5520_v11 }
  0xf4   : >> { %2064 = vmatpush1.bf16.msra.mxu0 %v4257_v14 }
  0xf5   : >> { %2559 = vmatpush1.bf16.msra.mxu1 %v4414_v13  ;;  %2065 = vmatprep.subr.bf16.mxu0 %v5520_v11 }
  0xf6   : >> { %2560 = vmatprep.subr.bf16.mxu1 %v5520_v11 }
  0xf7   : >> { %1733 = vmatmul.mubr.bf16.gmra.mxu0 %v4461_v42 }
  0xf8   : >> { %1934 = vmatmul.mubr.bf16.gmra.mxu1 %v4461_v42  ;;  %3409 = vmatprep.mubr.msk.bf16.mxu0 %vm631_vm0, %v4478_v30 }
  0xf9   : >> { %3426 = vmatprep.mubr.msk.bf16.mxu1 %vm631_vm0, %v4478_v30  ;;  %2066 = vmatpush1.bf16.msra.mxu0 %v4270_v36 }
  0xfa   : >> { %2561 = vmatpush1.bf16.msra.mxu1 %v4431_v17  ;;  %2067 = vmatprep.subr.bf16.mxu0 %v5520_v11 }
  0xfb   : >> { %2562 = vmatprep.subr.bf16.mxu1 %v5520_v11 }
  0xfd   : >> { %2068 = vmatpush1.bf16.msra.mxu0 %v4292_v49 }
  0xfe   : >> { %2563 = vmatpush1.bf16.msra.mxu1 %v4444_v19  ;;  %2069 = vmatprep.subr.bf16.mxu0 %v5520_v11  ;;  %v1459_v19 = vshll.u32 %v4632_v47, 16 }
  0xff   : >> { %2564 = vmatprep.subr.bf16.mxu1 %v5520_v11  ;;  %1741 = vmatmul.mubr.bf16.gmra.mxu0 %v4483_v32 }
 0x100   : >> { %1942 = vmatmul.mubr.bf16.gmra.mxu1 %v4483_v32  ;;  %3410 = vmatprep.mubr.msk.bf16.mxu0 %vm631_vm0, %v4506_v52  ;;  %v1461_v32 = vrot.slane %v1459_v19, 1  ;;  %v372_v19 = vld [vmem:[%s4278_s8 + $0x108] sm:$0xff] }
 0x101   : >> { %3427 = vmatprep.mubr.msk.bf16.mxu1 %vm631_vm0, %v4506_v52  ;;  %2070 = vmatpush1.bf16.msra.mxu0 %v4307_v8 }
 0x102   : >> { %2565 = vmatpush1.bf16.msra.mxu1 %v4458_v18  ;;  %2071 = vmatprep.subr.bf16.mxu0 %v5520_v11 }
 0x103   : >> { %2566 = vmatprep.subr.bf16.mxu1 %v5520_v11 }
 0x105   : >> { %2072 = vmatpush1.bf16.msra.mxu0 %v4319_v9 }
 0x106   : >> { %2567 = vmatpush1.bf16.msra.mxu1 %v4472_v37  ;;  %2073 = vmatprep.subr.bf16.mxu0 %v5520_v11 }
 0x107   : >> { %2568 = vmatprep.subr.bf16.mxu1 %v5520_v11  ;;  %1749 = vmatmul.mubr.bf16.gmra.mxu0 %v4511_v6 }
 0x108   : >> { %1950 = vmatmul.mubr.bf16.gmra.mxu1 %v4511_v6  ;;  %3411 = vmatprep.mubr.msk.bf16.mxu0 %vm631_vm0, %v4534_v25 }
 0x109   : >> { %3428 = vmatprep.mubr.msk.bf16.mxu1 %vm631_vm0, %v4534_v25  ;;  %2074 = vmatpush1.bf16.msra.mxu0 %v4331_v7 }
 0x10a   : >> { %2569 = vmatpush1.bf16.msra.mxu1 %v4489_v31  ;;  %2075 = vmatprep.subr.bf16.mxu0 %v5520_v11 }
 0x10b   : >> { %2570 = vmatprep.subr.bf16.mxu1 %v5520_v11 }
 0x10d   : >> { %2076 = vmatpush1.bf16.msra.mxu0 %v4343_v5 }
 0x10e   : >> { %2571 = vmatpush1.bf16.msra.mxu1 %v4500_v33  ;;  %2085 = vmatprep.subr.bf16.mxu0 %v5520_v11 }
 0x10f   : >> { %2580 = vmatprep.subr.bf16.mxu1 %v5520_v11  ;;  %1757 = vmatmul.mubr.bf16.gmra.mxu0 %v4539_v2 }
 0x110   : >> { %1958 = vmatmul.mubr.bf16.gmra.mxu1 %v4539_v2  ;;  %3412 = vmatprep.mubr.msk.bf16.mxu0 %vm631_vm0, %v4562_v10  ;;  %v5582_v2 = vld [vmem:[#allocation75_spill] sm:$0xff] }
 0x111   : >> { %3429 = vmatprep.mubr.msk.bf16.mxu1 %vm631_vm0, %v4562_v10  ;;  %2086 = vmatpush2.bf16.msra.mxu0 %v4355_v3 }
 0x112   : >> { %2581 = vmatpush2.bf16.msra.mxu1 %v4517_v39  ;;  %2087 = vmatprep.subr.bf16.mxu0 %v5520_v11  ;;  %v1470_v39 = vshrl.u32 %v4632_v47, 16 }
 0x113   : >> { %2582 = vmatprep.subr.bf16.mxu1 %v5520_v11 }
 0x115   : >> { %2088 = vmatpush2.bf16.msra.mxu0 %v4367_v1 }
 0x116   : >> { %2583 = vmatpush2.bf16.msra.mxu1 %v4528_v45  ;;  %2089 = vmatprep.subr.bf16.mxu0 %v5520_v11 }
 0x117   : >> { %2584 = vmatprep.subr.bf16.mxu1 %v5520_v11  ;;  %1765 = vmatmul.mubr.bf16.gmra.mxu0 %v4567_v22 }
 0x118   : >> { %1966 = vmatmul.mubr.bf16.gmra.mxu1 %v4567_v22  ;;  %3413 = vmatprep.mubr.msk.bf16.mxu0 %vm631_vm0, %v4578_v50 }
 0x119   : >> { %3430 = vmatprep.mubr.msk.bf16.mxu1 %vm631_vm0, %v4578_v50  ;;  %2090 = vmatpush2.bf16.msra.mxu0 %v4379_v23 }
 0x11a   : >> { %2585 = vmatpush2.bf16.msra.mxu1 %v4545_v12  ;;  %2091 = vmatprep.subr.bf16.mxu0 %v5520_v11  ;;  %v1474_v12 = vshll.u32 %v5582_v2, 16 }
 0x11b   : >> { %2586 = vmatprep.subr.bf16.mxu1 %v5520_v11 }
 0x11d   : >> { %2092 = vmatpush2.bf16.msra.mxu0 %v4392_v24 }
 0x11e   : >> { %2587 = vmatpush2.bf16.msra.mxu1 %v4556_v46 }
 0x11f   : >> { %1773 = vmatmul.mubr.bf16.gmra.mxu0 %v4583_v54 }
 0x120   : >> { %1974 = vmatmul.mubr.bf16.gmra.mxu1 %v4583_v54  ;;  %3414 = vmatprep.mubr.msk.bf16.mxu0 %vm631_vm0, %v4590_v21 }
 0x121   : >> { %3431 = vmatprep.mubr.msk.bf16.mxu1 %vm631_vm0, %v4590_v21  ;;  %v5583_v21 = vld [vmem:[#allocation76_spill] sm:$0xff] }
 0x127   : >> { %v717_v1 = vpop.f32.mrf.mxu0  ;;  %1781 = vmatmul.mubr.bf16.gmra.mxu0 %v4595_v35 }
 0x128   : >> { %v1158_v3 = vpop.f32.mrf.mxu1  ;;  %1982 = vmatmul.mubr.bf16.gmra.mxu1 %v4595_v35  ;;  %3415 = vmatprep.mubr.msk.bf16.mxu0 %vm631_vm0, %v4604_v40  ;;  %v1472_v35 = vor.u32 %v1470_v39, %v1461_v32 }
 0x129   : >> { %v4803_v5 = vadd.f32 %v1158_v3, %v717_v1  ;;  %3432 = vmatprep.mubr.msk.bf16.mxu1 %vm631_vm0, %v4604_v40  ;;  %v719_v7 = vpop.f32.mrf.mxu0  ;;  %v1476_v40 = vrot.slane %v1474_v12, 1 }
 0x12a   : >> { %v1160_v8 = vpop.f32.mrf.mxu1  ;;  %v5585_v7 = vld [vmem:[#allocation78_spill] sm:$0xff] }
 0x12b   : >> { %v720_v9 = vpop.f32.mrf.mxu0  ;;  %v1477_v57 = vsel %vm1297_vm1, %v1472_v35, %v1476_v40 }
 0x12c   : >> { %v1161_v11 = vpop.f32.mrf.mxu1 }
 0x12d   : >> { %v4809_v14 = vadd.f32 %v1161_v11, %v720_v9  ;;  %v722_v23 = vpop.f32.mrf.mxu0  ;;  %v1491_v9 = vrot.slane %v1489_v41, 1 }
 0x12e   : >> { %v1163_v24 = vpop.f32.mrf.mxu1 }
 0x12f   : >> { %v725_v29 = vpop.f32.mrf.mxu0  ;;  %1789 = vmatmul.mubr.bf16.gmra.mxu0 %v4607_v60 }
 0x130   : >> { %v1166_v36 = vpop.f32.mrf.mxu1  ;;  %1990 = vmatmul.mubr.bf16.gmra.mxu1 %v4607_v60  ;;  %3416 = vmatprep.mubr.msk.bf16.mxu0 %vm631_vm0, %v4621_v61 }
 0x131   : >> { %v4813_v42 = vadd.f32 %v1166_v36, %v725_v29  ;;  %3433 = vmatprep.mubr.msk.bf16.mxu1 %vm631_vm0, %v4621_v61  ;;  %v727_v48 = vpop.f32.mrf.mxu0  ;;  %v1457_v61 = vor.u32 %v1455_v28, %v4618_v34  ;;  %v1500_v36 = vshrl.u32 %v5584_v62, 16 }
 0x132   : >> { %v1168_v49 = vpop.f32.mrf.mxu1 }
 0x133   : >> { %v728_v13 = vpop.f32.mrf.mxu0  ;;  %v1462_v25 = vsel %vm1297_vm1, %v1457_v61, %v1461_v32  ;;  %v1502_v61 = vor.u32 %v1500_v36, %v1491_v9  ;;  %v3713_v36 = vld [vmem:[%s4275_s6 + $0x4] ss:$8 sps:$4 sm:$0xff]  }
 0x134   : >> { %v1169_v20 = vpop.f32.mrf.mxu1 }
 0x135   : >> { %v4819_v17 = vadd.f32 %v1169_v20, %v728_v13  ;;  %v730_v15 = vpop.f32.mrf.mxu0  ;;  %v1504_v13 = vshll.u32 %v4668_v58, 16 }
 0x136   : >> { %v1171_v60 = vpop.f32.mrf.mxu1 }
 0x137   : >> { %v733_v18 = vpop.f32.mrf.mxu0  ;;  %1797 = vmatmul.mubr.bf16.gmra.mxu0 %v4625_v16  ;;  %v1506_v32 = vrot.slane %v1504_v13, 1 }
 0x138   : >> { %v1174_v37 = vpop.f32.mrf.mxu1  ;;  %1998 = vmatmul.mubr.bf16.gmra.mxu1 %v4625_v16  ;;  %3417 = vmatprep.mubr.msk.bf16.mxu0 %vm631_vm0, %v4637_v38 }
 0x139   : >> { %v4825_v30 = vadd.f32 %v1174_v37, %v733_v18  ;;  %3434 = vmatprep.mubr.msk.bf16.mxu1 %vm631_vm0, %v4637_v38  ;;  %v735_v31 = vpop.f32.mrf.mxu0  ;;  %v1485_v38 = vshrl.u32 %v5582_v2, 16  ;;  %v5586_v37 = vld [vmem:[#allocation79_spill] sm:$0xff]  ;;  %v1507_v12 = vsel %vm1297_vm1, %v1502_v61, %v1506_v32  ;;  %v2246_v61 = vshrl.u32 %v3713_v36, 16 }
 0x13a   : >> { %v1176_v33 = vpop.f32.mrf.mxu1 }
 0x13b   : >> { %v736_v52 = vpop.f32.mrf.mxu0  ;;  %v1487_v8 = vor.u32 %v1485_v38, %v1476_v40 }
 0x13c   : >> { %v1177_v6 = vpop.f32.mrf.mxu1 }
 0x13d   : >> { %v4833_v45 = vadd.f32 %v1177_v6, %v736_v52  ;;  %v738_v46 = vpop.f32.mrf.mxu0  ;;  %v1492_v49 = vsel %vm1297_vm1, %v1487_v8, %v1491_v9  ;;  %v3394_v52 = vcombine.high %v4683_v56, %v372_v19 }
 0x13e   : >> { %v1179_v10 = vpop.f32.mrf.mxu1  ;;  %v1519_v46 = vshll.u32 %v4688_v43, 16 }
 0x13f   : >> { %v741_v22 = vpop.f32.mrf.mxu0  ;;  %1805 = vmatmul.mubr.bf16.gmra.mxu0 %v1462_v25 }
 0x140   : >> { %v1182_v50 = vpop.f32.mrf.mxu1  ;;  %2006 = vmatmul.mubr.bf16.gmra.mxu1 %v1462_v25  ;;  %3418 = vmatprep.mubr.msk.bf16.mxu0 %vm631_vm0, %v5583_v21  ;;  %v1515_v25 = vshrl.u32 %v4668_v58, 16 }
 0x141   : >> { %v4837_v54 = vadd.f32 %v1182_v50, %v741_v22  ;;  %3435 = vmatprep.mubr.msk.bf16.mxu1 %vm631_vm0, %v5583_v21  ;;  %v743_v53 = vpop.f32.mrf.mxu0  ;;  %v1538_v50 = vshrl.u32 %v4672_v55, 16  ;;  %v1542_v21 = vshll.u32 %v3394_v52, 16 }
 0x142   : >> { %v1184_v34 = vpop.f32.mrf.mxu1  ;;  %v1517_v58 = vor.u32 %v1515_v25, %v1506_v32 }
 0x143   : >> { %v744_v16 = vpop.f32.mrf.mxu0  ;;  %v1521_v34 = vrot.slane %v1519_v46, 1  ;;  %v1540_v55 = vor.u32 %v1538_v50, %v4690_v44 }
 0x144   : >> { %v1185_v47 = vpop.f32.mrf.mxu1 }
 0x145   : >> { %v4844_v26 = vadd.f32 %v1185_v47, %v744_v16  ;;  %v746_v59 = vpop.f32.mrf.mxu0  ;;  %v3393_v16 = vcombine.low %v4683_v56, %v372_v19 }
 0x146   : >> { %v1187_v4 = vpop.f32.mrf.mxu1  ;;  %v1530_v59 = vshrl.u32 %v4688_v43, 16 }
 0x147   : >> { %v749_v0 = vpop.f32.mrf.mxu0  ;;  %1813 = vmatmul.mubr.bf16.gmra.mxu0 %v1477_v57 }
 0x148   : >> { %v1190_v1 = vpop.f32.mrf.mxu1  ;;  %2014 = vmatmul.mubr.bf16.gmra.mxu1 %v1477_v57  ;;  %3419 = vmatprep.mubr.msk.bf16.mxu0 %vm631_vm0, %v5585_v7  ;;  %v1544_v57 = vrot.slane %v1542_v21, 1  ;;  %v1532_v43 = vor.u32 %v1530_v59, %v1521_v34 }
 0x149   : >> { %v4848_v3 = vadd.f32 %v1190_v1, %v749_v0  ;;  %3436 = vmatprep.mubr.msk.bf16.mxu1 %vm631_vm0, %v5585_v7  ;;  %v751_v11 = vpop.f32.mrf.mxu0  ;;  %v1522_v0 = vsel %vm1297_vm1, %v1517_v58, %v1521_v34  ;;  %v1534_v1 = vshll.u32 %v3393_v16, 16 }
 0x14a   : >> { %v1192_v23 = vpop.f32.mrf.mxu1  ;;  %v1545_v8 = vsel %vm1297_vm1, %v1540_v55, %v1544_v57 }
 0x14b   : >> { %v752_v24 = vpop.f32.mrf.mxu0  ;;  %v1536_v11 = vrot.slane %v1534_v1, 1  ;;  %v1549_v23 = vshrl.u32 %v3394_v52, 16 }
 0x14c   : >> { %v1193_v29 = vpop.f32.mrf.mxu1 }
 0x14d   : >> { %v4855_v48 = vadd.f32 %v1193_v29, %v752_v24  ;;  %v754_v20 = vpop.f32.mrf.mxu0  ;;  %v1537_v19 = vsel %vm1297_vm1, %v1532_v43, %v1536_v11 }
 0x14e   : >> { %v1195_v28 = vpop.f32.mrf.mxu1 }
 0x14f   : >> { %v757_v15 = vpop.f32.mrf.mxu0  ;;  %1821 = vmatmul.mubr.bf16.gmra.mxu0 %v1492_v49 }
 0x150   : >> { %v1198_v60 = vpop.f32.mrf.mxu1  ;;  %2022 = vmatmul.mubr.bf16.gmra.mxu1 %v1492_v49  ;;  %3420 = vmatprep.mubr.msk.bf16.mxu0 %vm631_vm0, %v5586_v37  ;;  %v2248_v49 = vshll.u32 %v3713_v36, 16 }
 0x151   : >> { %v4860_v18 = vadd.f32 %v1198_v60, %v757_v15  ;;  %3437 = vmatprep.mubr.msk.bf16.mxu1 %vm631_vm0, %v5586_v37  ;;  %v759_v31 = vpop.f32.mrf.mxu0  ;;  %v1551_v15 = vor.u32 %v1549_v23, %v1544_v57 }
 0x152   : >> { %v1200_v33 = vpop.f32.mrf.mxu1  ;;  %v2250_v32 = vrot.slane %v2248_v49, 1  ;;  %v3714_v31 = vld [vmem:[%s4275_s6 + $0x14] ss:$8 sps:$4 sm:$0xff]  }
 0x153   : >> { %v760_v6 = vpop.f32.mrf.mxu0  ;;  %v2252_v33 = vshll.u32 %v3714_v31, 16  ;;  %v2264_v59 = vshrl.u32 %v3714_v31, 16 }
 0x154   : >> { %v1201_v39 = vpop.f32.mrf.mxu1  ;;  %v2251_v50 = vor.u32 %v2250_v32, %v2246_v61 }
 0x155   : >> { %v4868_v2 = vadd.f32 %v1201_v39, %v760_v6  ;;  %v762_v10 = vpop.f32.mrf.mxu0  ;;  %v1546_v39 = vshrl.u32 %v3393_v16, 16  ;;  %v2254_v21 = vrot.slane %v2252_v33, 1  ;;  %v3719_v33 = vld [vmem:[%s4275_s6 + $0x34] ss:$8 sps:$4 sm:$0xff]  }
 0x156   : >> { %v1203_v22 = vpop.f32.mrf.mxu1 }
 0x157   : >> { %v765_v35 = vpop.f32.mrf.mxu0  ;;  %1829 = vmatmul.mubr.bf16.gmra.mxu0 %v1507_v12  ;;  %v1548_v58 = vor.u32 %v1546_v39, %v1536_v11  ;;  %v2266_v23 = vor.u32 %v2264_v59, %v2254_v21 }
 0x158   : >> { %v1206_v40 = vpop.f32.mrf.mxu1  ;;  %2030 = vmatmul.mubr.bf16.gmra.mxu1 %v1507_v12  ;;  %3421 = vmatprep.mubr.msk.bf16.mxu0 %vm631_vm0, %v4698_v63  ;;  %v3715_v12 = vld [vmem:[%s4275_s6] ss:$8 sps:$4 sm:$0xff]  }
 0x159   : >> { %v4873_v53 = vadd.f32 %v1206_v40, %v765_v35  ;;  %3438 = vmatprep.mubr.msk.bf16.mxu1 %vm631_vm0, %v4698_v63  ;;  %v767_v47 = vpop.f32.mrf.mxu0  ;;  %v2237_v46 = vshll.u32 %v3715_v12, 16  ;;  %v2235_v16 = vshrl.u32 %v3715_v12, 16 }
 0x15a   : >> { %v1208_v38 = vpop.f32.mrf.mxu1 }
 0x15b   : >> { %v768_v62 = vpop.f32.mrf.mxu0  ;;  %v2239_v47 = vrot.slane %v2237_v46, 1  ;;  %v3716_v38 = vld [vmem:[%s4275_s6 + $0x10] ss:$8 sps:$4 sm:$0xff]  }
 0x15c   : >> { %v1209_v41 = vpop.f32.mrf.mxu1  ;;  %v2242_v55 = vshll.u32 %v3716_v38, 16 }
 0x15d   : >> { %v4882_v4 = vadd.f32 %v1209_v41, %v768_v62  ;;  %v770_v63 = vpop.f32.mrf.mxu0  ;;  %v2255_v41 = vsel %vm1297_vm1, %v2251_v50, %v2254_v21 }
 0x15e   : >> { %v1211_v7 = vpop.f32.mrf.mxu1 }
 0x15f   : >> { %v773_v56 = vpop.f32.mrf.mxu0  ;;  %1837 = vmatmul.mubr.bf16.gmra.mxu0 %v1522_v0 }
 0x160   : >> { %v1214_v9 = vpop.f32.mrf.mxu1  ;;  %2038 = vmatmul.mubr.bf16.gmra.mxu1 %v1522_v0  ;;  %3422 = vmatprep.mubr.msk.bf16.mxu0 %vm631_vm0, %v1545_v8  ;;  %v3717_v0 = vld [vmem:[%s4275_s6 + $0x24] ss:$8 sps:$4 sm:$0xff]  }
 0x161   : >> { %v4886_v44 = vadd.f32 %v1214_v9, %v773_v56  ;;  %3439 = vmatprep.mubr.msk.bf16.mxu1 %vm631_vm0, %v1545_v8  ;;  %v775_v24 = vpop.f32.mrf.mxu0  ;;  %v2267_v1 = vshll.u32 %v3717_v0, 16  ;;  %v2240_v56 = vor.u32 %v2239_v47, %v2235_v16  ;;  %v2244_v9 = vrot.slane %v2242_v55, 1 }
 0x162   : >> { %v1216_v29 = vpop.f32.mrf.mxu1  ;;  %v2279_v32 = vshrl.u32 %v3717_v0, 16 }
 0x163   : >> { %v776_v13 = vpop.f32.mrf.mxu0  ;;  %v2269_v24 = vrot.slane %v2267_v1, 1  ;;  %v2294_v1 = vshrl.u32 %v3719_v33, 16 }
 0x164   : >> { %v1217_v20 = vpop.f32.mrf.mxu1 }
 0x165   : >> { %v4891_v28 = vadd.f32 %v1217_v20, %v776_v13  ;;  %v778_v60 = vpop.f32.mrf.mxu0  ;;  %v2245_v20 = vsel %vm1297_vm1, %v2240_v56, %v2244_v9  ;;  %v2270_v61 = vsel %vm1297_vm1, %v2266_v23, %v2269_v24 }
 0x166   : >> { %v1219_v37 = vpop.f32.mrf.mxu1 }
 0x167   : >> { %v781_v6 = vpop.f32.mrf.mxu0  ;;  %1845 = vmatmul.mubr.bf16.gmra.mxu0 %v1537_v19 }
 0x168   : >> { %v1222_v52 = vpop.f32.mrf.mxu1  ;;  %2046 = vmatmul.mubr.bf16.gmra.mxu1 %v1537_v19  ;;  %3423 = vmatprep.mubr.msk.bf16.mxu0 %vm631_vm0, %v1551_v15  ;;  %v2256_v19 = vshrl.u32 %v3716_v38, 16 }
 0x169   : >> { %v4895_v25 = vadd.f32 %v1222_v52, %v781_v6  ;;  %3440 = vmatprep.mubr.msk.bf16.mxu1 %vm631_vm0, %v1551_v15  ;;  %v783_v10 = vpop.f32.mrf.mxu0  ;;  %v3718_v15 = vld [vmem:[%s4275_s6 + $0x20] ss:$8 sps:$4 sm:$0xff]   ;;  %v2282_v6 = vshll.u32 %v3719_v33, 16 }
 0x16a   : >> { %v1224_v22 = vpop.f32.mrf.mxu1  ;;  %v2260_v60 = vshll.u32 %v3718_v15, 16  ;;  %v2258_v10 = vor.u32 %v2256_v19, %v2244_v9  ;;  %v2271_v55 = vshrl.u32 %v3718_v15, 16 }
 0x16b   : >> { %v784_v35 = vpop.f32.mrf.mxu0 }
 0x16c   : >> { %v1225_v40 = vpop.f32.mrf.mxu1  ;;  %v2262_v22 = vrot.slane %v2260_v60, 1 }
 0x16d   : >> { %v4900_v34 = vadd.f32 %v1225_v40, %v784_v35  ;;  %v786_v57 = vpop.f32.mrf.mxu0  ;;  %v2281_v35 = vor.u32 %v2279_v32, %v2269_v24  ;;  %v2284_v40 = vrot.slane %v2282_v6, 1 }
 0x16e   : >> { %v1227_v62 = vpop.f32.mrf.mxu1  ;;  %v3720_v57 = vld [vmem:[%s4275_s6 + $0x30] ss:$8 sps:$4 sm:$0xff]  }
 0x16f   : >> { %v789_v63 = vpop.f32.mrf.mxu0  ;;  %1853 = vmatmul.mubr.bf16.gmra.mxu0 %v1548_v58  ;;  %v2275_v62 = vshll.u32 %v3720_v57, 16  ;;  %v2285_v59 = vsel %vm1297_vm1, %v2281_v35, %v2284_v40 }
 0x170   : >> { %v1230_v7 = vpop.f32.mrf.mxu1  ;;  %2054 = vmatmul.mubr.bf16.gmra.mxu1 %v1548_v58  ;;  %3441 = vmatprep.mubr.msk.bf16.mxu0 %vm631_vm0, %v3713_v36 }
 0x171   : >> { %v4905_v8 = vadd.f32 %v1230_v7, %v789_v63  ;;  %3460 = vmatprep.mubr.msk.bf16.mxu1 %vm631_vm0, %v2255_v41  ;;  %v791_v43 = vpop.f32.mrf.mxu0  ;;  %v3721_v63 = vld [vmem:[%s4275_s6 + $0x44] ss:$8 sps:$4 sm:$0xff]   ;;  %v2277_v23 = vrot.slane %v2275_v62, 1 }
 0x172   : >> { %v1232_v11 = vpop.f32.mrf.mxu1  ;;  %v2297_v7 = vshll.u32 %v3721_v63, 16 }
 0x173   : >> { %v792_v29 = vpop.f32.mrf.mxu0  ;;  %v2273_v11 = vor.u32 %v2271_v55, %v2262_v22 }
 0x174   : >> { %v1233_v49 = vpop.f32.mrf.mxu1 }
 0x175   : >> { %v4909_v13 = vadd.f32 %v1233_v49, %v792_v29  ;;  %v794_v37 = vpop.f32.mrf.mxu0  ;;  %v2296_v49 = vor.u32 %v2294_v1, %v2284_v40 }
 0x176   : >> { %v1235_v36 = vpop.f32.mrf.mxu1 }
 0x177   : >> { %v797_v52 = vpop.f32.mrf.mxu0  ;;  %2094 = vmatmul.mubr.bf16.vlgmr.msra.gmra.mxu0 %v3715_v12  ;;  %v2263_v12 = vsel %vm1297_vm1, %v2258_v10, %v2262_v22  ;;  %v2286_v36 = vshrl.u32 %v3720_v57, 16  ;;  %v3723_v10 = vld [vmem:[%s4275_s6 + $0x54] ss:$8 sps:$4 sm:$0xff]  }
 0x178   : >> { %v1238_v39 = vpop.f32.mrf.mxu1  ;;  %2589 = vmatmul.mubr.bf16.vlgmr.msra.gmra.mxu1 %v2245_v20  ;;  %3442 = vmatprep.mubr.msk.bf16.mxu0 %vm631_vm0, %v3714_v31  ;;  %v2299_v20 = vrot.slane %v2297_v7, 1  ;;  %v2312_v22 = vshll.u32 %v3723_v10, 16  ;;  %v3724_v7 = vld [vmem:[%s4275_s6 + $0x50] ss:$8 sps:$4 sm:$0xff]  }
 0x179   : >> { %v4915_v46 = vadd.f32 %v1238_v39, %v797_v52  ;;  %3461 = vmatprep.mubr.msk.bf16.mxu1 %vm631_vm0, %v2270_v61  ;;  %v799_v50 = vpop.f32.mrf.mxu0  ;;  %v3722_v61 = vld [vmem:[%s4275_s6 + $0x40] ss:$8 sps:$4 sm:$0xff]   ;;  %v2309_v39 = vshrl.u32 %v3721_v63, 16  ;;  %v2288_v40 = vor.u32 %v2286_v36, %v2277_v23 }
 0x17a   : >> { %v1240_v21 = vpop.f32.mrf.mxu1  ;;  %v2290_v32 = vshll.u32 %v3722_v61, 16  ;;  %v2300_v52 = vsel %vm1297_vm1, %v2296_v49, %v2299_v20  ;;  %v2314_v62 = vrot.slane %v2312_v22, 1  ;;  %v2301_v1 = vshrl.u32 %v3722_v61, 16 }
 0x17b   : >> { %v800_v58 = vpop.f32.mrf.mxu0  ;;  %v2311_v55 = vor.u32 %v2309_v39, %v2299_v20 }
 0x17c   : >> { %v1241_v16 = vpop.f32.mrf.mxu1 }
 0x17d   : >> { %v4919_v47 = vadd.f32 %v1241_v16, %v800_v58  ;;  %v802_v41 = vpop.f32.mrf.mxu0  ;;  %v2292_v58 = vrot.slane %v2290_v32, 1 }
 0x17e   : >> { %v1243_v31 = vpop.f32.mrf.mxu1 }
 0x17f   : >> { %v805_v56 = vpop.f32.mrf.mxu0  ;;  %2102 = vmatmul.mubr.bf16.gmra.mxu0 %v3716_v38  ;;  %v2278_v38 = vsel %vm1297_vm1, %v2273_v11, %v2277_v23  ;;  %v2315_v11 = vsel %vm1297_vm1, %v2311_v55, %v2314_v62  ;;  %v2324_v23 = vshrl.u32 %v3723_v10, 16  ;;  %v3727_v55 = vld [vmem:[%s4275_s6 + $0x74] ss:$8 sps:$4 sm:$0xff]  }
 0x180   : >> { %v1246_v9 = vpop.f32.mrf.mxu1  ;;  %2597 = vmatmul.mubr.bf16.gmra.mxu1 %v2263_v12  ;;  %3443 = vmatprep.mubr.msk.bf16.mxu0 %vm631_vm0, %v3717_v0 }
 0x181   : >> { %v4925_v43 = vadd.f32 %v1246_v9, %v805_v56  ;;  %3462 = vmatprep.mubr.msk.bf16.mxu1 %vm631_vm0, %v2285_v59  ;;  %v807_v24 = vpop.f32.mrf.mxu0  ;;  %v2305_v56 = vshll.u32 %v3724_v7, 16 }
 0x182   : >> { %v1248_v29 = vpop.f32.mrf.mxu1  ;;  %v3725_v24 = vld [vmem:[%s4275_s6 + $0x64] ss:$8 sps:$4 sm:$0xff]  }
 0x183   : >> { %v808_v19 = vpop.f32.mrf.mxu0  ;;  %v2327_v29 = vshll.u32 %v3725_v24, 16 }
 0x184   : >> { %v1249_v60 = vpop.f32.mrf.mxu1 }
 0x185   : >> { %v4929_v37 = vadd.f32 %v1249_v60, %v808_v19  ;;  %v810_v6 = vpop.f32.mrf.mxu0  ;;  %v2303_v60 = vor.u32 %v2301_v1, %v2292_v58 }
 0x186   : >> { %v1251_v0 = vpop.f32.mrf.mxu1  ;;  %v2326_v6 = vor.u32 %v2324_v23, %v2314_v62 }
 0x187   : >> { %v813_v50 = vpop.f32.mrf.mxu0  ;;  %2110 = vmatmul.mubr.bf16.gmra.mxu0 %v3718_v15  ;;  %v2293_v15 = vsel %vm1297_vm1, %v2288_v40, %v2292_v58  ;;  %v2329_v0 = vrot.slane %v2327_v29, 1  ;;  %v2339_v58 = vshrl.u32 %v3725_v24, 16 }
 0x188   : >> { %v1254_v21 = vpop.f32.mrf.mxu1  ;;  %2605 = vmatmul.mubr.bf16.gmra.mxu1 %v2278_v38  ;;  %3444 = vmatprep.mubr.msk.bf16.mxu0 %vm631_vm0, %v3719_v33  ;;  %v2307_v38 = vrot.slane %v2305_v56, 1 }
 0x189   : >> { %v4935_v35 = vadd.f32 %v1254_v21, %v813_v50  ;;  %3463 = vmatprep.mubr.msk.bf16.mxu1 %vm631_vm0, %v2300_v52  ;;  %v815_v16 = vpop.f32.mrf.mxu0  ;;  %v2316_v50 = vshrl.u32 %v3724_v7, 16  ;;  %v3726_v21 = vld [vmem:[%s4275_s6 + $0x60] ss:$8 sps:$4 sm:$0xff]  }
 0x18a   : >> { %v1256_v12 = vpop.f32.mrf.mxu1  ;;  %v2320_v40 = vshll.u32 %v3726_v21, 16 }
 0x18b   : >> { %v816_v41 = vpop.f32.mrf.mxu0  ;;  %v2330_v12 = vsel %vm1297_vm1, %v2326_v6, %v2329_v0  ;;  %v2318_v1 = vor.u32 %v2316_v50, %v2307_v38 }
 0x18c   : >> { %v1257_v31 = vpop.f32.mrf.mxu1  ;;  %v2322_v56 = vrot.slane %v2320_v40, 1 }
 0x18d   : >> { %v4939_v59 = vadd.f32 %v1257_v31, %v816_v41  ;;  %v818_v9 = vpop.f32.mrf.mxu0  ;;  %v2342_v41 = vshll.u32 %v3727_v55, 16 }
 0x18e   : >> { %v1259_v33 = vpop.f32.mrf.mxu1 }
 0x18f   : >> { %v821_v49 = vpop.f32.mrf.mxu0  ;;  %2118 = vmatmul.mubr.bf16.gmra.mxu0 %v3720_v57  ;;  %v2308_v57 = vsel %vm1297_vm1, %v2303_v60, %v2307_v38  ;;  %v2344_v23 = vrot.slane %v2342_v41, 1  ;;  %v2331_v60 = vshrl.u32 %v3726_v21, 16  ;;  %v2354_v38 = vshrl.u32 %v3727_v55, 16 }
 0x190   : >> { %v1262_v19 = vpop.f32.mrf.mxu1  ;;  %2613 = vmatmul.mubr.bf16.gmra.mxu1 %v2293_v15  ;;  %3445 = vmatprep.mubr.msk.bf16.mxu0 %vm631_vm0, %v3721_v63 }
 0x191   : >> { %v4945_v20 = vadd.f32 %v1262_v19, %v821_v49  ;;  %3464 = vmatprep.mubr.msk.bf16.mxu1 %vm631_vm0, %v2315_v11  ;;  %v823_v36 = vpop.f32.mrf.mxu0  ;;  %v2341_v11 = vor.u32 %v2339_v58, %v2329_v0  ;;  %v2356_v41 = vor.u32 %v2354_v38, %v2344_v23 }
 0x192   : >> { %v1264_v32 = vpop.f32.mrf.mxu1  ;;  %v3728_v36 = vld [vmem:[%s4275_s6 + $0x70] ss:$8 sps:$4 sm:$0xff]  }
 0x193   : >> { %v824_v52 = vpop.f32.mrf.mxu0  ;;  %v2335_v32 = vshll.u32 %v3728_v36, 16 }
 0x194   : >> { %v1265_v39 = vpop.f32.mrf.mxu1 }
 0x195   : >> { %v4949_v22 = vadd.f32 %v1265_v39, %v824_v52  ;;  %v826_v16 = vpop.f32.mrf.mxu0  ;;  %v2345_v52 = vsel %vm1297_vm1, %v2341_v11, %v2344_v23  ;;  %v3729_v39 = vld [vmem:[%s4275_s6 + $0x84] ss:$8 sps:$4 sm:$0xff]   ;;  %v3730_v11 = vld [vmem:[%s4275_s6 + $0x80] ss:$8 sps:$4 sm:$0xff]  }
 0x196   : >> { %v1267_v63 = vpop.f32.mrf.mxu1  ;;  %v2333_v16 = vor.u32 %v2331_v60, %v2322_v56  ;;  %v3731_v60 = vld [vmem:[%s4275_s6 + $0x94] ss:$8 sps:$4 sm:$0xff]  }
 0x197   : >> { %v829_v31 = vpop.f32.mrf.mxu0  ;;  %2126 = vmatmul.mubr.bf16.gmra.mxu0 %v3722_v61  ;;  %v2323_v61 = vsel %vm1297_vm1, %v2318_v1, %v2322_v56  ;;  %v2337_v63 = vrot.slane %v2335_v32, 1  ;;  %v2369_v56 = vshrl.u32 %v3729_v39, 16  ;;  %v2372_v32 = vshll.u32 %v3731_v60, 16 }
 0x198   : >> { %v1270_v15 = vpop.f32.mrf.mxu1  ;;  %2621 = vmatmul.mubr.bf16.gmra.mxu1 %v2308_v57  ;;  %3446 = vmatprep.mubr.msk.bf16.mxu0 %vm631_vm0, %v3723_v10  ;;  %v2357_v57 = vshll.u32 %v3729_v39, 16 }
 0x199   : >> { %v4955_v62 = vadd.f32 %v1270_v15, %v829_v31  ;;  %3465 = vmatprep.mubr.msk.bf16.mxu1 %vm631_vm0, %v2330_v12  ;;  %v831_v9 = vpop.f32.mrf.mxu0 }
 0x19a   : >> { %v1272_v33 = vpop.f32.mrf.mxu1  ;;  %v2359_v31 = vrot.slane %v2357_v57, 1 }
 0x19b   : >> { %v832_v29 = vpop.f32.mrf.mxu0  ;;  %v2346_v33 = vshrl.u32 %v3728_v36, 16 }
 0x19c   : >> { %v1273_v49 = vpop.f32.mrf.mxu1 }
 0x19d   : >> { %v4959_v19 = vadd.f32 %v1273_v49, %v832_v29  ;;  %v834_v6 = vpop.f32.mrf.mxu0  ;;  %v2350_v29 = vshll.u32 %v3730_v11, 16 }
 0x19e   : >> { %v1275_v10 = vpop.f32.mrf.mxu1 }
 0x19f   : >> { %v837_v50 = vpop.f32.mrf.mxu0  ;;  %2134 = vmatmul.mubr.bf16.gmra.mxu0 %v3724_v7  ;;  %v2338_v7 = vsel %vm1297_vm1, %v2333_v16, %v2337_v63  ;;  %v2352_v38 = vrot.slane %v2350_v29, 1  ;;  %v2374_v16 = vrot.slane %v2372_v32, 1 }
 0x1a0   : >> { %v1278_v40 = vpop.f32.mrf.mxu1  ;;  %2629 = vmatmul.mubr.bf16.gmra.mxu1 %v2323_v61  ;;  %3447 = vmatprep.mubr.msk.bf16.mxu0 %vm631_vm0, %v3725_v24  ;;  %v2360_v61 = vsel %vm1297_vm1, %v2356_v41, %v2359_v31 }
 0x1a1   : >> { %v4965_v0 = vadd.f32 %v1278_v40, %v837_v50  ;;  %3466 = vmatprep.mubr.msk.bf16.mxu1 %vm631_vm0, %v2345_v52  ;;  %v839_v12 = vpop.f32.mrf.mxu0  ;;  %v2348_v52 = vor.u32 %v2346_v33, %v2337_v63  ;;  %v2371_v40 = vor.u32 %v2369_v56, %v2359_v31 }
 0x1a2   : >> { %v1280_v58 = vpop.f32.mrf.mxu1 }
 0x1a3   : >> { %v840_v15 = vpop.f32.mrf.mxu0  ;;  %v2353_v41 = vsel %vm1297_vm1, %v2348_v52, %v2352_v38 }
 0x1a4   : >> { %v1281_v1 = vpop.f32.mrf.mxu1 }
 0x1a5   : >> { %v4969_v9 = vadd.f32 %v1281_v1, %v840_v15  ;;  %v842_v49 = vpop.f32.mrf.mxu0  ;;  %v2361_v15 = vshrl.u32 %v3730_v11, 16 }
 0x1a6   : >> { %v1283_v24 = vpop.f32.mrf.mxu1 }
 0x1a7   : >> { %v845_v6 = vpop.f32.mrf.mxu0  ;;  %2142 = vmatmul.mubr.bf16.gmra.mxu0 %v3726_v21  ;;  %v3732_v21 = vld [vmem:[%s4275_s6 + $0x90] ss:$8 sps:$4 sm:$0xff]   ;;  %v2384_v24 = vshrl.u32 %v3731_v60, 16  ;;  %v2363_v56 = vor.u32 %v2361_v15, %v2352_v38 }
 0x1a8   : >> { %v1286_v10 = vpop.f32.mrf.mxu1  ;;  %2637 = vmatmul.mubr.bf16.gmra.mxu1 %v2338_v7  ;;  %3448 = vmatprep.mubr.msk.bf16.mxu0 %vm631_vm0, %v3727_v55  ;;  %v2365_v1 = vshll.u32 %v3732_v21, 16  ;;  %v2375_v55 = vsel %vm1297_vm1, %v2371_v40, %v2374_v16 }
 0x1a9   : >> { %v4975_v23 = vadd.f32 %v1286_v10, %v845_v6  ;;  %3467 = vmatprep.mubr.msk.bf16.mxu1 %vm631_vm0, %v2360_v61  ;;  %v847_v57 = vpop.f32.mrf.mxu0  ;;  %v3733_v61 = vld [vmem:[%s4275_s6 + $0xa4] ss:$8 sps:$4 sm:$0xff]   ;;  %v2386_v52 = vor.u32 %v2384_v24, %v2374_v16 }
 0x1aa   : >> { %v1288_v50 = vpop.f32.mrf.mxu1  ;;  %v2387_v63 = vshll.u32 %v3733_v61, 16  ;;  %v2367_v32 = vrot.slane %v2365_v1, 1  ;;  %v2399_v15 = vshrl.u32 %v3733_v61, 16  ;;  %v3735_v1 = vld [vmem:[%s4275_s6 + $0xb4] ss:$8 sps:$4 sm:$0xff]  }
 0x1ab   : >> { %v848_v12 = vpop.f32.mrf.mxu0 }
 0x1ac   : >> { %v1289_v58 = vpop.f32.mrf.mxu1  ;;  %v2389_v57 = vrot.slane %v2387_v63, 1  ;;  %v2376_v12 = vshrl.u32 %v3732_v21, 16 }
 0x1ad   : >> { %v849_v7 = vpop.f32.mrf.mxu0  ;;  %v3734_v58 = vld [vmem:[%s4275_s6 + $0xa0] ss:$8 sps:$4 sm:$0xff]  }
 0x1ae   : >> { %v1290_v49 = vpop.f32.mrf.mxu1  ;;  %v2390_v38 = vsel %vm1297_vm1, %v2386_v52, %v2389_v57  ;;  %v2378_v24 = vor.u32 %v2376_v12, %v2367_v32  ;;  %v2414_v12 = vshrl.u32 %v3735_v1, 16 }
 0x1af   : >> { %v1726_v33 = vpop.f32.mrf.mxu0  ;;  %2150 = vmatmul.mubr.bf16.gmra.mxu0 %v3728_v36  ;;  %v2402_v49 = vshll.u32 %v3735_v1, 16 }
 0x1b0   : >> { %v4983_v29 = vpop.f32.mrf.mxu1  ;;  %2645 = vmatmul.mubr.bf16.gmra.mxu1 %v2353_v41  ;;  %v4986_v31 = vadd.f32 %v1726_v33, %v4803_v5  ;;  %3449 = vmatprep.mubr.msk.bf16.mxu0 %vm631_vm0, %v3729_v39  ;;  %v2368_v5 = vsel %vm1297_vm1, %v2363_v56, %v2367_v32  ;;  %v2380_v39 = vshll.u32 %v3734_v58, 16 }
 0x1b1   : >> { %3468 = vmatprep.mubr.msk.bf16.mxu1 %vm631_vm0, %v2375_v55  ;;  %v1728_v6 = vpop.f32.mrf.mxu0 }
 0x1b2   : >> { %v1929_v10 = vpop.f32.mrf.mxu1  ;;  %v2382_v63 = vrot.slane %v2380_v39, 1  ;;  %v2401_v6 = vor.u32 %v2399_v15, %v2389_v57  ;;  %v3737_v39 = vld [vmem:[%s4275_s6 + $0xc4] ss:$8 sps:$4 sm:$0xff]  }
 0x1b3   : >> { %v1729_v50 = vpop.f32.mrf.mxu0  ;;  %v2404_v10 = vrot.slane %v2402_v49, 1 }
 0x1b4   : >> { %v4990_v40 = vpop.f32.mrf.mxu1  ;;  %v4993_v36 = vadd.f32 %v1729_v50, %v4809_v14 }
 0x1b5   : >> { %v1731_v41 = vpop.f32.mrf.mxu0  ;;  %v2405_v32 = vsel %vm1297_vm1, %v2401_v6, %v2404_v10  ;;  %v2416_v6 = vor.u32 %v2414_v12, %v2404_v10 }
 0x1b6   : >> { %v1932_v7 = vpop.f32.mrf.mxu1  ;;  %v3736_v41 = vld [vmem:[%s4275_s6 + $0xb0] ss:$8 sps:$4 sm:$0xff]  }
 0x1b7   : >> { %v1734_v16 = vpop.f32.mrf.mxu0  ;;  %2158 = vmatmul.mubr.bf16.gmra.mxu0 %v3730_v11 }
 0x1b8   : >> { %v4999_v55 = vpop.f32.mrf.mxu1  ;;  %2653 = vmatmul.mubr.bf16.gmra.mxu1 %v2368_v5  ;;  %v5002_v14 = vadd.f32 %v1734_v16, %v4813_v42  ;;  %3450 = vmatprep.mubr.msk.bf16.mxu0 %vm631_vm0, %v3731_v60  ;;  %v2383_v42 = vsel %vm1297_vm1, %v2378_v24, %v2382_v63  ;;  %v2391_v5 = vshrl.u32 %v3734_v58, 16  ;;  %v2395_v60 = vshll.u32 %v3736_v41, 16 }
 0x1b9   : >> { %3469 = vmatprep.mubr.msk.bf16.mxu1 %vm631_vm0, %v2390_v38  ;;  %v1736_v33 = vpop.f32.mrf.mxu0  ;;  %v2417_v16 = vshll.u32 %v3737_v39, 16 }
 0x1ba   : >> { %5587 = vst [vmem:[#allocation75_spill] sm:$0xff] %v5002_v14  ;;  %v1937_v56 = vpop.f32.mrf.mxu1  ;;  %v2393_v49 = vor.u32 %v2391_v5, %v2382_v63  ;;  %v2397_v24 = vrot.slane %v2395_v60, 1  ;;  %v2429_v5 = vshrl.u32 %v3737_v39, 16  ;;  %v3739_v60 = vld [vmem:[%s4275_s6 + $0xd4] ss:$8 sps:$4 sm:$0xff]  }
 0x1bb   : >> { %v1737_v52 = vpop.f32.mrf.mxu0 }
 0x1bc   : >> { %v5006_v50 = vpop.f32.mrf.mxu1  ;;  %v5009_v11 = vadd.f32 %v1737_v52, %v4819_v17  ;;  %v2419_v52 = vrot.slane %v2417_v16, 1 }
 0x1bd   : >> { %5588 = vst [vmem:[#allocation76_spill] sm:$0xff] %v5006_v50  ;;  %v1739_v7 = vpop.f32.mrf.mxu0 }
 0x1be   : >> { %5589 = vst [vmem:[#allocation77_spill] sm:$0xff] %v5009_v11  ;;  %v1940_v38 = vpop.f32.mrf.mxu1  ;;  %v2420_v63 = vsel %vm1297_vm1, %v2416_v6, %v2419_v52  ;;  %v2431_v6 = vor.u32 %v2429_v5, %v2419_v52  ;;  %v3741_v52 = vld [vmem:[%s4275_s6 + $0xe4] ss:$8 sps:$4 sm:$0xff]  }
 0x1bf   : >> { %v1742_v57 = vpop.f32.mrf.mxu0  ;;  %2166 = vmatmul.mubr.bf16.gmra.mxu0 %v3732_v21  ;;  %v2447_v5 = vshll.u32 %v3741_v52, 16 }
 0x1c0   : >> { %v5015_v15 = vpop.f32.mrf.mxu1  ;;  %2661 = vmatmul.mubr.bf16.gmra.mxu1 %v2383_v42  ;;  %v5018_v17 = vadd.f32 %v1742_v57, %v4825_v30  ;;  %3451 = vmatprep.mubr.msk.bf16.mxu0 %vm631_vm0, %v3733_v61  ;;  %v2398_v30 = vsel %vm1297_vm1, %v2393_v49, %v2397_v24  ;;  %v2406_v42 = vshrl.u32 %v3736_v41, 16  ;;  %v3738_v57 = vld [vmem:[%s4275_s6 + $0xc0] ss:$8 sps:$4 sm:$0xff]  }
 0x1c1   : >> { %3470 = vmatprep.mubr.msk.bf16.mxu1 %vm631_vm0, %v2405_v32  ;;  %v1744_v33 = vpop.f32.mrf.mxu0  ;;  %v2410_v61 = vshll.u32 %v3738_v57, 16 }
 0x1c2   : >> { %v1945_v56 = vpop.f32.mrf.mxu1  ;;  %v2432_v33 = vshll.u32 %v3739_v60, 16 }
 0x1c3   : >> { %v1745_v7 = vpop.f32.mrf.mxu0  ;;  %v2412_v16 = vrot.slane %v2410_v61, 1 }
 0x1c4   : >> { %v5022_v38 = vpop.f32.mrf.mxu1  ;;  %v5025_v21 = vadd.f32 %v1745_v7, %v4833_v45  ;;  %v2434_v7 = vrot.slane %v2432_v33, 1 }
 0x1c5   : >> { %v1747_v11 = vpop.f32.mrf.mxu0 }
 0x1c6   : >> { %v1948_v32 = vpop.f32.mrf.mxu1  ;;  %v2408_v11 = vor.u32 %v2406_v42, %v2397_v24  ;;  %v2435_v61 = vsel %vm1297_vm1, %v2431_v6, %v2434_v7 }
 0x1c7   : >> { %v1750_v10 = vpop.f32.mrf.mxu0  ;;  %2174 = vmatmul.mubr.bf16.gmra.mxu0 %v3734_v58 }
 0x1c8   : >> { %v5031_v12 = vpop.f32.mrf.mxu1  ;;  %2669 = vmatmul.mubr.bf16.gmra.mxu1 %v2398_v30  ;;  %v5034_v45 = vadd.f32 %v1750_v10, %v4837_v54  ;;  %3452 = vmatprep.mubr.msk.bf16.mxu0 %vm631_vm0, %v3735_v1  ;;  %v2413_v54 = vsel %vm1297_vm1, %v2408_v11, %v2412_v16  ;;  %v2421_v30 = vshrl.u32 %v3738_v57, 16  ;;  %v5045_v10 = vld [vmem:[%s4275_s6 + $0xd0] ss:$8 sps:$4 sm:$0xff]  }
 0x1c9   : >> { %3471 = vmatprep.mubr.msk.bf16.mxu1 %vm631_vm0, %v2420_v63  ;;  %v1752_v49 = vpop.f32.mrf.mxu0  ;;  %v2425_v1 = vshll.u32 %v5045_v10, 16  ;;  %v2444_v63 = vshrl.u32 %v3739_v60, 16 }
 0x1ca   : >> { %v1953_v56 = vpop.f32.mrf.mxu1  ;;  %v2423_v11 = vor.u32 %v2421_v30, %v2412_v16 }
 0x1cb   : >> { %v1753_v32 = vpop.f32.mrf.mxu0  ;;  %v2427_v56 = vrot.slane %v2425_v1, 1 }
 0x1cc   : >> { %v5038_v14 = vpop.f32.mrf.mxu1  ;;  %v5041_v58 = vadd.f32 %v1753_v32, %v4844_v26 }
 0x1cd   : >> { %v1755_v24 = vpop.f32.mrf.mxu0 }
 0x1ce   : >> { %5590 = vst [vmem:[#allocation78_spill] sm:$0xff] %v5041_v58  ;;  %v1956_v42 = vpop.f32.mrf.mxu1  ;;  %v2446_v24 = vor.u32 %v2444_v63, %v2434_v7  ;;  %v408_v63 = vld [vmem:[%s4275_s6 + $0x108] sm:$0xff] }
 0x1cf   : >> { %v1758_v33 = vpop.f32.mrf.mxu0  ;;  %2182 = vmatmul.mubr.bf16.gmra.mxu0 %v3736_v41  ;;  %v2449_v42 = vrot.slane %v2447_v5, 1 }
 0x1d0   : >> { %v5050_v49 = vpop.f32.mrf.mxu1  ;;  %2677 = vmatmul.mubr.bf16.gmra.mxu1 %v2413_v54  ;;  %v5053_v26 = vadd.f32 %v1758_v33, %v4848_v3  ;;  %3453 = vmatprep.mubr.msk.bf16.mxu0 %vm631_vm0, %v3737_v39  ;;  %v2428_v3 = vsel %vm1297_vm1, %v2423_v11, %v2427_v56  ;;  %v2436_v39 = vshrl.u32 %v5045_v10, 16  ;;  %v3742_v54 = vld [vmem:[%s4275_s6 + $0xe0] ss:$8 sps:$4 sm:$0xff]   ;;  %v2459_v33 = vshrl.u32 %v3741_v52, 16 }
 0x1d1   : >> { %5591 = vst [vmem:[#allocation79_spill] sm:$0xff] %v5050_v49  ;;  %3472 = vmatprep.mubr.msk.bf16.mxu1 %vm631_vm0, %v2435_v61  ;;  %v1760_v6 = vpop.f32.mrf.mxu0  ;;  %v2440_v61 = vshll.u32 %v3742_v54, 16  ;;  %v2450_v1 = vsel %vm1297_vm1, %v2446_v24, %v2449_v42 }
 0x1d2   : >> { %5592 = vst [vmem:[#allocation80_spill] sm:$0xff] %v5053_v26  ;;  %v1961_v32 = vpop.f32.mrf.mxu1  ;;  %v3743_v6 = vld [vmem:[%s4275_s6 + $0xf4] ss:$8 sps:$4 sm:$0xff]  }
 0x1d3   : >> { %v1761_v58 = vpop.f32.mrf.mxu0  ;;  %v2462_v7 = vshll.u32 %v3743_v6, 16  ;;  %v2442_v11 = vrot.slane %v2440_v61, 1  ;;  %v2474_v61 = vshrl.u32 %v3743_v6, 16 }
 0x1d4   : >> { %v5057_v49 = vpop.f32.mrf.mxu1  ;;  %v5060_v41 = vadd.f32 %v1761_v58, %v4855_v48  ;;  %v2438_v58 = vor.u32 %v2436_v39, %v2427_v56 }
 0x1d5   : >> { %5593 = vst [vmem:[#allocation81_spill] sm:$0xff] %v5057_v49  ;;  %v1763_v16 = vpop.f32.mrf.mxu0  ;;  %v3744_v49 = vld [vmem:[%s4275_s6 + $0x100] sm:$0xff] }
 0x1d6   : >> { %5594 = vst [vmem:[#allocation82_spill] sm:$0xff] %v5060_v41  ;;  %v1964_v30 = vpop.f32.mrf.mxu1  ;;  %v2464_v41 = vrot.slane %v2462_v7, 1  ;;  %v3459_v26 = vcombine.high %v3744_v49, %v408_v63 }
 0x1d7   : >> { %v1766_v5 = vpop.f32.mrf.mxu0  ;;  %2190 = vmatmul.mubr.bf16.gmra.mxu0 %v3738_v57  ;;  %v2461_v30 = vor.u32 %v2459_v33, %v2449_v42 }
 0x1d8   : >> { %v5068_v32 = vpop.f32.mrf.mxu1  ;;  %2685 = vmatmul.mubr.bf16.gmra.mxu1 %v2428_v3  ;;  %v5071_v48 = vadd.f32 %v1766_v5, %v4860_v18  ;;  %3454 = vmatprep.mubr.msk.bf16.mxu0 %vm631_vm0, %v3739_v60  ;;  %v2443_v18 = vsel %vm1297_vm1, %v2438_v58, %v2442_v11  ;;  %v2451_v3 = vshrl.u32 %v3742_v54, 16  ;;  %v3745_v60 = vld [vmem:[%s4275_s6 + $0xf0] ss:$8 sps:$4 sm:$0xff]   ;;  %v2478_v42 = vshll.u32 %v3459_v26, 16 }
 0x1d9   : >> { %5595 = vst [vmem:[#allocation83_spill] sm:$0xff] %v5068_v32  ;;  %3473 = vmatprep.mubr.msk.bf16.mxu1 %vm631_vm0, %v2450_v1  ;;  %v1768_v24 = vpop.f32.mrf.mxu0  ;;  %v2455_v5 = vshll.u32 %v3745_v60, 16  ;;  %v2465_v39 = vsel %vm1297_vm1, %v2461_v30, %v2464_v41 }
 0x1da   : >> { %5596 = vst [vmem:[#allocation84_spill] sm:$0xff] %v5071_v48  ;;  %v1969_v16 = vpop.f32.mrf.mxu1  ;;  %v3458_v24 = vcombine.low %v3744_v49, %v408_v63 }
 0x1db   : >> { %v1769_v50 = vpop.f32.mrf.mxu0  ;;  %v2457_v58 = vrot.slane %v2455_v5, 1 }
 0x1dc   : >> { %v5076_v32 = vpop.f32.mrf.mxu1  ;;  %v5079_v57 = vadd.f32 %v1769_v50, %v4868_v2  ;;  %v2453_v50 = vor.u32 %v2451_v3, %v2442_v11 }
 0x1dd   : >> { %5597 = vst [vmem:[#allocation85_spill] sm:$0xff] %v5076_v32  ;;  %v1771_v1 = vpop.f32.mrf.mxu0 }
 0x1de   : >> { %5598 = vst [vmem:[#allocation86_spill] sm:$0xff] %v5079_v57  ;;  %v1972_v56 = vpop.f32.mrf.mxu1  ;;  %v2476_v1 = vor.u32 %v2474_v61, %v2464_v41 }
 0x1df   : >> { %v1774_v33 = vpop.f32.mrf.mxu0  ;;  %2198 = vmatmul.mubr.bf16.gmra.mxu0 %v5045_v10  ;;  %v2480_v56 = vrot.slane %v2478_v42, 1 }
 0x1e0   : >> { %v5084_v7 = vpop.f32.mrf.mxu1  ;;  %2693 = vmatmul.mubr.bf16.gmra.mxu1 %v2443_v18  ;;  %v5088_v2 = vadd.f32 %v1774_v33, %v4873_v53  ;;  %3455 = vmatprep.mubr.msk.bf16.mxu0 %vm631_vm0, %v3741_v52  ;;  %v2458_v53 = vsel %vm1297_vm1, %v2453_v50, %v2457_v58  ;;  %v2466_v18 = vshrl.u32 %v3745_v60, 16  ;;  %v2470_v33 = vshll.u32 %v3458_v24, 16 }
 0x1e1   : >> { %3474 = vmatprep.mubr.msk.bf16.mxu1 %vm631_vm0, %v2465_v39  ;;  %v1776_v16 = vpop.f32.mrf.mxu0  ;;  %v2481_v11 = vsel %vm1297_vm1, %v2476_v1, %v2480_v56 }
 0x1e2   : >> { %v1977_v30 = vpop.f32.mrf.mxu1  ;;  %v2472_v63 = vrot.slane %v2470_v33, 1 }
 0x1e3   : >> { %v1777_v57 = vpop.f32.mrf.mxu0 }
 0x1e4   : >> { %v5092_v48 = vpop.f32.mrf.mxu1  ;;  %v5095_v10 = vadd.f32 %v1777_v57, %v4882_v4  ;;  %v2468_v4 = vor.u32 %v2466_v18, %v2457_v58  ;;  %v2485_v57 = vshrl.u32 %v3459_v26, 16  ;;  %v2482_v58 = vshrl.u32 %v3458_v24, 16 }
 0x1e5   : >> { %v1779_v52 = vpop.f32.mrf.mxu0 }
 0x1e6   : >> { %v1980_v32 = vpop.f32.mrf.mxu1  ;;  %v2487_v50 = vor.u32 %v2485_v57, %v2480_v56  ;;  %v2484_v18 = vor.u32 %v2482_v58, %v2472_v63 }
 0x1e7   : >> { %v1782_v3 = vpop.f32.mrf.mxu0  ;;  %2206 = vmatmul.mubr.bf16.gmra.mxu0 %v3742_v54  ;;  %v2473_v54 = vsel %vm1297_vm1, %v2468_v4, %v2472_v63 }
 0x1e8   : >> { %v5099_v49 = vpop.f32.mrf.mxu1  ;;  %2701 = vmatmul.mubr.bf16.gmra.mxu1 %v2458_v53  ;;  %v5102_v41 = vadd.f32 %v1782_v3, %v4886_v44  ;;  %3456 = vmatprep.mubr.msk.bf16.mxu0 %vm631_vm0, %v3743_v6 }
 0x1e9   : >> { %3475 = vmatprep.mubr.msk.bf16.mxu1 %vm631_vm0, %v2481_v11  ;;  %v1784_v5 = vpop.f32.mrf.mxu0 }
 0x1ea   : >> { %v1985_v39 = vpop.f32.mrf.mxu1 }
 0x1eb   : >> { %v1785_v32 = vpop.f32.mrf.mxu0 }
 0x1ec   : >> { %v5106_v61 = vpop.f32.mrf.mxu1  ;;  %v5109_v42 = vadd.f32 %v1785_v32, %v4891_v28 }
 0x1ed   : >> { %v1787_v44 = vpop.f32.mrf.mxu0 }
 0x1ee   : >> { %v1988_v16 = vpop.f32.mrf.mxu1 }
 0x1ef   : >> { %v1790_v30 = vpop.f32.mrf.mxu0  ;;  %2214 = vmatmul.mubr.bf16.gmra.mxu0 %v3745_v60 }
 0x1f0   : >> { %v5112_v6 = vpop.f32.mrf.mxu1  ;;  %2709 = vmatmul.mubr.bf16.gmra.mxu1 %v2473_v54  ;;  %v5115_v26 = vadd.f32 %v1790_v30, %v4895_v25  ;;  %3457 = vmatprep.mubr.msk.bf16.mxu0 %vm631_vm0, %v4692_v27 }
 0x1f1   : >> { %3476 = vmatprep.mubr.msk.bf16.mxu1 %vm631_vm0, %v2487_v50  ;;  %v1792_v28 = vpop.f32.mrf.mxu0 }
 0x1f2   : >> { %v1993_v1 = vpop.f32.mrf.mxu1 }
 0x1f3   : >> { %v1793_v53 = vpop.f32.mrf.mxu0 }
 0x1f4   : >> { %v5120_v56 = vpop.f32.mrf.mxu1  ;;  %v5123_v33 = vadd.f32 %v1793_v53, %v4900_v34 }
 0x1f5   : >> { %v1795_v60 = vpop.f32.mrf.mxu0 }
 0x1f6   : >> { %v1996_v52 = vpop.f32.mrf.mxu1 }
 0x1f7   : >> { %v1798_v24 = vpop.f32.mrf.mxu0  ;;  %2222 = vmatmul.mubr.bf16.gmra.mxu0 %v4704_v51 }
 0x1f8   : >> { %v5125_v11 = vpop.f32.mrf.mxu1  ;;  %2717 = vmatmul.mubr.bf16.gmra.mxu1 %v2484_v18  ;;  %v5129_v27 = vadd.f32 %v1798_v24, %v4905_v8 }
 0x1f9   : >> { %v1800_v25 = vpop.f32.mrf.mxu0 }
 0x1fa   : >> { %v2001_v3 = vpop.f32.mrf.mxu1 }
 0x1fb   : >> { %v1801_v4 = vpop.f32.mrf.mxu0 }
 0x1fc   : >> { %v5131_v57 = vpop.f32.mrf.mxu1  ;;  %v5134_v63 = vadd.f32 %v1801_v4, %v4909_v13 }
 0x1fd   : >> { %v1803_v34 = vpop.f32.mrf.mxu0 }
 0x1fe   : >> { %v2004_v5 = vpop.f32.mrf.mxu1 }
 0x1ff   : >> { %v1806_v39 = vpop.f32.mrf.mxu0 }
 0x200   : >> { %v5136_v32 = vpop.f32.mrf.mxu1  ;;  %v5139_v54 = vadd.f32 %v1806_v39, %v4915_v46 }
 0x201   : >> { %v1808_v51 = vpop.f32.mrf.mxu0 }
 0x202   : >> { %v2009_v50 = vpop.f32.mrf.mxu1 }
 0x203   : >> { %v1809_v8 = vpop.f32.mrf.mxu0 }
 0x204   : >> { %v5141_v44 = vpop.f32.mrf.mxu1  ;;  %v5144_v16 = vadd.f32 %v1809_v8, %v4919_v47 }
 0x205   : >> { %v1811_v30 = vpop.f32.mrf.mxu0 }
 0x206   : >> { %v2012_v58 = vpop.f32.mrf.mxu1 }
 0x207   : >> { %v1814_v13 = vpop.f32.mrf.mxu0 }
 0x208   : >> { %v5146_v28 = vpop.f32.mrf.mxu1  ;;  %v5149_v1 = vadd.f32 %v1814_v13, %v4925_v43 }
 0x209   : >> { %v1816_v53 = vpop.f32.mrf.mxu0 }
 0x20a   : >> { %v2017_v18 = vpop.f32.mrf.mxu1 }
 0x20b   : >> { %v1817_v46 = vpop.f32.mrf.mxu0 }
 0x20c   : >> { %v5151_v60 = vpop.f32.mrf.mxu1  ;;  %v5154_v52 = vadd.f32 %v1817_v46, %v4929_v37 }
 0x20d   : >> { %v1819_v24 = vpop.f32.mrf.mxu0 }
 0x20e   : >> { %v2020_v25 = vpop.f32.mrf.mxu1 }
 0x20f   : >> { %v1822_v47 = vpop.f32.mrf.mxu0 }
 0x210   : >> { %v5156_v3 = vpop.f32.mrf.mxu1  ;;  %v5159_v4 = vadd.f32 %v1822_v47, %v4935_v35 }
 0x211   : >> { %v1824_v34 = vpop.f32.mrf.mxu0 }
 0x212   : >> { %v2025_v5 = vpop.f32.mrf.mxu1 }
 0x213   : >> { %v1825_v43 = vpop.f32.mrf.mxu0 }
 0x214   : >> { %v5161_v39 = vpop.f32.mrf.mxu1  ;;  %v5164_v51 = vadd.f32 %v1825_v43, %v4939_v59 }
 0x215   : >> { %5599 = vst [vmem:[#allocation87_spill] sm:$0xff] %v5161_v39  ;;  %v1827_v50 = vpop.f32.mrf.mxu0 }
 0x216   : >> { %5600 = vst [vmem:[#allocation88_spill] sm:$0xff] %v5164_v51  ;;  %v2028_v8 = vpop.f32.mrf.mxu1 }
 0x217   : >> { %v1830_v37 = vpop.f32.mrf.mxu0 }
 0x218   : >> { %v5166_v30 = vpop.f32.mrf.mxu1  ;;  %v5169_v58 = vadd.f32 %v1830_v37, %v4945_v20 }
 0x219   : >> { %5601 = vst [vmem:[#allocation89_spill] sm:$0xff] %v5166_v30  ;;  %v1832_v13 = vpop.f32.mrf.mxu0 }
 0x21a   : >> { %5602 = vst [vmem:[#allocation90_spill] sm:$0xff] %v5169_v58  ;;  %v2033_v53 = vpop.f32.mrf.mxu1 }
 0x21b   : >> { %v1833_v35 = vpop.f32.mrf.mxu0 }
 0x21c   : >> { %v5171_v18 = vpop.f32.mrf.mxu1  ;;  %v5174_v46 = vadd.f32 %v1833_v35, %v4949_v22 }
 0x21d   : >> { %5603 = vst [vmem:[#allocation91_spill] sm:$0xff] %v5171_v18  ;;  %v1835_v24 = vpop.f32.mrf.mxu0 }
 0x21e   : >> { %5604 = vst [vmem:[#allocation92_spill] sm:$0xff] %v5174_v46  ;;  %v2036_v25 = vpop.f32.mrf.mxu1 }
 0x21f   : >> { %v1838_v59 = vpop.f32.mrf.mxu0 }
 0x220   : >> { %v5176_v47 = vpop.f32.mrf.mxu1  ;;  %v5179_v34 = vadd.f32 %v1838_v59, %v4955_v62 }
 0x221   : >> { %5605 = vst [vmem:[#allocation93_spill] sm:$0xff] %v5176_v47  ;;  %v1840_v5 = vpop.f32.mrf.mxu0 }
 0x222   : >> { %5606 = vst [vmem:[#allocation94_spill] sm:$0xff] %v5179_v34  ;;  %v2041_v43 = vpop.f32.mrf.mxu1 }
 0x223   : >> { %v1841_v20 = vpop.f32.mrf.mxu0 }
 0x224   : >> { %v5181_v50 = vpop.f32.mrf.mxu1  ;;  %v5184_v8 = vadd.f32 %v1841_v20, %v4959_v19 }
 0x225   : >> { %5607 = vst [vmem:[#allocation95_spill] sm:$0xff] %v5181_v50  ;;  %v1843_v37 = vpop.f32.mrf.mxu0 }
 0x226   : >> { %5608 = vst [vmem:[#allocation96_spill] sm:$0xff] %v5184_v8  ;;  %v2044_v13 = vpop.f32.mrf.mxu1 }
 0x227   : >> { %v1846_v22 = vpop.f32.mrf.mxu0 }
 0x228   : >> { %v5186_v53 = vpop.f32.mrf.mxu1  ;;  %v5189_v35 = vadd.f32 %v1846_v22, %v4965_v0 }
 0x229   : >> { %5609 = vst [vmem:[#allocation97_spill] sm:$0xff] %v5186_v53  ;;  %v1848_v24 = vpop.f32.mrf.mxu0 }
 0x22a   : >> { %5610 = vst [vmem:[#allocation98_spill] sm:$0xff] %v5189_v35  ;;  %v2049_v25 = vpop.f32.mrf.mxu1 }
 0x22b   : >> { %v1849_v62 = vpop.f32.mrf.mxu0 }
 0x22c   : >> { %v5191_v59 = vpop.f32.mrf.mxu1  ;;  %v5194_v5 = vadd.f32 %v1849_v62, %v4969_v9 }
 0x22d   : >> { %5611 = vst [vmem:[#allocation99_spill] sm:$0xff] %v5191_v59  ;;  %v1851_v43 = vpop.f32.mrf.mxu0 }
 0x22e   : >> { %5612 = vst [vmem:[#allocation100_spill] sm:$0xff] %v5194_v5  ;;  %v2052_v46 = vpop.f32.mrf.mxu1 }
 0x22f   : >> { %v1854_v19 = vpop.f32.mrf.mxu0 }
 0x230   : >> { %v5196_v20 = vpop.f32.mrf.mxu1  ;;  %v5199_v37 = vadd.f32 %v1854_v19, %v4975_v23 }
 0x231   : >> { %5613 = vst [vmem:[#allocation101_spill] sm:$0xff] %v5196_v20  ;;  %v1856_v13 = vpop.f32.mrf.mxu0 }
 0x232   : >> { %5614 = vst [vmem:[#allocation102_spill] sm:$0xff] %v5199_v37  ;;  %v2057_v58 = vpop.f32.mrf.mxu1 }
 0x233   : >> { %v1857_v0 = vpop.f32.mrf.mxu0 }
 0x234   : >> { %v2058_v22 = vpop.f32.mrf.mxu1 }
 0x235   : >> { %v1858_v24 = vpop.f32.mrf.mxu0 }
 0x236   : >> { %v2059_v25 = vpop.f32.mrf.mxu1 }
 0x237   : >> { %v2095_v18 = vpop.f32.mrf.mxu0 }
 0x238   : >> { %v2590_v51 = vpop.f32.mrf.mxu1 }
 0x239   : >> { %v2097_v59 = vpop.f32.mrf.mxu0 }
 0x23a   : >> { %v2592_v35 = vpop.f32.mrf.mxu1 }
 0x23b   : >> { %v2098_v9 = vpop.f32.mrf.mxu0  ;;  %v2096_v35 = vadd.f32 %v2095_v18, %v4983_v29 }
 0x23c   : >> { %v2593_v62 = vpop.f32.mrf.mxu1 }
 0x23d   : >> { %v2100_v43 = vpop.f32.mrf.mxu0 }
 0x23e   : >> { %v2595_v46 = vpop.f32.mrf.mxu1 }
 0x23f   : >> { %v2103_v5 = vpop.f32.mrf.mxu0 }
 0x240   : >> { %v2598_v30 = vpop.f32.mrf.mxu1 }
 0x241   : >> { %v2105_v20 = vpop.f32.mrf.mxu0 }
 0x242   : >> { %v2600_v53 = vpop.f32.mrf.mxu1 }
 0x243   : >> { %v2106_v23 = vpop.f32.mrf.mxu0 }
 0x244   : >> { %v2601_v19 = vpop.f32.mrf.mxu1 }
 0x245   : >> { %v2108_v13 = vpop.f32.mrf.mxu0 }
 0x246   : >> { %v2603_v58 = vpop.f32.mrf.mxu1  ;;  %v2724_v13 = vadd.f32 %v2590_v51, %v2096_v35 }
 0x247   : >> { %v2111_v0 = vpop.f32.mrf.mxu0  ;;  %v2099_v58 = vadd.f32 %v2098_v9, %v4990_v40 }
 0x248   : >> { %v2606_v22 = vpop.f32.mrf.mxu1  ;;  %v2112_v24 = vadd.f32 %v2111_v0, %v5015_v15 }
 0x249   : >> { %v2113_v25 = vpop.f32.mrf.mxu0 }
 0x24a   : >> { %v2608_v37 = vpop.f32.mrf.mxu1  ;;  %v2728_v59 = vadd.f32 %v2606_v22, %v2112_v24 }
 0x24b   : >> { %v2114_v8 = vpop.f32.mrf.mxu0 }
 0x24c   : >> { %v2609_v43 = vpop.f32.mrf.mxu1  ;;  %v2115_v46 = vadd.f32 %v2114_v8, %v5022_v38  ;;  %v2761_v53 = vmax.f32 %v5018_v17, %v2728_v59  ;;  %v2725_v8 = vadd.f32 %v2593_v62, %v2099_v58  ;;  %v2104_v17 = vadd.f32 %v2103_v5, %v4999_v55 }
 0x24d   : >> { %v2116_v39 = vpop.f32.mrf.mxu0 }
 0x24e   : >> { %v2611_v20 = vpop.f32.mrf.mxu1  ;;  %v2729_v34 = vadd.f32 %v2609_v43, %v2115_v46  ;;  %v2796_v0 = vrot.slane %v2761_v53, 1  ;;  %v2757_v39 = vmax.f32 %v4986_v31, %v2724_v13  ;;  %v2726_v35 = vadd.f32 %v2598_v30, %v2104_v17  ;;  %v5615_v31 = vld [vmem:[#allocation76_spill] sm:$0xff]  ;;  %v5616_v46 = vld [vmem:[#allocation78_spill] sm:$0xff]  ;;  %v5619_v30 = vld [vmem:[#allocation75_spill] sm:$0xff] }
 0x24f   : >> { %v2119_v50 = vpop.f32.mrf.mxu0  ;;  %v2107_v62 = vadd.f32 %v2106_v23, %v5615_v31 }
 0x250   : >> { %v2614_v47 = vpop.f32.mrf.mxu1  ;;  %v2762_v15 = vmax.f32 %v5025_v21, %v2729_v34  ;;  %v2120_v37 = vadd.f32 %v2119_v50, %v5031_v12 }
 0x251   : >> { %v2121_v29 = vpop.f32.mrf.mxu0 }
 0x252   : >> { %v2616_v18 = vpop.f32.mrf.mxu1  ;;  %v2797_v22 = vrot.slane %v2762_v15, 1  ;;  %v2730_v38 = vadd.f32 %v2614_v47, %v2120_v37  ;;  %v2758_v47 = vmax.f32 %v4993_v36, %v2725_v8  ;;  %v5620_v8 = vld [vmem:[#allocation80_spill] sm:$0xff] }
 0x253   : >> { %v2122_v51 = vpop.f32.mrf.mxu0  ;;  %v2759_v18 = vmax.f32 %v5619_v30, %v2726_v35 }
 0x254   : >> { %v2617_v24 = vpop.f32.mrf.mxu1  ;;  %v2798_v40 = vsel %vm2795_vm2, %v2796_v0, %v2797_v22  ;;  %v2763_v9 = vmax.f32 %v5034_v45, %v2730_v38  ;;  %v2123_v21 = vadd.f32 %v2122_v51, %v5038_v14  ;;  %v5617_v45 = vld [vmem:[#allocation79_spill] sm:$0xff]  ;;  %v5618_v14 = vld [vmem:[#allocation74_spill] sm:$0xff]  ;;  %v2727_v0 = vadd.f32 %v2601_v19, %v2107_v62 }
 0x255   : >> { %v2809_v12 = vmax.f32 %v2757_v39, %v2798_v40  ;;  %v2124_v34 = vpop.f32.mrf.mxu0 }
 0x256   : >> { %v2619_v50 = vpop.f32.mrf.mxu1  ;;  %v2799_v25 = vrot.slane %v2763_v9, 1  ;;  %v2731_v59 = vadd.f32 %v2617_v24, %v2123_v21 }
 0x257   : >> { %v2127_v55 = vpop.f32.mrf.mxu0  ;;  %v2813_v13 = vadd.f32 %v5618_v14, %v2809_v12  ;;  %v5621_v12 = vld [vmem:[#allocation77_spill] sm:$0xff] }
 0x258   : >> { %v2622_v5 = vpop.f32.mrf.mxu1  ;;  %v2800_v43 = vsel %vm2795_vm2, %v2797_v22, %v2799_v25  ;;  %v2764_v20 = vmax.f32 %v5616_v46, %v2731_v59  ;;  %v2128_v53 = vadd.f32 %v2127_v55, %v5617_v45  ;;  %v2760_v34 = vmax.f32 %v5621_v12, %v2727_v0 }
 0x259   : >> { %v2810_v58 = vmax.f32 %v2758_v47, %v2800_v43  ;;  %v2129_v15 = vpop.f32.mrf.mxu0  ;;  %v2817_v51 = vmax.f32 %v2813_v13, 0.0 }
 0x25a   : >> { %v2624_v37 = vpop.f32.mrf.mxu1  ;;  %v2801_v29 = vrot.slane %v2764_v20, 1  ;;  %v2732_v36 = vadd.f32 %v2622_v5, %v2128_v53 }
 0x25b   : >> { %v2814_v23 = vadd.f32 %v5618_v14, %v2810_v58  ;;  %v2130_v38 = vpop.f32.mrf.mxu0 }
 0x25c   : >> { %v2625_v22 = vpop.f32.mrf.mxu1  ;;  %v2802_v39 = vsel %vm2795_vm2, %v2799_v25, %v2801_v29  ;;  %v5224_v17 = vmax.f32 %v5620_v8, %v2732_v36 }
 0x25d   : >> { %v2818_v24 = vmax.f32 %v2814_v23, 0.0  ;;  %v2811_v40 = vmax.f32 %v2759_v18, %v2802_v39  ;;  %v2132_v9 = vpop.f32.mrf.mxu0 }
 0x25e   : >> { %v2627_v21 = vpop.f32.mrf.mxu1  ;;  %v2803_v19 = vrot.slane %v5224_v17, 1  ;;  %v5622_v9 = vld [vmem:[#allocation81_spill] sm:$0xff] }
 0x25f   : >> { %v3551_v50 = vpack.c.bf16 %v2818_v24, %v2817_v51  ;;  %v2135_v59 = vpop.f32.mrf.mxu0  ;;  %v2815_v35 = vadd.f32 %v5618_v14, %v2811_v40  ;;  %v2131_v21 = vadd.f32 %v2130_v38, %v5622_v9 }
 0x260   : >> { %v2630_v47 = vpop.f32.mrf.mxu1  ;;  %v2804_v25 = vsel %vm2795_vm2, %v2801_v29, %v2803_v19 }
 0x261   : >> { %3552 = vst [vmem:[%s5227_s14] sm:$0xff] %v3551_v50   ;;  %v2812_v31 = vmax.f32 %v2760_v34, %v2804_v25  ;;  %v2137_v62 = vpop.f32.mrf.mxu0  ;;  %v2819_v20 = vmax.f32 %v2815_v35, 0.0 }
 0x262   : >> { %v2632_v55 = vpop.f32.mrf.mxu1 }
 0x263   : >> { %v2816_v5 = vadd.f32 %v5618_v14, %v2812_v31  ;;  %v2138_v43 = vpop.f32.mrf.mxu0  ;;  %v2733_v55 = vadd.f32 %v2625_v22, %v2131_v21  ;;  %v5625_v22 = vld [vmem:[#allocation85_spill] sm:$0xff]  ;;  %v5626_v21 = vld [vmem:[#allocation84_spill] sm:$0xff] }
 0x264   : >> { %v2633_v46 = vpop.f32.mrf.mxu1 }
 0x265   : >> { %v2820_v45 = vmax.f32 %v2816_v5, 0.0  ;;  %v2140_v53 = vpop.f32.mrf.mxu0 }
 0x266   : >> { %v2635_v13 = vpop.f32.mrf.mxu1 }
 0x267   : >> { %v3556_v58 = vpack.c.bf16 %v2820_v45, %v2819_v20  ;;  %v2143_v15 = vpop.f32.mrf.mxu0 }
 0x268   : >> { %v2638_v37 = vpop.f32.mrf.mxu1  ;;  %v2144_v29 = vadd.f32 %v2143_v15, %v5084_v7 }
 0x269   : >> { %3558 = vst [vmem:[%s5227_s14 + $0x8] sm:$0xff] %v3556_v58   ;;  %v2145_v36 = vpop.f32.mrf.mxu0 }
 0x26a   : >> { %v2640_v30 = vpop.f32.mrf.mxu1  ;;  %v2736_v18 = vadd.f32 %v2638_v37, %v2144_v29  ;;  %v5624_v37 = vld [vmem:[#allocation82_spill] sm:$0xff] }
 0x26b   : >> { %v2146_v0 = vpop.f32.mrf.mxu0  ;;  %v2766_v29 = vmax.f32 %v5624_v37, %v2733_v55  ;;  %v2139_v30 = vadd.f32 %v2138_v43, %v5625_v22 }
 0x26c   : >> { %v2641_v23 = vpop.f32.mrf.mxu1  ;;  %v2147_v39 = vadd.f32 %v2146_v0, %v5092_v48  ;;  %v2769_v24 = vmax.f32 %v5088_v2, %v2736_v18  ;;  %v5623_v48 = vld [vmem:[#allocation83_spill] sm:$0xff] }
 0x26d   : >> { %v2148_v8 = vpop.f32.mrf.mxu0  ;;  %v2136_v5 = vadd.f32 %v2135_v59, %v5623_v48 }
 0x26e   : >> { %v2643_v51 = vpop.f32.mrf.mxu1  ;;  %v2737_v40 = vadd.f32 %v2641_v23, %v2147_v39  ;;  %v2850_v35 = vrot.slane %v2769_v24, 1 }
 0x26f   : >> { %v2151_v19 = vpop.f32.mrf.mxu0  ;;  %v2734_v36 = vadd.f32 %v2630_v47, %v2136_v5 }
 0x270   : >> { %v2646_v12 = vpop.f32.mrf.mxu1  ;;  %v2770_v34 = vmax.f32 %v5095_v10, %v2737_v40  ;;  %v2152_v7 = vadd.f32 %v2151_v19, %v5099_v49  ;;  %v2735_v19 = vadd.f32 %v2633_v46, %v2139_v30 }
 0x271   : >> { %v2153_v50 = vpop.f32.mrf.mxu0  ;;  %v2767_v47 = vmax.f32 %v5626_v21, %v2734_v36 }
 0x272   : >> { %v2648_v25 = vpop.f32.mrf.mxu1  ;;  %v2851_v31 = vrot.slane %v2770_v34, 1  ;;  %v2738_v62 = vadd.f32 %v2646_v12, %v2152_v7 }
 0x273   : >> { %v2154_v20 = vpop.f32.mrf.mxu0 }
 0x274   : >> { %v2649_v45 = vpop.f32.mrf.mxu1  ;;  %v2852_v2 = vsel %vm2795_vm2, %v2850_v35, %v2851_v31  ;;  %v2771_v38 = vmax.f32 %v5102_v41, %v2738_v62  ;;  %v2155_v53 = vadd.f32 %v2154_v20, %v5106_v61  ;;  %v5627_v62 = vld [vmem:[#allocation86_spill] sm:$0xff] }
 0x275   : >> { %v2864_v10 = vmax.f32 %v5224_v17, %v2852_v2  ;;  %v2156_v13 = vpop.f32.mrf.mxu0  ;;  %v2768_v55 = vmax.f32 %v5627_v62, %v2735_v19 }
 0x276   : >> { %v2651_v49 = vpop.f32.mrf.mxu1  ;;  %v2853_v58 = vrot.slane %v2771_v38, 1  ;;  %v2739_v15 = vadd.f32 %v2649_v45, %v2155_v53 }
 0x277   : >> { %v2869_v59 = vadd.f32 %v5618_v14, %v2864_v10  ;;  %v2159_v18 = vpop.f32.mrf.mxu0 }
 0x278   : >> { %v2654_v0 = vpop.f32.mrf.mxu1  ;;  %v2854_v23 = vsel %vm2795_vm2, %v2851_v31, %v2853_v58  ;;  %v2772_v41 = vmax.f32 %v5109_v42, %v2739_v15  ;;  %v2160_v61 = vadd.f32 %v2159_v18, %v5112_v6 }
 0x279   : >> { %v2874_v17 = vmax.f32 %v2869_v59, 0.0  ;;  %v2865_v39 = vmax.f32 %v2766_v29, %v2854_v23  ;;  %v2161_v8 = vpop.f32.mrf.mxu0 }
 0x27a   : >> { %v2656_v51 = vpop.f32.mrf.mxu1  ;;  %v2855_v40 = vrot.slane %v2772_v41, 1  ;;  %v2740_v9 = vadd.f32 %v2654_v0, %v2160_v61 }
 0x27b   : >> { %v2870_v43 = vadd.f32 %v5618_v14, %v2865_v39  ;;  %v5255_v12 = vpop.f32.mrf.mxu0  ;;  %v3530_v7 = vpack.c.bf16 %v2874_v17, %v2874_v17 }
 0x27c   : >> { %v5257_v34 = vpop.f32.mrf.mxu1  ;;  %v2856_v42 = vsel %vm2795_vm2, %v2853_v58, %v2855_v40  ;;  %v5261_v6 = vmax.f32 %v5115_v26, %v2740_v9 }
 0x27d   : >> { %v2875_v50 = vmax.f32 %v2870_v43, 0.0  ;;  %v2866_v25 = vmax.f32 %v2767_v47, %v2856_v42  ;;  %v2164_v35 = vpop.f32.mrf.mxu0  ;;  %v3489_v53 = vrot.slane %v3530_v7, 9 }
 0x27e   : >> { %v2659_v31 = vpop.f32.mrf.mxu1  ;;  %v2857_v46 = vrot.slane %v5261_v6, 1 }
 0x27f   : >> { %v3531_v48 = vpack.c.bf16 %v2875_v50, %v2875_v50  ;;  %v2871_v5 = vadd.f32 %v5618_v14, %v2866_v25  ;;  %v2167_v20 = vpop.f32.mrf.mxu0 }
 0x280   : >> { %v5266_v45 = vpop.f32.mrf.mxu1  ;;  %v2858_v2 = vsel %vm2795_vm2, %v2855_v40, %v2857_v46  ;;  %v2868_v38 = vmax.f32 %v2769_v24, %v2857_v46 }
 0x281   : >> { %v2901_v10 = vrot.slane %v3531_v48, 5  ;;  %v2876_v13 = vmax.f32 %v2871_v5, 0.0  ;;  %v2867_v49 = vmax.f32 %v2768_v55, %v2858_v2  ;;  %v2169_v58 = vpop.f32.mrf.mxu0  ;;  %v2163_v2 = vadd.f32 %v5255_v12, %v5120_v56 }
 0x282   : >> { %v2664_v15 = vpop.f32.mrf.mxu1  ;;  %v2873_v37 = vadd.f32 %v5618_v14, %v2868_v38 }
 0x283   : >> { %v2902_v29 = vsel %vm5269_vm5, %v3489_v53, %v2901_v10  ;;  %v3532_v36 = vpack.c.bf16 %v2876_v13, %v2876_v13  ;;  %v2872_v22 = vadd.f32 %v5618_v14, %v2867_v49  ;;  %v2170_v30 = vpop.f32.mrf.mxu0  ;;  %v2903_v18 = vrot.slane %v2901_v10, 4 }
 0x284   : >> { %v5278_v59 = vpop.f32.mrf.mxu1  ;;  %3492 = vst [vmem:[%s5227_s14 + $0x10] sm:$0xf] %v2902_v29  ;;  %v2878_v24 = vmax.f32 %v2873_v37, 0.0  ;;  %v2741_v37 = vadd.f32 %v5257_v34, %v2163_v2  ;;  %v2168_v29 = vadd.f32 %v2167_v20, %v5125_v11  ;;  %v2171_v11 = vadd.f32 %v2170_v30, %v5131_v57 }
 0x285   : >> { %v2904_v0 = vrot.slane %v3532_v36, 5  ;;  %v2877_v23 = vmax.f32 %v2872_v22, 0.0  ;;  %v2172_v41 = vpop.f32.mrf.mxu0 }
 0x286   : >> { %v2667_v61 = vpop.f32.mrf.mxu1  ;;  %v3534_v8 = vpack.c.bf16 %v2878_v24, %v2878_v24  ;;  %v2742_v34 = vadd.f32 %v5266_v45, %v2168_v29  ;;  %v2743_v57 = vadd.f32 %v5278_v59, %v2171_v11 }
 0x287   : >> { %v2905_v17 = vsel %vm5269_vm5, %v2903_v18, %v2904_v0  ;;  %v3533_v39 = vpack.c.bf16 %v2877_v23, %v2877_v23  ;;  %v2175_v51 = vpop.f32.mrf.mxu0  ;;  %v2906_v21 = vrot.slane %v2904_v0, 4  ;;  %v2774_v23 = vmax.f32 %v5123_v33, %v2741_v37 }
 0x288   : >> { %v2670_v40 = vpop.f32.mrf.mxu1  ;;  %3493 = vst [vmem:[%s5227_s14 + $0x14] sm:$0xf] %v2905_v17  ;;  %v2176_v9 = vadd.f32 %v2175_v51, %v5136_v32  ;;  %v2910_v25 = vrot.slane %v3534_v8, 5  ;;  %v2775_v45 = vmax.f32 %v5129_v27, %v2742_v34 }
 0x289   : >> { %v2907_v47 = vrot.slane %v3533_v39, 5  ;;  %v2177_v19 = vpop.f32.mrf.mxu0 }
 0x28a   : >> { %v2672_v43 = vpop.f32.mrf.mxu1  ;;  %v2744_v42 = vadd.f32 %v2670_v40, %v2176_v9 }
 0x28b   : >> { %v2908_v7 = vsel %vm5269_vm5, %v2906_v21, %v2907_v47  ;;  %v2909_v50 = vrot.slane %v2907_v47, 4  ;;  %v2178_v35 = vpop.f32.mrf.mxu0 }
 0x28c   : >> { %v2673_v31 = vpop.f32.mrf.mxu1  ;;  %3494 = vst [vmem:[%s5227_s14 + $0x18] sm:$0xf] %v2908_v7  ;;  %v2179_v46 = vadd.f32 %v2178_v35, %v5141_v44  ;;  %v2777_v48 = vmax.f32 %v5139_v54, %v2744_v42  ;;  %v2776_v7 = vmax.f32 %v5134_v63, %v2743_v57  ;;  %v5635_v57 = vld [vmem:[#allocation87_spill] sm:$0xff] }
 0x28d   : >> { %v2911_v62 = vsel %vm5269_vm5, %v2909_v50, %v2910_v25  ;;  %v2180_v32 = vpop.f32.mrf.mxu0 }
 0x28e   : >> { %v2675_v55 = vpop.f32.mrf.mxu1  ;;  %3495 = vst [vmem:[%s5227_s14 + $0x1c] sm:$0xf] %v2911_v62  ;;  %v2745_v5 = vadd.f32 %v2673_v31, %v2179_v46  ;;  %v2928_v58 = vrot.slane %v2777_v48, 1 }
 0x28f   : >> { %v2183_v38 = vpop.f32.mrf.mxu0 }
 0x290   : >> { %v2678_v53 = vpop.f32.mrf.mxu1  ;;  %v2778_v10 = vmax.f32 %v5144_v16, %v2745_v5  ;;  %v2184_v13 = vadd.f32 %v2183_v38, %v5146_v28 }
 0x291   : >> { %v2185_v49 = vpop.f32.mrf.mxu0 }
 0x292   : >> { %v2680_v44 = vpop.f32.mrf.mxu1  ;;  %v2929_v26 = vrot.slane %v2778_v10, 1  ;;  %v2746_v15 = vadd.f32 %v2678_v53, %v2184_v13 }
 0x293   : >> { %v2186_v54 = vpop.f32.mrf.mxu0 }
 0x294   : >> { %v2681_v36 = vpop.f32.mrf.mxu1  ;;  %v2930_v22 = vsel %vm2795_vm2, %v2928_v58, %v2929_v26  ;;  %v2779_v56 = vmax.f32 %v5149_v1, %v2746_v15  ;;  %v2187_v12 = vadd.f32 %v2186_v54, %v5151_v60 }
 0x295   : >> { %v2942_v16 = vmax.f32 %v5261_v6, %v2930_v22  ;;  %v2188_v28 = vpop.f32.mrf.mxu0 }
 0x296   : >> { %v2683_v24 = vpop.f32.mrf.mxu1  ;;  %v2931_v18 = vrot.slane %v2779_v56, 1  ;;  %v2747_v0 = vadd.f32 %v2681_v36, %v2187_v12  ;;  %v5632_v28 = vld [vmem:[#allocation93_spill] sm:$0xff] }
 0x297   : >> { %v2947_v20 = vadd.f32 %v5618_v14, %v2942_v16  ;;  %v2191_v41 = vpop.f32.mrf.mxu0 }
 0x298   : >> { %v2686_v61 = vpop.f32.mrf.mxu1  ;;  %v2932_v1 = vsel %vm2795_vm2, %v2929_v26, %v2931_v18  ;;  %v2780_v60 = vmax.f32 %v5154_v52, %v2747_v0  ;;  %v2192_v6 = vadd.f32 %v2191_v41, %v5156_v3 }
 0x299   : >> { %v2952_v17 = vmax.f32 %v2947_v20, 0.0  ;;  %v2943_v39 = vmax.f32 %v2774_v23, %v2932_v1  ;;  %v2193_v8 = vpop.f32.mrf.mxu0 }
 0x29a   : >> { %v2688_v51 = vpop.f32.mrf.mxu1  ;;  %v2933_v40 = vrot.slane %v2780_v60, 1  ;;  %v2748_v33 = vadd.f32 %v2686_v61, %v2192_v6  ;;  %v5633_v6 = vld [vmem:[#allocation95_spill] sm:$0xff] }
 0x29b   : >> { %v2948_v30 = vadd.f32 %v5618_v14, %v2943_v39  ;;  %v5313_v9 = vpop.f32.mrf.mxu0  ;;  %v3536_v47 = vpack.c.bf16 %v2952_v17, %v2952_v17 }
 0x29c   : >> { %v5315_v21 = vpop.f32.mrf.mxu1  ;;  %v2934_v52 = vsel %vm2795_vm2, %v2931_v18, %v2933_v40  ;;  %v5319_v3 = vmax.f32 %v5159_v4, %v2748_v33 }
 0x29d   : >> { %v2953_v19 = vmax.f32 %v2948_v30, 0.0  ;;  %v2944_v43 = vmax.f32 %v2775_v45, %v2934_v52  ;;  %v2196_v42 = vpop.f32.mrf.mxu0  ;;  %v3501_v32 = vrot.slane %v3536_v47, 10  ;;  %v2195_v30 = vadd.f32 %v5313_v9, %v5635_v57 }
 0x29e   : >> { %v2691_v27 = vpop.f32.mrf.mxu1  ;;  %v2935_v59 = vrot.slane %v5319_v3, 1  ;;  %v5637_v42 = vld [vmem:[#allocation97_spill] sm:$0xff] }
 0x29f   : >> { %v3537_v50 = vpack.c.bf16 %v2953_v19, %v2953_v19  ;;  %v2949_v25 = vadd.f32 %v5618_v14, %v2944_v43  ;;  %v2199_v35 = vpop.f32.mrf.mxu0  ;;  %v5636_v19 = vld [vmem:[#allocation96_spill] sm:$0xff] }
 0x2a0   : >> { %v5324_v31 = vpop.f32.mrf.mxu1  ;;  %v2936_v46 = vsel %vm2795_vm2, %v2933_v40, %v2935_v59  ;;  %v2946_v62 = vmax.f32 %v2777_v48, %v2935_v59  ;;  %v5634_v40 = vld [vmem:[#allocation94_spill] sm:$0xff] }
 0x2a1   : >> { %v2979_v55 = vrot.slane %v3537_v50, 6  ;;  %v2954_v5 = vmax.f32 %v2949_v25, 0.0  ;;  %v2945_v2 = vmax.f32 %v2776_v7, %v2936_v46  ;;  %v2201_v63 = vpop.f32.mrf.mxu0  ;;  %v2749_v46 = vadd.f32 %v5315_v21, %v2195_v30  ;;  %v5647_v30 = vld [vmem:[#allocation92_spill] sm:$0xff] }
 0x2a2   : >> { %v2696_v38 = vpop.f32.mrf.mxu1  ;;  %v2951_v53 = vadd.f32 %v5618_v14, %v2946_v62  ;;  %v5638_v62 = vld [vmem:[#allocation89_spill] sm:$0xff] }
 0x2a3   : >> { %v2980_v10 = vsel %vm5327_vm8, %v3501_v32, %v2979_v55  ;;  %v3538_v13 = vpack.c.bf16 %v2954_v5, %v2954_v5  ;;  %v2950_v49 = vadd.f32 %v5618_v14, %v2945_v2  ;;  %v2202_v44 = vpop.f32.mrf.mxu0  ;;  %v2981_v26 = vrot.slane %v2979_v55, 4  ;;  %v5639_v2 = vld [vmem:[#allocation98_spill] sm:$0xff]  ;;  %v5640_v38 = vld [vmem:[#allocation99_spill] sm:$0xff] }
 0x2a4   : >> { %v5336_v58 = vpop.f32.mrf.mxu1  ;;  %3504 = vst [vmem:[%s5227_s14 + $0x20] sm:$0xf] %v2980_v10  ;;  %v2956_v48 = vmax.f32 %v2951_v53, 0.0  ;;  %v2200_v32 = vadd.f32 %v2199_v35, %v5638_v62 }
 0x2a5   : >> { %v2982_v15 = vrot.slane %v3538_v13, 6  ;;  %v2955_v37 = vmax.f32 %v2950_v49, 0.0  ;;  %v2204_v29 = vpop.f32.mrf.mxu0 }
 0x2a6   : >> { %v2699_v54 = vpop.f32.mrf.mxu1  ;;  %v3540_v56 = vpack.c.bf16 %v2956_v48, %v2956_v48  ;;  %v2750_v21 = vadd.f32 %v5324_v31, %v2200_v32  ;;  %v5642_v29 = vld [vmem:[#allocation91_spill] sm:$0xff] }
 0x2a7   : >> { %v2983_v36 = vsel %vm5327_vm8, %v2981_v26, %v2982_v15  ;;  %v3539_v22 = vpack.c.bf16 %v2955_v37, %v2955_v37  ;;  %v2207_v12 = vpop.f32.mrf.mxu0  ;;  %v2984_v18 = vrot.slane %v2982_v15, 4  ;;  %v5641_v15 = vld [vmem:[#allocation88_spill] sm:$0xff]  ;;  %v2203_v35 = vadd.f32 %v2202_v44, %v5642_v29 }
 0x2a8   : >> { %v2702_v16 = vpop.f32.mrf.mxu1  ;;  %3505 = vst [vmem:[%s5227_s14 + $0x24] sm:$0xf] %v2983_v36  ;;  %v2208_v24 = vadd.f32 %v2207_v12, %v5632_v28  ;;  %v2988_v61 = vrot.slane %v3540_v56, 6  ;;  %v2782_v37 = vmax.f32 %v5641_v15, %v2749_v46  ;;  %v5643_v12 = vld [vmem:[#allocation100_spill] sm:$0xff]  ;;  %v5644_v28 = vld [vmem:[#allocation101_spill] sm:$0xff] }
 0x2a9   : >> { %v2985_v0 = vrot.slane %v3539_v22, 6  ;;  %v2209_v23 = vpop.f32.mrf.mxu0  ;;  %v2751_v44 = vadd.f32 %v5336_v58, %v2203_v35 }
 0x2aa   : >> { %v2704_v34 = vpop.f32.mrf.mxu1  ;;  %v2752_v11 = vadd.f32 %v2702_v16, %v2208_v24 }
 0x2ab   : >> { %v2986_v20 = vsel %vm5327_vm8, %v2984_v18, %v2985_v0  ;;  %v2987_v41 = vrot.slane %v2985_v0, 4  ;;  %v2210_v1 = vpop.f32.mrf.mxu0 }
 0x2ac   : >> { %v2705_v60 = vpop.f32.mrf.mxu1  ;;  %3506 = vst [vmem:[%s5227_s14 + $0x28] sm:$0xf] %v2986_v20  ;;  %v2211_v17 = vadd.f32 %v2210_v1, %v5633_v6  ;;  %v5351_v33 = vmax.f32 %v5634_v40, %v2752_v11  ;;  %v5645_v20 = vld [vmem:[#allocation90_spill] sm:$0xff] }
 0x2ad   : >> { %v2989_v39 = vsel %vm5327_vm8, %v2987_v41, %v2988_v61  ;;  %v2212_v8 = vpop.f32.mrf.mxu0  ;;  %v2783_v31 = vmax.f32 %v5645_v20, %v2750_v21  ;;  %v5646_v6 = vld [vmem:[#allocation102_spill] sm:$0xff] }
 0x2ae   : >> { %v2707_v51 = vpop.f32.mrf.mxu1  ;;  %3507 = vst [vmem:[%s5227_s14 + $0x2c] sm:$0xf] %v2989_v39  ;;  %v2753_v45 = vadd.f32 %v2705_v60, %v2211_v17  ;;  %v3006_v50 = vrot.slane %v5351_v33, 1 }
 0x2af   : >> { %v2215_v52 = vpop.f32.mrf.mxu0 }
 0x2b0   : >> { %v2710_v47 = vpop.f32.mrf.mxu1  ;;  %v2786_v43 = vmax.f32 %v5636_v19, %v2753_v45  ;;  %v2216_v27 = vadd.f32 %v2215_v52, %v5637_v42  ;;  %v2784_v52 = vmax.f32 %v5647_v30, %v2751_v44 }
 0x2b1   : >> { %v2217_v59 = vpop.f32.mrf.mxu0 }
 0x2b2   : >> { %v2712_v7 = vpop.f32.mrf.mxu1  ;;  %v3007_v25 = vrot.slane %v2786_v43, 1  ;;  %v2754_v4 = vadd.f32 %v2710_v47, %v2216_v27 }
 0x2b3   : >> { %v2218_v55 = vpop.f32.mrf.mxu0 }
 0x2b4   : >> { %v2713_v5 = vpop.f32.mrf.mxu1  ;;  %v3008_v9 = vsel %vm2795_vm2, %v3006_v50, %v3007_v25  ;;  %v2787_v63 = vmax.f32 %v5639_v2, %v2754_v4  ;;  %v2219_v53 = vadd.f32 %v2218_v55, %v5640_v38 }
 0x2b5   : >> { %v3020_v10 = vmax.f32 %v5319_v3, %v3008_v9  ;;  %v2220_v13 = vpop.f32.mrf.mxu0 }
 0x2b6   : >> { %v2715_v49 = vpop.f32.mrf.mxu1  ;;  %v3009_v48 = vrot.slane %v2787_v63, 1  ;;  %v2755_v26 = vadd.f32 %v2713_v5, %v2219_v53 }
 0x2b7   : >> { %v3025_v54 = vadd.f32 %v5618_v14, %v3020_v10  ;;  %v2223_v36 = vpop.f32.mrf.mxu0 }
 0x2b8   : >> { %v2718_v22 = vpop.f32.mrf.mxu1  ;;  %v3010_v56 = vsel %vm2795_vm2, %v3007_v25, %v3009_v48  ;;  %v2788_v16 = vmax.f32 %v5643_v12, %v2755_v26  ;;  %v2224_v3 = vadd.f32 %v2223_v36, %v5644_v28 }
 0x2b9   : >> { %v3030_v24 = vmax.f32 %v3025_v54, 0.0  ;;  %v3021_v18 = vmax.f32 %v2782_v37, %v3010_v56  ;;  %v2225_v0 = vpop.f32.mrf.mxu0 }
 0x2ba   : >> { %v2720_v23 = vpop.f32.mrf.mxu1  ;;  %v3011_v34 = vrot.slane %v2788_v16, 1  ;;  %v2756_v11 = vadd.f32 %v2718_v22, %v2224_v3 }
 0x2bb   : >> { %v3026_v41 = vadd.f32 %v5618_v14, %v3021_v18  ;;  %v2226_v61 = vpop.f32.mrf.mxu0  ;;  %v3542_v39 = vpack.c.bf16 %v3030_v24, %v3030_v24 }
 0x2bc   : >> { %v2721_v1 = vpop.f32.mrf.mxu1  ;;  %v3012_v60 = vsel %vm2795_vm2, %v3009_v48, %v3011_v34  ;;  %v2789_v17 = vmax.f32 %v5646_v6, %v2756_v11 }
 0x2bd   : >> { %v3031_v8 = vmax.f32 %v3026_v41, 0.0  ;;  %v3022_v51 = vmax.f32 %v2783_v31, %v3012_v60  ;;  %v2227_v40 = vpop.f32.mrf.mxu0  ;;  %v3513_v27 = vrot.slane %v3542_v39, 11 }
 0x2be   : >> { %v2722_v45 = vpop.f32.mrf.mxu1  ;;  %v3013_v57 = vrot.slane %v2789_v17, 1 }
 0x2bf   : >> { %v3543_v58 = vpack.c.bf16 %v3031_v8, %v3031_v8  ;;  %v3027_v47 = vadd.f32 %v5618_v14, %v3022_v51 }
 0x2c0   : >> { %v3014_v43 = vsel %vm2795_vm2, %v3011_v34, %v3013_v57  ;;  %v3024_v42 = vmax.f32 %v5351_v33, %v3013_v57 }
 0x2c1   : >> { %v3057_v59 = vrot.slane %v3543_v58, 7  ;;  %v3032_v7 = vmax.f32 %v3027_v47, 0.0  ;;  %v3023_v50 = vmax.f32 %v2784_v52, %v3014_v43 }
 0x2c2   : >> { %v3029_v25 = vadd.f32 %v5618_v14, %v3024_v42 }
 0x2c3   : >> { %v3058_v4 = vsel %vm5378_vm11, %v3513_v27, %v3057_v59  ;;  %v3544_v46 = vpack.c.bf16 %v3032_v7, %v3032_v7  ;;  %v3028_v62 = vadd.f32 %v5618_v14, %v3023_v50  ;;  %v3059_v55 = vrot.slane %v3057_v59, 4 }
 0x2c4   : >> { %3516 = vst [vmem:[%s5227_s14 + $0x30] sm:$0xf] %v3058_v4  ;;  %v3034_v32 = vmax.f32 %v3029_v25, 0.0 }
 0x2c5   : >> { %v3060_v5 = vrot.slane %v3544_v46, 7  ;;  %v3033_v33 = vmax.f32 %v3028_v62, 0.0 }
 0x2c6   : >> { %v3546_v63 = vpack.c.bf16 %v3034_v32, %v3034_v32 }
 0x2c7   : >> { %v3061_v9 = vsel %vm5378_vm11, %v3059_v55, %v3060_v5  ;;  %v3545_v2 = vpack.c.bf16 %v3033_v33, %v3033_v33  ;;  %v3062_v38 = vrot.slane %v3060_v5, 4 }
 0x2c8   : >> { %3517 = vst [vmem:[%s5227_s14 + $0x34] sm:$0xf] %v3061_v9  ;;  %v3066_v49 = vrot.slane %v3546_v63, 7 }
 0x2c9   : >> { %v3063_v53 = vrot.slane %v3545_v2, 7 }
 0x2ca   : > { %329 = sbr.rel (!%p327_p7) target bundleno = 53 (0x35), region = 84 }
 0x2cb   : >> { %v3064_v10 = vsel %vm5378_vm11, %v3062_v38, %v3063_v53  ;;  %v3065_v13 = vrot.slane %v3063_v53, 4 }
 0x2cc   : >> { %3518 = vst [vmem:[%s5227_s14 + $0x38] sm:$0xf] %v3064_v10 }
 0x2cd   : >> { %v3067_v48 = vsel %vm5378_vm11, %v3065_v13, %v3066_v49 }
 0x2ce   : >> { %3519 = vst [vmem:[%s5227_s14 + $0x3c] sm:$0xf] %v3067_v48 }
 0x2cf PF: > { %s14_s19 = sadd.s32 1, %s3788_s19   ;;  %s5650_s15 = smov %s3780_s17 }
 0x2d0   : > { %p11_p8 = scmp.ge.s32.totalorder %s14_s19, 6   ;;  %s5651_s16 = smov %s3784_s18 }
 0x2d1   : > { %s5652_s17 = smov %s5655_s20  ;;  %s5653_s18 = smov %s5659_s21 }
 0x2d2   :  { %13 = sbr.rel (!%p11_p8) target bundleno = 3 (0x3), region = 95 }

// kernel: agenet_gray_forward.5
= control target key start
LH: loop header
LB: loop body
LE: loop exit
PB: predicated region body
PF: predicated region fallthrough
CT: control target
= control target key end

     0   :  { %s2503_s18 = smov 0   ;;  %s2505_s19 = smov 0   ;;  %s3036_s0 = inlined_call_operand.vmem [shape: bf16[2,131072], index: 0, kind: input, shape index: {}]   ;;  %s3037_s1 = inlined_call_operand.vmem [shape: s8[2,131072,256], index: 1, kind: input, shape index: {}]   ;;  %s3038_s2 = inlined_call_operand.vmem [shape: f32[2,1,256], index: 2, kind: input, shape index: {}]   ;;  %s3039_s3 = inlined_call_operand.vmem [shape: f32[2,1,256], index: 3, kind: input, shape index: {}]   ;;  %s3040_s4 = inlined_call_operand.vmem [shape: f32[2,256,1], index: 4, kind: input, shape index: {}]   ;;  %s3041_s5 = inlined_call_operand.vmem [shape: f32[2,2,1], index: 5, kind: output, shape index: {}]  }
   0x1   :  { %s2507_s20 = smov 0   ;;  %s2509_s21 = smov 0  }
   0x2   :  { %s2511_s22 = smov 0  }
   0x3 LB: > { %s24_s23 = sadd.s32 1, %s2456_s20  ;;  %s27_s24 = sadd.s32 1, %s2460_s21  ;;  %s2464_s22 = sphi %s2511_s22, %s15_s22   ;;  %s2460_s21 = sphi %s2509_s21, %s3050_s21   ;;  %s2456_s20 = sphi %s2507_s20, %s3049_s20   ;;  %s2452_s19 = sphi %s2505_s19, %s3048_s19   ;;  %s2448_s18 = sphi %s2503_s18, %s3047_s18  }
   0x4   : > { %p25_p0 = scmp.ge.s32.totalorder %s24_s23, 4  ;;  %p2312_p1 = scmp.ge.s32.totalorder %s2464_s22, 1 }
   0x5   : > { %p245_p2 = scmp.lt.s32.totalorder %s2464_s22, 9 }
   0x6   : > { %s3052_s23 = smov (%p25_p0, %s24_s23), 0  ;;  %s3054_s24 = smov (!%p25_p0, %s27_s24), %s2460_s21 }
   0x7   : > { %3042 = sst [smem:[#allocation3_spill]] %s3052_s23  ;;  %p246_p3 = pnand %p2312_p1, %p245_p2 }
   0x8   : > { %p29_p4 = scmp.ge.s32.totalorder %s3054_s24, 2  ;;  %s2313_s25 = sshll.u32 (!%p246_p3), %s2448_s18, 8 }
   0x9   : > { %249 = sbr.rel (%p246_p3) target bundleno = 990 (0x3de), region = 40  ;;  %s2314_s26 = sshll.u32 (!%p246_p3), %s2448_s18, 10 }
   0xa   : > { %s3056_s24 = smov (%p29_p4, %s3054_s24), 0  ;;  %p295_p5 = scmp.lt.s32.totalorder (!%p246_p3), %s2313_s25, 1023 }
   0xb   : > { %3043 = sst [smem:[#allocation4_spill]] %s3056_s24  ;;  %p300_p6 = scmp.lt.s32.totalorder (!%p246_p3), %s2452_s19, 1 }
   0xc   : > { %p302_p7 = scmp.lt.s32.totalorder (!%p246_p3), %s2314_s26, 4095  ;;  %p2323_p8 = scmp.ne.s32.totalorder (!%p246_p3), %s2448_s18, 0 }
   0xe   : > { %s3058_s25 = smov (!%p295_p5, %s2313_s25), 1023  ;;  %s3060_s19 = smov (!%p300_p6, %s2452_s19), 1 }
   0xf   : > { %s3062_s26 = smov (!%p302_p7, %s2314_s26), 4095  ;;  %s2316_s30 = sshll.u32 %s3060_s19, 13 }
  0x10   : > { %s2543_s6 = sshll.u32 %s3060_s19, 1  ;;  %s2315_s7 = sshll.u32 %s3062_s26, 1 }
  0x11   : > { %s313_s10 = scalar_lea.vmem %s3038_s2, %s2543_s6  ;;  %s306_s11 = sadd.s32 %s2316_s30, %s2315_s7 }
  0x12   : > { %s317_s14 = scalar_lea.vmem %s3039_s3, %s2543_s6  ;;  %s2317_s15 = sshll.u32 %s306_s11, 3 }
  0x13   : > { %s2330_s16 = sshll.u32 %s3060_s19, 8  ;;  %s2556_s28 = scalar_lea.vmem %s3037_s1, %s2317_s15 }
  0x14   : > { %s2561_s26 = scalar_lea.vmem %s3040_s4, %s2330_s16  ;;  %s326_s30 = scalar_lea.vmem %s3041_s5, %s2543_s6 }
  0x15   : > { %330 = sbr.rel (%p2323_p8) target bundleno = 28 (0x1c), region = 44 }
  0x1a   : > { %v2470_v0 = vmov 0.0  }
  0x1b   : > { %331 = vst [vmem:[#allocation2] sm:$0xf] %v2470_v0 }
  0x1c PF: > { %s2568_s19 = smov 0  }
  0x1d LB: >> { %s2324_s24 = sshll.u32 %s2468_s19, 12  ;;  %v2471_v19 = vmov 1966171168   ;;  %v1128_v21 = vlaneseq  ;;  %s3044_s13 = scalar_lea.vmem %s3036_s0, %s3058_s25  ;;  %s2468_s19 = sphi %s2568_s19, %s337_s19  }
  0x1e   : >> { %s346_s23 = sshra.s32 %s2324_s24, 5  ;;  %v1126_v20 = vunpack.c.l.s4 %v2471_v19  ;;  %s339_s9 = sshra.s32 %s2324_s24, 7 }
  0x1f   : >> { %s2331_s29 = sshll.u32 %s346_s23, 4  ;;  %v2589_v27 = vshrl.u32 %v1128_v21, 7  ;;  %s2598_s15 = scalar_lea.vmem %s3044_s13, %s339_s9 }
  0x20   : >> { %s2577_s7 = scalar_lea.vmem %s2556_s28, %s2331_s29  ;;  %v1127_v26 = vunpack.c.0.s8 %v1126_v20  ;;  %v2606_v37 = vld [vmem:[%s2598_s15] sm:$0xff]  ;;  %s337_s19 = sadd.s32 1, %s2468_s19  }
  0x21   : >> { %v358_v1 = vld [vmem:[%s2577_s7 + $0x38] sm:$0xff]  ;;  %v357_v3 = vld [vmem:[%s2577_s7 + $0x30] sm:$0xff]  ;;  %v356_v11 = vld [vmem:[%s2577_s7 + $0x28] sm:$0xff]  ;;  %p334_p9 = scmp.ge.s32.totalorder %s337_s19, 8  }
  0x22   : >> { %v374_v2 = vld [vmem:[%s2577_s7 + $0xb8] sm:$0xff]  ;;  %v620_v4 = vunpack.c.l.s8.bf16 %v358_v1  ;;  %v622_v5 = vunpack.c.h.s8.bf16 %v358_v1  ;;  %v373_v8 = vld [vmem:[%s2577_s7 + $0xb0] sm:$0xff]  ;;  %v621_v9 = vunpack.c.h.s8.bf16 %v357_v3  ;;  %v372_v12 = vld [vmem:[%s2577_s7 + $0xa8] sm:$0xff]  ;;  %v619_v13 = vunpack.c.l.s8.bf16 %v357_v3  ;;  %p2327_p10 = scmp.ne.s32.totalorder (%p334_p9), %s2448_s18, 3 }
  0x23   : >> { %v652_v6 = vunpack.c.l.s8.bf16 %v374_v2  ;;  %v654_v7 = vunpack.c.h.s8.bf16 %v374_v2  ;;  %v653_v10 = vunpack.c.h.s8.bf16 %v373_v8  ;;  %v651_v14 = vunpack.c.l.s8.bf16 %v373_v8  ;;  %v355_v17 = vld [vmem:[%s2577_s7 + $0x20] sm:$0xff]  ;;  %v354_v28 = vld [vmem:[%s2577_s7 + $0x18] sm:$0xff]  ;;  %v353_v34 = vld [vmem:[%s2577_s7 + $0x10] sm:$0xff] }
  0x24   : >> { %1352 = vmatprep.subr.bf16.mxu0 %v622_v5  ;;  %v618_v15 = vunpack.c.h.s8.bf16 %v356_v11  ;;  %v650_v16 = vunpack.c.h.s8.bf16 %v372_v12  ;;  %v371_v18 = vld [vmem:[%s2577_s7 + $0xa0] sm:$0xff]  ;;  %v617_v22 = vunpack.c.h.s8.bf16 %v355_v17  ;;  %v616_v24 = vunpack.c.l.s8.bf16 %v356_v11  ;;  %v370_v29 = vld [vmem:[%s2577_s7 + $0x98] sm:$0xff]  ;;  %v369_v35 = vld [vmem:[%s2577_s7 + $0x90] sm:$0xff] }
  0x25   : >> { %1393 = vmatprep.subr.bf16.mxu1 %v654_v7  ;;  %1353 = vmatpush1.bf16.msra.mxu0 %v621_v9  ;;  %v649_v23 = vunpack.c.h.s8.bf16 %v371_v18  ;;  %v648_v25 = vunpack.c.l.s8.bf16 %v372_v12  ;;  %v615_v30 = vunpack.c.l.s8.bf16 %v355_v17  ;;  %v647_v31 = vunpack.c.l.s8.bf16 %v371_v18  ;;  %v352_v43 = vld [vmem:[%s2577_s7 + $0x8] sm:$0xff]  ;;  %v351_v50 = vld [vmem:[%s2577_s7] sm:$0xff]  ;;  %v366_v58 = vld [vmem:[%s2577_s7 + $0x78] sm:$0xff] }
  0x26   : >> { %1394 = vmatpush1.bf16.msra.mxu1 %v653_v10  ;;  %1354 = vmatprep.subr.bf16.mxu0 %v620_v4  ;;  %v614_v32 = vunpack.c.h.s8.bf16 %v354_v28  ;;  %v646_v33 = vunpack.c.h.s8.bf16 %v370_v29  ;;  %v2603_v36 = vsub.s32 %v1127_v26, %v2589_v27  ;;  %v613_v38 = vunpack.c.h.s8.bf16 %v353_v34  ;;  %v368_v44 = vld [vmem:[%s2577_s7 + $0x88] sm:$0xff]  ;;  %v367_v51 = vld [vmem:[%s2577_s7 + $0x80] sm:$0xff]  ;;  %v382_v59 = vld [vmem:[%s2577_s7 + $0xf8] sm:$0xff] }
  0x27   : >> { %1395 = vmatprep.subr.bf16.mxu1 %v652_v6  ;;  %v645_v39 = vunpack.c.h.s8.bf16 %v369_v35  ;;  %v612_v40 = vunpack.c.l.s8.bf16 %v354_v28  ;;  %v644_v41 = vunpack.c.l.s8.bf16 %v370_v29  ;;  %v611_v46 = vunpack.c.l.s8.bf16 %v353_v34  ;;  %v365_v0 = vld [vmem:[%s2577_s7 + $0x70] sm:$0xff]  ;;  %v364_v6 = vld [vmem:[%s2577_s7 + $0x68] sm:$0xff]  ;;  %v363_v12 = vld [vmem:[%s2577_s7 + $0x60] sm:$0xff] }
  0x28   : >> { %v2610_v42 = vrot.slane %v2606_v37, %v2603_v36  ;;  %v643_v47 = vunpack.c.l.s8.bf16 %v369_v35  ;;  %v610_v48 = vunpack.c.h.s8.bf16 %v352_v43  ;;  %v642_v49 = vunpack.c.h.s8.bf16 %v368_v44  ;;  %v381_v1 = vld [vmem:[%s2577_s7 + $0xf0] sm:$0xff]  ;;  %v380_v7 = vld [vmem:[%s2577_s7 + $0xe8] sm:$0xff]  ;;  %v362_v18 = vld [vmem:[%s2577_s7 + $0x58] sm:$0xff] }
  0x29   : >> { %1355 = vmatpush1.bf16.msra.mxu0 %v619_v13  ;;  %v609_v54 = vunpack.c.h.s8.bf16 %v351_v50  ;;  %v641_v55 = vunpack.c.h.s8.bf16 %v367_v51  ;;  %v608_v56 = vunpack.c.l.s8.bf16 %v352_v43  ;;  %v640_v57 = vunpack.c.l.s8.bf16 %v368_v44  ;;  %v379_v13 = vld [vmem:[%s2577_s7 + $0xe0] sm:$0xff]  ;;  %v378_v19 = vld [vmem:[%s2577_s7 + $0xd8] sm:$0xff] }
  0x2a   : >> { %1396 = vmatpush1.bf16.msra.mxu1 %v651_v14  ;;  %1356 = vmatprep.subr.bf16.mxu0 %v618_v15  ;;  %v1139_v45 = vcombine.high %v2610_v42, %v2610_v42  ;;  %v607_v60 = vunpack.c.l.s8.bf16 %v351_v50  ;;  %v639_v61 = vunpack.c.l.s8.bf16 %v367_v51  ;;  %v638_v62 = vunpack.c.h.s8.bf16 %v366_v58 }
  0x2b   : >> { %1397 = vmatprep.subr.bf16.mxu1 %v650_v16  ;;  %v670_v63 = vunpack.c.h.s8.bf16 %v382_v59  ;;  %v637_v2 = vunpack.c.h.s8.bf16 %v365_v0  ;;  %v669_v3 = vunpack.c.h.s8.bf16 %v381_v1  ;;  %v636_v4 = vunpack.c.l.s8.bf16 %v366_v58 }
  0x2c   : >> { %v1161_v52 = vrot.slane %v1139_v45, %v2603_v36  ;;  %v668_v5 = vunpack.c.l.s8.bf16 %v382_v59  ;;  %v635_v8 = vunpack.c.l.s8.bf16 %v365_v0  ;;  %v667_v9 = vunpack.c.l.s8.bf16 %v381_v1 }
  0x2d   : >> { %1357 = vmatpush1.bf16.msra.mxu0 %v617_v22  ;;  %v634_v10 = vunpack.c.h.s8.bf16 %v364_v6  ;;  %v666_v11 = vunpack.c.h.s8.bf16 %v380_v7  ;;  %v633_v14 = vunpack.c.h.s8.bf16 %v363_v12  ;;  %v665_v15 = vunpack.c.h.s8.bf16 %v379_v13 }
  0x2e   : >> { %1398 = vmatpush1.bf16.msra.mxu1 %v649_v23  ;;  %1358 = vmatprep.subr.bf16.mxu0 %v616_v24  ;;  %v1171_v53 = vcombine.high %v1161_v52, %v1161_v52  ;;  %v632_v16 = vunpack.c.l.s8.bf16 %v364_v6  ;;  %v664_v17 = vunpack.c.l.s8.bf16 %v380_v7  ;;  %v631_v20 = vunpack.c.l.s8.bf16 %v363_v12  ;;  %v361_v24 = vld [vmem:[%s2577_s7 + $0x50] sm:$0xff]  ;;  %v403_v6 = vld [vmem:[%s2577_s7 + $0x1a0] sm:$0xff]  ;;  %v402_v12 = vld [vmem:[%s2577_s7 + $0x198] sm:$0xff] }
  0x2f   : >> { %1399 = vmatprep.subr.bf16.mxu1 %v648_v25  ;;  %1384 = vmatprep.mubr.bf16.mxu0 %v1161_v52  ;;  %v663_v21 = vunpack.c.l.s8.bf16 %v379_v13  ;;  %v630_v22 = vunpack.c.h.s8.bf16 %v362_v18  ;;  %v662_v23 = vunpack.c.h.s8.bf16 %v378_v19  ;;  %v377_v25 = vld [vmem:[%s2577_s7 + $0xd0] sm:$0xff]  ;;  %v629_v26 = vunpack.c.h.s8.bf16 %v361_v24 }
  0x30   : >> { %1425 = vmatprep.mubr.bf16.mxu1 %v1171_v53  ;;  %v661_v28 = vunpack.c.h.s8.bf16 %v377_v25  ;;  %v628_v29 = vunpack.c.l.s8.bf16 %v362_v18  ;;  %v627_v34 = vunpack.c.l.s8.bf16 %v361_v24  ;;  %v659_v35 = vunpack.c.l.s8.bf16 %v377_v25  ;;  %v401_v18 = vld [vmem:[%s2577_s7 + $0x190] sm:$0xff]  ;;  %v400_v24 = vld [vmem:[%s2577_s7 + $0x188] sm:$0xff] }
  0x31   : >> { %1359 = vmatpush1.bf16.msra.mxu0 %v615_v30  ;;  %v660_v30 = vunpack.c.l.s8.bf16 %v378_v19  ;;  %v1147_v50 = vrot.slane %v2610_v42, %v2603_v36 }
  0x32   : >> { %1400 = vmatpush1.bf16.msra.mxu1 %v647_v31  ;;  %1360 = vmatprep.subr.bf16.mxu0 %v614_v32  ;;  %v360_v31 = vld [vmem:[%s2577_s7 + $0x48] sm:$0xff] }
  0x33   : >> { %1401 = vmatprep.subr.bf16.mxu1 %v646_v33  ;;  %v376_v32 = vld [vmem:[%s2577_s7 + $0xc8] sm:$0xff]  ;;  %v1124_v33 = vcombine.high %v2606_v37, %v2606_v37  ;;  %v624_v37 = vunpack.c.l.s8.bf16 %v360_v31  ;;  %v1169_v58 = vcombine.high %v1147_v50, %v1147_v50 }
  0x35   : >> { %1361 = vmatpush1.bf16.msra.mxu0 %v613_v38  ;;  %v626_v38 = vunpack.c.h.s8.bf16 %v360_v31  ;;  %v2638_v43 = vrot.slane %v1124_v33, %v2603_v36  ;;  %v399_v31 = vld [vmem:[%s2577_s7 + $0x180] sm:$0xff] }
  0x36   : >> { %1402 = vmatpush1.bf16.msra.mxu1 %v645_v39  ;;  %1362 = vmatprep.subr.bf16.mxu0 %v612_v40  ;;  %v658_v39 = vunpack.c.h.s8.bf16 %v376_v32  ;;  %v359_v40 = vld [vmem:[%s2577_s7 + $0x40] sm:$0xff]  ;;  %v705_v33 = vunpack.c.h.s8.bf16 %v399_v31 }
  0x37   : >> { %1403 = vmatprep.subr.bf16.mxu1 %v644_v41  ;;  %v375_v41 = vld [vmem:[%s2577_s7 + $0xc0] sm:$0xff]  ;;  %v625_v44 = vunpack.c.h.s8.bf16 %v359_v40  ;;  %v623_v51 = vunpack.c.l.s8.bf16 %v359_v40 }
  0x38   : >> { %v657_v45 = vunpack.c.h.s8.bf16 %v375_v41  ;;  %v655_v52 = vunpack.c.l.s8.bf16 %v375_v41  ;;  %v703_v41 = vunpack.c.l.s8.bf16 %v399_v31 }
  0x39   : >> { %1363 = vmatpush1.bf16.msra.mxu0 %v611_v46  ;;  %v656_v46 = vunpack.c.l.s8.bf16 %v376_v32 }
  0x3a   : >> { %1404 = vmatpush1.bf16.msra.mxu1 %v643_v47  ;;  %1364 = vmatprep.subr.bf16.mxu0 %v610_v48  ;;  %v390_v47 = vld [vmem:[%s2577_s7 + $0x138] sm:$0xff] }
  0x3b   : >> { %1405 = vmatprep.subr.bf16.mxu1 %v642_v49  ;;  %v406_v48 = vld [vmem:[%s2577_s7 + $0x1b8] sm:$0xff]  ;;  %v1140_v49 = vcombine.high %v2638_v43, %v2638_v43  ;;  %v686_v53 = vunpack.c.h.s8.bf16 %v390_v47  ;;  %v684_v42 = vunpack.c.l.s8.bf16 %v390_v47 }
  0x3d   : >> { %1365 = vmatpush1.bf16.msra.mxu0 %v609_v54  ;;  %v718_v54 = vunpack.c.h.s8.bf16 %v406_v48 }
  0x3e   : >> { %1406 = vmatpush1.bf16.msra.mxu1 %v641_v55  ;;  %1366 = vmatprep.subr.bf16.mxu0 %v608_v56  ;;  %v389_v55 = vld [vmem:[%s2577_s7 + $0x130] sm:$0xff] }
  0x3f   : >> { %1407 = vmatprep.subr.bf16.mxu1 %v640_v57  ;;  %v405_v56 = vld [vmem:[%s2577_s7 + $0x1b0] sm:$0xff]  ;;  %v1168_v57 = vrot.slane %v1140_v49, %v2603_v36  ;;  %v685_v59 = vunpack.c.h.s8.bf16 %v389_v55  ;;  %v683_v1 = vunpack.c.l.s8.bf16 %v389_v55 }
  0x41   : >> { %1367 = vmatpush1.bf16.msra.mxu0 %v607_v60  ;;  %v717_v60 = vunpack.c.h.s8.bf16 %v405_v56  ;;  %v1172_v0 = vcombine.high %v1168_v57, %v1168_v57 }
  0x42   : >> { %1408 = vmatpush1.bf16.msra.mxu1 %v639_v61  ;;  %1368 = vmatprep.subr.bf16.mxu0 %v638_v62  ;;  %v716_v61 = vunpack.c.l.s8.bf16 %v406_v48  ;;  %v388_v62 = vld [vmem:[%s2577_s7 + $0x128] sm:$0xff] }
  0x43   : >> { %1409 = vmatprep.subr.bf16.mxu1 %v670_v63  ;;  %v404_v63 = vld [vmem:[%s2577_s7 + $0x1a8] sm:$0xff] }
  0x45   : >> { %1369 = vmatpush2.bf16.msra.mxu0 %v637_v2  ;;  %v715_v2 = vunpack.c.l.s8.bf16 %v405_v56 }
  0x46   : >> { %1410 = vmatpush2.bf16.msra.mxu1 %v669_v3  ;;  %1370 = vmatprep.subr.bf16.mxu0 %v636_v4  ;;  %v682_v3 = vunpack.c.h.s8.bf16 %v388_v62  ;;  %v714_v4 = vunpack.c.h.s8.bf16 %v404_v63 }
  0x47   : >> { %1411 = vmatprep.subr.bf16.mxu1 %v668_v5  ;;  %v387_v5 = vld [vmem:[%s2577_s7 + $0x120] sm:$0xff] }
  0x48   : >> { %v681_v7 = vunpack.c.h.s8.bf16 %v387_v5  ;;  %v679_v13 = vunpack.c.l.s8.bf16 %v387_v5  ;;  %v409_v5 = vld [vmem:[%s2577_s7 + $0x1d0] sm:$0xff] }
  0x49   : >> { %1371 = vmatpush2.bf16.msra.mxu0 %v635_v8  ;;  %v713_v8 = vunpack.c.h.s8.bf16 %v403_v6 }
  0x4a   : >> { %1412 = vmatpush2.bf16.msra.mxu1 %v667_v9  ;;  %1372 = vmatprep.subr.bf16.mxu0 %v634_v10  ;;  %v680_v9 = vunpack.c.l.s8.bf16 %v388_v62  ;;  %v712_v10 = vunpack.c.l.s8.bf16 %v404_v63  ;;  %v394_v62 = vld [vmem:[%s2577_s7 + $0x158] sm:$0xff] }
  0x4b   : >> { %1413 = vmatprep.subr.bf16.mxu1 %v666_v11  ;;  %v386_v11 = vld [vmem:[%s2577_s7 + $0x118] sm:$0xff] }
  0x4c   : >> { %v410_v63 = vld [vmem:[%s2577_s7 + $0x1d8] sm:$0xff] }
  0x4d   : >> { %1373 = vmatpush2.bf16.msra.mxu0 %v633_v14  ;;  %v711_v14 = vunpack.c.l.s8.bf16 %v403_v6 }
  0x4e   : >> { %1414 = vmatpush2.bf16.msra.mxu1 %v665_v15  ;;  %1374 = vmatprep.subr.bf16.mxu0 %v632_v16  ;;  %v678_v15 = vunpack.c.h.s8.bf16 %v386_v11  ;;  %v710_v16 = vunpack.c.h.s8.bf16 %v402_v12 }
  0x4f   : >> { %1415 = vmatprep.subr.bf16.mxu1 %v664_v17  ;;  %v385_v17 = vld [vmem:[%s2577_s7 + $0x110] sm:$0xff] }
  0x50   : >> { %v677_v19 = vunpack.c.h.s8.bf16 %v385_v17  ;;  %v675_v25 = vunpack.c.l.s8.bf16 %v385_v17  ;;  %v391_v17 = vld [vmem:[%s2577_s7 + $0x140] sm:$0xff] }
  0x51   : >> { %1375 = vmatpush2.bf16.msra.mxu0 %v631_v20  ;;  %v709_v20 = vunpack.c.h.s8.bf16 %v401_v18 }
  0x52   : >> { %1416 = vmatpush2.bf16.msra.mxu1 %v663_v21  ;;  %1376 = vmatprep.subr.bf16.mxu0 %v630_v22  ;;  %v676_v21 = vunpack.c.l.s8.bf16 %v386_v11  ;;  %v708_v22 = vunpack.c.l.s8.bf16 %v402_v12  ;;  %v408_v11 = vld [vmem:[%s2577_s7 + $0x1c8] sm:$0xff] }
  0x53   : >> { %1417 = vmatprep.subr.bf16.mxu1 %v662_v23  ;;  %v384_v23 = vld [vmem:[%s2577_s7 + $0x108] sm:$0xff] }
  0x54   : >> { %v2676_v12 = vld [vmem:[%s2598_s15 + $0x8] sm:$0xff] }
  0x55   : >> { %1377 = vmatpush2.bf16.msra.mxu0 %v629_v26  ;;  %v707_v26 = vunpack.c.l.s8.bf16 %v401_v18  ;;  %v407_v18 = vld [vmem:[%s2577_s7 + $0x1c0] sm:$0xff] }
  0x56   : >> { %1418 = vmatpush2.bf16.msra.mxu1 %v661_v28  ;;  %1378 = vmatprep.subr.bf16.mxu0 %v628_v29  ;;  %v674_v28 = vunpack.c.h.s8.bf16 %v384_v23  ;;  %v706_v29 = vunpack.c.h.s8.bf16 %v400_v24 }
  0x57   : >> { %1419 = vmatprep.subr.bf16.mxu1 %v660_v30  ;;  %v383_v30 = vld [vmem:[%s2577_s7 + $0x100] sm:$0xff] }
  0x58   : >> { %v673_v32 = vunpack.c.h.s8.bf16 %v383_v30  ;;  %v671_v40 = vunpack.c.l.s8.bf16 %v383_v30  ;;  %v719_v30 = vunpack.c.l.s8.bf16 %v407_v18 }
  0x59   : >> { %1379 = vmatpush2.bf16.msra.mxu0 %v627_v34  ;;  %v672_v34 = vunpack.c.l.s8.bf16 %v384_v23  ;;  %v720_v23 = vunpack.c.l.s8.bf16 %v408_v11 }
  0x5a   : >> { %1420 = vmatpush2.bf16.msra.mxu1 %v659_v35  ;;  %1380 = vmatprep.subr.bf16.mxu0 %v626_v38  ;;  %v704_v35 = vunpack.c.l.s8.bf16 %v400_v24  ;;  %v398_v38 = vld [vmem:[%s2577_s7 + $0x178] sm:$0xff] }
  0x5b   : >> { %1421 = vmatprep.subr.bf16.mxu1 %v658_v39  ;;  %v414_v39 = vld [vmem:[%s2577_s7 + $0x1f8] sm:$0xff]  ;;  %v700_v49 = vunpack.c.l.s8.bf16 %v398_v38 }
  0x5c   : >> { %v422_v24 = vld [vmem:[%s2577_s7 + $0x238] sm:$0xff] }
  0x5d   : >> { %1381 = vmatpush2.bf16.msra.mxu0 %v625_v44  ;;  %v702_v44 = vunpack.c.h.s8.bf16 %v398_v38  ;;  %v750_v31 = vunpack.c.h.s8.bf16 %v422_v24 }
  0x5e   : >> { %1422 = vmatpush2.bf16.msra.mxu1 %v657_v45  ;;  %1382 = vmatprep.subr.bf16.mxu0 %v624_v37  ;;  %v734_v45 = vunpack.c.h.s8.bf16 %v414_v39  ;;  %v397_v37 = vld [vmem:[%s2577_s7 + $0x170] sm:$0xff] }
  0x5f   : >> { %1423 = vmatprep.subr.bf16.mxu1 %v656_v46  ;;  %v413_v46 = vld [vmem:[%s2577_s7 + $0x1f0] sm:$0xff]  ;;  %v701_v47 = vunpack.c.h.s8.bf16 %v397_v37 }
  0x60   : >> { %v733_v48 = vunpack.c.h.s8.bf16 %v413_v46 }
  0x61   : >> { %1383 = vmatpush2.bf16.msra.mxu0 %v623_v51  ;;  %v396_v51 = vld [vmem:[%s2577_s7 + $0x168] sm:$0xff] }
  0x62   : >> { %1424 = vmatpush2.bf16.msra.mxu1 %v655_v52  ;;  %1434 = vmatprep.subr.bf16.mxu0 %v686_v53  ;;  %v412_v52 = vld [vmem:[%s2577_s7 + $0x1e8] sm:$0xff]  ;;  %v699_v53 = vunpack.c.l.s8.bf16 %v397_v37  ;;  %v698_v55 = vunpack.c.h.s8.bf16 %v396_v51 }
  0x63   : >> { %1475 = vmatprep.subr.bf16.mxu1 %v718_v54  ;;  %v731_v54 = vunpack.c.l.s8.bf16 %v413_v46  ;;  %v730_v56 = vunpack.c.h.s8.bf16 %v412_v52 }
  0x64   : >> { %1385 = vmatmul.mubr.bf16.vlgmr.msra.gmra.mxu0 %v1147_v50  ;;  %v732_v50 = vunpack.c.l.s8.bf16 %v414_v39 }
  0x65   : >> { %1426 = vmatmul.mubr.bf16.vlgmr.msra.gmra.mxu1 %v1169_v58  ;;  %1435 = vmatpush1.bf16.msra.mxu0 %v685_v59  ;;  %v411_v58 = vld [vmem:[%s2577_s7 + $0x1e0] sm:$0xff] }
  0x66   : >> { %1476 = vmatpush1.bf16.msra.mxu1 %v717_v60  ;;  %1436 = vmatprep.subr.bf16.mxu0 %v684_v42  ;;  %v729_v60 = vunpack.c.h.s8.bf16 %v411_v58  ;;  %v696_v42 = vunpack.c.l.s8.bf16 %v396_v51  ;;  %v435_v51 = vld [vmem:[%s2577_s7 + $0x2a0] sm:$0xff] }
  0x67   : >> { %1477 = vmatprep.subr.bf16.mxu1 %v716_v61  ;;  %1466 = vmatprep.mubr.bf16.mxu0 %v1168_v57  ;;  %v395_v57 = vld [vmem:[%s2577_s7 + $0x160] sm:$0xff]  ;;  %v728_v61 = vunpack.c.l.s8.bf16 %v412_v52 }
  0x68   : >> { %1507 = vmatprep.mubr.bf16.mxu1 %v1172_v0  ;;  %v697_v59 = vunpack.c.h.s8.bf16 %v395_v57  ;;  %v695_v0 = vunpack.c.l.s8.bf16 %v395_v57  ;;  %v434_v57 = vld [vmem:[%s2577_s7 + $0x298] sm:$0xff] }
  0x69   : >> { %1437 = vmatpush1.bf16.msra.mxu0 %v683_v1  ;;  %v727_v1 = vunpack.c.l.s8.bf16 %v411_v58 }
  0x6a   : >> { %1478 = vmatpush1.bf16.msra.mxu1 %v715_v2  ;;  %1438 = vmatprep.subr.bf16.mxu0 %v682_v3  ;;  %v694_v2 = vunpack.c.h.s8.bf16 %v394_v62  ;;  %v726_v3 = vunpack.c.h.s8.bf16 %v410_v63 }
  0x6b   : >> { %1479 = vmatprep.subr.bf16.mxu1 %v714_v4  ;;  %v393_v4 = vld [vmem:[%s2577_s7 + $0x150] sm:$0xff] }
  0x6c   : >> { %v693_v6 = vunpack.c.h.s8.bf16 %v393_v4 }
  0x6d   : >> { %1439 = vmatpush1.bf16.msra.mxu0 %v681_v7  ;;  %v725_v7 = vunpack.c.h.s8.bf16 %v409_v5 }
  0x6e   : >> { %1480 = vmatpush1.bf16.msra.mxu1 %v713_v8  ;;  %1440 = vmatprep.subr.bf16.mxu0 %v680_v9  ;;  %v692_v8 = vunpack.c.l.s8.bf16 %v394_v62  ;;  %v724_v9 = vunpack.c.l.s8.bf16 %v410_v63  ;;  %v433_v62 = vld [vmem:[%s2577_s7 + $0x290] sm:$0xff] }
  0x6f   : >> { %1481 = vmatprep.subr.bf16.mxu1 %v712_v10  ;;  %v392_v10 = vld [vmem:[%s2577_s7 + $0x148] sm:$0xff] }
  0x71   : >> { %1441 = vmatpush1.bf16.msra.mxu0 %v679_v13  ;;  %v691_v13 = vunpack.c.l.s8.bf16 %v393_v4  ;;  %v432_v4 = vld [vmem:[%s2577_s7 + $0x288] sm:$0xff] }
  0x72   : >> { %1482 = vmatpush1.bf16.msra.mxu1 %v711_v14  ;;  %1442 = vmatprep.subr.bf16.mxu0 %v678_v15  ;;  %v723_v14 = vunpack.c.l.s8.bf16 %v409_v5  ;;  %v690_v15 = vunpack.c.h.s8.bf16 %v392_v10 }
  0x73   : >> { %1483 = vmatprep.subr.bf16.mxu1 %v710_v16  ;;  %v722_v16 = vunpack.c.h.s8.bf16 %v408_v11 }
  0x75   : >> { %1443 = vmatpush1.bf16.msra.mxu0 %v677_v19  ;;  %v2682_v19 = vrot.slane %v2676_v12, %v2603_v36 }
  0x76   : >> { %1484 = vmatpush1.bf16.msra.mxu1 %v709_v20  ;;  %1444 = vmatprep.subr.bf16.mxu0 %v676_v21  ;;  %v689_v20 = vunpack.c.h.s8.bf16 %v391_v17  ;;  %v721_v21 = vunpack.c.h.s8.bf16 %v407_v18 }
  0x77   : >> { %1485 = vmatprep.subr.bf16.mxu1 %v708_v22  ;;  %v688_v22 = vunpack.c.l.s8.bf16 %v392_v10  ;;  %v431_v10 = vld [vmem:[%s2577_s7 + $0x280] sm:$0xff] }
  0x79   : >> { %1445 = vmatpush1.bf16.msra.mxu0 %v675_v25  ;;  %v438_v25 = vld [vmem:[%s2577_s7 + $0x2b8] sm:$0xff] }
  0x7a   : >> { %1486 = vmatpush1.bf16.msra.mxu1 %v707_v26  ;;  %1446 = vmatprep.subr.bf16.mxu0 %v674_v28  ;;  %v1188_v26 = vcombine.high %v2682_v19, %v2682_v19  ;;  %v1154_v28 = vrot.slane %v2638_v43, %v2603_v36  ;;  %v748_v43 = vunpack.c.l.s8.bf16 %v422_v24  ;;  %v445_v24 = vld [vmem:[%s2577_s7 + $0x2f0] sm:$0xff] }
  0x7b   : >> { %1487 = vmatprep.subr.bf16.mxu1 %v706_v29  ;;  %v687_v29 = vunpack.c.l.s8.bf16 %v391_v17  ;;  %v446_v17 = vld [vmem:[%s2577_s7 + $0x2f8] sm:$0xff] }
  0x7c   : >> { %v1170_v38 = vcombine.high %v1154_v28, %v1154_v28 }
  0x7d   : >> { %1447 = vmatpush1.bf16.msra.mxu0 %v673_v32  ;;  %v782_v32 = vunpack.c.h.s8.bf16 %v438_v25 }
  0x7e   : >> { %1488 = vmatpush1.bf16.msra.mxu1 %v705_v33  ;;  %1448 = vmatprep.subr.bf16.mxu0 %v672_v34  ;;  %v421_v33 = vld [vmem:[%s2577_s7 + $0x230] sm:$0xff] }
  0x7f   : >> { %1489 = vmatprep.subr.bf16.mxu1 %v704_v35  ;;  %v437_v34 = vld [vmem:[%s2577_s7 + $0x2b0] sm:$0xff]  ;;  %v1210_v35 = vrot.slane %v1188_v26, %v2603_v36  ;;  %v749_v39 = vunpack.c.h.s8.bf16 %v421_v33  ;;  %v747_v46 = vunpack.c.l.s8.bf16 %v421_v33  ;;  %v797_v26 = vunpack.c.h.s8.bf16 %v445_v24 }
  0x80   : >> { %v795_v33 = vunpack.c.l.s8.bf16 %v445_v24 }
  0x81   : >> { %1449 = vmatpush1.bf16.msra.mxu0 %v671_v40  ;;  %v781_v40 = vunpack.c.h.s8.bf16 %v437_v34  ;;  %v1220_v37 = vcombine.high %v1210_v35, %v1210_v35 }
  0x82   : >> { %1490 = vmatpush1.bf16.msra.mxu1 %v703_v41  ;;  %1450 = vmatprep.subr.bf16.mxu0 %v702_v44  ;;  %v780_v41 = vunpack.c.l.s8.bf16 %v438_v25  ;;  %v420_v44 = vld [vmem:[%s2577_s7 + $0x228] sm:$0xff] }
  0x83   : >> { %1491 = vmatprep.subr.bf16.mxu1 %v734_v45  ;;  %v436_v45 = vld [vmem:[%s2577_s7 + $0x2a8] sm:$0xff] }
  0x85   : >> { %1451 = vmatpush2.bf16.msra.mxu0 %v701_v47  ;;  %v779_v47 = vunpack.c.l.s8.bf16 %v437_v34 }
  0x86   : >> { %1492 = vmatpush2.bf16.msra.mxu1 %v733_v48  ;;  %1452 = vmatprep.subr.bf16.mxu0 %v700_v49  ;;  %v746_v48 = vunpack.c.h.s8.bf16 %v420_v44  ;;  %v778_v49 = vunpack.c.h.s8.bf16 %v436_v45 }
  0x87   : >> { %1493 = vmatprep.subr.bf16.mxu1 %v732_v50  ;;  %v419_v50 = vld [vmem:[%s2577_s7 + $0x220] sm:$0xff] }
  0x88   : >> { %v745_v52 = vunpack.c.h.s8.bf16 %v419_v50  ;;  %v743_v58 = vunpack.c.l.s8.bf16 %v419_v50  ;;  %v425_v50 = vld [vmem:[%s2577_s7 + $0x250] sm:$0xff] }
  0x89   : >> { %1453 = vmatpush2.bf16.msra.mxu0 %v699_v53  ;;  %v777_v53 = vunpack.c.h.s8.bf16 %v435_v51 }
  0x8a   : >> { %1494 = vmatpush2.bf16.msra.mxu1 %v731_v54  ;;  %1454 = vmatprep.subr.bf16.mxu0 %v698_v55  ;;  %v744_v54 = vunpack.c.l.s8.bf16 %v420_v44  ;;  %v776_v55 = vunpack.c.l.s8.bf16 %v436_v45  ;;  %v426_v45 = vld [vmem:[%s2577_s7 + $0x258] sm:$0xff] }
  0x8b   : >> { %1495 = vmatprep.subr.bf16.mxu1 %v730_v56  ;;  %v418_v56 = vld [vmem:[%s2577_s7 + $0x218] sm:$0xff] }
  0x8d   : >> { %1455 = vmatpush2.bf16.msra.mxu0 %v697_v59  ;;  %v775_v59 = vunpack.c.l.s8.bf16 %v435_v51  ;;  %v441_v51 = vld [vmem:[%s2577_s7 + $0x2d0] sm:$0xff] }
  0x8e   : >> { %1496 = vmatpush2.bf16.msra.mxu1 %v729_v60  ;;  %1456 = vmatprep.subr.bf16.mxu0 %v696_v42  ;;  %v742_v60 = vunpack.c.h.s8.bf16 %v418_v56  ;;  %v774_v42 = vunpack.c.h.s8.bf16 %v434_v57 }
  0x8f   : >> { %1497 = vmatprep.subr.bf16.mxu1 %v728_v61  ;;  %v417_v61 = vld [vmem:[%s2577_s7 + $0x210] sm:$0xff] }
  0x90   : >> { %v741_v63 = vunpack.c.h.s8.bf16 %v417_v61  ;;  %v739_v5 = vunpack.c.l.s8.bf16 %v417_v61 }
  0x91   : >> { %1457 = vmatpush2.bf16.msra.mxu0 %v695_v0  ;;  %v773_v0 = vunpack.c.h.s8.bf16 %v433_v62 }
  0x92   : >> { %1498 = vmatpush2.bf16.msra.mxu1 %v727_v1  ;;  %1458 = vmatprep.subr.bf16.mxu0 %v694_v2  ;;  %v740_v1 = vunpack.c.l.s8.bf16 %v418_v56  ;;  %v772_v2 = vunpack.c.l.s8.bf16 %v434_v57  ;;  %v424_v56 = vld [vmem:[%s2577_s7 + $0x248] sm:$0xff] }
  0x93   : >> { %1499 = vmatprep.subr.bf16.mxu1 %v726_v3  ;;  %v416_v3 = vld [vmem:[%s2577_s7 + $0x208] sm:$0xff] }
  0x94   : >> { %v440_v57 = vld [vmem:[%s2577_s7 + $0x2c8] sm:$0xff] }
  0x95   : >> { %1459 = vmatpush2.bf16.msra.mxu0 %v693_v6  ;;  %v771_v6 = vunpack.c.l.s8.bf16 %v433_v62  ;;  %v786_v61 = vunpack.c.h.s8.bf16 %v440_v57  ;;  %v423_v62 = vld [vmem:[%s2577_s7 + $0x240] sm:$0xff] }
  0x96   : >> { %1500 = vmatpush2.bf16.msra.mxu1 %v725_v7  ;;  %1460 = vmatprep.subr.bf16.mxu0 %v692_v8  ;;  %v738_v7 = vunpack.c.h.s8.bf16 %v416_v3  ;;  %v770_v8 = vunpack.c.h.s8.bf16 %v432_v4 }
  0x97   : >> { %1501 = vmatprep.subr.bf16.mxu1 %v724_v9  ;;  %v415_v9 = vld [vmem:[%s2577_s7 + $0x200] sm:$0xff] }
  0x98   : >> { %v737_v11 = vunpack.c.h.s8.bf16 %v415_v9  ;;  %v735_v18 = vunpack.c.l.s8.bf16 %v415_v9 }
  0x99   : >> { %1461 = vmatpush2.bf16.msra.mxu0 %v691_v13  ;;  %v769_v13 = vunpack.c.h.s8.bf16 %v431_v10 }
  0x9a   : >> { %1502 = vmatpush2.bf16.msra.mxu1 %v723_v14  ;;  %1462 = vmatprep.subr.bf16.mxu0 %v690_v15  ;;  %v736_v14 = vunpack.c.l.s8.bf16 %v416_v3  ;;  %v768_v15 = vunpack.c.l.s8.bf16 %v432_v4  ;;  %v784_v3 = vunpack.c.l.s8.bf16 %v440_v57  ;;  %v454_v4 = vld [vmem:[%s2577_s7 + $0x338] sm:$0xff] }
  0x9b   : >> { %1503 = vmatprep.subr.bf16.mxu1 %v722_v16  ;;  %v430_v16 = vld [vmem:[%s2577_s7 + $0x278] sm:$0xff] }
  0x9d   : >> { %1463 = vmatpush2.bf16.msra.mxu0 %v689_v20  ;;  %v767_v20 = vunpack.c.l.s8.bf16 %v431_v10  ;;  %v814_v10 = vunpack.c.h.s8.bf16 %v454_v4 }
  0x9e   : >> { %1504 = vmatpush2.bf16.msra.mxu1 %v721_v21  ;;  %1464 = vmatprep.subr.bf16.mxu0 %v688_v22  ;;  %v766_v21 = vunpack.c.h.s8.bf16 %v430_v16  ;;  %v798_v22 = vunpack.c.h.s8.bf16 %v446_v17 }
  0x9f   : >> { %1505 = vmatprep.subr.bf16.mxu1 %v720_v23  ;;  %v429_v23 = vld [vmem:[%s2577_s7 + $0x270] sm:$0xff] }
  0xa0   : >> { %v765_v25 = vunpack.c.h.s8.bf16 %v429_v23 }
  0xa1   : >> { %1465 = vmatpush2.bf16.msra.mxu0 %v687_v29  ;;  %v796_v29 = vunpack.c.l.s8.bf16 %v446_v17 }
  0xa2   : >> { %1506 = vmatpush2.bf16.msra.mxu1 %v719_v30  ;;  %1516 = vmatprep.subr.bf16.mxu0 %v750_v31  ;;  %v428_v30 = vld [vmem:[%s2577_s7 + $0x268] sm:$0xff] }
  0xa3   : >> { %1557 = vmatprep.subr.bf16.mxu1 %v782_v32  ;;  %v444_v31 = vld [vmem:[%s2577_s7 + $0x2e8] sm:$0xff]  ;;  %v763_v32 = vunpack.c.l.s8.bf16 %v429_v23  ;;  %v762_v34 = vunpack.c.h.s8.bf16 %v428_v30 }
  0xa4   : >> { %1467 = vmatmul.mubr.bf16.vlgmr.msra.gmra.mxu0 %v1154_v28  ;;  %v764_v28 = vunpack.c.l.s8.bf16 %v430_v16  ;;  %v792_v44 = vunpack.c.l.s8.bf16 %v444_v31 }
  0xa5   : >> { %1508 = vmatmul.mubr.bf16.vlgmr.msra.gmra.mxu1 %v1170_v38  ;;  %1517 = vmatpush1.bf16.msra.mxu0 %v749_v39  ;;  %v427_v38 = vld [vmem:[%s2577_s7 + $0x260] sm:$0xff] }
  0xa6   : >> { %1558 = vmatpush1.bf16.msra.mxu1 %v781_v40  ;;  %1518 = vmatprep.subr.bf16.mxu0 %v748_v43  ;;  %v443_v39 = vld [vmem:[%s2577_s7 + $0x2e0] sm:$0xff]  ;;  %v761_v40 = vunpack.c.h.s8.bf16 %v427_v38 }
  0xa7   : >> { %1559 = vmatprep.subr.bf16.mxu1 %v780_v41  ;;  %1548 = vmatprep.mubr.bf16.mxu0 %v1210_v35  ;;  %v794_v35 = vunpack.c.h.s8.bf16 %v444_v31  ;;  %v793_v43 = vunpack.c.h.s8.bf16 %v443_v39  ;;  %v760_v41 = vunpack.c.l.s8.bf16 %v428_v30  ;;  %v467_v30 = vld [vmem:[%s2577_s7 + $0x3a0] sm:$0xff] }
  0xa8   : >> { %1589 = vmatprep.mubr.bf16.mxu1 %v1220_v37  ;;  %v442_v37 = vld [vmem:[%s2577_s7 + $0x2d8] sm:$0xff] }
  0xa9   : >> { %1519 = vmatpush1.bf16.msra.mxu0 %v747_v46  ;;  %v759_v46 = vunpack.c.l.s8.bf16 %v427_v38  ;;  %v466_v38 = vld [vmem:[%s2577_s7 + $0x398] sm:$0xff] }
  0xaa   : >> { %1560 = vmatpush1.bf16.msra.mxu1 %v779_v47  ;;  %1520 = vmatprep.subr.bf16.mxu0 %v746_v48  ;;  %v791_v47 = vunpack.c.l.s8.bf16 %v443_v39  ;;  %v758_v48 = vunpack.c.h.s8.bf16 %v426_v45 }
  0xab   : >> { %1561 = vmatprep.subr.bf16.mxu1 %v778_v49  ;;  %v790_v49 = vunpack.c.h.s8.bf16 %v442_v37 }
  0xad   : >> { %1521 = vmatpush1.bf16.msra.mxu0 %v745_v52  ;;  %v757_v52 = vunpack.c.h.s8.bf16 %v425_v50 }
  0xae   : >> { %1562 = vmatpush1.bf16.msra.mxu1 %v777_v53  ;;  %1522 = vmatprep.subr.bf16.mxu0 %v744_v54  ;;  %v789_v53 = vunpack.c.h.s8.bf16 %v441_v51  ;;  %v756_v54 = vunpack.c.l.s8.bf16 %v426_v45  ;;  %v465_v45 = vld [vmem:[%s2577_s7 + $0x390] sm:$0xff] }
  0xaf   : >> { %1563 = vmatprep.subr.bf16.mxu1 %v776_v55  ;;  %v788_v55 = vunpack.c.l.s8.bf16 %v442_v37 }
  0xb1   : >> { %1523 = vmatpush1.bf16.msra.mxu0 %v743_v58  ;;  %v1173_v58 = vcombine.high %v2676_v12, %v2676_v12  ;;  %v752_v12 = vunpack.c.l.s8.bf16 %v424_v56 }
  0xb2   : >> { %1564 = vmatpush1.bf16.msra.mxu1 %v775_v59  ;;  %1524 = vmatprep.subr.bf16.mxu0 %v742_v60  ;;  %v755_v59 = vunpack.c.l.s8.bf16 %v425_v50  ;;  %v787_v60 = vunpack.c.l.s8.bf16 %v441_v51  ;;  %v464_v50 = vld [vmem:[%s2577_s7 + $0x388] sm:$0xff] }
  0xb3   : >> { %1565 = vmatprep.subr.bf16.mxu1 %v774_v42  ;;  %v754_v42 = vunpack.c.h.s8.bf16 %v424_v56  ;;  %v463_v56 = vld [vmem:[%s2577_s7 + $0x380] sm:$0xff] }
  0xb5   : >> { %1525 = vmatpush1.bf16.msra.mxu0 %v741_v63  ;;  %v439_v63 = vld [vmem:[%s2577_s7 + $0x2c0] sm:$0xff] }
  0xb6   : >> { %1566 = vmatpush1.bf16.msra.mxu1 %v773_v0  ;;  %1526 = vmatprep.subr.bf16.mxu0 %v740_v1  ;;  %v2724_v0 = vrot.slane %v1173_v58, %v2603_v36  ;;  %v753_v1 = vunpack.c.h.s8.bf16 %v423_v62  ;;  %v783_v9 = vunpack.c.l.s8.bf16 %v439_v63  ;;  %v833_v58 = vunpack.c.h.s8.bf16 %v463_v56 }
  0xb7   : >> { %1567 = vmatprep.subr.bf16.mxu1 %v772_v2  ;;  %v785_v2 = vunpack.c.h.s8.bf16 %v439_v63  ;;  %v831_v63 = vunpack.c.l.s8.bf16 %v463_v56 }
  0xb9   : >> { %1527 = vmatpush1.bf16.msra.mxu0 %v739_v5  ;;  %v470_v5 = vld [vmem:[%s2577_s7 + $0x3b8] sm:$0xff] }
  0xba   : >> { %1568 = vmatpush1.bf16.msra.mxu1 %v771_v6  ;;  %1528 = vmatprep.subr.bf16.mxu0 %v738_v7  ;;  %v1189_v6 = vcombine.high %v2724_v0, %v2724_v0  ;;  %v1196_v7 = vrot.slane %v2682_v19, %v2603_v36  ;;  %v812_v19 = vunpack.c.l.s8.bf16 %v454_v4 }
  0xbb   : >> { %1569 = vmatprep.subr.bf16.mxu1 %v770_v8  ;;  %v751_v8 = vunpack.c.l.s8.bf16 %v423_v62 }
  0xbc   : >> { %v1218_v16 = vcombine.high %v1196_v7, %v1196_v7 }
  0xbd   : >> { %1529 = vmatpush1.bf16.msra.mxu0 %v737_v11  ;;  %v846_v11 = vunpack.c.h.s8.bf16 %v470_v5 }
  0xbe   : >> { %1570 = vmatpush1.bf16.msra.mxu1 %v769_v13  ;;  %1530 = vmatprep.subr.bf16.mxu0 %v736_v14  ;;  %v453_v13 = vld [vmem:[%s2577_s7 + $0x330] sm:$0xff] }
  0xbf   : >> { %1571 = vmatprep.subr.bf16.mxu1 %v768_v15  ;;  %v469_v14 = vld [vmem:[%s2577_s7 + $0x3b0] sm:$0xff]  ;;  %v1217_v15 = vrot.slane %v1189_v6, %v2603_v36  ;;  %v813_v17 = vunpack.c.h.s8.bf16 %v453_v13  ;;  %v811_v24 = vunpack.c.l.s8.bf16 %v453_v13 }
  0xc1   : >> { %1531 = vmatpush1.bf16.msra.mxu0 %v735_v18  ;;  %v845_v18 = vunpack.c.h.s8.bf16 %v469_v14  ;;  %v1221_v23 = vcombine.high %v1217_v15, %v1217_v15 }
  0xc2   : >> { %1572 = vmatpush1.bf16.msra.mxu1 %v767_v20  ;;  %1532 = vmatprep.subr.bf16.mxu0 %v766_v21  ;;  %v844_v20 = vunpack.c.l.s8.bf16 %v470_v5  ;;  %v452_v21 = vld [vmem:[%s2577_s7 + $0x328] sm:$0xff] }
  0xc3   : >> { %1573 = vmatprep.subr.bf16.mxu1 %v798_v22  ;;  %v468_v22 = vld [vmem:[%s2577_s7 + $0x3a8] sm:$0xff] }
  0xc5   : >> { %1533 = vmatpush2.bf16.msra.mxu0 %v765_v25  ;;  %v843_v25 = vunpack.c.l.s8.bf16 %v469_v14 }
  0xc6   : >> { %1574 = vmatpush2.bf16.msra.mxu1 %v797_v26  ;;  %1534 = vmatprep.subr.bf16.mxu0 %v764_v28  ;;  %v810_v26 = vunpack.c.h.s8.bf16 %v452_v21  ;;  %v842_v28 = vunpack.c.h.s8.bf16 %v468_v22 }
  0xc7   : >> { %1575 = vmatprep.subr.bf16.mxu1 %v796_v29  ;;  %v451_v29 = vld [vmem:[%s2577_s7 + $0x320] sm:$0xff] }
  0xc8   : >> { %v809_v31 = vunpack.c.h.s8.bf16 %v451_v29  ;;  %v807_v39 = vunpack.c.l.s8.bf16 %v451_v29  ;;  %v473_v29 = vld [vmem:[%s2577_s7 + $0x3d0] sm:$0xff] }
  0xc9   : >> { %1535 = vmatpush2.bf16.msra.mxu0 %v763_v32  ;;  %v841_v32 = vunpack.c.h.s8.bf16 %v467_v30 }
  0xca   : >> { %1576 = vmatpush2.bf16.msra.mxu1 %v795_v33  ;;  %1536 = vmatprep.subr.bf16.mxu0 %v762_v34  ;;  %v808_v33 = vunpack.c.l.s8.bf16 %v452_v21  ;;  %v840_v34 = vunpack.c.l.s8.bf16 %v468_v22  ;;  %v458_v21 = vld [vmem:[%s2577_s7 + $0x358] sm:$0xff] }
  0xcb   : >> { %1577 = vmatprep.subr.bf16.mxu1 %v794_v35  ;;  %v450_v35 = vld [vmem:[%s2577_s7 + $0x318] sm:$0xff] }
  0xcc   : >> { %v474_v22 = vld [vmem:[%s2577_s7 + $0x3d8] sm:$0xff] }
  0xcd   : >> { %1537 = vmatpush2.bf16.msra.mxu0 %v761_v40  ;;  %v839_v40 = vunpack.c.l.s8.bf16 %v467_v30 }
  0xce   : >> { %1578 = vmatpush2.bf16.msra.mxu1 %v793_v43  ;;  %1538 = vmatprep.subr.bf16.mxu0 %v760_v41  ;;  %v806_v43 = vunpack.c.h.s8.bf16 %v450_v35  ;;  %v838_v41 = vunpack.c.h.s8.bf16 %v466_v38 }
  0xcf   : >> { %1579 = vmatprep.subr.bf16.mxu1 %v792_v44  ;;  %v449_v44 = vld [vmem:[%s2577_s7 + $0x310] sm:$0xff] }
  0xd0   : >> { %v805_v37 = vunpack.c.h.s8.bf16 %v449_v44  ;;  %v803_v51 = vunpack.c.l.s8.bf16 %v449_v44  ;;  %v455_v44 = vld [vmem:[%s2577_s7 + $0x340] sm:$0xff] }
  0xd1   : >> { %1539 = vmatpush2.bf16.msra.mxu0 %v759_v46  ;;  %v837_v46 = vunpack.c.h.s8.bf16 %v465_v45 }
  0xd2   : >> { %1580 = vmatpush2.bf16.msra.mxu1 %v791_v47  ;;  %1540 = vmatprep.subr.bf16.mxu0 %v758_v48  ;;  %v804_v47 = vunpack.c.l.s8.bf16 %v450_v35  ;;  %v836_v48 = vunpack.c.l.s8.bf16 %v466_v38  ;;  %v472_v35 = vld [vmem:[%s2577_s7 + $0x3c8] sm:$0xff]  ;;  %v2762_v38 = vld [vmem:[%s2598_s15 + $0x10] sm:$0xff] }
  0xd3   : >> { %1581 = vmatprep.subr.bf16.mxu1 %v790_v49  ;;  %v448_v49 = vld [vmem:[%s2577_s7 + $0x308] sm:$0xff] }
  0xd5   : >> { %1541 = vmatpush2.bf16.msra.mxu0 %v757_v52  ;;  %v835_v52 = vunpack.c.l.s8.bf16 %v465_v45  ;;  %v471_v45 = vld [vmem:[%s2577_s7 + $0x3c0] sm:$0xff] }
  0xd6   : >> { %1582 = vmatpush2.bf16.msra.mxu1 %v789_v53  ;;  %1542 = vmatprep.subr.bf16.mxu0 %v756_v54  ;;  %v802_v53 = vunpack.c.h.s8.bf16 %v448_v49  ;;  %v834_v54 = vunpack.c.h.s8.bf16 %v464_v50 }
  0xd7   : >> { %1583 = vmatprep.subr.bf16.mxu1 %v788_v55  ;;  %v447_v55 = vld [vmem:[%s2577_s7 + $0x300] sm:$0xff] }
  0xd8   : >> { %v801_v57 = vunpack.c.h.s8.bf16 %v447_v55  ;;  %v799_v62 = vunpack.c.l.s8.bf16 %v447_v55  ;;  %v847_v55 = vunpack.c.l.s8.bf16 %v471_v45 }
  0xd9   : >> { %1543 = vmatpush2.bf16.msra.mxu0 %v755_v59  ;;  %v800_v59 = vunpack.c.l.s8.bf16 %v448_v49  ;;  %v848_v49 = vunpack.c.l.s8.bf16 %v472_v35 }
  0xda   : >> { %1584 = vmatpush2.bf16.msra.mxu1 %v787_v60  ;;  %1544 = vmatprep.subr.bf16.mxu0 %v754_v42  ;;  %v832_v60 = vunpack.c.l.s8.bf16 %v464_v50  ;;  %v462_v42 = vld [vmem:[%s2577_s7 + $0x378] sm:$0xff] }
  0xdb   : >> { %1585 = vmatprep.subr.bf16.mxu1 %v786_v61  ;;  %v478_v61 = vld [vmem:[%s2577_s7 + $0x3f8] sm:$0xff]  ;;  %v828_v6 = vunpack.c.l.s8.bf16 %v462_v42 }
  0xdc   : >> { %v486_v50 = vld [vmem:[%s2577_s7 + $0x438] sm:$0xff] }
  0xdd   : >> { %1545 = vmatpush2.bf16.msra.mxu0 %v753_v1  ;;  %v830_v1 = vunpack.c.h.s8.bf16 %v462_v42  ;;  %v878_v56 = vunpack.c.h.s8.bf16 %v486_v50 }
  0xde   : >> { %1586 = vmatpush2.bf16.msra.mxu1 %v785_v2  ;;  %1546 = vmatprep.subr.bf16.mxu0 %v752_v12  ;;  %v862_v2 = vunpack.c.h.s8.bf16 %v478_v61  ;;  %v461_v12 = vld [vmem:[%s2577_s7 + $0x370] sm:$0xff] }
  0xdf   : >> { %1587 = vmatprep.subr.bf16.mxu1 %v784_v3  ;;  %v477_v3 = vld [vmem:[%s2577_s7 + $0x3f0] sm:$0xff]  ;;  %v829_v4 = vunpack.c.h.s8.bf16 %v461_v12 }
  0xe0   : >> { %v861_v5 = vunpack.c.h.s8.bf16 %v477_v3 }
  0xe1   : >> { %1547 = vmatpush2.bf16.msra.mxu0 %v751_v8  ;;  %v460_v8 = vld [vmem:[%s2577_s7 + $0x368] sm:$0xff] }
  0xe2   : >> { %1588 = vmatpush2.bf16.msra.mxu1 %v783_v9  ;;  %1598 = vmatprep.subr.bf16.mxu0 %v814_v10  ;;  %v476_v9 = vld [vmem:[%s2577_s7 + $0x3e8] sm:$0xff]  ;;  %v827_v10 = vunpack.c.l.s8.bf16 %v461_v12  ;;  %v826_v13 = vunpack.c.h.s8.bf16 %v460_v8 }
  0xe3   : >> { %1639 = vmatprep.subr.bf16.mxu1 %v846_v11  ;;  %v859_v11 = vunpack.c.l.s8.bf16 %v477_v3  ;;  %v858_v14 = vunpack.c.h.s8.bf16 %v476_v9 }
  0xe4   : >> { %1549 = vmatmul.mubr.bf16.vlgmr.msra.gmra.mxu0 %v1196_v7  ;;  %v860_v7 = vunpack.c.l.s8.bf16 %v478_v61 }
  0xe5   : >> { %1590 = vmatmul.mubr.bf16.vlgmr.msra.gmra.mxu1 %v1218_v16  ;;  %1599 = vmatpush1.bf16.msra.mxu0 %v813_v17  ;;  %v475_v16 = vld [vmem:[%s2577_s7 + $0x3e0] sm:$0xff] }
  0xe6   : >> { %1640 = vmatpush1.bf16.msra.mxu1 %v845_v18  ;;  %1600 = vmatprep.subr.bf16.mxu0 %v812_v19  ;;  %v857_v18 = vunpack.c.h.s8.bf16 %v475_v16  ;;  %v824_v19 = vunpack.c.l.s8.bf16 %v460_v8 }
  0xe7   : >> { %1641 = vmatprep.subr.bf16.mxu1 %v844_v20  ;;  %1630 = vmatprep.mubr.bf16.mxu0 %v1217_v15  ;;  %v459_v15 = vld [vmem:[%s2577_s7 + $0x360] sm:$0xff]  ;;  %v856_v20 = vunpack.c.l.s8.bf16 %v476_v9 }
  0xe8   : >> { %1671 = vmatprep.mubr.bf16.mxu1 %v1221_v23  ;;  %v825_v17 = vunpack.c.h.s8.bf16 %v459_v15  ;;  %v823_v23 = vunpack.c.l.s8.bf16 %v459_v15 }
  0xe9   : >> { %1601 = vmatpush1.bf16.msra.mxu0 %v811_v24  ;;  %v855_v24 = vunpack.c.l.s8.bf16 %v475_v16 }
  0xea   : >> { %1642 = vmatpush1.bf16.msra.mxu1 %v843_v25  ;;  %1602 = vmatprep.subr.bf16.mxu0 %v810_v26  ;;  %v822_v25 = vunpack.c.h.s8.bf16 %v458_v21  ;;  %v854_v26 = vunpack.c.h.s8.bf16 %v474_v22 }
  0xeb   : >> { %1643 = vmatprep.subr.bf16.mxu1 %v842_v28  ;;  %v457_v28 = vld [vmem:[%s2577_s7 + $0x350] sm:$0xff] }
  0xec   : >> { %v821_v30 = vunpack.c.h.s8.bf16 %v457_v28 }
  0xed   : >> { %1603 = vmatpush1.bf16.msra.mxu0 %v809_v31  ;;  %v853_v31 = vunpack.c.h.s8.bf16 %v473_v29 }
  0xee   : >> { %1644 = vmatpush1.bf16.msra.mxu1 %v841_v32  ;;  %1604 = vmatprep.subr.bf16.mxu0 %v808_v33  ;;  %v820_v32 = vunpack.c.l.s8.bf16 %v458_v21  ;;  %v852_v33 = vunpack.c.l.s8.bf16 %v474_v22 }
  0xef   : >> { %1645 = vmatprep.subr.bf16.mxu1 %v840_v34  ;;  %v456_v34 = vld [vmem:[%s2577_s7 + $0x348] sm:$0xff] }
  0xf1   : >> { %1605 = vmatpush1.bf16.msra.mxu0 %v807_v39  ;;  %v819_v39 = vunpack.c.l.s8.bf16 %v457_v28 }
  0xf2   : >> { %1646 = vmatpush1.bf16.msra.mxu1 %v839_v40  ;;  %1606 = vmatprep.subr.bf16.mxu0 %v806_v43  ;;  %v851_v40 = vunpack.c.l.s8.bf16 %v473_v29  ;;  %v818_v43 = vunpack.c.h.s8.bf16 %v456_v34 }
  0xf3   : >> { %1647 = vmatprep.subr.bf16.mxu1 %v838_v41  ;;  %v850_v41 = vunpack.c.h.s8.bf16 %v472_v35 }
  0xf5   : >> { %1607 = vmatpush1.bf16.msra.mxu0 %v805_v37  ;;  %v2768_v37 = vrot.slane %v2762_v38, %v2603_v36 }
  0xf6   : >> { %1648 = vmatpush1.bf16.msra.mxu1 %v837_v46  ;;  %1608 = vmatprep.subr.bf16.mxu0 %v804_v47  ;;  %v817_v46 = vunpack.c.h.s8.bf16 %v455_v44  ;;  %v849_v47 = vunpack.c.h.s8.bf16 %v471_v45 }
  0xf7   : >> { %1649 = vmatprep.subr.bf16.mxu1 %v836_v48  ;;  %v816_v48 = vunpack.c.l.s8.bf16 %v456_v34 }
  0xf9   : >> { %1609 = vmatpush1.bf16.msra.mxu0 %v803_v51  ;;  %v502_v51 = vld [vmem:[%s2577_s7 + $0x4b8] sm:$0xff] }
  0xfa   : >> { %1650 = vmatpush1.bf16.msra.mxu1 %v835_v52  ;;  %1610 = vmatprep.subr.bf16.mxu0 %v802_v53  ;;  %v1237_v52 = vcombine.high %v2768_v37, %v2768_v37  ;;  %v1203_v53 = vrot.slane %v2724_v0, %v2603_v36  ;;  %v876_v0 = vunpack.c.l.s8.bf16 %v486_v50 }
  0xfb   : >> { %1651 = vmatprep.subr.bf16.mxu1 %v834_v54  ;;  %v815_v54 = vunpack.c.l.s8.bf16 %v455_v44 }
  0xfc   : >> { %v1219_v42 = vcombine.high %v1203_v53, %v1203_v53 }
  0xfd   : >> { %1611 = vmatpush1.bf16.msra.mxu0 %v801_v57  ;;  %v910_v57 = vunpack.c.h.s8.bf16 %v502_v51 }
  0xfe   : >> { %1652 = vmatpush1.bf16.msra.mxu1 %v833_v58  ;;  %1612 = vmatprep.subr.bf16.mxu0 %v800_v59  ;;  %v485_v58 = vld [vmem:[%s2577_s7 + $0x430] sm:$0xff] }
  0xff   : >> { %1653 = vmatprep.subr.bf16.mxu1 %v832_v60  ;;  %v501_v59 = vld [vmem:[%s2577_s7 + $0x4b0] sm:$0xff]  ;;  %v1259_v60 = vrot.slane %v1237_v52, %v2603_v36  ;;  %v877_v61 = vunpack.c.h.s8.bf16 %v485_v58 }
 0x101   : >> { %1613 = vmatpush1.bf16.msra.mxu0 %v799_v62  ;;  %v909_v62 = vunpack.c.h.s8.bf16 %v501_v59  ;;  %v1269_v12 = vcombine.high %v1259_v60, %v1259_v60 }
 0x102   : >> { %1654 = vmatpush1.bf16.msra.mxu1 %v831_v63  ;;  %1614 = vmatprep.subr.bf16.mxu0 %v830_v1  ;;  %v908_v63 = vunpack.c.l.s8.bf16 %v502_v51  ;;  %v484_v1 = vld [vmem:[%s2577_s7 + $0x428] sm:$0xff] }
 0x103   : >> { %1655 = vmatprep.subr.bf16.mxu1 %v862_v2  ;;  %v500_v2 = vld [vmem:[%s2577_s7 + $0x4a8] sm:$0xff]  ;;  %v872_v22 = vunpack.c.l.s8.bf16 %v484_v1 }
 0x105   : >> { %1615 = vmatpush2.bf16.msra.mxu0 %v829_v4 }
 0x106   : >> { %1656 = vmatpush2.bf16.msra.mxu1 %v861_v5  ;;  %1616 = vmatprep.subr.bf16.mxu0 %v828_v6  ;;  %v875_v6 = vunpack.c.l.s8.bf16 %v485_v58 }
 0x107   : >> { %1657 = vmatprep.subr.bf16.mxu1 %v860_v7  ;;  %v907_v7 = vunpack.c.l.s8.bf16 %v501_v59  ;;  %v493_v59 = vld [vmem:[%s2577_s7 + $0x470] sm:$0xff] }
 0x109   : >> { %1617 = vmatpush2.bf16.msra.mxu0 %v827_v10  ;;  %v874_v10 = vunpack.c.h.s8.bf16 %v484_v1  ;;  %v508_v1 = vld [vmem:[%s2577_s7 + $0x4e8] sm:$0xff] }
 0x10a   : >> { %1658 = vmatpush2.bf16.msra.mxu1 %v859_v11  ;;  %1618 = vmatprep.subr.bf16.mxu0 %v826_v13  ;;  %v906_v11 = vunpack.c.h.s8.bf16 %v500_v2  ;;  %v483_v13 = vld [vmem:[%s2577_s7 + $0x420] sm:$0xff] }
 0x10b   : >> { %1659 = vmatprep.subr.bf16.mxu1 %v858_v14  ;;  %v499_v14 = vld [vmem:[%s2577_s7 + $0x4a0] sm:$0xff] }
 0x10c   : >> { %v903_v28 = vunpack.c.l.s8.bf16 %v499_v14 }
 0x10d   : >> { %1619 = vmatpush2.bf16.msra.mxu0 %v825_v17 }
 0x10e   : >> { %1660 = vmatpush2.bf16.msra.mxu1 %v857_v18  ;;  %1620 = vmatprep.subr.bf16.mxu0 %v824_v19  ;;  %v873_v18 = vunpack.c.h.s8.bf16 %v483_v13  ;;  %v905_v19 = vunpack.c.h.s8.bf16 %v499_v14  ;;  %v506_v14 = vld [vmem:[%s2577_s7 + $0x4d8] sm:$0xff] }
 0x10f   : >> { %1661 = vmatprep.subr.bf16.mxu1 %v856_v20 }
 0x111   : >> { %1621 = vmatpush2.bf16.msra.mxu0 %v823_v23  ;;  %v904_v23 = vunpack.c.l.s8.bf16 %v500_v2  ;;  %v891_v2 = vunpack.c.l.s8.bf16 %v493_v59 }
 0x112   : >> { %1662 = vmatpush2.bf16.msra.mxu1 %v855_v24  ;;  %1622 = vmatprep.subr.bf16.mxu0 %v822_v25  ;;  %v482_v24 = vld [vmem:[%s2577_s7 + $0x418] sm:$0xff] }
 0x113   : >> { %1663 = vmatprep.subr.bf16.mxu1 %v854_v26  ;;  %v498_v25 = vld [vmem:[%s2577_s7 + $0x498] sm:$0xff]  ;;  %v871_v26 = vunpack.c.l.s8.bf16 %v483_v13  ;;  %v870_v29 = vunpack.c.h.s8.bf16 %v482_v24  ;;  %v868_v35 = vunpack.c.l.s8.bf16 %v482_v24 }
 0x114   : >> { %v490_v13 = vld [vmem:[%s2577_s7 + $0x458] sm:$0xff] }
 0x115   : >> { %1623 = vmatpush2.bf16.msra.mxu0 %v821_v30  ;;  %v902_v30 = vunpack.c.h.s8.bf16 %v498_v25  ;;  %v884_v24 = vunpack.c.l.s8.bf16 %v490_v13 }
 0x116   : >> { %1664 = vmatpush2.bf16.msra.mxu1 %v853_v31  ;;  %1624 = vmatprep.subr.bf16.mxu0 %v820_v32  ;;  %v481_v31 = vld [vmem:[%s2577_s7 + $0x410] sm:$0xff] }
 0x117   : >> { %1665 = vmatprep.subr.bf16.mxu1 %v852_v33  ;;  %v497_v32 = vld [vmem:[%s2577_s7 + $0x490] sm:$0xff]  ;;  %v869_v33 = vunpack.c.h.s8.bf16 %v481_v31 }
 0x118   : >> { %v901_v34 = vunpack.c.h.s8.bf16 %v497_v32  ;;  %v899_v44 = vunpack.c.l.s8.bf16 %v497_v32 }
 0x119   : >> { %1625 = vmatpush2.bf16.msra.mxu0 %v819_v39  ;;  %v900_v39 = vunpack.c.l.s8.bf16 %v498_v25  ;;  %v916_v25 = vunpack.c.l.s8.bf16 %v506_v14 }
 0x11a   : >> { %1666 = vmatpush2.bf16.msra.mxu1 %v851_v40  ;;  %1626 = vmatprep.subr.bf16.mxu0 %v818_v43  ;;  %v480_v40 = vld [vmem:[%s2577_s7 + $0x408] sm:$0xff] }
 0x11b   : >> { %1667 = vmatprep.subr.bf16.mxu1 %v850_v41  ;;  %v496_v43 = vld [vmem:[%s2577_s7 + $0x488] sm:$0xff]  ;;  %v867_v41 = vunpack.c.l.s8.bf16 %v481_v31  ;;  %v866_v45 = vunpack.c.h.s8.bf16 %v480_v40  ;;  %v864_v51 = vunpack.c.l.s8.bf16 %v480_v40 }
 0x11c   : >> { %v896_v52 = vunpack.c.l.s8.bf16 %v496_v43 }
 0x11d   : >> { %1627 = vmatpush2.bf16.msra.mxu0 %v817_v46  ;;  %v898_v46 = vunpack.c.h.s8.bf16 %v496_v43 }
 0x11e   : >> { %1668 = vmatpush2.bf16.msra.mxu1 %v849_v47  ;;  %1628 = vmatprep.subr.bf16.mxu0 %v816_v48  ;;  %v479_v47 = vld [vmem:[%s2577_s7 + $0x400] sm:$0xff] }
 0x11f   : >> { %1669 = vmatprep.subr.bf16.mxu1 %v848_v49  ;;  %v495_v48 = vld [vmem:[%s2577_s7 + $0x480] sm:$0xff]  ;;  %v865_v49 = vunpack.c.h.s8.bf16 %v479_v47 }
 0x120   : >> { %v897_v50 = vunpack.c.h.s8.bf16 %v495_v48 }
 0x121   : >> { %1629 = vmatpush2.bf16.msra.mxu0 %v815_v54  ;;  %v510_v54 = vld [vmem:[%s2577_s7 + $0x4f8] sm:$0xff] }
 0x122   : >> { %1670 = vmatpush2.bf16.msra.mxu1 %v847_v55  ;;  %1680 = vmatprep.subr.bf16.mxu0 %v878_v56  ;;  %v863_v55 = vunpack.c.l.s8.bf16 %v479_v47  ;;  %v895_v56 = vunpack.c.l.s8.bf16 %v495_v48  ;;  %v926_v58 = vunpack.c.h.s8.bf16 %v510_v54  ;;  %v1245_v47 = vrot.slane %v2768_v37, %v2603_v36 }
 0x123   : >> { %1721 = vmatprep.subr.bf16.mxu1 %v910_v57 }
 0x124   : >> { %v1386_v3 = vpop.f32.mrf.mxu0  ;;  %1631 = vmatmul.mubr.bf16.vlgmr.msra.gmra.mxu0 %v1203_v53  ;;  %v494_v53 = vld [vmem:[%s2577_s7 + $0x478] sm:$0xff] }
 0x125   : >> { %v1427_v4 = vpop.f32.mrf.mxu1  ;;  %1672 = vmatmul.mubr.bf16.vlgmr.msra.gmra.mxu1 %v1219_v42  ;;  %1681 = vmatpush1.bf16.msra.mxu0 %v877_v61  ;;  %v894_v57 = vunpack.c.h.s8.bf16 %v494_v53  ;;  %v893_v42 = vunpack.c.h.s8.bf16 %v493_v59  ;;  %v516_v59 = vld [vmem:[%s2577_s7 + $0x528] sm:$0xff] }
 0x126   : >> { %v2781_v5 = vadd.f32 %v1427_v4, %v1386_v3  ;;  %1722 = vmatpush1.bf16.msra.mxu1 %v909_v62  ;;  %v1388_v8 = vpop.f32.mrf.mxu0  ;;  %1682 = vmatprep.subr.bf16.mxu0 %v876_v0  ;;  %v892_v62 = vunpack.c.l.s8.bf16 %v494_v53  ;;  %v924_v0 = vunpack.c.l.s8.bf16 %v510_v54  ;;  %v922_v4 = vunpack.c.h.s8.bf16 %v508_v1  ;;  %v533_v53 = vld [vmem:[%s2577_s7 + $0x5b0] sm:$0xff] }
 0x127   : >> { %v1429_v9 = vpop.f32.mrf.mxu1  ;;  %1723 = vmatprep.subr.bf16.mxu1 %v908_v63  ;;  %1712 = vmatprep.mubr.bf16.mxu0 %v1259_v60  ;;  %v509_v60 = vld [vmem:[%s2577_s7 + $0x4f0] sm:$0xff]  ;;  %v492_v63 = vld [vmem:[%s2577_s7 + $0x468] sm:$0xff] }
 0x128   : >> { %v2785_v15 = vadd.f32 %v1429_v9, %v1388_v8  ;;  %1753 = vmatprep.mubr.bf16.mxu1 %v1269_v12  ;;  %v1390_v16 = vpop.f32.mrf.mxu0  ;;  %v925_v61 = vunpack.c.h.s8.bf16 %v509_v60  ;;  %v923_v12 = vunpack.c.l.s8.bf16 %v509_v60  ;;  %v890_v3 = vunpack.c.h.s8.bf16 %v492_v63  ;;  %v532_v60 = vld [vmem:[%s2577_s7 + $0x5a8] sm:$0xff] }
 0x129   : >> { %v1431_v17 = vpop.f32.mrf.mxu1  ;;  %1683 = vmatpush1.bf16.msra.mxu0 %v875_v6  ;;  %v491_v6 = vld [vmem:[%s2577_s7 + $0x460] sm:$0xff] }
 0x12a   : >> { %1724 = vmatpush1.bf16.msra.mxu1 %v907_v7  ;;  %v1391_v20 = vpop.f32.mrf.mxu0  ;;  %1684 = vmatprep.subr.bf16.mxu0 %v874_v10  ;;  %v507_v7 = vld [vmem:[%s2577_s7 + $0x4e0] sm:$0xff]  ;;  %v889_v8 = vunpack.c.h.s8.bf16 %v491_v6  ;;  %v888_v10 = vunpack.c.l.s8.bf16 %v492_v63  ;;  %v887_v16 = vunpack.c.l.s8.bf16 %v491_v6 }
 0x12b   : >> { %v1432_v21 = vpop.f32.mrf.mxu1  ;;  %1725 = vmatprep.subr.bf16.mxu1 %v906_v11  ;;  %v921_v9 = vunpack.c.h.s8.bf16 %v507_v7  ;;  %v920_v11 = vunpack.c.l.s8.bf16 %v508_v1  ;;  %v919_v17 = vunpack.c.l.s8.bf16 %v507_v7  ;;  %v489_v20 = vld [vmem:[%s2577_s7 + $0x450] sm:$0xff]  ;;  %v971_v1 = vunpack.c.l.s8.bf16 %v533_v53  ;;  %v515_v6 = vld [vmem:[%s2577_s7 + $0x520] sm:$0xff] }
 0x12c   : >> { %v505_v21 = vld [vmem:[%s2577_s7 + $0x4d0] sm:$0xff]  ;;  %v531_v7 = vld [vmem:[%s2577_s7 + $0x5a0] sm:$0xff] }
 0x12d   : >> { %1685 = vmatpush1.bf16.msra.mxu0 %v873_v18  ;;  %v886_v18 = vunpack.c.h.s8.bf16 %v490_v13  ;;  %v915_v31 = vunpack.c.l.s8.bf16 %v505_v21  ;;  %v937_v13 = vunpack.c.h.s8.bf16 %v515_v6 }
 0x12e   : >> { %1726 = vmatpush1.bf16.msra.mxu1 %v905_v19  ;;  %1686 = vmatprep.subr.bf16.mxu0 %v872_v22  ;;  %v918_v19 = vunpack.c.h.s8.bf16 %v506_v14  ;;  %v885_v22 = vunpack.c.h.s8.bf16 %v489_v20  ;;  %v969_v14 = vunpack.c.h.s8.bf16 %v531_v7 }
 0x12f   : >> { %1727 = vmatprep.subr.bf16.mxu1 %v904_v23  ;;  %v917_v23 = vunpack.c.h.s8.bf16 %v505_v21  ;;  %v935_v21 = vunpack.c.l.s8.bf16 %v515_v6  ;;  %v522_v6 = vld [vmem:[%s2577_s7 + $0x558] sm:$0xff] }
 0x131   : >> { %1687 = vmatpush1.bf16.msra.mxu0 %v871_v26  ;;  %v488_v26 = vld [vmem:[%s2577_s7 + $0x448] sm:$0xff] }
 0x132   : >> { %1728 = vmatpush1.bf16.msra.mxu1 %v903_v28  ;;  %1688 = vmatprep.subr.bf16.mxu0 %v870_v29  ;;  %v504_v28 = vld [vmem:[%s2577_s7 + $0x4c8] sm:$0xff]  ;;  %v1222_v29 = vcombine.high %v2762_v38, %v2762_v38  ;;  %v882_v32 = vunpack.c.h.s8.bf16 %v488_v26  ;;  %v880_v38 = vunpack.c.l.s8.bf16 %v488_v26  ;;  %v529_v26 = vld [vmem:[%s2577_s7 + $0x590] sm:$0xff] }
 0x133   : >> { %1729 = vmatprep.subr.bf16.mxu1 %v902_v30  ;;  %v883_v30 = vunpack.c.l.s8.bf16 %v489_v20  ;;  %v530_v20 = vld [vmem:[%s2577_s7 + $0x598] sm:$0xff] }
 0x135   : >> { %1689 = vmatpush1.bf16.msra.mxu0 %v869_v33  ;;  %v914_v33 = vunpack.c.h.s8.bf16 %v504_v28 }
 0x136   : >> { %1730 = vmatpush1.bf16.msra.mxu1 %v901_v34  ;;  %1690 = vmatprep.subr.bf16.mxu0 %v868_v35  ;;  %v487_v34 = vld [vmem:[%s2577_s7 + $0x440] sm:$0xff] }
 0x137   : >> { %1731 = vmatprep.subr.bf16.mxu1 %v900_v39  ;;  %v503_v35 = vld [vmem:[%s2577_s7 + $0x4c0] sm:$0xff]  ;;  %v2814_v39 = vrot.slane %v1222_v29, %v2603_v36  ;;  %v881_v40 = vunpack.c.h.s8.bf16 %v487_v34  ;;  %v879_v48 = vunpack.c.l.s8.bf16 %v487_v34  ;;  %v965_v29 = vunpack.c.h.s8.bf16 %v529_v26 }
 0x138   : >> { %v913_v43 = vunpack.c.h.s8.bf16 %v503_v35 }
 0x139   : >> { %1691 = vmatpush1.bf16.msra.mxu0 %v867_v41  ;;  %v912_v41 = vunpack.c.l.s8.bf16 %v504_v28 }
 0x13a   : >> { %1732 = vmatpush1.bf16.msra.mxu1 %v899_v44  ;;  %1692 = vmatprep.subr.bf16.mxu0 %v866_v45  ;;  %v518_v44 = vld [vmem:[%s2577_s7 + $0x538] sm:$0xff] }
 0x13b   : >> { %1733 = vmatprep.subr.bf16.mxu1 %v898_v46  ;;  %v534_v45 = vld [vmem:[%s2577_s7 + $0x5b8] sm:$0xff]  ;;  %v1238_v46 = vcombine.high %v2814_v39, %v2814_v39  ;;  %v940_v37 = vunpack.c.l.s8.bf16 %v518_v44 }
 0x13d   : >> { %1693 = vmatpush1.bf16.msra.mxu0 %v865_v49  ;;  %v911_v49 = vunpack.c.l.s8.bf16 %v503_v35  ;;  %v1266_v54 = vrot.slane %v1238_v46, %v2603_v36  ;;  %v963_v35 = vunpack.c.l.s8.bf16 %v529_v26 }
 0x13e   : >> { %1734 = vmatpush1.bf16.msra.mxu1 %v897_v50  ;;  %1694 = vmatprep.subr.bf16.mxu0 %v864_v51  ;;  %v942_v50 = vunpack.c.h.s8.bf16 %v518_v44  ;;  %v974_v51 = vunpack.c.h.s8.bf16 %v534_v45 }
 0x13f   : >> { %1735 = vmatprep.subr.bf16.mxu1 %v896_v52  ;;  %v517_v52 = vld [vmem:[%s2577_s7 + $0x530] sm:$0xff] }
 0x140   : >> { %v939_v63 = vunpack.c.l.s8.bf16 %v517_v52 }
 0x141   : >> { %1695 = vmatpush1.bf16.msra.mxu0 %v863_v55  ;;  %v1267_v55 = vcombine.high %v1245_v47, %v1245_v47 }
 0x142   : >> { %1736 = vmatpush1.bf16.msra.mxu1 %v895_v56  ;;  %1696 = vmatprep.subr.bf16.mxu0 %v894_v57  ;;  %v941_v56 = vunpack.c.h.s8.bf16 %v517_v52  ;;  %v973_v57 = vunpack.c.h.s8.bf16 %v533_v53 }
 0x143   : >> { %1737 = vmatprep.subr.bf16.mxu1 %v926_v58  ;;  %v972_v58 = vunpack.c.l.s8.bf16 %v534_v45 }
 0x145   : >> { %1697 = vmatpush2.bf16.msra.mxu0 %v893_v42  ;;  %v1270_v42 = vcombine.high %v1266_v54, %v1266_v54 }
 0x146   : >> { %1738 = vmatpush2.bf16.msra.mxu1 %v925_v61  ;;  %1698 = vmatprep.subr.bf16.mxu0 %v892_v62 }
 0x147   : >> { %1739 = vmatprep.subr.bf16.mxu1 %v924_v0 }
 0x149   : >> { %1699 = vmatpush2.bf16.msra.mxu0 %v891_v2 }
 0x14a   : >> { %1740 = vmatpush2.bf16.msra.mxu1 %v923_v12  ;;  %1700 = vmatprep.subr.bf16.mxu0 %v890_v3  ;;  %v938_v3 = vunpack.c.h.s8.bf16 %v516_v59 }
 0x14b   : >> { %1741 = vmatprep.subr.bf16.mxu1 %v922_v4  ;;  %v970_v4 = vunpack.c.h.s8.bf16 %v532_v60 }
 0x14d   : >> { %1701 = vmatpush2.bf16.msra.mxu0 %v889_v8 }
 0x14e   : >> { %1742 = vmatpush2.bf16.msra.mxu1 %v921_v9  ;;  %1702 = vmatprep.subr.bf16.mxu0 %v888_v10 }
 0x14f   : >> { %1743 = vmatprep.subr.bf16.mxu1 %v920_v11 }
 0x151   : >> { %1703 = vmatpush2.bf16.msra.mxu0 %v887_v16 }
 0x152   : >> { %1744 = vmatpush2.bf16.msra.mxu1 %v919_v17  ;;  %1704 = vmatprep.subr.bf16.mxu0 %v886_v18  ;;  %v936_v18 = vunpack.c.l.s8.bf16 %v516_v59  ;;  %v524_v59 = vld [vmem:[%s2577_s7 + $0x568] sm:$0xff] }
 0x153   : >> { %1745 = vmatprep.subr.bf16.mxu1 %v918_v19  ;;  %v514_v19 = vld [vmem:[%s2577_s7 + $0x518] sm:$0xff] }
 0x155   : >> { %1705 = vmatpush2.bf16.msra.mxu0 %v885_v22  ;;  %v967_v22 = vunpack.c.l.s8.bf16 %v531_v7  ;;  %v538_v7 = vld [vmem:[%s2577_s7 + $0x5d8] sm:$0xff] }
 0x156   : >> { %1746 = vmatpush2.bf16.msra.mxu1 %v917_v23  ;;  %1706 = vmatprep.subr.bf16.mxu0 %v884_v24  ;;  %v934_v23 = vunpack.c.h.s8.bf16 %v514_v19  ;;  %v966_v24 = vunpack.c.h.s8.bf16 %v530_v20 }
 0x157   : >> { %1747 = vmatprep.subr.bf16.mxu1 %v916_v25  ;;  %v513_v25 = vld [vmem:[%s2577_s7 + $0x510] sm:$0xff] }
 0x158   : >> { %v933_v28 = vunpack.c.h.s8.bf16 %v513_v25  ;;  %v931_v34 = vunpack.c.l.s8.bf16 %v513_v25 }
 0x159   : >> { %1707 = vmatpush2.bf16.msra.mxu0 %v883_v30  ;;  %v932_v30 = vunpack.c.l.s8.bf16 %v514_v19  ;;  %v980_v19 = vunpack.c.l.s8.bf16 %v538_v7 }
 0x15a   : >> { %1748 = vmatpush2.bf16.msra.mxu1 %v915_v31  ;;  %1708 = vmatprep.subr.bf16.mxu0 %v882_v32  ;;  %v964_v31 = vunpack.c.l.s8.bf16 %v530_v20  ;;  %v512_v32 = vld [vmem:[%s2577_s7 + $0x508] sm:$0xff] }
 0x15b   : >> { %1749 = vmatprep.subr.bf16.mxu1 %v914_v33  ;;  %v528_v33 = vld [vmem:[%s2577_s7 + $0x588] sm:$0xff]  ;;  %v928_v46 = vunpack.c.l.s8.bf16 %v512_v32 }
 0x15c   : >> { %v520_v20 = vld [vmem:[%s2577_s7 + $0x548] sm:$0xff] }
 0x15d   : >> { %1709 = vmatpush2.bf16.msra.mxu0 %v881_v40  ;;  %v930_v40 = vunpack.c.h.s8.bf16 %v512_v32  ;;  %v946_v25 = vunpack.c.h.s8.bf16 %v520_v20 }
 0x15e   : >> { %1750 = vmatpush2.bf16.msra.mxu1 %v913_v43  ;;  %1710 = vmatprep.subr.bf16.mxu0 %v880_v38  ;;  %v962_v43 = vunpack.c.h.s8.bf16 %v528_v33  ;;  %v511_v38 = vld [vmem:[%s2577_s7 + $0x500] sm:$0xff] }
 0x15f   : >> { %1751 = vmatprep.subr.bf16.mxu1 %v912_v41  ;;  %v527_v41 = vld [vmem:[%s2577_s7 + $0x580] sm:$0xff]  ;;  %v929_v44 = vunpack.c.h.s8.bf16 %v511_v38 }
 0x160   : >> { %v961_v45 = vunpack.c.h.s8.bf16 %v527_v41 }
 0x161   : >> { %1711 = vmatpush2.bf16.msra.mxu0 %v879_v48  ;;  %v526_v48 = vld [vmem:[%s2577_s7 + $0x578] sm:$0xff] }
 0x162   : >> { %1752 = vmatpush2.bf16.msra.mxu1 %v911_v49  ;;  %1762 = vmatprep.subr.bf16.mxu0 %v942_v50  ;;  %v542_v49 = vld [vmem:[%s2577_s7 + $0x5f8] sm:$0xff]  ;;  %v927_v50 = vunpack.c.l.s8.bf16 %v511_v38  ;;  %v958_v52 = vunpack.c.h.s8.bf16 %v526_v48  ;;  %v1252_v38 = vrot.slane %v2814_v39, %v2603_v36 }
 0x163   : >> { %1803 = vmatprep.subr.bf16.mxu1 %v974_v51  ;;  %v959_v51 = vunpack.c.l.s8.bf16 %v527_v41  ;;  %v990_v53 = vunpack.c.h.s8.bf16 %v542_v49 }
 0x164   : >> { %v1468_v61 = vpop.f32.mrf.mxu0  ;;  %1713 = vmatmul.mubr.bf16.vlgmr.msra.gmra.mxu0 %v1245_v47  ;;  %v960_v47 = vunpack.c.l.s8.bf16 %v528_v33  ;;  %v944_v33 = vunpack.c.l.s8.bf16 %v520_v20  ;;  %v561_v20 = vld [vmem:[%s2577_s7 + $0x690] sm:$0xff] }
 0x165   : >> { %v1509_v62 = vpop.f32.mrf.mxu1  ;;  %1754 = vmatmul.mubr.bf16.vlgmr.msra.gmra.mxu1 %v1267_v55  ;;  %v1469_v0 = vadd.f32 %v1468_v61, %v2781_v5  ;;  %1763 = vmatpush1.bf16.msra.mxu0 %v941_v56  ;;  %v541_v55 = vld [vmem:[%s2577_s7 + $0x5f0] sm:$0xff] }
 0x166   : >> { %1804 = vmatpush1.bf16.msra.mxu1 %v973_v57  ;;  %v1470_v2 = vpop.f32.mrf.mxu0  ;;  %1764 = vmatprep.subr.bf16.mxu0 %v940_v37  ;;  %v989_v57 = vunpack.c.h.s8.bf16 %v541_v55  ;;  %v956_v37 = vunpack.c.l.s8.bf16 %v526_v48  ;;  %v987_v61 = vunpack.c.l.s8.bf16 %v541_v55  ;;  %v565_v48 = vld [vmem:[%s2577_s7 + $0x6b0] sm:$0xff]  ;;  %v564_v55 = vld [vmem:[%s2577_s7 + $0x6a8] sm:$0xff] }
 0x167   : >> { %v1511_v12 = vpop.f32.mrf.mxu1  ;;  %1805 = vmatprep.subr.bf16.mxu1 %v972_v58  ;;  %v2830_v8 = vadd.f32 %v1509_v62, %v1469_v0  ;;  %v1471_v9 = vadd.f32 %v1470_v2, %v2785_v15  ;;  %1794 = vmatprep.mubr.bf16.mxu0 %v1266_v54  ;;  %v968_v15 = vunpack.c.l.s8.bf16 %v532_v60  ;;  %v525_v54 = vld [vmem:[%s2577_s7 + $0x570] sm:$0xff]  ;;  %v988_v58 = vunpack.c.l.s8.bf16 %v542_v49  ;;  %v540_v60 = vld [vmem:[%s2577_s7 + $0x5e8] sm:$0xff] }
 0x168   : >> { %1835 = vmatprep.mubr.bf16.mxu1 %v1270_v42  ;;  %v1472_v5 = vpop.f32.mrf.mxu0  ;;  %v957_v56 = vunpack.c.h.s8.bf16 %v525_v54  ;;  %v955_v42 = vunpack.c.l.s8.bf16 %v525_v54  ;;  %v954_v62 = vunpack.c.h.s8.bf16 %v524_v59  ;;  %v986_v0 = vunpack.c.h.s8.bf16 %v540_v60  ;;  %v548_v54 = vld [vmem:[%s2577_s7 + $0x628] sm:$0xff] }
 0x169   : >> { %v1513_v10 = vpop.f32.mrf.mxu1  ;;  %v2833_v11 = vadd.f32 %v1511_v12, %v1471_v9  ;;  %1765 = vmatpush1.bf16.msra.mxu0 %v939_v63  ;;  %v523_v63 = vld [vmem:[%s2577_s7 + $0x560] sm:$0xff] }
 0x16a   : >> { %1806 = vmatpush1.bf16.msra.mxu1 %v971_v1  ;;  %v1473_v16 = vpop.f32.mrf.mxu0  ;;  %1766 = vmatprep.subr.bf16.mxu0 %v938_v3  ;;  %v539_v1 = vld [vmem:[%s2577_s7 + $0x5e0] sm:$0xff]  ;;  %v953_v2 = vunpack.c.h.s8.bf16 %v523_v63  ;;  %v952_v3 = vunpack.c.l.s8.bf16 %v524_v59  ;;  %v951_v9 = vunpack.c.l.s8.bf16 %v523_v63  ;;  %v950_v10 = vunpack.c.h.s8.bf16 %v522_v6 }
 0x16b   : >> { %v1514_v17 = vpop.f32.mrf.mxu1  ;;  %1807 = vmatprep.subr.bf16.mxu1 %v970_v4  ;;  %v985_v12 = vunpack.c.h.s8.bf16 %v539_v1  ;;  %v984_v4 = vunpack.c.l.s8.bf16 %v540_v60  ;;  %v983_v5 = vunpack.c.l.s8.bf16 %v539_v1  ;;  %v537_v16 = vld [vmem:[%s2577_s7 + $0x5d0] sm:$0xff]  ;;  %v1035_v60 = vunpack.c.l.s8.bf16 %v565_v48  ;;  %v547_v63 = vld [vmem:[%s2577_s7 + $0x620] sm:$0xff] }
 0x16c   : >> { %v563_v1 = vld [vmem:[%s2577_s7 + $0x6a0] sm:$0xff] }
 0x16d   : >> { %1767 = vmatpush1.bf16.msra.mxu0 %v937_v13  ;;  %v982_v13 = vunpack.c.h.s8.bf16 %v538_v7  ;;  %v1033_v7 = vunpack.c.h.s8.bf16 %v563_v1 }
 0x16e   : >> { %1808 = vmatpush1.bf16.msra.mxu1 %v969_v14  ;;  %1768 = vmatprep.subr.bf16.mxu0 %v936_v18  ;;  %v521_v14 = vld [vmem:[%s2577_s7 + $0x550] sm:$0xff]  ;;  %v981_v18 = vunpack.c.h.s8.bf16 %v537_v16 }
 0x16f   : >> { %1809 = vmatprep.subr.bf16.mxu1 %v968_v15  ;;  %v949_v17 = vunpack.c.h.s8.bf16 %v521_v14  ;;  %v948_v15 = vunpack.c.l.s8.bf16 %v522_v6  ;;  %v1001_v6 = vunpack.c.h.s8.bf16 %v547_v63 }
 0x171   : >> { %1769 = vmatpush1.bf16.msra.mxu0 %v935_v21  ;;  %v536_v21 = vld [vmem:[%s2577_s7 + $0x5c8] sm:$0xff] }
 0x172   : >> { %1810 = vmatpush1.bf16.msra.mxu1 %v967_v22  ;;  %1770 = vmatprep.subr.bf16.mxu0 %v934_v23  ;;  %v2858_v22 = vld [vmem:[%s2598_s15 + $0x18] sm:$0xff]  ;;  %v947_v23 = vunpack.c.l.s8.bf16 %v521_v14  ;;  %v978_v26 = vunpack.c.h.s8.bf16 %v536_v21 }
 0x173   : >> { %1811 = vmatprep.subr.bf16.mxu1 %v966_v24  ;;  %v979_v24 = vunpack.c.l.s8.bf16 %v537_v16  ;;  %v562_v14 = vld [vmem:[%s2577_s7 + $0x698] sm:$0xff]  ;;  %v999_v16 = vunpack.c.l.s8.bf16 %v547_v63 }
 0x175   : >> { %1771 = vmatpush1.bf16.msra.mxu0 %v933_v28  ;;  %v519_v28 = vld [vmem:[%s2577_s7 + $0x540] sm:$0xff] }
 0x176   : >> { %1812 = vmatpush1.bf16.msra.mxu1 %v965_v29  ;;  %1772 = vmatprep.subr.bf16.mxu0 %v932_v30  ;;  %v535_v29 = vld [vmem:[%s2577_s7 + $0x5c0] sm:$0xff]  ;;  %v2864_v30 = vrot.slane %v2858_v22, %v2603_v36  ;;  %v943_v41 = vunpack.c.l.s8.bf16 %v519_v28 }
 0x177   : >> { %1813 = vmatprep.subr.bf16.mxu1 %v964_v31  ;;  %v945_v31 = vunpack.c.h.s8.bf16 %v519_v28  ;;  %v977_v32 = vunpack.c.h.s8.bf16 %v535_v29  ;;  %v560_v28 = vld [vmem:[%s2577_s7 + $0x688] sm:$0xff] }
 0x179   : >> { %1773 = vmatpush1.bf16.msra.mxu0 %v931_v34  ;;  %v976_v34 = vunpack.c.l.s8.bf16 %v536_v21 }
 0x17a   : >> { %1814 = vmatpush1.bf16.msra.mxu1 %v963_v35  ;;  %1774 = vmatprep.subr.bf16.mxu0 %v930_v40  ;;  %v550_v35 = vld [vmem:[%s2577_s7 + $0x638] sm:$0xff] }
 0x17b   : >> { %1815 = vmatprep.subr.bf16.mxu1 %v962_v43  ;;  %v566_v40 = vld [vmem:[%s2577_s7 + $0x6b8] sm:$0xff]  ;;  %v1286_v43 = vcombine.high %v2864_v30, %v2864_v30  ;;  %v1004_v39 = vunpack.c.l.s8.bf16 %v550_v35 }
 0x17d   : >> { %1775 = vmatpush1.bf16.msra.mxu0 %v929_v44  ;;  %v975_v44 = vunpack.c.l.s8.bf16 %v535_v29  ;;  %v1308_v49 = vrot.slane %v1286_v43, %v2603_v36 }
 0x17e   : >> { %1816 = vmatpush1.bf16.msra.mxu1 %v961_v45  ;;  %1776 = vmatprep.subr.bf16.mxu0 %v928_v46  ;;  %v1006_v45 = vunpack.c.h.s8.bf16 %v550_v35  ;;  %v1038_v46 = vunpack.c.h.s8.bf16 %v566_v40  ;;  %v559_v35 = vld [vmem:[%s2577_s7 + $0x680] sm:$0xff] }
 0x17f   : >> { %1817 = vmatprep.subr.bf16.mxu1 %v960_v47  ;;  %v549_v47 = vld [vmem:[%s2577_s7 + $0x630] sm:$0xff]  ;;  %v1025_v43 = vunpack.c.h.s8.bf16 %v559_v35 }
 0x180   : >> { %v1003_v59 = vunpack.c.l.s8.bf16 %v549_v47 }
 0x181   : >> { %1777 = vmatpush1.bf16.msra.mxu0 %v927_v50  ;;  %v1268_v50 = vcombine.high %v1252_v38, %v1252_v38 }
 0x182   : >> { %1818 = vmatpush1.bf16.msra.mxu1 %v959_v51  ;;  %1778 = vmatprep.subr.bf16.mxu0 %v958_v52  ;;  %v1005_v51 = vunpack.c.h.s8.bf16 %v549_v47  ;;  %v1037_v52 = vunpack.c.h.s8.bf16 %v565_v48  ;;  %v1023_v47 = vunpack.c.l.s8.bf16 %v559_v35 }
 0x183   : >> { %1819 = vmatprep.subr.bf16.mxu1 %v990_v53  ;;  %v1036_v53 = vunpack.c.l.s8.bf16 %v566_v40 }
 0x185   : >> { %1779 = vmatpush2.bf16.msra.mxu0 %v957_v56  ;;  %v1318_v56 = vcombine.high %v1308_v49, %v1308_v49 }
 0x186   : >> { %1820 = vmatpush2.bf16.msra.mxu1 %v989_v57  ;;  %1780 = vmatprep.subr.bf16.mxu0 %v956_v37 }
 0x187   : >> { %1821 = vmatprep.subr.bf16.mxu1 %v988_v58 }
 0x189   : >> { %1781 = vmatpush2.bf16.msra.mxu0 %v955_v42 }
 0x18a   : >> { %1822 = vmatpush2.bf16.msra.mxu1 %v987_v61  ;;  %1782 = vmatprep.subr.bf16.mxu0 %v954_v62  ;;  %v1002_v62 = vunpack.c.h.s8.bf16 %v548_v54 }
 0x18b   : >> { %1823 = vmatprep.subr.bf16.mxu1 %v986_v0  ;;  %v1034_v0 = vunpack.c.h.s8.bf16 %v564_v55 }
 0x18d   : >> { %1783 = vmatpush2.bf16.msra.mxu0 %v953_v2 }
 0x18e   : >> { %1824 = vmatpush2.bf16.msra.mxu1 %v985_v12  ;;  %1784 = vmatprep.subr.bf16.mxu0 %v952_v3 }
 0x18f   : >> { %1825 = vmatprep.subr.bf16.mxu1 %v984_v4 }
 0x191   : >> { %1785 = vmatpush2.bf16.msra.mxu0 %v951_v9 }
 0x192   : >> { %1826 = vmatpush2.bf16.msra.mxu1 %v983_v5  ;;  %1786 = vmatprep.subr.bf16.mxu0 %v950_v10  ;;  %v1000_v10 = vunpack.c.l.s8.bf16 %v548_v54 }
 0x193   : >> { %1827 = vmatprep.subr.bf16.mxu1 %v982_v13  ;;  %v546_v13 = vld [vmem:[%s2577_s7 + $0x618] sm:$0xff] }
 0x195   : >> { %1787 = vmatpush2.bf16.msra.mxu0 %v949_v17  ;;  %v1031_v17 = vunpack.c.l.s8.bf16 %v563_v1  ;;  %v554_v1 = vld [vmem:[%s2577_s7 + $0x658] sm:$0xff] }
 0x196   : >> { %1828 = vmatpush2.bf16.msra.mxu1 %v981_v18  ;;  %1788 = vmatprep.subr.bf16.mxu0 %v948_v15  ;;  %v998_v18 = vunpack.c.h.s8.bf16 %v546_v13  ;;  %v1030_v15 = vunpack.c.h.s8.bf16 %v562_v14 }
 0x197   : >> { %1829 = vmatprep.subr.bf16.mxu1 %v980_v19  ;;  %v545_v19 = vld [vmem:[%s2577_s7 + $0x610] sm:$0xff] }
 0x198   : >> { %v997_v21 = vunpack.c.h.s8.bf16 %v545_v19  ;;  %v995_v29 = vunpack.c.l.s8.bf16 %v545_v19 }
 0x199   : >> { %1789 = vmatpush2.bf16.msra.mxu0 %v947_v23  ;;  %v1029_v23 = vunpack.c.h.s8.bf16 %v561_v20 }
 0x19a   : >> { %1830 = vmatpush2.bf16.msra.mxu1 %v979_v24  ;;  %1790 = vmatprep.subr.bf16.mxu0 %v946_v25  ;;  %v996_v24 = vunpack.c.l.s8.bf16 %v546_v13  ;;  %v1028_v25 = vunpack.c.l.s8.bf16 %v562_v14  ;;  %v1012_v13 = vunpack.c.l.s8.bf16 %v554_v1 }
 0x19b   : >> { %1831 = vmatprep.subr.bf16.mxu1 %v978_v26  ;;  %v544_v26 = vld [vmem:[%s2577_s7 + $0x608] sm:$0xff] }
 0x19d   : >> { %1791 = vmatpush2.bf16.msra.mxu0 %v945_v31  ;;  %v1027_v31 = vunpack.c.l.s8.bf16 %v561_v20 }
 0x19e   : >> { %1832 = vmatpush2.bf16.msra.mxu1 %v977_v32  ;;  %1792 = vmatprep.subr.bf16.mxu0 %v944_v33  ;;  %v994_v32 = vunpack.c.h.s8.bf16 %v544_v26  ;;  %v1026_v33 = vunpack.c.h.s8.bf16 %v560_v28 }
 0x19f   : >> { %1833 = vmatprep.subr.bf16.mxu1 %v976_v34  ;;  %v543_v34 = vld [vmem:[%s2577_s7 + $0x600] sm:$0xff] }
 0x1a0   : >> { %v993_v40 = vunpack.c.h.s8.bf16 %v543_v34 }
 0x1a1   : >> { %1793 = vmatpush2.bf16.msra.mxu0 %v943_v41  ;;  %v1024_v41 = vunpack.c.l.s8.bf16 %v560_v28 }
 0x1a2   : >> { %1834 = vmatpush2.bf16.msra.mxu1 %v975_v44  ;;  %1844 = vmatprep.subr.bf16.mxu0 %v1006_v45  ;;  %v558_v44 = vld [vmem:[%s2577_s7 + $0x678] sm:$0xff] }
 0x1a3   : >> { %1885 = vmatprep.subr.bf16.mxu1 %v1038_v46  ;;  %v574_v45 = vld [vmem:[%s2577_s7 + $0x6f8] sm:$0xff]  ;;  %v991_v46 = vunpack.c.l.s8.bf16 %v543_v34  ;;  %v1022_v48 = vunpack.c.h.s8.bf16 %v558_v44  ;;  %v1294_v34 = vrot.slane %v2864_v30, %v2603_v36 }
 0x1a4   : >> { %v1550_v57 = vpop.f32.mrf.mxu0  ;;  %1795 = vmatmul.mubr.bf16.vlgmr.msra.gmra.mxu0 %v1252_v38  ;;  %v992_v38 = vunpack.c.l.s8.bf16 %v544_v26  ;;  %v1052_v54 = vunpack.c.l.s8.bf16 %v574_v45 }
 0x1a5   : >> { %v1591_v37 = vpop.f32.mrf.mxu1  ;;  %1836 = vmatmul.mubr.bf16.vlgmr.msra.gmra.mxu1 %v1268_v50  ;;  %v1551_v58 = vadd.f32 %v1550_v57, %v2830_v8  ;;  %1845 = vmatpush1.bf16.msra.mxu0 %v1005_v51  ;;  %v557_v50 = vld [vmem:[%s2577_s7 + $0x670] sm:$0xff] }
 0x1a6   : >> { %1886 = vmatpush1.bf16.msra.mxu1 %v1037_v52  ;;  %v1552_v42 = vpop.f32.mrf.mxu0  ;;  %1846 = vmatprep.subr.bf16.mxu0 %v1004_v39  ;;  %v573_v51 = vld [vmem:[%s2577_s7 + $0x6f0] sm:$0xff]  ;;  %v1021_v52 = vunpack.c.h.s8.bf16 %v557_v50  ;;  %v1019_v57 = vunpack.c.l.s8.bf16 %v557_v50  ;;  %v580_v50 = vld [vmem:[%s2577_s7 + $0x728] sm:$0xff] }
 0x1a7   : >> { %v1593_v61 = vpop.f32.mrf.mxu1  ;;  %1887 = vmatprep.subr.bf16.mxu1 %v1036_v53  ;;  %v2880_v2 = vadd.f32 %v1591_v37, %v1551_v58  ;;  %v1553_v12 = vadd.f32 %v1552_v42, %v2833_v11  ;;  %1876 = vmatprep.mubr.bf16.mxu0 %v1308_v49  ;;  %v1032_v11 = vunpack.c.l.s8.bf16 %v564_v55  ;;  %v1054_v49 = vunpack.c.h.s8.bf16 %v574_v45  ;;  %v556_v55 = vld [vmem:[%s2577_s7 + $0x668] sm:$0xff]  ;;  %v571_v42 = vld [vmem:[%s2577_s7 + $0x6e0] sm:$0xff] }
 0x1a8   : >> { %1917 = vmatprep.mubr.bf16.mxu1 %v1318_v56  ;;  %v1554_v8 = vpop.f32.mrf.mxu0  ;;  %v1053_v39 = vunpack.c.h.s8.bf16 %v573_v51  ;;  %v1020_v53 = vunpack.c.l.s8.bf16 %v558_v44  ;;  %v572_v56 = vld [vmem:[%s2577_s7 + $0x6e8] sm:$0xff]  ;;  %v1051_v37 = vunpack.c.l.s8.bf16 %v573_v51  ;;  %v1018_v58 = vunpack.c.h.s8.bf16 %v556_v55  ;;  %v597_v44 = vld [vmem:[%s2577_s7 + $0x7b0] sm:$0xff] }
 0x1a9   : >> { %v1595_v3 = vpop.f32.mrf.mxu1  ;;  %v2883_v4 = vadd.f32 %v1593_v61, %v1553_v12  ;;  %1847 = vmatpush1.bf16.msra.mxu0 %v1003_v59  ;;  %v1050_v59 = vunpack.c.h.s8.bf16 %v572_v56  ;;  %v1048_v63 = vunpack.c.l.s8.bf16 %v572_v56  ;;  %v570_v12 = vld [vmem:[%s2577_s7 + $0x6d8] sm:$0xff]  ;;  %v596_v51 = vld [vmem:[%s2577_s7 + $0x7a8] sm:$0xff]  ;;  %v1099_v56 = vunpack.c.l.s8.bf16 %v597_v44 }
 0x1aa   : >> { %1888 = vmatpush1.bf16.msra.mxu1 %v1035_v60  ;;  %v1555_v9 = vpop.f32.mrf.mxu0  ;;  %1848 = vmatprep.subr.bf16.mxu0 %v1002_v62  ;;  %v555_v60 = vld [vmem:[%s2577_s7 + $0x660] sm:$0xff]  ;;  %v1049_v62 = vunpack.c.h.s8.bf16 %v571_v42  ;;  %v1047_v3 = vunpack.c.l.s8.bf16 %v571_v42  ;;  %v1044_v14 = vunpack.c.l.s8.bf16 %v570_v12 }
 0x1ab   : >> { %v1596_v5 = vpop.f32.mrf.mxu1  ;;  %1889 = vmatprep.subr.bf16.mxu1 %v1034_v0  ;;  %v1017_v61 = vunpack.c.h.s8.bf16 %v555_v60  ;;  %v1016_v0 = vunpack.c.l.s8.bf16 %v556_v55  ;;  %v1015_v8 = vunpack.c.l.s8.bf16 %v555_v60  ;;  %v553_v9 = vld [vmem:[%s2577_s7 + $0x650] sm:$0xff]  ;;  %v579_v60 = vld [vmem:[%s2577_s7 + $0x720] sm:$0xff] }
 0x1ac   : >> { %v569_v5 = vld [vmem:[%s2577_s7 + $0x6d0] sm:$0xff]  ;;  %v595_v42 = vld [vmem:[%s2577_s7 + $0x7a0] sm:$0xff] }
 0x1ad   : >> { %1849 = vmatpush1.bf16.msra.mxu0 %v1001_v6  ;;  %v1014_v6 = vunpack.c.h.s8.bf16 %v554_v1  ;;  %v1043_v19 = vunpack.c.l.s8.bf16 %v569_v5  ;;  %v1065_v1 = vunpack.c.h.s8.bf16 %v579_v60 }
 0x1ae   : >> { %1890 = vmatpush1.bf16.msra.mxu1 %v1033_v7  ;;  %1850 = vmatprep.subr.bf16.mxu0 %v1000_v10  ;;  %v1046_v7 = vunpack.c.h.s8.bf16 %v570_v12  ;;  %v1013_v10 = vunpack.c.h.s8.bf16 %v553_v9  ;;  %v1097_v12 = vunpack.c.h.s8.bf16 %v595_v42 }
 0x1af   : >> { %1891 = vmatprep.subr.bf16.mxu1 %v1032_v11  ;;  %v1045_v11 = vunpack.c.h.s8.bf16 %v569_v5  ;;  %v1063_v5 = vunpack.c.l.s8.bf16 %v579_v60  ;;  %v586_v60 = vld [vmem:[%s2577_s7 + $0x758] sm:$0xff] }
 0x1b1   : >> { %1851 = vmatpush1.bf16.msra.mxu0 %v999_v16  ;;  %v552_v16 = vld [vmem:[%s2577_s7 + $0x648] sm:$0xff] }
 0x1b2   : >> { %1892 = vmatpush1.bf16.msra.mxu1 %v1031_v17  ;;  %1852 = vmatprep.subr.bf16.mxu0 %v998_v18  ;;  %v568_v17 = vld [vmem:[%s2577_s7 + $0x6c8] sm:$0xff]  ;;  %v1271_v18 = vcombine.high %v2858_v22, %v2858_v22  ;;  %v1010_v20 = vunpack.c.h.s8.bf16 %v552_v16  ;;  %v1008_v22 = vunpack.c.l.s8.bf16 %v552_v16  ;;  %v593_v16 = vld [vmem:[%s2577_s7 + $0x790] sm:$0xff] }
 0x1b3   : >> { %1893 = vmatprep.subr.bf16.mxu1 %v1030_v15  ;;  %v1011_v15 = vunpack.c.l.s8.bf16 %v553_v9  ;;  %v594_v9 = vld [vmem:[%s2577_s7 + $0x798] sm:$0xff] }
 0x1b5   : >> { %1853 = vmatpush1.bf16.msra.mxu0 %v997_v21  ;;  %v1042_v21 = vunpack.c.h.s8.bf16 %v568_v17 }
 0x1b6   : >> { %1894 = vmatpush1.bf16.msra.mxu1 %v1029_v23  ;;  %1854 = vmatprep.subr.bf16.mxu0 %v996_v24  ;;  %v551_v23 = vld [vmem:[%s2577_s7 + $0x640] sm:$0xff] }
 0x1b7   : >> { %1895 = vmatprep.subr.bf16.mxu1 %v1028_v25  ;;  %v567_v24 = vld [vmem:[%s2577_s7 + $0x6c0] sm:$0xff]  ;;  %v2912_v25 = vrot.slane %v1271_v18, %v2603_v36  ;;  %v1009_v26 = vunpack.c.h.s8.bf16 %v551_v23  ;;  %v1007_v35 = vunpack.c.l.s8.bf16 %v551_v23  ;;  %v1093_v18 = vunpack.c.h.s8.bf16 %v593_v16 }
 0x1b8   : >> { %v1041_v28 = vunpack.c.h.s8.bf16 %v567_v24 }
 0x1b9   : >> { %1855 = vmatpush1.bf16.msra.mxu0 %v995_v29  ;;  %v1040_v29 = vunpack.c.l.s8.bf16 %v568_v17 }
 0x1ba   : >> { %1896 = vmatpush1.bf16.msra.mxu1 %v1027_v31  ;;  %1856 = vmatprep.subr.bf16.mxu0 %v994_v32  ;;  %v582_v31 = vld [vmem:[%s2577_s7 + $0x738] sm:$0xff] }
 0x1bb   : >> { %1897 = vmatprep.subr.bf16.mxu1 %v1026_v33  ;;  %v598_v32 = vld [vmem:[%s2577_s7 + $0x7b8] sm:$0xff]  ;;  %v1287_v33 = vcombine.high %v2912_v25, %v2912_v25  ;;  %v1068_v30 = vunpack.c.l.s8.bf16 %v582_v31 }
 0x1bd   : >> { %1857 = vmatpush1.bf16.msra.mxu0 %v993_v40  ;;  %v1039_v40 = vunpack.c.l.s8.bf16 %v567_v24  ;;  %v1315_v45 = vrot.slane %v1287_v33, %v2603_v36  ;;  %v1091_v24 = vunpack.c.l.s8.bf16 %v593_v16  ;;  %v583_v16 = vld [vmem:[%s2577_s7 + $0x740] sm:$0xff] }
 0x1be   : >> { %1898 = vmatpush1.bf16.msra.mxu1 %v1025_v43  ;;  %1858 = vmatprep.subr.bf16.mxu0 %v992_v38  ;;  %v1070_v43 = vunpack.c.h.s8.bf16 %v582_v31  ;;  %v1102_v38 = vunpack.c.h.s8.bf16 %v598_v32 }
 0x1bf   : >> { %1899 = vmatprep.subr.bf16.mxu1 %v1024_v41  ;;  %v581_v41 = vld [vmem:[%s2577_s7 + $0x730] sm:$0xff] }
 0x1c0   : >> { %v1067_v55 = vunpack.c.l.s8.bf16 %v581_v41 }
 0x1c1   : >> { %1859 = vmatpush1.bf16.msra.mxu0 %v991_v46  ;;  %v1316_v46 = vcombine.high %v1294_v34, %v1294_v34 }
 0x1c2   : >> { %1900 = vmatpush1.bf16.msra.mxu1 %v1023_v47  ;;  %1860 = vmatprep.subr.bf16.mxu0 %v1022_v48  ;;  %v1069_v47 = vunpack.c.h.s8.bf16 %v581_v41  ;;  %v1101_v48 = vunpack.c.h.s8.bf16 %v597_v44 }
 0x1c3   : >> { %1901 = vmatprep.subr.bf16.mxu1 %v1054_v49  ;;  %v1100_v49 = vunpack.c.l.s8.bf16 %v598_v32 }
 0x1c5   : >> { %1861 = vmatpush2.bf16.msra.mxu0 %v1021_v52  ;;  %v1319_v52 = vcombine.high %v1315_v45, %v1315_v45 }
 0x1c6   : >> { %1902 = vmatpush2.bf16.msra.mxu1 %v1053_v39  ;;  %1862 = vmatprep.subr.bf16.mxu0 %v1020_v53 }
 0x1c7   : >> { %1903 = vmatprep.subr.bf16.mxu1 %v1052_v54 }
 0x1c9   : >> { %1863 = vmatpush2.bf16.msra.mxu0 %v1019_v57 }
 0x1ca   : >> { %1904 = vmatpush2.bf16.msra.mxu1 %v1051_v37  ;;  %1864 = vmatprep.subr.bf16.mxu0 %v1018_v58  ;;  %v1066_v58 = vunpack.c.h.s8.bf16 %v580_v50 }
 0x1cb   : >> { %1905 = vmatprep.subr.bf16.mxu1 %v1050_v59  ;;  %v1098_v59 = vunpack.c.h.s8.bf16 %v596_v51 }
 0x1cd   : >> { %1865 = vmatpush2.bf16.msra.mxu0 %v1017_v61 }
 0x1ce   : >> { %1906 = vmatpush2.bf16.msra.mxu1 %v1049_v62  ;;  %1866 = vmatprep.subr.bf16.mxu0 %v1016_v0 }
 0x1cf   : >> { %1907 = vmatprep.subr.bf16.mxu1 %v1048_v63 }
 0x1d1   : >> { %1867 = vmatpush2.bf16.msra.mxu0 %v1015_v8 }
 0x1d2   : >> { %1908 = vmatpush2.bf16.msra.mxu1 %v1047_v3  ;;  %1868 = vmatprep.subr.bf16.mxu0 %v1014_v6  ;;  %v1064_v6 = vunpack.c.l.s8.bf16 %v580_v50  ;;  %v588_v50 = vld [vmem:[%s2577_s7 + $0x768] sm:$0xff] }
 0x1d3   : >> { %1909 = vmatprep.subr.bf16.mxu1 %v1046_v7  ;;  %v578_v7 = vld [vmem:[%s2577_s7 + $0x718] sm:$0xff] }
 0x1d5   : >> { %1869 = vmatpush2.bf16.msra.mxu0 %v1013_v10  ;;  %v1095_v10 = vunpack.c.l.s8.bf16 %v595_v42  ;;  %v602_v42 = vld [vmem:[%s2577_s7 + $0x7d8] sm:$0xff] }
 0x1d6   : >> { %1910 = vmatpush2.bf16.msra.mxu1 %v1045_v11  ;;  %1870 = vmatprep.subr.bf16.mxu0 %v1012_v13  ;;  %v1062_v11 = vunpack.c.h.s8.bf16 %v578_v7  ;;  %v1094_v13 = vunpack.c.h.s8.bf16 %v594_v9 }
 0x1d7   : >> { %1911 = vmatprep.subr.bf16.mxu1 %v1044_v14  ;;  %v577_v14 = vld [vmem:[%s2577_s7 + $0x710] sm:$0xff] }
 0x1d8   : >> { %v1061_v17 = vunpack.c.h.s8.bf16 %v577_v14  ;;  %v1059_v23 = vunpack.c.l.s8.bf16 %v577_v14 }
 0x1d9   : >> { %1871 = vmatpush2.bf16.msra.mxu0 %v1011_v15  ;;  %v1060_v15 = vunpack.c.l.s8.bf16 %v578_v7  ;;  %v1108_v7 = vunpack.c.l.s8.bf16 %v602_v42 }
 0x1da   : >> { %1912 = vmatpush2.bf16.msra.mxu1 %v1043_v19  ;;  %1872 = vmatprep.subr.bf16.mxu0 %v1010_v20  ;;  %v1092_v19 = vunpack.c.l.s8.bf16 %v594_v9  ;;  %v576_v20 = vld [vmem:[%s2577_s7 + $0x708] sm:$0xff] }
 0x1db   : >> { %1913 = vmatprep.subr.bf16.mxu1 %v1042_v21  ;;  %v592_v21 = vld [vmem:[%s2577_s7 + $0x788] sm:$0xff]  ;;  %v1056_v33 = vunpack.c.l.s8.bf16 %v576_v20 }
 0x1dc   : >> { %v584_v9 = vld [vmem:[%s2577_s7 + $0x748] sm:$0xff] }
 0x1dd   : >> { %1873 = vmatpush2.bf16.msra.mxu0 %v1009_v26  ;;  %v1058_v26 = vunpack.c.h.s8.bf16 %v576_v20 }
 0x1de   : >> { %1914 = vmatpush2.bf16.msra.mxu1 %v1041_v28  ;;  %1874 = vmatprep.subr.bf16.mxu0 %v1008_v22  ;;  %v1090_v28 = vunpack.c.h.s8.bf16 %v592_v21  ;;  %v575_v22 = vld [vmem:[%s2577_s7 + $0x700] sm:$0xff] }
 0x1df   : >> { %1915 = vmatprep.subr.bf16.mxu1 %v1040_v29  ;;  %v591_v29 = vld [vmem:[%s2577_s7 + $0x780] sm:$0xff]  ;;  %v1057_v31 = vunpack.c.h.s8.bf16 %v575_v22 }
 0x1e0   : >> { %v1089_v32 = vunpack.c.h.s8.bf16 %v591_v29 }
 0x1e1   : >> { %1875 = vmatpush2.bf16.msra.mxu0 %v1007_v35  ;;  %v590_v35 = vld [vmem:[%s2577_s7 + $0x778] sm:$0xff] }
 0x1e2   : >> { %1916 = vmatpush2.bf16.msra.mxu1 %v1039_v40  ;;  %1926 = vmatprep.subr.bf16.mxu0 %v1070_v43  ;;  %v606_v40 = vld [vmem:[%s2577_s7 + $0x7f8] sm:$0xff]  ;;  %v1055_v43 = vunpack.c.l.s8.bf16 %v575_v22  ;;  %v1086_v41 = vunpack.c.h.s8.bf16 %v590_v35 }
 0x1e3   : >> { %1967 = vmatprep.subr.bf16.mxu1 %v1102_v38  ;;  %v1087_v38 = vunpack.c.l.s8.bf16 %v591_v29  ;;  %v1118_v44 = vunpack.c.h.s8.bf16 %v606_v40 }
 0x1e4   : >> { %v1632_v39 = vpop.f32.mrf.mxu0  ;;  %1877 = vmatmul.mubr.bf16.vlgmr.msra.gmra.mxu0 %v1294_v34  ;;  %v1088_v34 = vunpack.c.l.s8.bf16 %v592_v21  ;;  %v1301_v21 = vrot.slane %v2912_v25, %v2603_v36 }
 0x1e5   : >> { %v1673_v53 = vpop.f32.mrf.mxu1  ;;  %1918 = vmatmul.mubr.bf16.vlgmr.msra.gmra.mxu1 %v1316_v46  ;;  %v1633_v54 = vadd.f32 %v1632_v39, %v2880_v2  ;;  %1927 = vmatpush1.bf16.msra.mxu0 %v1069_v47  ;;  %v605_v46 = vld [vmem:[%s2577_s7 + $0x7f0] sm:$0xff] }
 0x1e6   : >> { %1968 = vmatpush1.bf16.msra.mxu1 %v1101_v48  ;;  %v1634_v57 = vpop.f32.mrf.mxu0  ;;  %1928 = vmatprep.subr.bf16.mxu0 %v1068_v30  ;;  %v1117_v48 = vunpack.c.h.s8.bf16 %v605_v46  ;;  %v1084_v30 = vunpack.c.l.s8.bf16 %v590_v35  ;;  %v1115_v39 = vunpack.c.l.s8.bf16 %v605_v46 }
 0x1e7   : >> { %v1675_v37 = vpop.f32.mrf.mxu1  ;;  %1969 = vmatprep.subr.bf16.mxu1 %v1100_v49  ;;  %v2928_v61 = vadd.f32 %v1673_v53, %v1633_v54  ;;  %v1635_v62 = vadd.f32 %v1634_v57, %v2883_v4  ;;  %1958 = vmatprep.mubr.bf16.mxu0 %v1315_v45  ;;  %v1096_v4 = vunpack.c.l.s8.bf16 %v596_v51  ;;  %v589_v45 = vld [vmem:[%s2577_s7 + $0x770] sm:$0xff]  ;;  %v1116_v49 = vunpack.c.l.s8.bf16 %v606_v40  ;;  %v604_v51 = vld [vmem:[%s2577_s7 + $0x7e8] sm:$0xff] }
 0x1e8   : >> { %1999 = vmatprep.mubr.bf16.mxu1 %v1319_v52  ;;  %v1636_v2 = vpop.f32.mrf.mxu0  ;;  %v1085_v47 = vunpack.c.h.s8.bf16 %v589_v45  ;;  %v1083_v52 = vunpack.c.l.s8.bf16 %v589_v45  ;;  %v1082_v53 = vunpack.c.h.s8.bf16 %v588_v50  ;;  %v1114_v54 = vunpack.c.h.s8.bf16 %v604_v51 }
 0x1e9   : >> { %v1677_v0 = vpop.f32.mrf.mxu1  ;;  %v2931_v63 = vadd.f32 %v1675_v37, %v1635_v62  ;;  %1929 = vmatpush1.bf16.msra.mxu0 %v1067_v55  ;;  %v587_v55 = vld [vmem:[%s2577_s7 + $0x760] sm:$0xff] }
 0x1ea   : >> { %1970 = vmatpush1.bf16.msra.mxu1 %v1099_v56  ;;  %v1637_v8 = vpop.f32.mrf.mxu0  ;;  %1930 = vmatprep.subr.bf16.mxu0 %v1066_v58  ;;  %v603_v56 = vld [vmem:[%s2577_s7 + $0x7e0] sm:$0xff]  ;;  %v1081_v57 = vunpack.c.h.s8.bf16 %v587_v55  ;;  %v1080_v58 = vunpack.c.l.s8.bf16 %v588_v50  ;;  %v1079_v62 = vunpack.c.l.s8.bf16 %v587_v55  ;;  %v1078_v0 = vunpack.c.h.s8.bf16 %v586_v60 }
 0x1eb   : >> { %v1678_v3 = vpop.f32.mrf.mxu1  ;;  %1971 = vmatprep.subr.bf16.mxu1 %v1098_v59  ;;  %v1113_v37 = vunpack.c.h.s8.bf16 %v603_v56  ;;  %v1112_v59 = vunpack.c.l.s8.bf16 %v604_v51  ;;  %v1111_v2 = vunpack.c.l.s8.bf16 %v603_v56  ;;  %v601_v8 = vld [vmem:[%s2577_s7 + $0x7d0] sm:$0xff] }
 0x1ed   : >> { %1931 = vmatpush1.bf16.msra.mxu0 %v1065_v1  ;;  %v1110_v1 = vunpack.c.h.s8.bf16 %v602_v42 }
 0x1ee   : >> { %1972 = vmatpush1.bf16.msra.mxu1 %v1097_v12  ;;  %1932 = vmatprep.subr.bf16.mxu0 %v1064_v6  ;;  %v585_v12 = vld [vmem:[%s2577_s7 + $0x750] sm:$0xff]  ;;  %v1109_v6 = vunpack.c.h.s8.bf16 %v601_v8 }
 0x1ef   : >> { %1973 = vmatprep.subr.bf16.mxu1 %v1096_v4  ;;  %v1077_v3 = vunpack.c.h.s8.bf16 %v585_v12  ;;  %v1076_v4 = vunpack.c.l.s8.bf16 %v586_v60  ;;  %v2472_v60 = vmov 1983009808  }
 0x1f0   : >> { %v2012_v42 = vunpack.c.l.s4 %v2472_v60 }
 0x1f1   : >> { %1933 = vmatpush1.bf16.msra.mxu0 %v1063_v5  ;;  %v600_v5 = vld [vmem:[%s2577_s7 + $0x7c8] sm:$0xff] }
 0x1f2   : >> { %1974 = vmatpush1.bf16.msra.mxu1 %v1095_v10  ;;  %1934 = vmatprep.subr.bf16.mxu0 %v1062_v11  ;;  %v1075_v10 = vunpack.c.l.s8.bf16 %v585_v12  ;;  %v1107_v11 = vunpack.c.l.s8.bf16 %v601_v8  ;;  %v1106_v14 = vunpack.c.h.s8.bf16 %v600_v5  ;;  %v1104_v20 = vunpack.c.l.s8.bf16 %v600_v5 }
 0x1f3   : >> { %1975 = vmatprep.subr.bf16.mxu1 %v1094_v13  ;;  %v1074_v13 = vunpack.c.h.s8.bf16 %v584_v9  ;;  %v2013_v12 = vunpack.c.0.s8 %v2012_v42 }
 0x1f5   : >> { %1935 = vmatpush1.bf16.msra.mxu0 %v1061_v17  ;;  %v599_v17 = vld [vmem:[%s2577_s7 + $0x7c0] sm:$0xff] }
 0x1f6   : >> { %1976 = vmatpush1.bf16.msra.mxu1 %v1093_v18  ;;  %1936 = vmatprep.subr.bf16.mxu0 %v1060_v15  ;;  %v1073_v18 = vunpack.c.h.s8.bf16 %v583_v16  ;;  %v1105_v15 = vunpack.c.h.s8.bf16 %v599_v17 }
 0x1f7   : >> { %1977 = vmatprep.subr.bf16.mxu1 %v1092_v19  ;;  %v1072_v19 = vunpack.c.l.s8.bf16 %v584_v9 }
 0x1f9   : >> { %1937 = vmatpush1.bf16.msra.mxu0 %v1059_v23  ;;  %v1071_v23 = vunpack.c.l.s8.bf16 %v583_v16  ;;  %v1119_v16 = vld [vmem:[#allocation2] sm:$0xf] }
 0x1fa   : >> { %1978 = vmatpush1.bf16.msra.mxu1 %v1091_v24  ;;  %1938 = vmatprep.subr.bf16.mxu0 %v1058_v26  ;;  %v1103_v24 = vunpack.c.l.s8.bf16 %v599_v17  ;;  %v1317_v26 = vcombine.high %v1301_v21, %v1301_v21 }
 0x1fb   : >> { %1979 = vmatprep.subr.bf16.mxu1 %v1090_v28 }
 0x1fd   : >> { %1939 = vmatpush1.bf16.msra.mxu0 %v1057_v31 }
 0x1fe   : >> { %1980 = vmatpush1.bf16.msra.mxu1 %v1089_v32  ;;  %1940 = vmatprep.subr.bf16.mxu0 %v1056_v33 }
 0x1ff   : >> { %1981 = vmatprep.subr.bf16.mxu1 %v1088_v34 }
 0x201   : >> { %1941 = vmatpush1.bf16.msra.mxu0 %v1055_v43 }
 0x202   : >> { %1982 = vmatpush1.bf16.msra.mxu1 %v1087_v38  ;;  %1942 = vmatprep.subr.bf16.mxu0 %v1086_v41 }
 0x203   : >> { %1983 = vmatprep.subr.bf16.mxu1 %v1118_v44 }
 0x205   : >> { %1943 = vmatpush2.bf16.msra.mxu0 %v1085_v47 }
 0x206   : >> { %1984 = vmatpush2.bf16.msra.mxu1 %v1117_v48  ;;  %1944 = vmatprep.subr.bf16.mxu0 %v1084_v30 }
 0x207   : >> { %1985 = vmatprep.subr.bf16.mxu1 %v1116_v49 }
 0x209   : >> { %1945 = vmatpush2.bf16.msra.mxu0 %v1083_v52 }
 0x20a   : >> { %1986 = vmatpush2.bf16.msra.mxu1 %v1115_v39  ;;  %1946 = vmatprep.subr.bf16.mxu0 %v1082_v53 }
 0x20b   : >> { %1987 = vmatprep.subr.bf16.mxu1 %v1114_v54 }
 0x20d   : >> { %1947 = vmatpush2.bf16.msra.mxu0 %v1081_v57 }
 0x20e   : >> { %1988 = vmatpush2.bf16.msra.mxu1 %v1113_v37  ;;  %1948 = vmatprep.subr.bf16.mxu0 %v1080_v58 }
 0x20f   : >> { %1989 = vmatprep.subr.bf16.mxu1 %v1112_v59 }
 0x211   : >> { %1949 = vmatpush2.bf16.msra.mxu0 %v1079_v62 }
 0x212   : >> { %1990 = vmatpush2.bf16.msra.mxu1 %v1111_v2  ;;  %1950 = vmatprep.subr.bf16.mxu0 %v1078_v0 }
 0x213   : >> { %1991 = vmatprep.subr.bf16.mxu1 %v1110_v1 }
 0x215   : >> { %1951 = vmatpush2.bf16.msra.mxu0 %v1077_v3 }
 0x216   : >> { %1992 = vmatpush2.bf16.msra.mxu1 %v1109_v6  ;;  %1952 = vmatprep.subr.bf16.mxu0 %v1076_v4 }
 0x217   : >> { %1993 = vmatprep.subr.bf16.mxu1 %v1108_v7 }
 0x219   : >> { %1953 = vmatpush2.bf16.msra.mxu0 %v1075_v10  ;;  %v2962_v10 = vsub.s32 %v2013_v12, %v2589_v27 }
 0x21a   : >> { %1994 = vmatpush2.bf16.msra.mxu1 %v1107_v11  ;;  %1954 = vmatprep.subr.bf16.mxu0 %v1074_v13 }
 0x21b   : >> { %1995 = vmatprep.subr.bf16.mxu1 %v1106_v14 }
 0x21d   : >> { %1955 = vmatpush2.bf16.msra.mxu0 %v1073_v18 }
 0x21e   : >> { %1996 = vmatpush2.bf16.msra.mxu1 %v1105_v15  ;;  %1956 = vmatprep.subr.bf16.mxu0 %v1072_v19 }
 0x21f   : >> { %1997 = vmatprep.subr.bf16.mxu1 %v1104_v20 }
 0x221   : >> { %1957 = vmatpush2.bf16.msra.mxu0 %v1071_v23 }
 0x222   : >> { %1998 = vmatpush2.bf16.msra.mxu1 %v1103_v24 }
 0x224   : >> { %v1714_v28 = vpop.f32.mrf.mxu0  ;;  %1959 = vmatmul.mubr.bf16.vlgmr.msra.gmra.mxu0 %v1301_v21 }
 0x225   : >> { %v1755_v22 = vpop.f32.mrf.mxu1  ;;  %2000 = vmatmul.mubr.bf16.vlgmr.msra.gmra.mxu1 %v1317_v26  ;;  %v1715_v29 = vadd.f32 %v1714_v28, %v2928_v61 }
 0x226   : >> { %v1716_v31 = vpop.f32.mrf.mxu0 }
 0x227   : >> { %v1757_v32 = vpop.f32.mrf.mxu1  ;;  %v1756_v33 = vadd.f32 %v1755_v22, %v1715_v29  ;;  %v1717_v36 = vadd.f32 %v1716_v31, %v2931_v63 }
 0x228   : >> { %v1718_v25 = vpop.f32.mrf.mxu0 }
 0x229   : >> { %v1759_v34 = vpop.f32.mrf.mxu1  ;;  %v1758_v35 = vadd.f32 %v1757_v32, %v1717_v36 }
 0x22a   : >> { %v1719_v40 = vpop.f32.mrf.mxu0 }
 0x22b   : >> { %v1760_v43 = vpop.f32.mrf.mxu1 }
 0x264   : >> { %v1796_v38 = vpop.f32.mrf.mxu0 }
 0x265   : >> { %v1837_v41 = vpop.f32.mrf.mxu1  ;;  %v1797_v44 = vadd.f32 %v1796_v38, %v1756_v33 }
 0x266   : >> { %v1798_v45 = vpop.f32.mrf.mxu0 }
 0x267   : >> { %v1839_v46 = vpop.f32.mrf.mxu1  ;;  %v1838_v47 = vadd.f32 %v1837_v41, %v1797_v44  ;;  %v1799_v48 = vadd.f32 %v1798_v45, %v1758_v35 }
 0x268   : >> { %v1800_v30 = vpop.f32.mrf.mxu0 }
 0x269   : >> { %v1841_v49 = vpop.f32.mrf.mxu1  ;;  %v1840_v61 = vadd.f32 %v1839_v46, %v1799_v48 }
 0x26a   : >> { %v1801_v50 = vpop.f32.mrf.mxu0 }
 0x26b   : >> { %v1842_v51 = vpop.f32.mrf.mxu1 }
 0x2a4   : >> { %v1878_v52 = vpop.f32.mrf.mxu0 }
 0x2a5   : >> { %v1919_v39 = vpop.f32.mrf.mxu1  ;;  %v1879_v63 = vadd.f32 %v1878_v52, %v1838_v47 }
 0x2a6   : >> { %v1880_v53 = vpop.f32.mrf.mxu0 }
 0x2a7   : >> { %v1921_v54 = vpop.f32.mrf.mxu1  ;;  %v1920_v55 = vadd.f32 %v1919_v39, %v1879_v63  ;;  %v1881_v59 = vadd.f32 %v1880_v53, %v1840_v61 }
 0x2a8   : >> { %v1882_v56 = vpop.f32.mrf.mxu0 }
 0x2a9   : >> { %v1923_v57 = vpop.f32.mrf.mxu1  ;;  %v1922_v0 = vadd.f32 %v1921_v54, %v1881_v59 }
 0x2aa   : >> { %v1883_v37 = vpop.f32.mrf.mxu0 }
 0x2ab   : >> { %v1924_v58 = vpop.f32.mrf.mxu1 }
 0x2e4   : >> { %v1960_v62 = vpop.f32.mrf.mxu0 }
 0x2e5   : >> { %v2001_v2 = vpop.f32.mrf.mxu1  ;;  %v1961_v1 = vadd.f32 %v1960_v62, %v1920_v55 }
 0x2e6   : >> { %v1962_v8 = vpop.f32.mrf.mxu0 }
 0x2e7   : >> { %v2003_v3 = vpop.f32.mrf.mxu1  ;;  %v1963_v6 = vadd.f32 %v1962_v8, %v1922_v0  ;;  %v2002_v9 = vadd.f32 %v2001_v2, %v1961_v1 }
 0x2e8   : >> { %v1964_v4 = vpop.f32.mrf.mxu0 }
 0x2e9   : >> { %v2005_v7 = vpop.f32.mrf.mxu1  ;;  %v2004_v5 = vadd.f32 %v2003_v3, %v1963_v6 }
 0x2ea   : >> { %v1965_v11 = vpop.f32.mrf.mxu0 }
 0x2eb   : >> { %v2006_v13 = vpop.f32.mrf.mxu1  ;;  %v2010_v14 = vcombine.low %v2002_v9, %v2004_v5 }
 0x2ed   : >> { %v2017_v17 = vrot.slane %v2010_v14, %v2962_v10  ;;  %336 = sbr.rel (!%p334_p9) target bundleno = 29 (0x1d), region = 99 }
 0x2ef   : >> { %v2019_v18 = vadd.f32 %v2017_v17, %v1119_v16 }
 0x2f1   : >> { %2020 = vst [vmem:[#allocation2] sm:$0xf] %v2019_v18 }
 0x2f2   : > { %2024 = sbr.rel (%p2327_p10) target bundleno = 990 (0x3de), region = 55 }
 0x2f7   : > { %v2098_v15 = vld [vmem:[%s2561_s26 + $0xf8] sm:$0xff]  ;;  %v2097_v20 = vld [vmem:[%s2561_s26 + $0xf0] sm:$0xff]  ;;  %v2096_v23 = vld [vmem:[%s2561_s26 + $0xe8] sm:$0xff]  ;;  %v2030_v32 = vsub.s32 0, %v2589_v27  ;;  %v2034_v33 = vsub.s32 1, %v2589_v27  ;;  %vm2180_vm0 = vcmask 1024  }
 0x2f8   : > { %v2082_v19 = vld [vmem:[%s2561_s26 + $0x78] sm:$0xff]  ;;  %2332 = vmatprep.subr.mxu0 %v2098_v15  ;;  %v2081_v21 = vld [vmem:[%s2561_s26 + $0x70] sm:$0xff]  ;;  %v2080_v24 = vld [vmem:[%s2561_s26 + $0x68] sm:$0xff] }
 0x2f9   : > { %2333 = vmatpush3.msra.mxu0 %v2082_v19  ;;  %v2095_v26 = vld [vmem:[%s2561_s26 + $0xe0] sm:$0xff]  ;;  %v2094_v22 = vld [vmem:[%s2561_s26 + $0xd8] sm:$0xff]  ;;  %v2093_v31 = vld [vmem:[%s2561_s26 + $0xd0] sm:$0xff] }
 0x2fa   : > { %2334 = vmatprep.subr.mxu0 %v2097_v20  ;;  %v2079_v28 = vld [vmem:[%s2561_s26 + $0x60] sm:$0xff]  ;;  %v2078_v29 = vld [vmem:[%s2561_s26 + $0x58] sm:$0xff]  ;;  %v2077_v36 = vld [vmem:[%s2561_s26 + $0x50] sm:$0xff] }
 0x2fb   : > { %2335 = vmatpush3.msra.mxu0 %v2081_v21  ;;  %v2092_v25 = vld [vmem:[%s2561_s26 + $0xc8] sm:$0xff]  ;;  %v2026_v35 = vld [vmem:[%s313_s10] sm:$0x3]  ;;  %v2090_v46 = vld [vmem:[%s2561_s26 + $0xb8] sm:$0xff] }
 0x2fc   : > { %2336 = vmatprep.subr.mxu0 %v2096_v23  ;;  %v2076_v34 = vld [vmem:[%s2561_s26 + $0x48] sm:$0xff]  ;;  %v2046_v40 = vld [vmem:[%s317_s14] sm:$0x3]  ;;  %v2031_v43 = vrot.slane %v2026_v35, %v2030_v32  ;;  %v2035_v38 = vrot.slane %v2026_v35, %v2034_v33  ;;  %v2074_v30 = vld [vmem:[%s2561_s26 + $0x38] sm:$0xff] }
 0x2fd   : > { %2337 = vmatpush3.msra.mxu0 %v2080_v24  ;;  %v2091_v27 = vld [vmem:[%s2561_s26 + $0xc0] sm:$0xff]  ;;  %v2051_v41 = vrot.slane %v2046_v40, %v2030_v32  ;;  %v2055_v44 = vrot.slane %v2046_v40, %v2034_v33  ;;  %v2089_v61 = vld [vmem:[%s2561_s26 + $0xb0] sm:$0xff]  ;;  %v2088_v39 = vld [vmem:[%s2561_s26 + $0xa8] sm:$0xff] }
 0x2fe   : > { %2338 = vmatprep.subr.mxu0 %v2095_v26  ;;  %v2075_v45 = vld [vmem:[%s2561_s26 + $0x40] sm:$0xff]  ;;  %v2036_v47 = vcombine.low %v2031_v43, %v2035_v38  ;;  %v2073_v52 = vld [vmem:[%s2561_s26 + $0x30] sm:$0xff]  ;;  %v2072_v53 = vld [vmem:[%s2561_s26 + $0x28] sm:$0xff] }
 0x2ff   : > { %2339 = vmatpush3.msra.mxu0 %v2079_v28  ;;  %v2056_v48 = vcombine.low %v2051_v41, %v2055_v44  ;;  %v2025_v49 = vld [vmem:[#allocation2] sm:$0xf]  ;;  %v2086_v57 = vld [vmem:[%s2561_s26 + $0x98] sm:$0xff]  ;;  %v2085_v59 = vld [vmem:[%s2561_s26 + $0x90] sm:$0xff] }
 0x300   : > { %2340 = vmatprep.subr.mxu0 %v2094_v22  ;;  %v2043_v50 = vrot.slane %v2036_v47, %v2962_v10  ;;  %v2087_v54 = vld [vmem:[%s2561_s26 + $0xa0] sm:$0xff]  ;;  %v2070_v58 = vld [vmem:[%s2561_s26 + $0x18] sm:$0xff]  ;;  %v2069_v42 = vld [vmem:[%s2561_s26 + $0x10] sm:$0xff] }
 0x301   : > { %2341 = vmatpush3.msra.mxu0 %v2078_v29  ;;  %v2063_v51 = vrot.slane %v2056_v48, %v2962_v10  ;;  %v2071_v56 = vld [vmem:[%s2561_s26 + $0x20] sm:$0xff]  ;;  %v2084_v62 = vld [vmem:[%s2561_s26 + $0x88] sm:$0xff] }
 0x302   : > { %2342 = vmatprep.subr.mxu0 %v2093_v31  ;;  %v2045_v63 = vmul.f32 %v2043_v50, %v2025_v49  ;;  %v2068_v0 = vld [vmem:[%s2561_s26 + $0x8] sm:$0xff]  ;;  %v2083_v1 = vld [vmem:[%s2561_s26 + $0x80] sm:$0xff] }
 0x303   : > { %2343 = vmatpush3.msra.mxu0 %v2077_v36  ;;  %v2067_v12 = vld [vmem:[%s2561_s26] sm:$0xff] }
 0x304   : > { %2344 = vmatprep.subr.mxu0 %v2092_v25  ;;  %v2065_v55 = vadd.f32 %v2063_v51, %v2045_v63 }
 0x305   : > { %2345 = vmatpush3.msra.mxu0 %v2076_v34 }
 0x306   : > { %2346 = vmatprep.subr.mxu0 %v2091_v27  ;;  %v2066_v37 = vmax.f32 %v2065_v55, 0.0 }
 0x307   : > { %2347 = vmatpush3.msra.mxu0 %v2075_v45 }
 0x308   : > { %2348 = vmatprep.subr.mxu0 %v2090_v46  ;;  %v2106_v60 = vrot.slane %v2066_v37, %v2962_v10 }
 0x309   : > { %2349 = vmatpush3.msra.mxu0 %v2074_v30 }
 0x30a   : > { %2350 = vmatprep.subr.mxu0 %v2089_v61  ;;  %v2107_v2 = vcombine.high %v2106_v60, %v2106_v60 }
 0x30b   : > { %2351 = vmatpush3.msra.mxu0 %v2073_v52 }
 0x30c   : > { %2352 = vmatprep.subr.mxu0 %v2088_v39  ;;  %2174 = vmatprep.mubr.f32.mxu0 %v2107_v2 }
 0x30d   : > { %2353 = vmatpush3.msra.mxu0 %v2072_v53 }
 0x30e   : > { %2354 = vmatprep.subr.mxu0 %v2087_v54 }
 0x30f   : > { %2355 = vmatpush3.msra.mxu0 %v2071_v56 }
 0x310   : > { %2356 = vmatprep.subr.mxu0 %v2086_v57 }
 0x311   : > { %2357 = vmatpush3.msra.mxu0 %v2070_v58 }
 0x312   : > { %2358 = vmatprep.subr.mxu0 %v2085_v59 }
 0x313   : > { %2359 = vmatpush3.msra.mxu0 %v2069_v42 }
 0x314   : > { %2360 = vmatprep.subr.mxu0 %v2084_v62 }
 0x315   : > { %2361 = vmatpush3.msra.mxu0 %v2068_v0 }
 0x316   : > { %2362 = vmatprep.subr.mxu0 %v2083_v1 }
 0x317   : > { %2363 = vmatpush3.msra.mxu0 %v2067_v12 }
 0x318   : > { %2175 = vmatmul.mubr.f32.vlgmr.msra.gmra.mxu0 %v2106_v60 }
 0x3d8   : > { %v2364_v8 = vpop.f32.mrf.mxu0 }
 0x3da   : > { %v2365_v3 = vpop.f32.mrf.mxu0 }
 0x3db   : > { %v2366_v6 = vadd.f32 %v2365_v3, %v2364_v8 }
 0x3dd   : > { %2181 = vst.msk [vmem:[%s326_s30] sm:$0x3] %vm2180_vm0, %v2366_v6 }
 0x3de PF: > { %s15_s22 = sadd.s32 1, %s2464_s22   ;;  %s3045_s27 = sld [smem:[#allocation3_spill]] }
 0x3df   : > { %p12_p11 = scmp.ge.s32.totalorder %s15_s22, 10   ;;  %s3046_s28 = sld [smem:[#allocation4_spill]] }
 0x3e0   : > { %s3047_s18 = smov %s2456_s20  ;;  %s3048_s19 = smov %s2460_s21 }
 0x3e1   :  { %14 = sbr.rel (!%p12_p11) target bundleno = 3 (0x3), region = 110 }
 0x3e4   : > { %s3049_s20 = smov %s3045_s27 }
 0x3e5   : > { %s3050_s21 = smov %s3046_s28 }

</bundles_post_ra>
